<compile_context>
chip_gen: v7x
topology: tpu7x:2x2x1
jax: 0.10.0
libtpu: 0.0.40
codegen_flags: <defaults>
</compile_context>

<pallas_src>
import functools

import numpy as np
import jax
import jax.numpy as jnp
from jax import lax
from jax.experimental import pallas as pl
from jax.experimental.pallas import tpu as pltpu

LANE = 128
_SUB = 8                          # f32 sublane granularity; all offsets 8-aligned
_TL = 64                          # conv L-chunk rows accumulated in registers
_VMEM_LIMIT = 32 * 1024 * 1024    # <= scoped limit on v5e/v6e/v7x


def _round_up(x, m):
    return (x + m - 1) // m * m


def _geom(H, W):
    """Geometry of the padded, channels-last, flattened slab (P, C) layout.

    Slab row S + i'*Wp + j' holds padded-image pixel (i', j') (zero border of
    one row/col plus extra zero columns up to Wp); everything else is zero.
    A 3x3/pad-1 conv output pixel p = i*Wp + j reads slab rows
    S + p + kh*Wp + kw and is written back (re-padded) at row top + p with
    top = S + Wp + 1.  S % 8 == 7 and Wp % 8 == 0 make `top`, every chunked
    store, and the kw=1 read windows 8-row aligned.
    """
    Wp = _round_up(W + 2, _SUB)
    Hp = H + 2
    S = _SUB - 1                         # S % 8 == 7
    top = S + Wp + 1                     # multiple of 8
    L = (H - 1) * Wp + W                 # output rows actually needed
    n_chunks = -(-L // _TL)
    L_pad = n_chunks * _TL
    P = _round_up(max(S + 2 * Wp + L_pad + 2 * _SUB,   # last extended read
                      top + L_pad,                     # last written row
                      S + Hp * Wp), _SUB)              # padded image extent
    return Wp, Hp, S, top, L, L_pad, n_chunks, P


def _col_mask(H, W):
    """(L_pad, 1) f32 mask: 1.0 where output row p maps to a valid (i<H, j<W)."""
    Wp, _, _, _, _, L_pad, _, _ = _geom(H, W)
    idx = np.arange(L_pad)
    valid = ((idx % Wp) < W) & ((idx // Wp) < H)
    return jnp.asarray(valid.astype(np.float32)).reshape(L_pad, 1)


# ----------------------------------------------------------------------------
# Pallas kernels
# ----------------------------------------------------------------------------

def _conv3x3_relu_kernel(x_ref, w_ref, b_ref, m_ref, o_ref, *, H, W):
    """One batch element: 3x3 conv (stride 1, zero pad 1) + bias + ReLU.

    x_ref: (1, P, Cin_p) f32 padded channels-last slab
    w_ref: (9, Cin_p, Cout_p) f32 taps, t = kh*3 + kw
    b_ref: (1, Cout_p) f32, m_ref: (L_pad, 1) f32 validity mask
    o_ref: (1, P, Cout_p) f32 -- next layer's padded slab, written directly.
    """
    Wp, Hp, S, top, L, L_pad, n_chunks, P = _geom(H, W)
    assert P == x_ref.shape[1] and P == o_ref.shape[1]
    cout = o_ref.shape[-1]
    TL = _TL

    bias = b_ref[...]                                    # (1, cout), load once

    # Rows the conv never writes must be exactly zero: the next conv layer and
    # the gram contraction rely on padded rows/lanes being zero.
    o_ref[0, 0:top, :] = jnp.zeros((top, cout), o_ref.dtype)
    o_ref[0, top + L_pad:P, :] = jnp.zeros((P - top - L_pad, cout), o_ref.dtype)

    for c in range(n_chunks):
        r0 = c * TL
        acc = None                                       # register accumulator
        for kh in range(3):
            # Aligned extended window covering rows needed by kw in {0,1,2}.
            b1 = S + 1 + kh * Wp + r0                    # multiple of 8
            ext = x_ref[0, b1 - _SUB:b1 + TL + _SUB, :]  # (TL+16, cin) aligned
            for kw in range(3):
                # kw=1 is a whole-vreg selection; kw=0/2 are in-register
                # sublane shifts (XLU), never a misaligned VMEM copy.
                win = ext[7 + kw:7 + kw + TL, :]
                contrib = jnp.dot(win, w_ref[kh * 3 + kw],
                                  preferred_element_type=jnp.float32)
                acc = contrib if acc is None else acc + contrib
        a = jnp.maximum(acc + bias, 0.0) * m_ref[r0:r0 + TL, :]
        o_ref[0, top + r0:top + r0 + TL, :] = a.astype(o_ref.dtype)   # aligned


def _feat_gram_kernel(a_ref, b_ref, feat_ref, gram_ref, *, gram_scale):
    """Fused per-sample: sum|a-b| and sum|gram(a)-gram(b)|, accumulated across
    the grid into resident (8,128) output blocks (init at step 0)."""
    @pl.when(pl.program_id(0) == 0)
    def _():
        feat_ref[...] = jnp.zeros_like(feat_ref)
        gram_ref[...] = jnp.zeros_like(gram_ref)

    a = a_ref[0]                                         # (P, Cp) f32
    b = b_ref[0]

    d = jnp.abs(a - b)
    s = jnp.sum(d, axis=1, keepdims=True)
    s = jnp.sum(s, axis=0, keepdims=True)                # (1, 1)
    feat_ref[...] += jnp.broadcast_to(s, feat_ref.shape)

    dn = (((0,), (0,)), ((), ()))                        # contract over H*W axis
    ga = lax.dot_general(a, a, dn, preferred_element_type=jnp.float32)
    gb = lax.dot_general(b, b, dn, preferred_element_type=jnp.float32)
    g = jnp.abs(ga - gb) * gram_scale
    gs = jnp.sum(g, axis=1, keepdims=True)
    gs = jnp.sum(gs, axis=0, keepdims=True)
    gram_ref[...] += jnp.broadcast_to(gs, gram_ref.shape)


def _pixel_l1_kernel(a_ref, b_ref, o_ref):
    """sum |a - b| over the raw (unpadded) tensors, broadcast to (8,128)."""
    d = jnp.abs(a_ref[...] - b_ref[...])
    s = jnp.sum(d, axis=1, keepdims=True)
    s = jnp.sum(s, axis=0, keepdims=True)
    o_ref[...] = jnp.broadcast_to(s, o_ref.shape)


# ----------------------------------------------------------------------------
# pallas_call wrappers
# ----------------------------------------------------------------------------

def conv3x3_relu_padded(xf, taps, bias, mask, *, H, W):
    """Conv2d(3x3, stride 1, pad 1) + ReLU on padded channels-last slabs."""
    B, P, cin = xf.shape
    cout = taps.shape[-1]
    _, _, _, _, _, L_pad, _, P2 = _geom(H, W)
    assert P == P2

    kernel = functools.partial(_conv3x3_relu_kernel, H=H, W=W)
    flops = 2 * B * L_pad * cin * cout * 9
    bytes_acc = (B * P * (cin + cout) * 4 + int(taps.size) * 4
                 + int(bias.size) * 4 + int(mask.size) * 4)

    # NOTE: taps/bias/mask have constant block indices, so Pallas only copies
    # them once; their double-buffer is ~1 MB of a 32 MB budget, so we keep
    # the default pipeline mode for robustness.
    return pl.pallas_call(
        kernel,
        grid=(B,),
        out_shape=jax.ShapeDtypeStruct((B, P, cout), jnp.float32),
        in_specs=[
            pl.BlockSpec((1, P, cin), lambda i: (i, 0, 0)),
            pl.BlockSpec((9, cin, cout), lambda i: (0, 0, 0)),
            pl.BlockSpec((1, cout), lambda i: (0, 0)),
            pl.BlockSpec((L_pad, 1), lambda i: (0, 0)),
        ],
        out_specs=pl.BlockSpec((1, P, cout), lambda i: (i, 0, 0)),
        compiler_params=pltpu.CompilerParams(
            dimension_semantics=("parallel",),
            vmem_limit_bytes=_VMEM_LIMIT),
        cost_estimate=pl.CostEstimate(flops=flops, transcendentals=0,
                                      bytes_accessed=bytes_acc),
    )(xf, taps, bias, mask)


def _feat_and_gram_sums(f_all, n, c_true, hw_true):
    """Fused: (sum_i |f_in_i - f_out_i|, sum_i |gram(f_in_i) - gram(f_out_i)|).

    f_all holds input activations at [0, n) and target activations at [n, 2n).
    gram = (X^T X) / (c*h*w); padded rows/lanes are zero so they contribute
    nothing to either reduction.
    """
    B, P, C = f_all.shape
    gram_scale = 1.0 / float(c_true * hw_true)
    kernel = functools.partial(_feat_gram_kernel, gram_scale=gram_scale)
    feat, gram = pl.pallas_call(
        kernel,
        grid=(n,),
        out_shape=(jax.ShapeDtypeStruct((8, LANE), jnp.float32),
                   jax.ShapeDtypeStruct((8, LANE), jnp.float32)),
        in_specs=[
            pl.BlockSpec((1, P, C), lambda i: (i, 0, 0)),
            pl.BlockSpec((1, P, C), lambda i: (i + n, 0, 0)),
        ],
        out_specs=(pl.BlockSpec((8, LANE), lambda i: (0, 0)),
                   pl.BlockSpec((8, LANE), lambda i: (0, 0))),
        compiler_params=pltpu.CompilerParams(
            dimension_semantics=("arbitrary",),   # output blocks accumulate
            vmem_limit_bytes=_VMEM_LIMIT),
        cost_estimate=pl.CostEstimate(
            flops=n * (3 * P * C + 4 * P * C * C), transcendentals=0,
            bytes_accessed=2 * n * P * C * 4 + 2 * 8 * LANE * 4),
    )(f_all, f_all)
    return feat[0, 0], gram[0, 0]


def _pixel_l1_mean(inp, tgt):
    """mean |inp - tgt| on the raw tensors (no padded slab, no extra cast)."""
    N, C, H, W = inp.shape
    a = inp.reshape(N * C, H * W).astype(jnp.float32)
    b = tgt.reshape(N * C, H * W).astype(jnp.float32)
    R, K = a.shape
    part = pl.pallas_call(
        _pixel_l1_kernel,
        grid=(1,),
        out_shape=jax.ShapeDtypeStruct((8, LANE), jnp.float32),
        in_specs=[pl.BlockSpec((R, K), lambda i: (0, 0)),
                  pl.BlockSpec((R, K), lambda i: (0, 0))],
        out_specs=pl.BlockSpec((8, LANE), lambda i: (0, 0)),
        compiler_params=pltpu.CompilerParams(
            dimension_semantics=("arbitrary",),
            vmem_limit_bytes=_VMEM_LIMIT),
    )(a, b)
    return part[0, 0] / float(N * C * H * W)


# ----------------------------------------------------------------------------
# FeatureLoss
# ----------------------------------------------------------------------------

class FeatureLoss:
    """JAX/Pallas port of the fastai FeatureLoss module.

    The synthetic m_feat is a 3-layer conv(3x3, pad=1)+ReLU stack; every ReLU
    output is "hooked" (produced explicitly) and used as a perceptual feature.
    """
    # TODO(synk): PyTorch forward-hook machinery (hook_outputs / Hooks.remove)
    # has no Pallas equivalent; features are produced explicitly instead.

    def __init__(self, conv_params, layer_wgts):
        self.wgts = tuple(float(w) for w in layer_wgts)
        n = len(self.wgts)
        self.metric_names = (['pixel'] + [f'feat_{i}' for i in range(n)]
                             + [f'gram_{i}' for i in range(n)])

        self._layers = []
        for w, b in conv_params:
            c_out, c_in = int(w.shape[0]), int(w.shape[1])
            cin_p = _round_up(max(c_in, LANE), LANE)
            cout_p = _round_up(max(c_out, LANE), LANE)
            taps = jnp.transpose(w, (2, 3, 1, 0)).reshape(9, c_in, c_out)
            taps = jnp.pad(taps, ((0, 0), (0, cin_p - c_in),
                                  (0, cout_p - c_out))).astype(jnp.float32)
            bias = jnp.pad(jnp.reshape(b, (1, c_out)),
                           ((0, 0), (0, cout_p - c_out))).astype(jnp.float32)
            self._layers.append((taps, bias, c_out))

        self.metrics = {}
        self.feat_losses = []
        self._fwd = jax.jit(self._forward_impl)

    # -- layout helpers ------------------------------------------------------

    def _to_slab(self, x_nchw):
        N, C, H, W = x_nchw.shape
        Wp, Hp, S, _, _, _, _, P = _geom(H, W)
        cin_p = self._layers[0][0].shape[1]
        xt = jnp.transpose(x_nchw, (0, 2, 3, 1))                   # (B,H,W,C)
        xt = jnp.pad(xt, ((0, 0), (1, Hp - H - 1),
                          (1, Wp - W - 1), (0, 0)))                # (B,Hp,Wp,C)
        xt = xt.reshape(N, Hp * Wp, C)
        xt = jnp.pad(xt, ((0, 0), (S, P - S - Hp * Wp), (0, cin_p - C)))
        return xt.astype(jnp.float32)

    def make_features(self, x):
        """Per-layer ReLU activations, in padded channels-last slab layout."""
        _, _, H, W = x.shape
        mask = _col_mask(H, W)
        f = self._to_slab(x)
        feats = []
        for taps, bias, _ in self._layers:
            f = conv3x3_relu_padded(f, taps, bias, mask, H=H, W=W)
            feats.append(f)
        return feats

    # -- forward -------------------------------------------------------------

    def _forward_impl(self, inp, tgt):
        N, C, H, W = inp.shape
        mask = _col_mask(H, W)

        losses = [_pixel_l1_mean(inp, tgt)]                        # pixel

        # Batch input and target together: one conv launch per layer; the
        # fused loss kernel reads each activation slab exactly once.
        x_all = jnp.concatenate([inp, tgt], axis=0)                # (2N,C,H,W)
        f = self._to_slab(x_all)                                   # (2N,P,Cp)

        feat_terms, gram_terms = [], []
        for taps, bias, c_out in self._layers:
            f = conv3x3_relu_padded(f, taps, bias, mask, H=H, W=W)
            fs, gs = _feat_and_gram_sums(f, N, c_out, H * W)
            feat_terms.append((fs, c_out))
            gram_terms.append((gs, c_out))

        for (s, c_out), w in zip(feat_terms, self.wgts):
            losses.append(s / float(N * c_out * H * W) * w)
        for (s, c_out), w in zip(gram_terms, self.wgts):
            losses.append(s / float(N * c_out * c_out) * (w ** 2) * 5000.0)
        return tuple(losses)

    def __call__(self, input, target):
        losses = self._fwd(input, target)
        self.feat_losses = list(losses)
        self.metrics = dict(zip(self.metric_names, losses))
        return sum(losses)


# ----------------------------------------------------------------------------
# Pure-JAX reference (for the self-check in main)
# ----------------------------------------------------------------------------

def _reference_loss(inp, tgt, conv_params, wgts):
    def feats(x):
        out, h = [], x
        for w, b in conv_params:
            h = lax.conv_general_dilated(
                h, w, window_strides=(1, 1), padding="SAME",
                dimension_numbers=("NCHW", "OIHW", "NCHW"),
                precision=lax.Precision.HIGHEST)
            h = jnp.maximum(h + b.reshape(1, -1, 1, 1), 0.0)
            out.append(h)
        return out

    def gram(f):
        n, c, hh, ww = f.shape
        x = f.reshape(n, c, hh * ww)
        return jnp.einsum("ncx,ndx->ncd", x, x,
                          precision=lax.Precision.HIGHEST) / (c * hh * ww)

    fi, ft = feats(inp), feats(tgt)
    terms = [jnp.mean(jnp.abs(inp - tgt))]
    terms += [jnp.mean(jnp.abs(a - b)) * w for a, b, w in zip(fi, ft, wgts)]
    terms += [jnp.mean(jnp.abs(gram(a) - gram(b))) * (w ** 2) * 5000.0
              for a, b, w in zip(fi, ft, wgts)]
    return sum(terms)


# ----------------------------------------------------------------------------
# Main
# ----------------------------------------------------------------------------

def _make_conv_params(key, channels):
    """Deterministic (w, b) per layer; w: (C_out, C_in, 3, 3), b: (C_out,)."""
    params = []
    for c_in, c_out in zip(channels[:-1], channels[1:]):
        key, kw, kb = jax.random.split(key, 3)
        w = 0.1 * jax.random.normal(kw, (c_out, c_in, 3, 3), dtype=jnp.float32)
        b = 0.05 * jax.random.normal(kb, (c_out,), dtype=jnp.float32)
        params.append((w, b))
    return params


if __name__ == "__main__":
    key = jax.random.PRNGKey(0)
    k_in, k_tgt, k_params = jax.random.split(key, 3)

    N, C, H, W = 2, 3, 16, 16
    x_input = jax.random.normal(k_in, (N, C, H, W), dtype=jnp.float32)
    x_target = jax.random.normal(k_tgt, (N, C, H, W), dtype=jnp.float32)

    # Synthetic feature extractor: 3 -> 8 -> 16 -> 16 channels, spatial kept.
    conv_params = _make_conv_params(k_params, [C, 8, 16, 16])
    layer_wgts = [5.0, 15.0, 2.0]

    loss_fn = FeatureLoss(conv_params, layer_wgts)
    total = loss_fn(x_input, x_target)
    total = jax.block_until_ready(total)
    assert jnp.isfinite(total), "loss is not finite"

    ref = float(jax.block_until_ready(
        _reference_loss(x_input, x_target, conv_params, layer_wgts)))
    rel = abs(float(total) - ref) / max(abs(ref), 1e-6)
    assert rel < 5e-2, f"mismatch: pallas={float(total):.6f} ref={ref:.6f} rel={rel:.3e}"

    print("KERNEL_OK")
</pallas_src>

<mosaic_0001>
module attributes {stable_mosaic.version = 11 : i64} {
  func.func @_pixel_l1_kernel(%arg0: i32, %arg1: memref<6x256xf32, #tpu.memory_space<vmem>>, %arg2: memref<6x256xf32, #tpu.memory_space<vmem>>, %arg3: memref<8x128xf32, #tpu.memory_space<vmem>>) attributes {dimension_semantics = [#tpu.dimension_semantics<arbitrary>], iteration_bounds = array<i64: 1>, scalar_prefetch = 0 : i64, scratch_operands = 0 : i64, tpu.core_type = #tpu.core_type<tc>, window_params = [{pipeline_mode = #tpu.pipeline_mode<synchronous>, transform_indices = @transform_0, window_bounds = array<i64: 6, 256>}, {pipeline_mode = #tpu.pipeline_mode<synchronous>, transform_indices = @transform_1, window_bounds = array<i64: 6, 256>}, {pipeline_mode = #tpu.pipeline_mode<synchronous>, transform_indices = @transform_2, window_bounds = array<i64: 8, 128>}]} {
    %c0 = arith.constant 0 : index
    %c0_0 = arith.constant 0 : index
    %0 = vector.load %arg1[%c0, %c0_0] : memref<6x256xf32, #tpu.memory_space<vmem>>, vector<6x256xf32>
    %c0_1 = arith.constant 0 : index
    %c0_2 = arith.constant 0 : index
    %1 = vector.load %arg2[%c0_1, %c0_2] : memref<6x256xf32, #tpu.memory_space<vmem>>, vector<6x256xf32>
    %2 = arith.subf %0, %1 : vector<6x256xf32>
    %3 = math.absf %2 : vector<6x256xf32>
    %cst = arith.constant dense<0.000000e+00> : vector<6xf32>
    %4 = vector.multi_reduction <add>, %3, %cst [1] : vector<6x256xf32> to vector<6xf32>
    %5 = vector.shape_cast %4 : vector<6xf32> to vector<6x1xf32>
    %cst_3 = arith.constant dense<0.000000e+00> : vector<1xf32>
    %6 = vector.multi_reduction <add>, %5, %cst_3 [0] : vector<6x1xf32> to vector<1xf32>
    %7 = vector.shape_cast %6 : vector<1xf32> to vector<1x1xf32>
    %8 = vector.shape_cast %7 : vector<1x1xf32> to vector<1x1xf32>
    %9 = vector.broadcast %8 : vector<1x1xf32> to vector<8x128xf32>
    %c0_4 = arith.constant 0 : index
    %c0_5 = arith.constant 0 : index
    %10 = vector.load %arg3[%c0_4, %c0_5] : memref<8x128xf32, #tpu.memory_space<vmem>>, vector<8x128xf32>
    tpu.vector_store %arg3[%c0_4, %c0_5], %9 {strides = array<i32>} : memref<8x128xf32, #tpu.memory_space<vmem>>, vector<8x128xf32>,
    return
  }
  func.func @transform_0(%arg0: i32) -> (i32, i32) {
    %c0_i32 = arith.constant 0 : i32
    %c0_i32_0 = arith.constant 0 : i32
    %c0_i32_1 = arith.constant 0 : i32
    return %c0_i32, %c0_i32_0 : i32, i32
  }
  func.func @transform_1(%arg0: i32) -> (i32, i32) {
    %c0_i32 = arith.constant 0 : i32
    %c0_i32_0 = arith.constant 0 : i32
    %c0_i32_1 = arith.constant 0 : i32
    return %c0_i32, %c0_i32_0 : i32, i32
  }
  func.func @transform_2(%arg0: i32) -> (i32, i32) {
    %c0_i32 = arith.constant 0 : i32
    %c0_i32_0 = arith.constant 0 : i32
    %c0_i32_1 = arith.constant 0 : i32
    return %c0_i32, %c0_i32_0 : i32, i32
  }
}

module attributes {stable_mosaic.version = 11 : i64} {
  func.func @_feat_gram_kernel(%arg0: i32, %arg1: memref<1x456x128xf32, #tpu.memory_space<vmem>>, %arg2: memref<1x456x128xf32, #tpu.memory_space<vmem>>, %arg3: memref<8x128xf32, #tpu.memory_space<vmem>>, %arg4: memref<8x128xf32, #tpu.memory_space<vmem>>) attributes {dimension_semantics = [#tpu.dimension_semantics<arbitrary>], iteration_bounds = array<i64: 2>, scalar_prefetch = 0 : i64, scratch_operands = 0 : i64, tpu.core_type = #tpu.core_type<tc>, window_params = [{transform_indices = @transform_0, window_bounds = array<i64: 1, 456, 128>}, {transform_indices = @transform_1, window_bounds = array<i64: 1, 456, 128>}, {pipeline_mode = #tpu.pipeline_mode<synchronous>, transform_indices = @transform_2, window_bounds = array<i64: 8, 128>}, {pipeline_mode = #tpu.pipeline_mode<synchronous>, transform_indices = @transform_3, window_bounds = array<i64: 8, 128>}]} {
    %c0_i32 = arith.constant 0 : i32
    %0 = arith.cmpi eq, %arg0, %c0_i32 : i32
    %1 = arith.extui %0 : i1 to i32
    %c0_i32_0 = arith.constant 0 : i32
    %2 = arith.cmpi ne, %1, %c0_i32_0 : i32
    scf.if %2 {
      %cst_20 = arith.constant 0.000000e+00 : f32
      %33 = vector.broadcast %cst_20 : f32 to vector<8x128xf32>
      %c0_21 = arith.constant 0 : index
      %c0_22 = arith.constant 0 : index
      %34 = vector.load %arg3[%c0_21, %c0_22] : memref<8x128xf32, #tpu.memory_space<vmem>>, vector<8x128xf32>
      tpu.vector_store %arg3[%c0_21, %c0_22], %33 {strides = array<i32>} : memref<8x128xf32, #tpu.memory_space<vmem>>, vector<8x128xf32>,
      %cst_23 = arith.constant 0.000000e+00 : f32
      %35 = vector.broadcast %cst_23 : f32 to vector<8x128xf32>
      %c0_24 = arith.constant 0 : index
      %c0_25 = arith.constant 0 : index
      %36 = vector.load %arg4[%c0_24, %c0_25] : memref<8x128xf32, #tpu.memory_space<vmem>>, vector<8x128xf32>
      tpu.vector_store %arg4[%c0_24, %c0_25], %35 {strides = array<i32>} : memref<8x128xf32, #tpu.memory_space<vmem>>, vector<8x128xf32>,
    } else {
    }
    %c0 = arith.constant 0 : index
    %c0_1 = arith.constant 0 : index
    %c0_2 = arith.constant 0 : index
    %3 = vector.load %arg1[%c0, %c0_1, %c0_2] : memref<1x456x128xf32, #tpu.memory_space<vmem>>, vector<1x456x128xf32>
    %4 = vector.shape_cast %3 : vector<1x456x128xf32> to vector<456x128xf32>
    %c0_3 = arith.constant 0 : index
    %c0_4 = arith.constant 0 : index
    %c0_5 = arith.constant 0 : index
    %5 = vector.load %arg2[%c0_3, %c0_4, %c0_5] : memref<1x456x128xf32, #tpu.memory_space<vmem>>, vector<1x456x128xf32>
    %6 = vector.shape_cast %5 : vector<1x456x128xf32> to vector<456x128xf32>
    %7 = arith.subf %4, %6 : vector<456x128xf32>
    %8 = math.absf %7 : vector<456x128xf32>
    %cst = arith.constant dense<0.000000e+00> : vector<456xf32>
    %9 = vector.multi_reduction <add>, %8, %cst [1] : vector<456x128xf32> to vector<456xf32>
    %10 = vector.shape_cast %9 : vector<456xf32> to vector<456x1xf32>
    %cst_6 = arith.constant dense<0.000000e+00> : vector<1xf32>
    %11 = vector.multi_reduction <add>, %10, %cst_6 [0] : vector<456x1xf32> to vector<1xf32>
    %12 = vector.shape_cast %11 : vector<1xf32> to vector<1x1xf32>
    %c0_7 = arith.constant 0 : index
    %c0_8 = arith.constant 0 : index
    %13 = vector.load %arg3[%c0_7, %c0_8] : memref<8x128xf32, #tpu.memory_space<vmem>>, vector<8x128xf32>
    %14 = vector.shape_cast %12 : vector<1x1xf32> to vector<1x1xf32>
    %15 = vector.broadcast %14 : vector<1x1xf32> to vector<8x128xf32>
    %16 = arith.addf %13, %15 : vector<8x128xf32>
    %c0_9 = arith.constant 0 : index
    %c0_10 = arith.constant 0 : index
    %17 = vector.load %arg3[%c0_9, %c0_10] : memref<8x128xf32, #tpu.memory_space<vmem>>, vector<8x128xf32>
    tpu.vector_store %arg3[%c0_9, %c0_10], %16 {strides = array<i32>} : memref<8x128xf32, #tpu.memory_space<vmem>>, vector<8x128xf32>,
    %cst_11 = arith.constant dense<0.000000e+00> : vector<128x128xf32>
    %18 = tpu.matmul %4, %4, %cst_11 {dimension_numbers = #tpu.dot_dimension_numbers<[0], [0], [1], [1], [0, 1, 1, 1], [], []>} : vector<456x128xf32>, vector<456x128xf32>, vector<128x128xf32> -> vector<128x128xf32>
    %cst_12 = arith.constant dense<0.000000e+00> : vector<128x128xf32>
    %19 = tpu.matmul %6, %6, %cst_12 {dimension_numbers = #tpu.dot_dimension_numbers<[0], [0], [1], [1], [0, 1, 1, 1], [], []>} : vector<456x128xf32>, vector<456x128xf32>, vector<128x128xf32> -> vector<128x128xf32>
    %20 = arith.subf %18, %19 : vector<128x128xf32>
    %21 = math.absf %20 : vector<128x128xf32>
    %cst_13 = arith.constant 4.8828125E-4 : f32
    %22 = vector.broadcast %cst_13 : f32 to vector<128x128xf32>
    %23 = arith.mulf %21, %22 : vector<128x128xf32>
    %cst_14 = arith.constant dense<0.000000e+00> : vector<128xf32>
    %24 = vector.multi_reduction <add>, %23, %cst_14 [1] : vector<128x128xf32> to vector<128xf32>
    %25 = vector.shape_cast %24 : vector<128xf32> to vector<128x1xf32>
    %cst_15 = arith.constant dense<0.000000e+00> : vector<1xf32>
    %26 = vector.multi_reduction <add>, %25, %cst_15 [0] : vector<128x1xf32> to vector<1xf32>
    %27 = vector.shape_cast %26 : vector<1xf32> to vector<1x1xf32>
    %c0_16 = arith.constant 0 : index
    %c0_17 = arith.constant 0 : index
    %28 = vector.load %arg4[%c0_16, %c0_17] : memref<8x128xf32, #tpu.memory_space<vmem>>, vector<8x128xf32>
    %29 = vector.shape_cast %27 : vector<1x1xf32> to vector<1x1xf32>
    %30 = vector.broadcast %29 : vector<1x1xf32> to vector<8x128xf32>
    %31 = arith.addf %28, %30 : vector<8x128xf32>
    %c0_18 = arith.constant 0 : index
    %c0_19 = arith.constant 0 : index
    %32 = vector.load %arg4[%c0_18, %c0_19] : memref<8x128xf32, #tpu.memory_space<vmem>>, vector<8x128xf32>
    tpu.vector_store %arg4[%c0_18, %c0_19], %31 {strides = array<i32>} : memref<8x128xf32, #tpu.memory_space<vmem>>, vector<8x128xf32>,
    return
  }
  func.func @transform_0(%arg0: i32) -> (i32, i32, i32) {
    %c0_i32 = arith.constant 0 : i32
    %c0_i32_0 = arith.constant 0 : i32
    %c0_i32_1 = arith.constant 0 : i32
    return %arg0, %c0_i32, %c0_i32_0 : i32, i32, i32
  }
  func.func @transform_1(%arg0: i32) -> (i32, i32, i32) {
    %c2_i32 = arith.constant 2 : i32
    %0 = arith.addi %arg0, %c2_i32 : i32
    %c0_i32 = arith.constant 0 : i32
    %c0_i32_0 = arith.constant 0 : i32
    %c0_i32_1 = arith.constant 0 : i32
    return %0, %c0_i32, %c0_i32_0 : i32, i32, i32
  }
  func.func @transform_2(%arg0: i32) -> (i32, i32) {
    %c0_i32 = arith.constant 0 : i32
    %c0_i32_0 = arith.constant 0 : i32
    %c0_i32_1 = arith.constant 0 : i32
    return %c0_i32, %c0_i32_0 : i32, i32
  }
  func.func @transform_3(%arg0: i32) -> (i32, i32) {
    %c0_i32 = arith.constant 0 : i32
    %c0_i32_0 = arith.constant 0 : i32
    %c0_i32_1 = arith.constant 0 : i32
    return %c0_i32, %c0_i32_0 : i32, i32
  }
}

module attributes {stable_mosaic.version = 11 : i64} {
  func.func @_conv3x3_relu_kernel(%arg0: i32, %arg1: memref<1x456x128xf32, #tpu.memory_space<vmem>>, %arg2: memref<9x128x128xf32, #tpu.memory_space<vmem>>, %arg3: memref<1x128xf32, #tpu.memory_space<vmem>>, %arg4: memref<384x1xf32, #tpu.memory_space<vmem>>, %arg5: memref<1x456x128xf32, #tpu.memory_space<vmem>>) attributes {dimension_semantics = [#tpu.dimension_semantics<parallel>], iteration_bounds = array<i64: 4>, scalar_prefetch = 0 : i64, scratch_operands = 0 : i64, tpu.core_type = #tpu.core_type<tc>, window_params = [{transform_indices = @transform_0, window_bounds = array<i64: 1, 456, 128>}, {pipeline_mode = #tpu.pipeline_mode<synchronous>, transform_indices = @transform_1, window_bounds = array<i64: 9, 128, 128>}, {pipeline_mode = #tpu.pipeline_mode<synchronous>, transform_indices = @transform_2, window_bounds = array<i64: 1, 128>}, {pipeline_mode = #tpu.pipeline_mode<synchronous>, transform_indices = @transform_3, window_bounds = array<i64: 384, 1>}, {transform_indices = @transform_4, window_bounds = array<i64: 1, 456, 128>}]} {
    %c0 = arith.constant 0 : index
    %c0_0 = arith.constant 0 : index
    %0 = vector.load %arg3[%c0, %c0_0] : memref<1x128xf32, #tpu.memory_space<vmem>>, vector<1x128xf32>
    %cst = arith.constant 0.000000e+00 : f32
    %1 = vector.broadcast %cst : f32 to vector<32x128xf32>
    %c0_1 = arith.constant 0 : index
    %c0_2 = arith.constant 0 : index
    %c0_3 = arith.constant 0 : index
    %2 = vector.load %arg5[%c0_1, %c0_2, %c0_3] : memref<1x456x128xf32, #tpu.memory_space<vmem>>, vector<1x32x128xf32>
    %3 = vector.shape_cast %2 : vector<1x32x128xf32> to vector<32x128xf32>
    %4 = vector.shape_cast %1 : vector<32x128xf32> to vector<1x32x128xf32>
    tpu.vector_store %arg5[%c0_1, %c0_2, %c0_3], %4 {strides = array<i32>} : memref<1x456x128xf32, #tpu.memory_space<vmem>>, vector<1x32x128xf32>,
    %cst_4 = arith.constant 0.000000e+00 : f32
    %5 = vector.broadcast %cst_4 : f32 to vector<40x128xf32>
    %c0_5 = arith.constant 0 : index
    %c416 = arith.constant 416 : index
    %c0_6 = arith.constant 0 : index
    %6 = vector.load %arg5[%c0_5, %c416, %c0_6] : memref<1x456x128xf32, #tpu.memory_space<vmem>>, vector<1x40x128xf32>
    %7 = vector.shape_cast %6 : vector<1x40x128xf32> to vector<40x128xf32>
    %8 = vector.shape_cast %5 : vector<40x128xf32> to vector<1x40x128xf32>
    tpu.vector_store %arg5[%c0_5, %c416, %c0_6], %8 {strides = array<i32>} : memref<1x456x128xf32, #tpu.memory_space<vmem>>, vector<1x40x128xf32>,
    %c0_7 = arith.constant 0 : index
    %c0_8 = arith.constant 0 : index
    %c0_9 = arith.constant 0 : index
    %9 = vector.load %arg1[%c0_7, %c0_8, %c0_9] : memref<1x456x128xf32, #tpu.memory_space<vmem>>, vector<1x80x128xf32>
    %10 = vector.shape_cast %9 : vector<1x80x128xf32> to vector<80x128xf32>
    %11 = vector.extract_strided_slice %10 {offsets = [7, 0], sizes = [64, 128], strides = [1, 1]} : vector<80x128xf32> to vector<64x128xf32>
    %c0_10 = arith.constant 0 : index
    %c0_11 = arith.constant 0 : index
    %c0_12 = arith.constant 0 : index
    %12 = vector.load %arg2[%c0_10, %c0_11, %c0_12] : memref<9x128x128xf32, #tpu.memory_space<vmem>>, vector<1x128x128xf32>
    %13 = vector.shape_cast %12 : vector<1x128x128xf32> to vector<128x128xf32>
    %cst_13 = arith.constant dense<0.000000e+00> : vector<64x128xf32>
    %14 = tpu.matmul %11, %13, %cst_13 {dimension_numbers = #tpu.dot_dimension_numbers<[1], [0], [0], [1], [0, 0, 1, 1], [], []>} : vector<64x128xf32>, vector<128x128xf32>, vector<64x128xf32> -> vector<64x128xf32>
    %15 = vector.extract_strided_slice %10 {offsets = [8, 0], sizes = [64, 128], strides = [1, 1]} : vector<80x128xf32> to vector<64x128xf32>
    %c1 = arith.constant 1 : index
    %c0_14 = arith.constant 0 : index
    %c0_15 = arith.constant 0 : index
    %16 = vector.load %arg2[%c1, %c0_14, %c0_15] : memref<9x128x128xf32, #tpu.memory_space<vmem>>, vector<1x128x128xf32>
    %17 = vector.shape_cast %16 : vector<1x128x128xf32> to vector<128x128xf32>
    %cst_16 = arith.constant dense<0.000000e+00> : vector<64x128xf32>
    %18 = tpu.matmul %15, %17, %cst_16 {dimension_numbers = #tpu.dot_dimension_numbers<[1], [0], [0], [1], [0, 0, 1, 1], [], []>} : vector<64x128xf32>, vector<128x128xf32>, vector<64x128xf32> -> vector<64x128xf32>
    %19 = arith.addf %14, %18 : vector<64x128xf32>
    %20 = vector.extract_strided_slice %10 {offsets = [9, 0], sizes = [64, 128], strides = [1, 1]} : vector<80x128xf32> to vector<64x128xf32>
    %c2 = arith.constant 2 : index
    %c0_17 = arith.constant 0 : index
    %c0_18 = arith.constant 0 : index
    %21 = vector.load %arg2[%c2, %c0_17, %c0_18] : memref<9x128x128xf32, #tpu.memory_space<vmem>>, vector<1x128x128xf32>
    %22 = vector.shape_cast %21 : vector<1x128x128xf32> to vector<128x128xf32>
    %cst_19 = arith.constant dense<0.000000e+00> : vector<64x128xf32>
    %23 = tpu.matmul %20, %22, %cst_19 {dimension_numbers = #tpu.dot_dimension_numbers<[1], [0], [0], [1], [0, 0, 1, 1], [], []>} : vector<64x128xf32>, vector<128x128xf32>, vector<64x128xf32> -> vector<64x128xf32>
    %24 = arith.addf %19, %23 : vector<64x128xf32>
    %c0_20 = arith.constant 0 : index
    %c24 = arith.constant 24 : index
    %c0_21 = arith.constant 0 : index
    %25 = vector.load %arg1[%c0_20, %c24, %c0_21] : memref<1x456x128xf32, #tpu.memory_space<vmem>>, vector<1x80x128xf32>
    %26 = vector.shape_cast %25 : vector<1x80x128xf32> to vector<80x128xf32>
    %27 = vector.extract_strided_slice %26 {offsets = [7, 0], sizes = [64, 128], strides = [1, 1]} : vector<80x128xf32> to vector<64x128xf32>
    %c3 = arith.constant 3 : index
    %c0_22 = arith.constant 0 : index
    %c0_23 = arith.constant 0 : index
    %28 = vector.load %arg2[%c3, %c0_22, %c0_23] : memref<9x128x128xf32, #tpu.memory_space<vmem>>, vector<1x128x128xf32>
    %29 = vector.shape_cast %28 : vector<1x128x128xf32> to vector<128x128xf32>
    %cst_24 = arith.constant dense<0.000000e+00> : vector<64x128xf32>
    %30 = tpu.matmul %27, %29, %cst_24 {dimension_numbers = #tpu.dot_dimension_numbers<[1], [0], [0], [1], [0, 0, 1, 1], [], []>} : vector<64x128xf32>, vector<128x128xf32>, vector<64x128xf32> -> vector<64x128xf32>
    %31 = arith.addf %24, %30 : vector<64x128xf32>
    %32 = vector.extract_strided_slice %26 {offsets = [8, 0], sizes = [64, 128], strides = [1, 1]} : vector<80x128xf32> to vector<64x128xf32>
    %c4 = arith.constant 4 : index
    %c0_25 = arith.constant 0 : index
    %c0_26 = arith.constant 0 : index
    %33 = vector.load %arg2[%c4, %c0_25, %c0_26] : memref<9x128x128xf32, #tpu.memory_space<vmem>>, vector<1x128x128xf32>
    %34 = vector.shape_cast %33 : vector<1x128x128xf32> to vector<128x128xf32>
    %cst_27 = arith.constant dense<0.000000e+00> : vector<64x128xf32>
    %35 = tpu.matmul %32, %34, %cst_27 {dimension_numbers = #tpu.dot_dimension_numbers<[1], [0], [0], [1], [0, 0, 1, 1], [], []>} : vector<64x128xf32>, vector<128x128xf32>, vector<64x128xf32> -> vector<64x128xf32>
    %36 = arith.addf %31, %35 : vector<64x128xf32>
    %37 = vector.extract_strided_slice %26 {offsets = [9, 0], sizes = [64, 128], strides = [1, 1]} : vector<80x128xf32> to vector<64x128xf32>
    %c5 = arith.constant 5 : index
    %c0_28 = arith.constant 0 : index
    %c0_29 = arith.constant 0 : index
    %38 = vector.load %arg2[%c5, %c0_28, %c0_29] : memref<9x128x128xf32, #tpu.memory_space<vmem>>, vector<1x128x128xf32>
    %39 = vector.shape_cast %38 : vector<1x128x128xf32> to vector<128x128xf32>
    %cst_30 = arith.constant dense<0.000000e+00> : vector<64x128xf32>
    %40 = tpu.matmul %37, %39, %cst_30 {dimension_numbers = #tpu.dot_dimension_numbers<[1], [0], [0], [1], [0, 0, 1, 1], [], []>} : vector<64x128xf32>, vector<128x128xf32>, vector<64x128xf32> -> vector<64x128xf32>
    %41 = arith.addf %36, %40 : vector<64x128xf32>
    %c0_31 = arith.constant 0 : index
    %c48 = arith.constant 48 : index
    %c0_32 = arith.constant 0 : index
    %42 = vector.load %arg1[%c0_31, %c48, %c0_32] : memref<1x456x128xf32, #tpu.memory_space<vmem>>, vector<1x80x128xf32>
    %43 = vector.shape_cast %42 : vector<1x80x128xf32> to vector<80x128xf32>
    %44 = vector.extract_strided_slice %43 {offsets = [7, 0], sizes = [64, 128], strides = [1, 1]} : vector<80x128xf32> to vector<64x128xf32>
    %c6 = arith.constant 6 : index
    %c0_33 = arith.constant 0 : index
    %c0_34 = arith.constant 0 : index
    %45 = vector.load %arg2[%c6, %c0_33, %c0_34] : memref<9x128x128xf32, #tpu.memory_space<vmem>>, vector<1x128x128xf32>
    %46 = vector.shape_cast %45 : vector<1x128x128xf32> to vector<128x128xf32>
    %cst_35 = arith.constant dense<0.000000e+00> : vector<64x128xf32>
    %47 = tpu.matmul %44, %46, %cst_35 {dimension_numbers = #tpu.dot_dimension_numbers<[1], [0], [0], [1], [0, 0, 1, 1], [], []>} : vector<64x128xf32>, vector<128x128xf32>, vector<64x128xf32> -> vector<64x128xf32>
    %48 = arith.addf %41, %47 : vector<64x128xf32>
    %49 = vector.extract_strided_slice %43 {offsets = [8, 0], sizes = [64, 128], strides = [1, 1]} : vector<80x128xf32> to vector<64x128xf32>
    %c7 = arith.constant 7 : index
    %c0_36 = arith.constant 0 : index
    %c0_37 = arith.constant 0 : index
    %50 = vector.load %arg2[%c7, %c0_36, %c0_37] : memref<9x128x128xf32, #tpu.memory_space<vmem>>, vector<1x128x128xf32>
    %51 = vector.shape_cast %50 : vector<1x128x128xf32> to vector<128x128xf32>
    %cst_38 = arith.constant dense<0.000000e+00> : vector<64x128xf32>
    %52 = tpu.matmul %49, %51, %cst_38 {dimension_numbers = #tpu.dot_dimension_numbers<[1], [0], [0], [1], [0, 0, 1, 1], [], []>} : vector<64x128xf32>, vector<128x128xf32>, vector<64x128xf32> -> vector<64x128xf32>
    %53 = arith.addf %48, %52 : vector<64x128xf32>
    %54 = vector.extract_strided_slice %43 {offsets = [9, 0], sizes = [64, 128], strides = [1, 1]} : vector<80x128xf32> to vector<64x128xf32>
    %c8 = arith.constant 8 : index
    %c0_39 = arith.constant 0 : index
    %c0_40 = arith.constant 0 : index
    %55 = vector.load %arg2[%c8, %c0_39, %c0_40] : memref<9x128x128xf32, #tpu.memory_space<vmem>>, vector<1x128x128xf32>
    %56 = vector.shape_cast %55 : vector<1x128x128xf32> to vector<128x128xf32>
    %cst_41 = arith.constant dense<0.000000e+00> : vector<64x128xf32>
    %57 = tpu.matmul %54, %56, %cst_41 {dimension_numbers = #tpu.dot_dimension_numbers<[1], [0], [0], [1], [0, 0, 1, 1], [], []>} : vector<64x128xf32>, vector<128x128xf32>, vector<64x128xf32> -> vector<64x128xf32>
    %58 = arith.addf %53, %57 : vector<64x128xf32>
    %59 = vector.broadcast %0 : vector<1x128xf32> to vector<64x128xf32>
    %60 = arith.addf %58, %59 : vector<64x128xf32>
    %cst_42 = arith.constant 0.000000e+00 : f32
    %61 = vector.broadcast %cst_42 : f32 to vector<64x128xf32>
    %62 = arith.maximumf %60, %61 : vector<64x128xf32>
    %c0_43 = arith.constant 0 : index
    %c0_44 = arith.constant 0 : index
    %63 = vector.load %arg4[%c0_43, %c0_44] : memref<384x1xf32, #tpu.memory_space<vmem>>, vector<64x1xf32>
    %64 = vector.broadcast %63 : vector<64x1xf32> to vector<64x128xf32>
    %65 = arith.mulf %62, %64 : vector<64x128xf32>
    %c0_45 = arith.constant 0 : index
    %c32 = arith.constant 32 : index
    %c0_46 = arith.constant 0 : index
    %66 = vector.load %arg5[%c0_45, %c32, %c0_46] : memref<1x456x128xf32, #tpu.memory_space<vmem>>, vector<1x64x128xf32>
    %67 = vector.shape_cast %66 : vector<1x64x128xf32> to vector<64x128xf32>
    %68 = vector.shape_cast %65 : vector<64x128xf32> to vector<1x64x128xf32>
    tpu.vector_store %arg5[%c0_45, %c32, %c0_46], %68 {strides = array<i32>} : memref<1x456x128xf32, #tpu.memory_space<vmem>>, vector<1x64x128xf32>,
    %c0_47 = arith.constant 0 : index
    %c64 = arith.constant 64 : index
    %c0_48 = arith.constant 0 : index
    %69 = vector.load %arg1[%c0_47, %c64, %c0_48] : memref<1x456x128xf32, #tpu.memory_space<vmem>>, vector<1x80x128xf32>
    %70 = vector.shape_cast %69 : vector<1x80x128xf32> to vector<80x128xf32>
    %71 = vector.extract_strided_slice %70 {offsets = [7, 0], sizes = [64, 128], strides = [1, 1]} : vector<80x128xf32> to vector<64x128xf32>
    %c0_49 = arith.constant 0 : index
    %c0_50 = arith.constant 0 : index
    %c0_51 = arith.constant 0 : index
    %72 = vector.load %arg2[%c0_49, %c0_50, %c0_51] : memref<9x128x128xf32, #tpu.memory_space<vmem>>, vector<1x128x128xf32>
    %73 = vector.shape_cast %72 : vector<1x128x128xf32> to vector<128x128xf32>
    %cst_52 = arith.constant dense<0.000000e+00> : vector<64x128xf32>
    %74 = tpu.matmul %71, %73, %cst_52 {dimension_numbers = #tpu.dot_dimension_numbers<[1], [0], [0], [1], [0, 0, 1, 1], [], []>} : vector<64x128xf32>, vector<128x128xf32>, vector<64x128xf32> -> vector<64x128xf32>
    %75 = vector.extract_strided_slice %70 {offsets = [8, 0], sizes = [64, 128], strides = [1, 1]} : vector<80x128xf32> to vector<64x128xf32>
    %c1_53 = arith.constant 1 : index
    %c0_54 = arith.constant 0 : index
    %c0_55 = arith.constant 0 : index
    %76 = vector.load %arg2[%c1_53, %c0_54, %c0_55] : memref<9x128x128xf32, #tpu.memory_space<vmem>>, vector<1x128x128xf32>
    %77 = vector.shape_cast %76 : vector<1x128x128xf32> to vector<128x128xf32>
    %cst_56 = arith.constant dense<0.000000e+00> : vector<64x128xf32>
    %78 = tpu.matmul %75, %77, %cst_56 {dimension_numbers = #tpu.dot_dimension_numbers<[1], [0], [0], [1], [0, 0, 1, 1], [], []>} : vector<64x128xf32>, vector<128x128xf32>, vector<64x128xf32> -> vector<64x128xf32>
    %79 = arith.addf %74, %78 : vector<64x128xf32>
    %80 = vector.extract_strided_slice %70 {offsets = [9, 0], sizes = [64, 128], strides = [1, 1]} : vector<80x128xf32> to vector<64x128xf32>
    %c2_57 = arith.constant 2 : index
    %c0_58 = arith.constant 0 : index
    %c0_59 = arith.constant 0 : index
    %81 = vector.load %arg2[%c2_57, %c0_58, %c0_59] : memref<9x128x128xf32, #tpu.memory_space<vmem>>, vector<1x128x128xf32>
    %82 = vector.shape_cast %81 : vector<1x128x128xf32> to vector<128x128xf32>
    %cst_60 = arith.constant dense<0.000000e+00> : vector<64x128xf32>
    %83 = tpu.matmul %80, %82, %cst_60 {dimension_numbers = #tpu.dot_dimension_numbers<[1], [0], [0], [1], [0, 0, 1, 1], [], []>} : vector<64x128xf32>, vector<128x128xf32>, vector<64x128xf32> -> vector<64x128xf32>
    %84 = arith.addf %79, %83 : vector<64x128xf32>
    %c0_61 = arith.constant 0 : index
    %c88 = arith.constant 88 : index
    %c0_62 = arith.constant 0 : index
    %85 = vector.load %arg1[%c0_61, %c88, %c0_62] : memref<1x456x128xf32, #tpu.memory_space<vmem>>, vector<1x80x128xf32>
    %86 = vector.shape_cast %85 : vector<1x80x128xf32> to vector<80x128xf32>
    %87 = vector.extract_strided_slice %86 {offsets = [7, 0], sizes = [64, 128], strides = [1, 1]} : vector<80x128xf32> to vector<64x128xf32>
    %c3_63 = arith.constant 3 : index
    %c0_64 = arith.constant 0 : index
    %c0_65 = arith.constant 0 : index
    %88 = vector.load %arg2[%c3_63, %c0_64, %c0_65] : memref<9x128x128xf32, #tpu.memory_space<vmem>>, vector<1x128x128xf32>
    %89 = vector.shape_cast %88 : vector<1x128x128xf32> to vector<128x128xf32>
    %cst_66 = arith.constant dense<0.000000e+00> : vector<64x128xf32>
    %90 = tpu.matmul %87, %89, %cst_66 {dimension_numbers = #tpu.dot_dimension_numbers<[1], [0], [0], [1], [0, 0, 1, 1], [], []>} : vector<64x128xf32>, vector<128x128xf32>, vector<64x128xf32> -> vector<64x128xf32>
    %91 = arith.addf %84, %90 : vector<64x128xf32>
    %92 = vector.extract_strided_slice %86 {offsets = [8, 0], sizes = [64, 128], strides = [1, 1]} : vector<80x128xf32> to vector<64x128xf32>
    %c4_67 = arith.constant 4 : index
    %c0_68 = arith.constant 0 : index
    %c0_69 = arith.constant 0 : index
    %93 = vector.load %arg2[%c4_67, %c0_68, %c0_69] : memref<9x128x128xf32, #tpu.memory_space<vmem>>, vector<1x128x128xf32>
    %94 = vector.shape_cast %93 : vector<1x128x128xf32> to vector<128x128xf32>
    %cst_70 = arith.constant dense<0.000000e+00> : vector<64x128xf32>
    %95 = tpu.matmul %92, %94, %cst_70 {dimension_numbers = #tpu.dot_dimension_numbers<[1], [0], [0], [1], [0, 0, 1, 1], [], []>} : vector<64x128xf32>, vector<128x128xf32>, vector<64x128xf32> -> vector<64x128xf32>
    %96 = arith.addf %91, %95 : vector<64x128xf32>
    %97 = vector.extract_strided_slice %86 {offsets = [9, 0], sizes = [64, 128], strides = [1, 1]} : vector<80x128xf32> to vector<64x128xf32>
    %c5_71 = arith.constant 5 : index
    %c0_72 = arith.constant 0 : index
    %c0_73 = arith.constant 0 : index
    %98 = vector.load %arg2[%c5_71, %c0_72, %c0_73] : memref<9x128x128xf32, #tpu.memory_space<vmem>>, vector<1x128x128xf32>
    %99 = vector.shape_cast %98 : vector<1x128x128xf32> to vector<128x128xf32>
    %cst_74 = arith.constant dense<0.000000e+00> : vector<64x128xf32>
    %100 = tpu.matmul %97, %99, %cst_74 {dimension_numbers = #tpu.dot_dimension_numbers<[1], [0], [0], [1], [0, 0, 1, 1], [], []>} : vector<64x128xf32>, vector<128x128xf32>, vector<64x128xf32> -> vector<64x128xf32>
    %101 = arith.addf %96, %100 : vector<64x128xf32>
    %c0_75 = arith.constant 0 : index
    %c112 = arith.constant 112 : index
    %c0_76 = arith.constant 0 : index
    %102 = vector.load %arg1[%c0_75, %c112, %c0_76] : memref<1x456x128xf32, #tpu.memory_space<vmem>>, vector<1x80x128xf32>
    %103 = vector.shape_cast %102 : vector<1x80x128xf32> to vector<80x128xf32>
    %104 = vector.extract_strided_slice %103 {offsets = [7, 0], sizes = [64, 128], strides = [1, 1]} : vector<80x128xf32> to vector<64x128xf32>
    %c6_77 = arith.constant 6 : index
    %c0_78 = arith.constant 0 : index
    %c0_79 = arith.constant 0 : index
    %105 = vector.load %arg2[%c6_77, %c0_78, %c0_79] : memref<9x128x128xf32, #tpu.memory_space<vmem>>, vector<1x128x128xf32>
    %106 = vector.shape_cast %105 : vector<1x128x128xf32> to vector<128x128xf32>
    %cst_80 = arith.constant dense<0.000000e+00> : vector<64x128xf32>
    %107 = tpu.matmul %104, %106, %cst_80 {dimension_numbers = #tpu.dot_dimension_numbers<[1], [0], [0], [1], [0, 0, 1, 1], [], []>} : vector<64x128xf32>, vector<128x128xf32>, vector<64x128xf32> -> vector<64x128xf32>
    %108 = arith.addf %101, %107 : vector<64x128xf32>
    %109 = vector.extract_strided_slice %103 {offsets = [8, 0], sizes = [64, 128], strides = [1, 1]} : vector<80x128xf32> to vector<64x128xf32>
    %c7_81 = arith.constant 7 : index
    %c0_82 = arith.constant 0 : index
    %c0_83 = arith.constant 0 : index
    %110 = vector.load %arg2[%c7_81, %c0_82, %c0_83] : memref<9x128x128xf32, #tpu.memory_space<vmem>>, vector<1x128x128xf32>
    %111 = vector.shape_cast %110 : vector<1x128x128xf32> to vector<128x128xf32>
    %cst_84 = arith.constant dense<0.000000e+00> : vector<64x128xf32>
    %112 = tpu.matmul %109, %111, %cst_84 {dimension_numbers = #tpu.dot_dimension_numbers<[1], [0], [0], [1], [0, 0, 1, 1], [], []>} : vector<64x128xf32>, vector<128x128xf32>, vector<64x128xf32> -> vector<64x128xf32>
    %113 = arith.addf %108, %112 : vector<64x128xf32>
    %114 = vector.extract_strided_slice %103 {offsets = [9, 0], sizes = [64, 128], strides = [1, 1]} : vector<80x128xf32> to vector<64x128xf32>
    %c8_85 = arith.constant 8 : index
    %c0_86 = arith.constant 0 : index
    %c0_87 = arith.constant 0 : index
    %115 = vector.load %arg2[%c8_85, %c0_86, %c0_87] : memref<9x128x128xf32, #tpu.memory_space<vmem>>, vector<1x128x128xf32>
    %116 = vector.shape_cast %115 : vector<1x128x128xf32> to vector<128x128xf32>
    %cst_88 = arith.constant dense<0.000000e+00> : vector<64x128xf32>
    %117 = tpu.matmul %114, %116, %cst_88 {dimension_numbers = #tpu.dot_dimension_numbers<[1], [0], [0], [1], [0, 0, 1, 1], [], []>} : vector<64x128xf32>, vector<128x128xf32>, vector<64x128xf32> -> vector<64x128xf32>
    %118 = arith.addf %113, %117 : vector<64x128xf32>
    %119 = vector.broadcast %0 : vector<1x128xf32> to vector<64x128xf32>
    %120 = arith.addf %118, %119 : vector<64x128xf32>
    %cst_89 = arith.constant 0.000000e+00 : f32
    %121 = vector.broadcast %cst_89 : f32 to vector<64x128xf32>
    %122 = arith.maximumf %120, %121 : vector<64x128xf32>
    %c64_90 = arith.constant 64 : index
    %c0_91 = arith.constant 0 : index
    %123 = vector.load %arg4[%c64_90, %c0_91] : memref<384x1xf32, #tpu.memory_space<vmem>>, vector<64x1xf32>
    %124 = vector.broadcast %123 : vector<64x1xf32> to vector<64x128xf32>
    %125 = arith.mulf %122, %124 : vector<64x128xf32>
    %c0_92 = arith.constant 0 : index
    %c96 = arith.constant 96 : index
    %c0_93 = arith.constant 0 : index
    %126 = vector.load %arg5[%c0_92, %c96, %c0_93] : memref<1x456x128xf32, #tpu.memory_space<vmem>>, vector<1x64x128xf32>
    %127 = vector.shape_cast %126 : vector<1x64x128xf32> to vector<64x128xf32>
    %128 = vector.shape_cast %125 : vector<64x128xf32> to vector<1x64x128xf32>
    tpu.vector_store %arg5[%c0_92, %c96, %c0_93], %128 {strides = array<i32>} : memref<1x456x128xf32, #tpu.memory_space<vmem>>, vector<1x64x128xf32>,
    %c0_94 = arith.constant 0 : index
    %c128 = arith.constant 128 : index
    %c0_95 = arith.constant 0 : index
    %129 = vector.load %arg1[%c0_94, %c128, %c0_95] : memref<1x456x128xf32, #tpu.memory_space<vmem>>, vector<1x80x128xf32>
    %130 = vector.shape_cast %129 : vector<1x80x128xf32> to vector<80x128xf32>
    %131 = vector.extract_strided_slice %130 {offsets = [7, 0], sizes = [64, 128], strides = [1, 1]} : vector<80x128xf32> to vector<64x128xf32>
    %c0_96 = arith.constant 0 : index
    %c0_97 = arith.constant 0 : index
    %c0_98 = arith.constant 0 : index
    %132 = vector.load %arg2[%c0_96, %c0_97, %c0_98] : memref<9x128x128xf32, #tpu.memory_space<vmem>>, vector<1x128x128xf32>
    %133 = vector.shape_cast %132 : vector<1x128x128xf32> to vector<128x128xf32>
    %cst_99 = arith.constant dense<0.000000e+00> : vector<64x128xf32>
    %134 = tpu.matmul %131, %133, %cst_99 {dimension_numbers = #tpu.dot_dimension_numbers<[1], [0], [0], [1], [0, 0, 1, 1], [], []>} : vector<64x128xf32>, vector<128x128xf32>, vector<64x128xf32> -> vector<64x128xf32>
    %135 = vector.extract_strided_slice %130 {offsets = [8, 0], sizes = [64, 128], strides = [1, 1]} : vector<80x128xf32> to vector<64x128xf32>
    %c1_100 = arith.constant 1 : index
    %c0_101 = arith.constant 0 : index
    %c0_102 = arith.constant 0 : index
    %136 = vector.load %arg2[%c1_100, %c0_101, %c0_102] : memref<9x128x128xf32, #tpu.memory_space<vmem>>, vector<1x128x128xf32>
    %137 = vector.shape_cast %136 : vector<1x128x128xf32> to vector<128x128xf32>
    %cst_103 = arith.constant dense<0.000000e+00> : vector<64x128xf32>
    %138 = tpu.matmul %135, %137, %cst_103 {dimension_numbers = #tpu.dot_dimension_numbers<[1], [0], [0], [1], [0, 0, 1, 1], [], []>} : vector<64x128xf32>, vector<128x128xf32>, vector<64x128xf32> -> vector<64x128xf32>
    %139 = arith.addf %134, %138 : vector<64x128xf32>
    %140 = vector.extract_strided_slice %130 {offsets = [9, 0], sizes = [64, 128], strides = [1, 1]} : vector<80x128xf32> to vector<64x128xf32>
    %c2_104 = arith.constant 2 : index
    %c0_105 = arith.constant 0 : index
    %c0_106 = arith.constant 0 : index
    %141 = vector.load %arg2[%c2_104, %c0_105, %c0_106] : memref<9x128x128xf32, #tpu.memory_space<vmem>>, vector<1x128x128xf32>
    %142 = vector.shape_cast %141 : vector<1x128x128xf32> to vector<128x128xf32>
    %cst_107 = arith.constant dense<0.000000e+00> : vector<64x128xf32>
    %143 = tpu.matmul %140, %142, %cst_107 {dimension_numbers = #tpu.dot_dimension_numbers<[1], [0], [0], [1], [0, 0, 1, 1], [], []>} : vector<64x128xf32>, vector<128x128xf32>, vector<64x128xf32> -> vector<64x128xf32>
    %144 = arith.addf %139, %143 : vector<64x128xf32>
    %c0_108 = arith.constant 0 : index
    %c152 = arith.constant 152 : index
    %c0_109 = arith.constant 0 : index
    %145 = vector.load %arg1[%c0_108, %c152, %c0_109] : memref<1x456x128xf32, #tpu.memory_space<vmem>>, vector<1x80x128xf32>
    %146 = vector.shape_cast %145 : vector<1x80x128xf32> to vector<80x128xf32>
    %147 = vector.extract_strided_slice %146 {offsets = [7, 0], sizes = [64, 128], strides = [1, 1]} : vector<80x128xf32> to vector<64x128xf32>
    %c3_110 = arith.constant 3 : index
    %c0_111 = arith.constant 0 : index
    %c0_112 = arith.constant 0 : index
    %148 = vector.load %arg2[%c3_110, %c0_111, %c0_112] : memref<9x128x128xf32, #tpu.memory_space<vmem>>, vector<1x128x128xf32>
    %149 = vector.shape_cast %148 : vector<1x128x128xf32> to vector<128x128xf32>
    %cst_113 = arith.constant dense<0.000000e+00> : vector<64x128xf32>
    %150 = tpu.matmul %147, %149, %cst_113 {dimension_numbers = #tpu.dot_dimension_numbers<[1], [0], [0], [1], [0, 0, 1, 1], [], []>} : vector<64x128xf32>, vector<128x128xf32>, vector<64x128xf32> -> vector<64x128xf32>
    %151 = arith.addf %144, %150 : vector<64x128xf32>
    %152 = vector.extract_strided_slice %146 {offsets = [8, 0], sizes = [64, 128], strides = [1, 1]} : vector<80x128xf32> to vector<64x128xf32>
    %c4_114 = arith.constant 4 : index
    %c0_115 = arith.constant 0 : index
    %c0_116 = arith.constant 0 : index
    %153 = vector.load %arg2[%c4_114, %c0_115, %c0_116] : memref<9x128x128xf32, #tpu.memory_space<vmem>>, vector<1x128x128xf32>
    %154 = vector.shape_cast %153 : vector<1x128x128xf32> to vector<128x128xf32>
    %cst_117 = arith.constant dense<0.000000e+00> : vector<64x128xf32>
    %155 = tpu.matmul %152, %154, %cst_117 {dimension_numbers = #tpu.dot_dimension_numbers<[1], [0], [0], [1], [0, 0, 1, 1], [], []>} : vector<64x128xf32>, vector<128x128xf32>, vector<64x128xf32> -> vector<64x128xf32>
    %156 = arith.addf %151, %155 : vector<64x128xf32>
    %157 = vector.extract_strided_slice %146 {offsets = [9, 0], sizes = [64, 128], strides = [1, 1]} : vector<80x128xf32> to vector<64x128xf32>
    %c5_118 = arith.constant 5 : index
    %c0_119 = arith.constant 0 : index
    %c0_120 = arith.constant 0 : index
    %158 = vector.load %arg2[%c5_118, %c0_119, %c0_120] : memref<9x128x128xf32, #tpu.memory_space<vmem>>, vector<1x128x128xf32>
    %159 = vector.shape_cast %158 : vector<1x128x128xf32> to vector<128x128xf32>
    %cst_121 = arith.constant dense<0.000000e+00> : vector<64x128xf32>
    %160 = tpu.matmul %157, %159, %cst_121 {dimension_numbers = #tpu.dot_dimension_numbers<[1], [0], [0], [1], [0, 0, 1, 1], [], []>} : vector<64x128xf32>, vector<128x128xf32>, vector<64x128xf32> -> vector<64x128xf32>
    %161 = arith.addf %156, %160 : vector<64x128xf32>
    %c0_122 = arith.constant 0 : index
    %c176 = arith.constant 176 : index
    %c0_123 = arith.constant 0 : index
    %162 = vector.load %arg1[%c0_122, %c176, %c0_123] : memref<1x456x128xf32, #tpu.memory_space<vmem>>, vector<1x80x128xf32>
    %163 = vector.shape_cast %162 : vector<1x80x128xf32> to vector<80x128xf32>
    %164 = vector.extract_strided_slice %163 {offsets = [7, 0], sizes = [64, 128], strides = [1, 1]} : vector<80x128xf32> to vector<64x128xf32>
    %c6_124 = arith.constant 6 : index
    %c0_125 = arith.constant 0 : index
    %c0_126 = arith.constant 0 : index
    %165 = vector.load %arg2[%c6_124, %c0_125, %c0_126] : memref<9x128x128xf32, #tpu.memory_space<vmem>>, vector<1x128x128xf32>
    %166 = vector.shape_cast %165 : vector<1x128x128xf32> to vector<128x128xf32>
    %cst_127 = arith.constant dense<0.000000e+00> : vector<64x128xf32>
    %167 = tpu.matmul %164, %166, %cst_127 {dimension_numbers = #tpu.dot_dimension_numbers<[1], [0], [0], [1], [0, 0, 1, 1], [], []>} : vector<64x128xf32>, vector<128x128xf32>, vector<64x128xf32> -> vector<64x128xf32>
    %168 = arith.addf %161, %167 : vector<64x128xf32>
    %169 = vector.extract_strided_slice %163 {offsets = [8, 0], sizes = [64, 128], strides = [1, 1]} : vector<80x128xf32> to vector<64x128xf32>
    %c7_128 = arith.constant 7 : index
    %c0_129 = arith.constant 0 : index
    %c0_130 = arith.constant 0 : index
    %170 = vector.load %arg2[%c7_128, %c0_129, %c0_130] : memref<9x128x128xf32, #tpu.memory_space<vmem>>, vector<1x128x128xf32>
    %171 = vector.shape_cast %170 : vector<1x128x128xf32> to vector<128x128xf32>
    %cst_131 = arith.constant dense<0.000000e+00> : vector<64x128xf32>
    %172 = tpu.matmul %169, %171, %cst_131 {dimension_numbers = #tpu.dot_dimension_numbers<[1], [0], [0], [1], [0, 0, 1, 1], [], []>} : vector<64x128xf32>, vector<128x128xf32>, vector<64x128xf32> -> vector<64x128xf32>
    %173 = arith.addf %168, %172 : vector<64x128xf32>
    %174 = vector.extract_strided_slice %163 {offsets = [9, 0], sizes = [64, 128], strides = [1, 1]} : vector<80x128xf32> to vector<64x128xf32>
    %c8_132 = arith.constant 8 : index
    %c0_133 = arith.constant 0 : index
    %c0_134 = arith.constant 0 : index
    %175 = vector.load %arg2[%c8_132, %c0_133, %c0_134] : memref<9x128x128xf32, #tpu.memory_space<vmem>>, vector<1x128x128xf32>
    %176 = vector.shape_cast %175 : vector<1x128x128xf32> to vector<128x128xf32>
    %cst_135 = arith.constant dense<0.000000e+00> : vector<64x128xf32>
    %177 = tpu.matmul %174, %176, %cst_135 {dimension_numbers = #tpu.dot_dimension_numbers<[1], [0], [0], [1], [0, 0, 1, 1], [], []>} : vector<64x128xf32>, vector<128x128xf32>, vector<64x128xf32> -> vector<64x128xf32>
    %178 = arith.addf %173, %177 : vector<64x128xf32>
    %179 = vector.broadcast %0 : vector<1x128xf32> to vector<64x128xf32>
    %180 = arith.addf %178, %179 : vector<64x128xf32>
    %cst_136 = arith.constant 0.000000e+00 : f32
    %181 = vector.broadcast %cst_136 : f32 to vector<64x128xf32>
    %182 = arith.maximumf %180, %181 : vector<64x128xf32>
    %c128_137 = arith.constant 128 : index
    %c0_138 = arith.constant 0 : index
    %183 = vector.load %arg4[%c128_137, %c0_138] : memref<384x1xf32, #tpu.memory_space<vmem>>, vector<64x1xf32>
    %184 = vector.broadcast %183 : vector<64x1xf32> to vector<64x128xf32>
    %185 = arith.mulf %182, %184 : vector<64x128xf32>
    %c0_139 = arith.constant 0 : index
    %c160 = arith.constant 160 : index
    %c0_140 = arith.constant 0 : index
    %186 = vector.load %arg5[%c0_139, %c160, %c0_140] : memref<1x456x128xf32, #tpu.memory_space<vmem>>, vector<1x64x128xf32>
    %187 = vector.shape_cast %186 : vector<1x64x128xf32> to vector<64x128xf32>
    %188 = vector.shape_cast %185 : vector<64x128xf32> to vector<1x64x128xf32>
    tpu.vector_store %arg5[%c0_139, %c160, %c0_140], %188 {strides = array<i32>} : memref<1x456x128xf32, #tpu.memory_space<vmem>>, vector<1x64x128xf32>,
    %c0_141 = arith.constant 0 : index
    %c192 = arith.constant 192 : index
    %c0_142 = arith.constant 0 : index
    %189 = vector.load %arg1[%c0_141, %c192, %c0_142] : memref<1x456x128xf32, #tpu.memory_space<vmem>>, vector<1x80x128xf32>
    %190 = vector.shape_cast %189 : vector<1x80x128xf32> to vector<80x128xf32>
    %191 = vector.extract_strided_slice %190 {offsets = [7, 0], sizes = [64, 128], strides = [1, 1]} : vector<80x128xf32> to vector<64x128xf32>
    %c0_143 = arith.constant 0 : index
    %c0_144 = arith.constant 0 : index
    %c0_145 = arith.constant 0 : index
    %192 = vector.load %arg2[%c0_143, %c0_144, %c0_145] : memref<9x128x128xf32, #tpu.memory_space<vmem>>, vector<1x128x128xf32>
    %193 = vector.shape_cast %192 : vector<1x128x128xf32> to vector<128x128xf32>
    %cst_146 = arith.constant dense<0.000000e+00> : vector<64x128xf32>
    %194 = tpu.matmul %191, %193, %cst_146 {dimension_numbers = #tpu.dot_dimension_numbers<[1], [0], [0], [1], [0, 0, 1, 1], [], []>} : vector<64x128xf32>, vector<128x128xf32>, vector<64x128xf32> -> vector<64x128xf32>
    %195 = vector.extract_strided_slice %190 {offsets = [8, 0], sizes = [64, 128], strides = [1, 1]} : vector<80x128xf32> to vector<64x128xf32>
    %c1_147 = arith.constant 1 : index
    %c0_148 = arith.constant 0 : index
    %c0_149 = arith.constant 0 : index
    %196 = vector.load %arg2[%c1_147, %c0_148, %c0_149] : memref<9x128x128xf32, #tpu.memory_space<vmem>>, vector<1x128x128xf32>
    %197 = vector.shape_cast %196 : vector<1x128x128xf32> to vector<128x128xf32>
    %cst_150 = arith.constant dense<0.000000e+00> : vector<64x128xf32>
    %198 = tpu.matmul %195, %197, %cst_150 {dimension_numbers = #tpu.dot_dimension_numbers<[1], [0], [0], [1], [0, 0, 1, 1], [], []>} : vector<64x128xf32>, vector<128x128xf32>, vector<64x128xf32> -> vector<64x128xf32>
    %199 = arith.addf %194, %198 : vector<64x128xf32>
    %200 = vector.extract_strided_slice %190 {offsets = [9, 0], sizes = [64, 128], strides = [1, 1]} : vector<80x128xf32> to vector<64x128xf32>
    %c2_151 = arith.constant 2 : index
    %c0_152 = arith.constant 0 : index
    %c0_153 = arith.constant 0 : index
    %201 = vector.load %arg2[%c2_151, %c0_152, %c0_153] : memref<9x128x128xf32, #tpu.memory_space<vmem>>, vector<1x128x128xf32>
    %202 = vector.shape_cast %201 : vector<1x128x128xf32> to vector<128x128xf32>
    %cst_154 = arith.constant dense<0.000000e+00> : vector<64x128xf32>
    %203 = tpu.matmul %200, %202, %cst_154 {dimension_numbers = #tpu.dot_dimension_numbers<[1], [0], [0], [1], [0, 0, 1, 1], [], []>} : vector<64x128xf32>, vector<128x128xf32>, vector<64x128xf32> -> vector<64x128xf32>
    %204 = arith.addf %199, %203 : vector<64x128xf32>
    %c0_155 = arith.constant 0 : index
    %c216 = arith.constant 216 : index
    %c0_156 = arith.constant 0 : index
    %205 = vector.load %arg1[%c0_155, %c216, %c0_156] : memref<1x456x128xf32, #tpu.memory_space<vmem>>, vector<1x80x128xf32>
    %206 = vector.shape_cast %205 : vector<1x80x128xf32> to vector<80x128xf32>
    %207 = vector.extract_strided_slice %206 {offsets = [7, 0], sizes = [64, 128], strides = [1, 1]} : vector<80x128xf32> to vector<64x128xf32>
    %c3_157 = arith.constant 3 : index
    %c0_158 = arith.constant 0 : index
    %c0_159 = arith.constant 0 : index
    %208 = vector.load %arg2[%c3_157, %c0_158, %c0_159] : memref<9x128x128xf32, #tpu.memory_space<vmem>>, vector<1x128x128xf32>
    %209 = vector.shape_cast %208 : vector<1x128x128xf32> to vector<128x128xf32>
    %cst_160 = arith.constant dense<0.000000e+00> : vector<64x128xf32>
    %210 = tpu.matmul %207, %209, %cst_160 {dimension_numbers = #tpu.dot_dimension_numbers<[1], [0], [0], [1], [0, 0, 1, 1], [], []>} : vector<64x128xf32>, vector<128x128xf32>, vector<64x128xf32> -> vector<64x128xf32>
    %211 = arith.addf %204, %210 : vector<64x128xf32>
    %212 = vector.extract_strided_slice %206 {offsets = [8, 0], sizes = [64, 128], strides = [1, 1]} : vector<80x128xf32> to vector<64x128xf32>
    %c4_161 = arith.constant 4 : index
    %c0_162 = arith.constant 0 : index
    %c0_163 = arith.constant 0 : index
    %213 = vector.load %arg2[%c4_161, %c0_162, %c0_163] : memref<9x128x128xf32, #tpu.memory_space<vmem>>, vector<1x128x128xf32>
    %214 = vector.shape_cast %213 : vector<1x128x128xf32> to vector<128x128xf32>
    %cst_164 = arith.constant dense<0.000000e+00> : vector<64x128xf32>
    %215 = tpu.matmul %212, %214, %cst_164 {dimension_numbers = #tpu.dot_dimension_numbers<[1], [0], [0], [1], [0, 0, 1, 1], [], []>} : vector<64x128xf32>, vector<128x128xf32>, vector<64x128xf32> -> vector<64x128xf32>
    %216 = arith.addf %211, %215 : vector<64x128xf32>
    %217 = vector.extract_strided_slice %206 {offsets = [9, 0], sizes = [64, 128], strides = [1, 1]} : vector<80x128xf32> to vector<64x128xf32>
    %c5_165 = arith.constant 5 : index
    %c0_166 = arith.constant 0 : index
    %c0_167 = arith.constant 0 : index
    %218 = vector.load %arg2[%c5_165, %c0_166, %c0_167] : memref<9x128x128xf32, #tpu.memory_space<vmem>>, vector<1x128x128xf32>
    %219 = vector.shape_cast %218 : vector<1x128x128xf32> to vector<128x128xf32>
    %cst_168 = arith.constant dense<0.000000e+00> : vector<64x128xf32>
    %220 = tpu.matmul %217, %219, %cst_168 {dimension_numbers = #tpu.dot_dimension_numbers<[1], [0], [0], [1], [0, 0, 1, 1], [], []>} : vector<64x128xf32>, vector<128x128xf32>, vector<64x128xf32> -> vector<64x128xf32>
    %221 = arith.addf %216, %220 : vector<64x128xf32>
    %c0_169 = arith.constant 0 : index
    %c240 = arith.constant 240 : index
    %c0_170 = arith.constant 0 : index
    %222 = vector.load %arg1[%c0_169, %c240, %c0_170] : memref<1x456x128xf32, #tpu.memory_space<vmem>>, vector<1x80x128xf32>
    %223 = vector.shape_cast %222 : vector<1x80x128xf32> to vector<80x128xf32>
    %224 = vector.extract_strided_slice %223 {offsets = [7, 0], sizes = [64, 128], strides = [1, 1]} : vector<80x128xf32> to vector<64x128xf32>
    %c6_171 = arith.constant 6 : index
    %c0_172 = arith.constant 0 : index
    %c0_173 = arith.constant 0 : index
    %225 = vector.load %arg2[%c6_171, %c0_172, %c0_173] : memref<9x128x128xf32, #tpu.memory_space<vmem>>, vector<1x128x128xf32>
    %226 = vector.shape_cast %225 : vector<1x128x128xf32> to vector<128x128xf32>
    %cst_174 = arith.constant dense<0.000000e+00> : vector<64x128xf32>
    %227 = tpu.matmul %224, %226, %cst_174 {dimension_numbers = #tpu.dot_dimension_numbers<[1], [0], [0], [1], [0, 0, 1, 1], [], []>} : vector<64x128xf32>, vector<128x128xf32>, vector<64x128xf32> -> vector<64x128xf32>
    %228 = arith.addf %221, %227 : vector<64x128xf32>
    %229 = vector.extract_strided_slice %223 {offsets = [8, 0], sizes = [64, 128], strides = [1, 1]} : vector<80x128xf32> to vector<64x128xf32>
    %c7_175 = arith.constant 7 : index
    %c0_176 = arith.constant 0 : index
    %c0_177 = arith.constant 0 : index
    %230 = vector.load %arg2[%c7_175, %c0_176, %c0_177] : memref<9x128x128xf32, #tpu.memory_space<vmem>>, vector<1x128x128xf32>
    %231 = vector.shape_cast %230 : vector<1x128x128xf32> to vector<128x128xf32>
    %cst_178 = arith.constant dense<0.000000e+00> : vector<64x128xf32>
    %232 = tpu.matmul %229, %231, %cst_178 {dimension_numbers = #tpu.dot_dimension_numbers<[1], [0], [0], [1], [0, 0, 1, 1], [], []>} : vector<64x128xf32>, vector<128x128xf32>, vector<64x128xf32> -> vector<64x128xf32>
    %233 = arith.addf %228, %232 : vector<64x128xf32>
    %234 = vector.extract_strided_slice %223 {offsets = [9, 0], sizes = [64, 128], strides = [1, 1]} : vector<80x128xf32> to vector<64x128xf32>
    %c8_179 = arith.constant 8 : index
    %c0_180 = arith.constant 0 : index
    %c0_181 = arith.constant 0 : index
    %235 = vector.load %arg2[%c8_179, %c0_180, %c0_181] : memref<9x128x128xf32, #tpu.memory_space<vmem>>, vector<1x128x128xf32>
    %236 = vector.shape_cast %235 : vector<1x128x128xf32> to vector<128x128xf32>
    %cst_182 = arith.constant dense<0.000000e+00> : vector<64x128xf32>
    %237 = tpu.matmul %234, %236, %cst_182 {dimension_numbers = #tpu.dot_dimension_numbers<[1], [0], [0], [1], [0, 0, 1, 1], [], []>} : vector<64x128xf32>, vector<128x128xf32>, vector<64x128xf32> -> vector<64x128xf32>
    %238 = arith.addf %233, %237 : vector<64x128xf32>
    %239 = vector.broadcast %0 : vector<1x128xf32> to vector<64x128xf32>
    %240 = arith.addf %238, %239 : vector<64x128xf32>
    %cst_183 = arith.constant 0.000000e+00 : f32
    %241 = vector.broadcast %cst_183 : f32 to vector<64x128xf32>
    %242 = arith.maximumf %240, %241 : vector<64x128xf32>
    %c192_184 = arith.constant 192 : index
    %c0_185 = arith.constant 0 : index
    %243 = vector.load %arg4[%c192_184, %c0_185] : memref<384x1xf32, #tpu.memory_space<vmem>>, vector<64x1xf32>
    %244 = vector.broadcast %243 : vector<64x1xf32> to vector<64x128xf32>
    %245 = arith.mulf %242, %244 : vector<64x128xf32>
    %c0_186 = arith.constant 0 : index
    %c224 = arith.constant 224 : index
    %c0_187 = arith.constant 0 : index
    %246 = vector.load %arg5[%c0_186, %c224, %c0_187] : memref<1x456x128xf32, #tpu.memory_space<vmem>>, vector<1x64x128xf32>
    %247 = vector.shape_cast %246 : vector<1x64x128xf32> to vector<64x128xf32>
    %248 = vector.shape_cast %245 : vector<64x128xf32> to vector<1x64x128xf32>
    tpu.vector_store %arg5[%c0_186, %c224, %c0_187], %248 {strides = array<i32>} : memref<1x456x128xf32, #tpu.memory_space<vmem>>, vector<1x64x128xf32>,
    %c0_188 = arith.constant 0 : index
    %c256 = arith.constant 256 : index
    %c0_189 = arith.constant 0 : index
    %249 = vector.load %arg1[%c0_188, %c256, %c0_189] : memref<1x456x128xf32, #tpu.memory_space<vmem>>, vector<1x80x128xf32>
    %250 = vector.shape_cast %249 : vector<1x80x128xf32> to vector<80x128xf32>
    %251 = vector.extract_strided_slice %250 {offsets = [7, 0], sizes = [64, 128], strides = [1, 1]} : vector<80x128xf32> to vector<64x128xf32>
    %c0_190 = arith.constant 0 : index
    %c0_191 = arith.constant 0 : index
    %c0_192 = arith.constant 0 : index
    %252 = vector.load %arg2[%c0_190, %c0_191, %c0_192] : memref<9x128x128xf32, #tpu.memory_space<vmem>>, vector<1x128x128xf32>
    %253 = vector.shape_cast %252 : vector<1x128x128xf32> to vector<128x128xf32>
    %cst_193 = arith.constant dense<0.000000e+00> : vector<64x128xf32>
    %254 = tpu.matmul %251, %253, %cst_193 {dimension_numbers = #tpu.dot_dimension_numbers<[1], [0], [0], [1], [0, 0, 1, 1], [], []>} : vector<64x128xf32>, vector<128x128xf32>, vector<64x128xf32> -> vector<64x128xf32>
    %255 = vector.extract_strided_slice %250 {offsets = [8, 0], sizes = [64, 128], strides = [1, 1]} : vector<80x128xf32> to vector<64x128xf32>
    %c1_194 = arith.constant 1 : index
    %c0_195 = arith.constant 0 : index
    %c0_196 = arith.constant 0 : index
    %256 = vector.load %arg2[%c1_194, %c0_195, %c0_196] : memref<9x128x128xf32, #tpu.memory_space<vmem>>, vector<1x128x128xf32>
    %257 = vector.shape_cast %256 : vector<1x128x128xf32> to vector<128x128xf32>
    %cst_197 = arith.constant dense<0.000000e+00> : vector<64x128xf32>
    %258 = tpu.matmul %255, %257, %cst_197 {dimension_numbers = #tpu.dot_dimension_numbers<[1], [0], [0], [1], [0, 0, 1, 1], [], []>} : vector<64x128xf32>, vector<128x128xf32>, vector<64x128xf32> -> vector<64x128xf32>
    %259 = arith.addf %254, %258 : vector<64x128xf32>
    %260 = vector.extract_strided_slice %250 {offsets = [9, 0], sizes = [64, 128], strides = [1, 1]} : vector<80x128xf32> to vector<64x128xf32>
    %c2_198 = arith.constant 2 : index
    %c0_199 = arith.constant 0 : index
    %c0_200 = arith.constant 0 : index
    %261 = vector.load %arg2[%c2_198, %c0_199, %c0_200] : memref<9x128x128xf32, #tpu.memory_space<vmem>>, vector<1x128x128xf32>
    %262 = vector.shape_cast %261 : vector<1x128x128xf32> to vector<128x128xf32>
    %cst_201 = arith.constant dense<0.000000e+00> : vector<64x128xf32>
    %263 = tpu.matmul %260, %262, %cst_201 {dimension_numbers = #tpu.dot_dimension_numbers<[1], [0], [0], [1], [0, 0, 1, 1], [], []>} : vector<64x128xf32>, vector<128x128xf32>, vector<64x128xf32> -> vector<64x128xf32>
    %264 = arith.addf %259, %263 : vector<64x128xf32>
    %c0_202 = arith.constant 0 : index
    %c280 = arith.constant 280 : index
    %c0_203 = arith.constant 0 : index
    %265 = vector.load %arg1[%c0_202, %c280, %c0_203] : memref<1x456x128xf32, #tpu.memory_space<vmem>>, vector<1x80x128xf32>
    %266 = vector.shape_cast %265 : vector<1x80x128xf32> to vector<80x128xf32>
    %267 = vector.extract_strided_slice %266 {offsets = [7, 0], sizes = [64, 128], strides = [1, 1]} : vector<80x128xf32> to vector<64x128xf32>
    %c3_204 = arith.constant 3 : index
    %c0_205 = arith.constant 0 : index
    %c0_206 = arith.constant 0 : index
    %268 = vector.load %arg2[%c3_204, %c0_205, %c0_206] : memref<9x128x128xf32, #tpu.memory_space<vmem>>, vector<1x128x128xf32>
    %269 = vector.shape_cast %268 : vector<1x128x128xf32> to vector<128x128xf32>
    %cst_207 = arith.constant dense<0.000000e+00> : vector<64x128xf32>
    %270 = tpu.matmul %267, %269, %cst_207 {dimension_numbers = #tpu.dot_dimension_numbers<[1], [0], [0], [1], [0, 0, 1, 1], [], []>} : vector<64x128xf32>, vector<128x128xf32>, vector<64x128xf32> -> vector<64x128xf32>
    %271 = arith.addf %264, %270 : vector<64x128xf32>
    %272 = vector.extract_strided_slice %266 {offsets = [8, 0], sizes = [64, 128], strides = [1, 1]} : vector<80x128xf32> to vector<64x128xf32>
    %c4_208 = arith.constant 4 : index
    %c0_209 = arith.constant 0 : index
    %c0_210 = arith.constant 0 : index
    %273 = vector.load %arg2[%c4_208, %c0_209, %c0_210] : memref<9x128x128xf32, #tpu.memory_space<vmem>>, vector<1x128x128xf32>
    %274 = vector.shape_cast %273 : vector<1x128x128xf32> to vector<128x128xf32>
    %cst_211 = arith.constant dense<0.000000e+00> : vector<64x128xf32>
    %275 = tpu.matmul %272, %274, %cst_211 {dimension_numbers = #tpu.dot_dimension_numbers<[1], [0], [0], [1], [0, 0, 1, 1], [], []>} : vector<64x128xf32>, vector<128x128xf32>, vector<64x128xf32> -> vector<64x128xf32>
    %276 = arith.addf %271, %275 : vector<64x128xf32>
    %277 = vector.extract_strided_slice %266 {offsets = [9, 0], sizes = [64, 128], strides = [1, 1]} : vector<80x128xf32> to vector<64x128xf32>
    %c5_212 = arith.constant 5 : index
    %c0_213 = arith.constant 0 : index
    %c0_214 = arith.constant 0 : index
    %278 = vector.load %arg2[%c5_212, %c0_213, %c0_214] : memref<9x128x128xf32, #tpu.memory_space<vmem>>, vector<1x128x128xf32>
    %279 = vector.shape_cast %278 : vector<1x128x128xf32> to vector<128x128xf32>
    %cst_215 = arith.constant dense<0.000000e+00> : vector<64x128xf32>
    %280 = tpu.matmul %277, %279, %cst_215 {dimension_numbers = #tpu.dot_dimension_numbers<[1], [0], [0], [1], [0, 0, 1, 1], [], []>} : vector<64x128xf32>, vector<128x128xf32>, vector<64x128xf32> -> vector<64x128xf32>
    %281 = arith.addf %276, %280 : vector<64x128xf32>
    %c0_216 = arith.constant 0 : index
    %c304 = arith.constant 304 : index
    %c0_217 = arith.constant 0 : index
    %282 = vector.load %arg1[%c0_216, %c304, %c0_217] : memref<1x456x128xf32, #tpu.memory_space<vmem>>, vector<1x80x128xf32>
    %283 = vector.shape_cast %282 : vector<1x80x128xf32> to vector<80x128xf32>
    %284 = vector.extract_strided_slice %283 {offsets = [7, 0], sizes = [64, 128], strides = [1, 1]} : vector<80x128xf32> to vector<64x128xf32>
    %c6_218 = arith.constant 6 : index
    %c0_219 = arith.constant 0 : index
    %c0_220 = arith.constant 0 : index
    %285 = vector.load %arg2[%c6_218, %c0_219, %c0_220] : memref<9x128x128xf32, #tpu.memory_space<vmem>>, vector<1x128x128xf32>
    %286 = vector.shape_cast %285 : vector<1x128x128xf32> to vector<128x128xf32>
    %cst_221 = arith.constant dense<0.000000e+00> : vector<64x128xf32>
    %287 = tpu.matmul %284, %286, %cst_221 {dimension_numbers = #tpu.dot_dimension_numbers<[1], [0], [0], [1], [0, 0, 1, 1], [], []>} : vector<64x128xf32>, vector<128x128xf32>, vector<64x128xf32> -> vector<64x128xf32>
    %288 = arith.addf %281, %287 : vector<64x128xf32>
    %289 = vector.extract_strided_slice %283 {offsets = [8, 0], sizes = [64, 128], strides = [1, 1]} : vector<80x128xf32> to vector<64x128xf32>
    %c7_222 = arith.constant 7 : index
    %c0_223 = arith.constant 0 : index
    %c0_224 = arith.constant 0 : index
    %290 = vector.load %arg2[%c7_222, %c0_223, %c0_224] : memref<9x128x128xf32, #tpu.memory_space<vmem>>, vector<1x128x128xf32>
    %291 = vector.shape_cast %290 : vector<1x128x128xf32> to vector<128x128xf32>
    %cst_225 = arith.constant dense<0.000000e+00> : vector<64x128xf32>
    %292 = tpu.matmul %289, %291, %cst_225 {dimension_numbers = #tpu.dot_dimension_numbers<[1], [0], [0], [1], [0, 0, 1, 1], [], []>} : vector<64x128xf32>, vector<128x128xf32>, vector<64x128xf32> -> vector<64x128xf32>
    %293 = arith.addf %288, %292 : vector<64x128xf32>
    %294 = vector.extract_strided_slice %283 {offsets = [9, 0], sizes = [64, 128], strides = [1, 1]} : vector<80x128xf32> to vector<64x128xf32>
    %c8_226 = arith.constant 8 : index
    %c0_227 = arith.constant 0 : index
    %c0_228 = arith.constant 0 : index
    %295 = vector.load %arg2[%c8_226, %c0_227, %c0_228] : memref<9x128x128xf32, #tpu.memory_space<vmem>>, vector<1x128x128xf32>
    %296 = vector.shape_cast %295 : vector<1x128x128xf32> to vector<128x128xf32>
    %cst_229 = arith.constant dense<0.000000e+00> : vector<64x128xf32>
    %297 = tpu.matmul %294, %296, %cst_229 {dimension_numbers = #tpu.dot_dimension_numbers<[1], [0], [0], [1], [0, 0, 1, 1], [], []>} : vector<64x128xf32>, vector<128x128xf32>, vector<64x128xf32> -> vector<64x128xf32>
    %298 = arith.addf %293, %297 : vector<64x128xf32>
    %299 = vector.broadcast %0 : vector<1x128xf32> to vector<64x128xf32>
    %300 = arith.addf %298, %299 : vector<64x128xf32>
    %cst_230 = arith.constant 0.000000e+00 : f32
    %301 = vector.broadcast %cst_230 : f32 to vector<64x128xf32>
    %302 = arith.maximumf %300, %301 : vector<64x128xf32>
    %c256_231 = arith.constant 256 : index
    %c0_232 = arith.constant 0 : index
    %303 = vector.load %arg4[%c256_231, %c0_232] : memref<384x1xf32, #tpu.memory_space<vmem>>, vector<64x1xf32>
    %304 = vector.broadcast %303 : vector<64x1xf32> to vector<64x128xf32>
    %305 = arith.mulf %302, %304 : vector<64x128xf32>
    %c0_233 = arith.constant 0 : index
    %c288 = arith.constant 288 : index
    %c0_234 = arith.constant 0 : index
    %306 = vector.load %arg5[%c0_233, %c288, %c0_234] : memref<1x456x128xf32, #tpu.memory_space<vmem>>, vector<1x64x128xf32>
    %307 = vector.shape_cast %306 : vector<1x64x128xf32> to vector<64x128xf32>
    %308 = vector.shape_cast %305 : vector<64x128xf32> to vector<1x64x128xf32>
    tpu.vector_store %arg5[%c0_233, %c288, %c0_234], %308 {strides = array<i32>} : memref<1x456x128xf32, #tpu.memory_space<vmem>>, vector<1x64x128xf32>,
    %c0_235 = arith.constant 0 : index
    %c320 = arith.constant 320 : index
    %c0_236 = arith.constant 0 : index
    %309 = vector.load %arg1[%c0_235, %c320, %c0_236] : memref<1x456x128xf32, #tpu.memory_space<vmem>>, vector<1x80x128xf32>
    %310 = vector.shape_cast %309 : vector<1x80x128xf32> to vector<80x128xf32>
    %311 = vector.extract_strided_slice %310 {offsets = [7, 0], sizes = [64, 128], strides = [1, 1]} : vector<80x128xf32> to vector<64x128xf32>
    %c0_237 = arith.constant 0 : index
    %c0_238 = arith.constant 0 : index
    %c0_239 = arith.constant 0 : index
    %312 = vector.load %arg2[%c0_237, %c0_238, %c0_239] : memref<9x128x128xf32, #tpu.memory_space<vmem>>, vector<1x128x128xf32>
    %313 = vector.shape_cast %312 : vector<1x128x128xf32> to vector<128x128xf32>
    %cst_240 = arith.constant dense<0.000000e+00> : vector<64x128xf32>
    %314 = tpu.matmul %311, %313, %cst_240 {dimension_numbers = #tpu.dot_dimension_numbers<[1], [0], [0], [1], [0, 0, 1, 1], [], []>} : vector<64x128xf32>, vector<128x128xf32>, vector<64x128xf32> -> vector<64x128xf32>
    %315 = vector.extract_strided_slice %310 {offsets = [8, 0], sizes = [64, 128], strides = [1, 1]} : vector<80x128xf32> to vector<64x128xf32>
    %c1_241 = arith.constant 1 : index
    %c0_242 = arith.constant 0 : index
    %c0_243 = arith.constant 0 : index
    %316 = vector.load %arg2[%c1_241, %c0_242, %c0_243] : memref<9x128x128xf32, #tpu.memory_space<vmem>>, vector<1x128x128xf32>
    %317 = vector.shape_cast %316 : vector<1x128x128xf32> to vector<128x128xf32>
    %cst_244 = arith.constant dense<0.000000e+00> : vector<64x128xf32>
    %318 = tpu.matmul %315, %317, %cst_244 {dimension_numbers = #tpu.dot_dimension_numbers<[1], [0], [0], [1], [0, 0, 1, 1], [], []>} : vector<64x128xf32>, vector<128x128xf32>, vector<64x128xf32> -> vector<64x128xf32>
    %319 = arith.addf %314, %318 : vector<64x128xf32>
    %320 = vector.extract_strided_slice %310 {offsets = [9, 0], sizes = [64, 128], strides = [1, 1]} : vector<80x128xf32> to vector<64x128xf32>
    %c2_245 = arith.constant 2 : index
    %c0_246 = arith.constant 0 : index
    %c0_247 = arith.constant 0 : index
    %321 = vector.load %arg2[%c2_245, %c0_246, %c0_247] : memref<9x128x128xf32, #tpu.memory_space<vmem>>, vector<1x128x128xf32>
    %322 = vector.shape_cast %321 : vector<1x128x128xf32> to vector<128x128xf32>
    %cst_248 = arith.constant dense<0.000000e+00> : vector<64x128xf32>
    %323 = tpu.matmul %320, %322, %cst_248 {dimension_numbers = #tpu.dot_dimension_numbers<[1], [0], [0], [1], [0, 0, 1, 1], [], []>} : vector<64x128xf32>, vector<128x128xf32>, vector<64x128xf32> -> vector<64x128xf32>
    %324 = arith.addf %319, %323 : vector<64x128xf32>
    %c0_249 = arith.constant 0 : index
    %c344 = arith.constant 344 : index
    %c0_250 = arith.constant 0 : index
    %325 = vector.load %arg1[%c0_249, %c344, %c0_250] : memref<1x456x128xf32, #tpu.memory_space<vmem>>, vector<1x80x128xf32>
    %326 = vector.shape_cast %325 : vector<1x80x128xf32> to vector<80x128xf32>
    %327 = vector.extract_strided_slice %326 {offsets = [7, 0], sizes = [64, 128], strides = [1, 1]} : vector<80x128xf32> to vector<64x128xf32>
    %c3_251 = arith.constant 3 : index
    %c0_252 = arith.constant 0 : index
    %c0_253 = arith.constant 0 : index
    %328 = vector.load %arg2[%c3_251, %c0_252, %c0_253] : memref<9x128x128xf32, #tpu.memory_space<vmem>>, vector<1x128x128xf32>
    %329 = vector.shape_cast %328 : vector<1x128x128xf32> to vector<128x128xf32>
    %cst_254 = arith.constant dense<0.000000e+00> : vector<64x128xf32>
    %330 = tpu.matmul %327, %329, %cst_254 {dimension_numbers = #tpu.dot_dimension_numbers<[1], [0], [0], [1], [0, 0, 1, 1], [], []>} : vector<64x128xf32>, vector<128x128xf32>, vector<64x128xf32> -> vector<64x128xf32>
    %331 = arith.addf %324, %330 : vector<64x128xf32>
    %332 = vector.extract_strided_slice %326 {offsets = [8, 0], sizes = [64, 128], strides = [1, 1]} : vector<80x128xf32> to vector<64x128xf32>
    %c4_255 = arith.constant 4 : index
    %c0_256 = arith.constant 0 : index
    %c0_257 = arith.constant 0 : index
    %333 = vector.load %arg2[%c4_255, %c0_256, %c0_257] : memref<9x128x128xf32, #tpu.memory_space<vmem>>, vector<1x128x128xf32>
    %334 = vector.shape_cast %333 : vector<1x128x128xf32> to vector<128x128xf32>
    %cst_258 = arith.constant dense<0.000000e+00> : vector<64x128xf32>
    %335 = tpu.matmul %332, %334, %cst_258 {dimension_numbers = #tpu.dot_dimension_numbers<[1], [0], [0], [1], [0, 0, 1, 1], [], []>} : vector<64x128xf32>, vector<128x128xf32>, vector<64x128xf32> -> vector<64x128xf32>
    %336 = arith.addf %331, %335 : vector<64x128xf32>
    %337 = vector.extract_strided_slice %326 {offsets = [9, 0], sizes = [64, 128], strides = [1, 1]} : vector<80x128xf32> to vector<64x128xf32>
    %c5_259 = arith.constant 5 : index
    %c0_260 = arith.constant 0 : index
    %c0_261 = arith.constant 0 : index
    %338 = vector.load %arg2[%c5_259, %c0_260, %c0_261] : memref<9x128x128xf32, #tpu.memory_space<vmem>>, vector<1x128x128xf32>
    %339 = vector.shape_cast %338 : vector<1x128x128xf32> to vector<128x128xf32>
    %cst_262 = arith.constant dense<0.000000e+00> : vector<64x128xf32>
    %340 = tpu.matmul %337, %339, %cst_262 {dimension_numbers = #tpu.dot_dimension_numbers<[1], [0], [0], [1], [0, 0, 1, 1], [], []>} : vector<64x128xf32>, vector<128x128xf32>, vector<64x128xf32> -> vector<64x128xf32>
    %341 = arith.addf %336, %340 : vector<64x128xf32>
    %c0_263 = arith.constant 0 : index
    %c368 = arith.constant 368 : index
    %c0_264 = arith.constant 0 : index
    %342 = vector.load %arg1[%c0_263, %c368, %c0_264] : memref<1x456x128xf32, #tpu.memory_space<vmem>>, vector<1x80x128xf32>
    %343 = vector.shape_cast %342 : vector<1x80x128xf32> to vector<80x128xf32>
    %344 = vector.extract_strided_slice %343 {offsets = [7, 0], sizes = [64, 128], strides = [1, 1]} : vector<80x128xf32> to vector<64x128xf32>
    %c6_265 = arith.constant 6 : index
    %c0_266 = arith.constant 0 : index
    %c0_267 = arith.constant 0 : index
    %345 = vector.load %arg2[%c6_265, %c0_266, %c0_267] : memref<9x128x128xf32, #tpu.memory_space<vmem>>, vector<1x128x128xf32>
    %346 = vector.shape_cast %345 : vector<1x128x128xf32> to vector<128x128xf32>
    %cst_268 = arith.constant dense<0.000000e+00> : vector<64x128xf32>
    %347 = tpu.matmul %344, %346, %cst_268 {dimension_numbers = #tpu.dot_dimension_numbers<[1], [0], [0], [1], [0, 0, 1, 1], [], []>} : vector<64x128xf32>, vector<128x128xf32>, vector<64x128xf32> -> vector<64x128xf32>
    %348 = arith.addf %341, %347 : vector<64x128xf32>
    %349 = vector.extract_strided_slice %343 {offsets = [8, 0], sizes = [64, 128], strides = [1, 1]} : vector<80x128xf32> to vector<64x128xf32>
    %c7_269 = arith.constant 7 : index
    %c0_270 = arith.constant 0 : index
    %c0_271 = arith.constant 0 : index
    %350 = vector.load %arg2[%c7_269, %c0_270, %c0_271] : memref<9x128x128xf32, #tpu.memory_space<vmem>>, vector<1x128x128xf32>
    %351 = vector.shape_cast %350 : vector<1x128x128xf32> to vector<128x128xf32>
    %cst_272 = arith.constant dense<0.000000e+00> : vector<64x128xf32>
    %352 = tpu.matmul %349, %351, %cst_272 {dimension_numbers = #tpu.dot_dimension_numbers<[1], [0], [0], [1], [0, 0, 1, 1], [], []>} : vector<64x128xf32>, vector<128x128xf32>, vector<64x128xf32> -> vector<64x128xf32>
    %353 = arith.addf %348, %352 : vector<64x128xf32>
    %354 = vector.extract_strided_slice %343 {offsets = [9, 0], sizes = [64, 128], strides = [1, 1]} : vector<80x128xf32> to vector<64x128xf32>
    %c8_273 = arith.constant 8 : index
    %c0_274 = arith.constant 0 : index
    %c0_275 = arith.constant 0 : index
    %355 = vector.load %arg2[%c8_273, %c0_274, %c0_275] : memref<9x128x128xf32, #tpu.memory_space<vmem>>, vector<1x128x128xf32>
    %356 = vector.shape_cast %355 : vector<1x128x128xf32> to vector<128x128xf32>
    %cst_276 = arith.constant dense<0.000000e+00> : vector<64x128xf32>
    %357 = tpu.matmul %354, %356, %cst_276 {dimension_numbers = #tpu.dot_dimension_numbers<[1], [0], [0], [1], [0, 0, 1, 1], [], []>} : vector<64x128xf32>, vector<128x128xf32>, vector<64x128xf32> -> vector<64x128xf32>
    %358 = arith.addf %353, %357 : vector<64x128xf32>
    %359 = vector.broadcast %0 : vector<1x128xf32> to vector<64x128xf32>
    %360 = arith.addf %358, %359 : vector<64x128xf32>
    %cst_277 = arith.constant 0.000000e+00 : f32
    %361 = vector.broadcast %cst_277 : f32 to vector<64x128xf32>
    %362 = arith.maximumf %360, %361 : vector<64x128xf32>
    %c320_278 = arith.constant 320 : index
    %c0_279 = arith.constant 0 : index
    %363 = vector.load %arg4[%c320_278, %c0_279] : memref<384x1xf32, #tpu.memory_space<vmem>>, vector<64x1xf32>
    %364 = vector.broadcast %363 : vector<64x1xf32> to vector<64x128xf32>
    %365 = arith.mulf %362, %364 : vector<64x128xf32>
    %c0_280 = arith.constant 0 : index
    %c352 = arith.constant 352 : index
    %c0_281 = arith.constant 0 : index
    %366 = vector.load %arg5[%c0_280, %c352, %c0_281] : memref<1x456x128xf32, #tpu.memory_space<vmem>>, vector<1x64x128xf32>
    %367 = vector.shape_cast %366 : vector<1x64x128xf32> to vector<64x128xf32>
    %368 = vector.shape_cast %365 : vector<64x128xf32> to vector<1x64x128xf32>
    tpu.vector_store %arg5[%c0_280, %c352, %c0_281], %368 {strides = array<i32>} : memref<1x456x128xf32, #tpu.memory_space<vmem>>, vector<1x64x128xf32>,
    return
  }
  func.func @transform_0(%arg0: i32) -> (i32, i32, i32) {
    %c0_i32 = arith.constant 0 : i32
    %c0_i32_0 = arith.constant 0 : i32
    %c0_i32_1 = arith.constant 0 : i32
    return %arg0, %c0_i32, %c0_i32_0 : i32, i32, i32
  }
  func.func @transform_1(%arg0: i32) -> (i32, i32, i32) {
    %c0_i32 = arith.constant 0 : i32
    %c0_i32_0 = arith.constant 0 : i32
    %c0_i32_1 = arith.constant 0 : i32
    %c0_i32_2 = arith.constant 0 : i32
    return %c0_i32, %c0_i32_0, %c0_i32_1 : i32, i32, i32
  }
  func.func @transform_2(%arg0: i32) -> (i32, i32) {
    %c0_i32 = arith.constant 0 : i32
    %c0_i32_0 = arith.constant 0 : i32
    %c0_i32_1 = arith.constant 0 : i32
    return %c0_i32, %c0_i32_0 : i32, i32
  }
  func.func @transform_3(%arg0: i32) -> (i32, i32) {
    %c0_i32 = arith.constant 0 : i32
    %c0_i32_0 = arith.constant 0 : i32
    %c0_i32_1 = arith.constant 0 : i32
    return %c0_i32, %c0_i32_0 : i32, i32
  }
  func.func @transform_4(%arg0: i32) -> (i32, i32, i32) {
    %c0_i32 = arith.constant 0 : i32
    %c0_i32_0 = arith.constant 0 : i32
    %c0_i32_1 = arith.constant 0 : i32
    return %arg0, %c0_i32, %c0_i32_0 : i32, i32, i32
  }
}

module attributes {stable_mosaic.version = 11 : i64} {
  func.func @_feat_gram_kernel(%arg0: i32, %arg1: memref<1x456x128xf32, #tpu.memory_space<vmem>>, %arg2: memref<1x456x128xf32, #tpu.memory_space<vmem>>, %arg3: memref<8x128xf32, #tpu.memory_space<vmem>>, %arg4: memref<8x128xf32, #tpu.memory_space<vmem>>) attributes {dimension_semantics = [#tpu.dimension_semantics<arbitrary>], iteration_bounds = array<i64: 2>, scalar_prefetch = 0 : i64, scratch_operands = 0 : i64, tpu.core_type = #tpu.core_type<tc>, window_params = [{transform_indices = @transform_0, window_bounds = array<i64: 1, 456, 128>}, {transform_indices = @transform_1, window_bounds = array<i64: 1, 456, 128>}, {pipeline_mode = #tpu.pipeline_mode<synchronous>, transform_indices = @transform_2, window_bounds = array<i64: 8, 128>}, {pipeline_mode = #tpu.pipeline_mode<synchronous>, transform_indices = @transform_3, window_bounds = array<i64: 8, 128>}]} {
    %c0_i32 = arith.constant 0 : i32
    %0 = arith.cmpi eq, %arg0, %c0_i32 : i32
    %1 = arith.extui %0 : i1 to i32
    %c0_i32_0 = arith.constant 0 : i32
    %2 = arith.cmpi ne, %1, %c0_i32_0 : i32
    scf.if %2 {
      %cst_20 = arith.constant 0.000000e+00 : f32
      %33 = vector.broadcast %cst_20 : f32 to vector<8x128xf32>
      %c0_21 = arith.constant 0 : index
      %c0_22 = arith.constant 0 : index
      %34 = vector.load %arg3[%c0_21, %c0_22] : memref<8x128xf32, #tpu.memory_space<vmem>>, vector<8x128xf32>
      tpu.vector_store %arg3[%c0_21, %c0_22], %33 {strides = array<i32>} : memref<8x128xf32, #tpu.memory_space<vmem>>, vector<8x128xf32>,
      %cst_23 = arith.constant 0.000000e+00 : f32
      %35 = vector.broadcast %cst_23 : f32 to vector<8x128xf32>
      %c0_24 = arith.constant 0 : index
      %c0_25 = arith.constant 0 : index
      %36 = vector.load %arg4[%c0_24, %c0_25] : memref<8x128xf32, #tpu.memory_space<vmem>>, vector<8x128xf32>
      tpu.vector_store %arg4[%c0_24, %c0_25], %35 {strides = array<i32>} : memref<8x128xf32, #tpu.memory_space<vmem>>, vector<8x128xf32>,
    } else {
    }
    %c0 = arith.constant 0 : index
    %c0_1 = arith.constant 0 : index
    %c0_2 = arith.constant 0 : index
    %3 = vector.load %arg1[%c0, %c0_1, %c0_2] : memref<1x456x128xf32, #tpu.memory_space<vmem>>, vector<1x456x128xf32>
    %4 = vector.shape_cast %3 : vector<1x456x128xf32> to vector<456x128xf32>
    %c0_3 = arith.constant 0 : index
    %c0_4 = arith.constant 0 : index
    %c0_5 = arith.constant 0 : index
    %5 = vector.load %arg2[%c0_3, %c0_4, %c0_5] : memref<1x456x128xf32, #tpu.memory_space<vmem>>, vector<1x456x128xf32>
    %6 = vector.shape_cast %5 : vector<1x456x128xf32> to vector<456x128xf32>
    %7 = arith.subf %4, %6 : vector<456x128xf32>
    %8 = math.absf %7 : vector<456x128xf32>
    %cst = arith.constant dense<0.000000e+00> : vector<456xf32>
    %9 = vector.multi_reduction <add>, %8, %cst [1] : vector<456x128xf32> to vector<456xf32>
    %10 = vector.shape_cast %9 : vector<456xf32> to vector<456x1xf32>
    %cst_6 = arith.constant dense<0.000000e+00> : vector<1xf32>
    %11 = vector.multi_reduction <add>, %10, %cst_6 [0] : vector<456x1xf32> to vector<1xf32>
    %12 = vector.shape_cast %11 : vector<1xf32> to vector<1x1xf32>
    %c0_7 = arith.constant 0 : index
    %c0_8 = arith.constant 0 : index
    %13 = vector.load %arg3[%c0_7, %c0_8] : memref<8x128xf32, #tpu.memory_space<vmem>>, vector<8x128xf32>
    %14 = vector.shape_cast %12 : vector<1x1xf32> to vector<1x1xf32>
    %15 = vector.broadcast %14 : vector<1x1xf32> to vector<8x128xf32>
    %16 = arith.addf %13, %15 : vector<8x128xf32>
    %c0_9 = arith.constant 0 : index
    %c0_10 = arith.constant 0 : index
    %17 = vector.load %arg3[%c0_9, %c0_10] : memref<8x128xf32, #tpu.memory_space<vmem>>, vector<8x128xf32>
    tpu.vector_store %arg3[%c0_9, %c0_10], %16 {strides = array<i32>} : memref<8x128xf32, #tpu.memory_space<vmem>>, vector<8x128xf32>,
    %cst_11 = arith.constant dense<0.000000e+00> : vector<128x128xf32>
    %18 = tpu.matmul %4, %4, %cst_11 {dimension_numbers = #tpu.dot_dimension_numbers<[0], [0], [1], [1], [0, 1, 1, 1], [], []>} : vector<456x128xf32>, vector<456x128xf32>, vector<128x128xf32> -> vector<128x128xf32>
    %cst_12 = arith.constant dense<0.000000e+00> : vector<128x128xf32>
    %19 = tpu.matmul %6, %6, %cst_12 {dimension_numbers = #tpu.dot_dimension_numbers<[0], [0], [1], [1], [0, 1, 1, 1], [], []>} : vector<456x128xf32>, vector<456x128xf32>, vector<128x128xf32> -> vector<128x128xf32>
    %20 = arith.subf %18, %19 : vector<128x128xf32>
    %21 = math.absf %20 : vector<128x128xf32>
    %cst_13 = arith.constant 2.44140625E-4 : f32
    %22 = vector.broadcast %cst_13 : f32 to vector<128x128xf32>
    %23 = arith.mulf %21, %22 : vector<128x128xf32>
    %cst_14 = arith.constant dense<0.000000e+00> : vector<128xf32>
    %24 = vector.multi_reduction <add>, %23, %cst_14 [1] : vector<128x128xf32> to vector<128xf32>
    %25 = vector.shape_cast %24 : vector<128xf32> to vector<128x1xf32>
    %cst_15 = arith.constant dense<0.000000e+00> : vector<1xf32>
    %26 = vector.multi_reduction <add>, %25, %cst_15 [0] : vector<128x1xf32> to vector<1xf32>
    %27 = vector.shape_cast %26 : vector<1xf32> to vector<1x1xf32>
    %c0_16 = arith.constant 0 : index
    %c0_17 = arith.constant 0 : index
    %28 = vector.load %arg4[%c0_16, %c0_17] : memref<8x128xf32, #tpu.memory_space<vmem>>, vector<8x128xf32>
    %29 = vector.shape_cast %27 : vector<1x1xf32> to vector<1x1xf32>
    %30 = vector.broadcast %29 : vector<1x1xf32> to vector<8x128xf32>
    %31 = arith.addf %28, %30 : vector<8x128xf32>
    %c0_18 = arith.constant 0 : index
    %c0_19 = arith.constant 0 : index
    %32 = vector.load %arg4[%c0_18, %c0_19] : memref<8x128xf32, #tpu.memory_space<vmem>>, vector<8x128xf32>
    tpu.vector_store %arg4[%c0_18, %c0_19], %31 {strides = array<i32>} : memref<8x128xf32, #tpu.memory_space<vmem>>, vector<8x128xf32>,
    return
  }
  func.func @transform_0(%arg0: i32) -> (i32, i32, i32) {
    %c0_i32 = arith.constant 0 : i32
    %c0_i32_0 = arith.constant 0 : i32
    %c0_i32_1 = arith.constant 0 : i32
    return %arg0, %c0_i32, %c0_i32_0 : i32, i32, i32
  }
  func.func @transform_1(%arg0: i32) -> (i32, i32, i32) {
    %c2_i32 = arith.constant 2 : i32
    %0 = arith.addi %arg0, %c2_i32 : i32
    %c0_i32 = arith.constant 0 : i32
    %c0_i32_0 = arith.constant 0 : i32
    %c0_i32_1 = arith.constant 0 : i32
    return %0, %c0_i32, %c0_i32_0 : i32, i32, i32
  }
  func.func @transform_2(%arg0: i32) -> (i32, i32) {
    %c0_i32 = arith.constant 0 : i32
    %c0_i32_0 = arith.constant 0 : i32
    %c0_i32_1 = arith.constant 0 : i32
    return %c0_i32, %c0_i32_0 : i32, i32
  }
  func.func @transform_3(%arg0: i32) -> (i32, i32) {
    %c0_i32 = arith.constant 0 : i32
    %c0_i32_0 = arith.constant 0 : i32
    %c0_i32_1 = arith.constant 0 : i32
    return %c0_i32, %c0_i32_0 : i32, i32
  }
}

</mosaic_0001>

<bundles_post_ra>
// kernel: _forward_impl.7
= control target key start
LH: loop header
LB: loop body
LE: loop exit
PB: predicated region body
PF: predicated region fallthrough
CT: control target
= control target key end

     0   :  { %vm19_vm0 = vcmask 1045504   ;;  %s67_s0 = inlined_call_operand.vmem [shape: f32[6,256], index: 0, kind: input, shape index: {}]   ;;  %s68_s1 = inlined_call_operand.vmem [shape: f32[6,256], index: 1, kind: input, shape index: {}]   ;;  %s69_s2 = inlined_call_operand.vmem [shape: f32[8,128], index: 2, kind: output, shape index: {}]  }
   0x1   :  { %v11_v0 = vld [vmem:[%s67_s0] sm:$0x3f]  ;;  %v12_v1 = vld [vmem:[%s67_s0 + $0x8] sm:$0x3f] }
   0x2   :  { %v13_v2 = vld [vmem:[%s68_s1] sm:$0x3f]  ;;  %v14_v3 = vld [vmem:[%s68_s1 + $0x8] sm:$0x3f] }
   0x3   :  { %v15_v4 = vsub.f32 %v11_v0, %v13_v2  ;;  %v16_v5 = vsub.f32 %v12_v1, %v14_v3 }
   0x5   :  { %v17_v6 = vand.u32 2147483647, %v15_v4  ;;  %v18_v7 = vand.u32 2147483647, %v16_v5 }
   0x7   :  { %v20_v8 = vsel %vm19_vm0, %v17_v6, 0.0  ;;  %v21_v9 = vsel %vm19_vm0, %v18_v7, 0.0 }
   0x8   :  { %v22_v10 = vadd.f32 %v21_v9, %v20_v8 }
   0xa   :  { %23 = vadd.xlane.f32.xlu0 %v22_v10 }
  0x97   :  { %v24_v11 = vpop.xlane.xlu0 %23 }
  0x98   :  { %v25_v12 = vsel %vm19_vm0, %v24_v11, 0.0 }
  0x99   :  { %v26_v13 = vrot.slane %v25_v12, 4 }
  0x9b   :  { %v27_v14 = vadd.f32 %v26_v13, %v25_v12 }
  0x9d   :  { %v28_v15 = vrot.slane %v27_v14, 2 }
  0x9f   :  { %v29_v16 = vadd.f32 %v28_v15, %v27_v14 }
  0xa1   :  { %v30_v17 = vrot.slane %v29_v16, 1 }
  0xa3   :  { %v31_v18 = vadd.f32 %v30_v17, %v29_v16 }
  0xa5   :  { %32 = vst [vmem:[%s69_s2] sm:$0xff] %v31_v18 }

// kernel: _forward_impl.9
= control target key start
LH: loop header
LB: loop body
LE: loop exit
PB: predicated region body
PF: predicated region fallthrough
CT: control target
= control target key end

     0   :  { %s2525_s12 = smov 0   ;;  %s3527_s0 = inlined_call_operand.vmem [shape: f32[4,456,128], index: 0, kind: input, shape index: {}, may-alias: {0,1}]   ;;  %s3528_s1 = inlined_call_operand.vmem [shape: f32[4,456,128], index: 1, kind: input, shape index: {}, may-alias: {0,1}]   ;;  %s3529_s2 = inlined_call_operand.vmem [shape: f32[8,128], index: 2, kind: output, shape index: {0}]   ;;  %s3530_s3 = inlined_call_operand.vmem [shape: f32[8,128], index: 3, kind: output, shape index: {1}]  }
   0x1 LB: > { %s1677_s13 = sadd.s32 4294967295, %s2500_s12   ;;  %p1680_p0 = scmp.ge.s32.totalorder %s2500_s12, 1  ;;  %s2500_s12 = sphi %s2525_s12, %s14_s12  }
   0x2   : > { %p144_p1 = scmp.lt.s32.totalorder %s2500_s12, 3 }
   0x4   : > { %p145_p2 = pnand %p1680_p0, %p144_p1 }
   0x5   : > { %p169_p3 = scmp.lt.s32.totalorder (!%p145_p2), %s1677_s13, 3  ;;  %s174_s14 = sadd.s32 (!%p145_p2), 2, %s1677_s13 }
   0x6   : > { %148 = sbr.rel (%p145_p2) target bundleno = 724 (0x2d4), region = 28  ;;  %p175_p4 = scmp.lt.s32.totalorder (!%p145_p2), %s174_s14, 3 }
   0x7   : > { %p1683_p5 = scmp.ne.s32.totalorder (!%p145_p2), %s1677_s13, 0 }
   0xd   : > { %s170_s15 = scalar_select %p169_p3, %s1677_s13, 3 }
   0xe   : > { %s3535_s14 = smov (!%p175_p4, %s174_s14), 3  ;;  %184 = sbr.rel (%p1683_p5) target bundleno = 21 (0x15), region = 32 }
   0xf   : > { %s2040_s16 = smul.u32 456, %s170_s15  ;;  %v2502_v0 = vmov (!%p1683_p5), 0.0  }
  0x10   : > { %s2041_s17 = smul.u32 456, %s3535_s14  ;;  %185 = vst [vmem:[%s3529_s2] sm:$0xff] (!%p1683_p5), %v2502_v0  ;;  %186 = vst [vmem:[%s3530_s3] sm:$0xff] (!%p1683_p5), %v2502_v0 }
  0x11   : > { %s2536_s20 = scalar_lea.vmem %s3527_s0, %s2040_s16 }
  0x12   : > { %s2541_s23 = scalar_lea.vmem %s3528_s1, %s2041_s17 }
  0x15 PF: > { %v2550_v1 = vld [vmem:[%s2536_s20 + $0x180] sm:$0xff]  ;;  %v188_v5 = vld [vmem:[%s2536_s20 + $0x8] sm:$0xff]  ;;  %v205_v11 = vld [vmem:[%s2536_s20 + $0x90] sm:$0xff]  ;;  %v2503_v48 = vmov 0.0|0.0   ;;  %vm722_vm0 = vcmask 588800  }
  0x16   : > { %v2553_v2 = vld [vmem:[%s2536_s20] sm:$0xff]  ;;  %690 = vxpose.xlu1.b32.start [1/9] (short) %v2550_v1, 128  ;;  %v204_v6 = vld [vmem:[%s2536_s20 + $0x88] sm:$0xff]  ;;  %v206_v12 = vld [vmem:[%s2536_s20 + $0x98] sm:$0xff]  ;;  %1910 = vmatprep.subr.bf16.mxu1 %v2503_v48 }
  0x17   : > { %v203_v3 = vld [vmem:[%s2536_s20 + $0x80] sm:$0xff]  ;;  %v2561_v7 = vld [vmem:[%s2536_s20 + $0x188] sm:$0xff]  ;;  %v1880_v9 = vpack.c.bf16 %v188_v5, %v2553_v2  ;;  %v2055_v10 = vpack.i.bf16 %v188_v5, %v204_v6  ;;  %v2567_v13 = vld [vmem:[%s2536_s20 + $0x10] sm:$0xff]  ;;  %v1882_v15 = vpack.c.bf16 %v206_v12, %v205_v11 }
  0x18   : > { %v2053_v4 = vpack.i.bf16 %v2553_v2, %v203_v3  ;;  %v1878_v8 = vpack.c.bf16 %v204_v6, %v203_v3  ;;  %v190_v14 = vld [vmem:[%s2536_s20 + $0x18] sm:$0xff]  ;;  %v207_v16 = vld [vmem:[%s2536_s20 + $0xa0] sm:$0xff]  ;;  %v2573_v17 = vld [vmem:[%s2536_s20 + $0xa8] sm:$0xff]  ;;  %v2057_v21 = vpack.i.bf16 %v2567_v13, %v205_v11 }
  0x19   : > { %v1884_v18 = vpack.c.bf16 %v190_v14, %v2567_v13  ;;  %v2577_v19 = vld [vmem:[%s2536_s20 + $0x190] sm:$0xff]  ;;  %v1886_v20 = vpack.c.bf16 %v2573_v17, %v207_v16  ;;  %v191_v22 = vld [vmem:[%s2536_s20 + $0x20] sm:$0xff]  ;;  %v192_v23 = vld [vmem:[%s2536_s20 + $0x28] sm:$0xff]  ;;  %v2059_v29 = vpack.i.bf16 %v190_v14, %v206_v12 }
  0x1a   : > { %2054 = vxpose.xlu0.b32.start [1/16] %v2053_v4, 128  ;;  %1879 = vmatprep.subr.bf16.mxu0 %v1878_v8  ;;  %v2585_v24 = vld [vmem:[%s2536_s20 + $0xb0] sm:$0xff]  ;;  %v2588_v25 = vld [vmem:[%s2536_s20 + $0xb8] sm:$0xff]  ;;  %v1888_v26 = vpack.c.bf16 %v192_v23, %v191_v22  ;;  %v2601_v32 = vld [vmem:[%s2536_s20 + $0xc0] sm:$0xff]  ;;  %v2061_v37 = vpack.i.bf16 %v191_v22, %v207_v16  ;;  %v2063_v49 = vpack.i.bf16 %v192_v23, %v2573_v17 }
  0x1b   : > { %691 = vxpose.xlu1.b32.cont [2/9] (short) %v2561_v7, 128  ;;  %1881 = vmatpush3.bf16.msra.mxu0 %v1880_v9  ;;  %v2591_v27 = vld [vmem:[%s2536_s20 + $0x198] sm:$0xff]  ;;  %v1890_v28 = vpack.c.bf16 %v2588_v25, %v2585_v24  ;;  %v193_v30 = vld [vmem:[%s2536_s20 + $0x30] sm:$0xff]  ;;  %v2604_v33 = vld [vmem:[%s2536_s20 + $0xc8] sm:$0xff] }
  0x1c   : > { %1883 = vmatprep.subr.bf16.mxu0 %v1882_v15  ;;  %v2597_v31 = vld [vmem:[%s2536_s20 + $0x38] sm:$0xff]  ;;  %v2608_v35 = vld [vmem:[%s2536_s20 + $0x1a0] sm:$0xff]  ;;  %v1894_v36 = vpack.c.bf16 %v2604_v33, %v2601_v32  ;;  %v2616_v39 = vld [vmem:[%s2536_s20 + $0x48] sm:$0xff]  ;;  %v2065_v60 = vpack.i.bf16 %v193_v30, %v2585_v24 }
  0x1d   : > { %v1892_v34 = vpack.c.bf16 %v2597_v31, %v193_v30  ;;  %v2613_v38 = vld [vmem:[%s2536_s20 + $0x40] sm:$0xff]  ;;  %v2622_v41 = vld [vmem:[%s2536_s20 + $0x108] sm:$0xff]  ;;  %v2626_v42 = vld [vmem:[%s2536_s20 + $0xd0] sm:$0xff] }
  0x1e   : > { %2056 = vxpose.xlu0.b32.cont [2/16] %v2055_v10, 128  ;;  %v2619_v40 = vld [vmem:[%s2536_s20 + $0x100] sm:$0xff]  ;;  %v2629_v43 = vld [vmem:[%s2536_s20 + $0xd8] sm:$0xff]  ;;  %v1896_v44 = vpack.c.bf16 %v2616_v39, %v2613_v38  ;;  %v2636_v46 = vld [vmem:[%s2536_s20 + $0x1a8] sm:$0xff]  ;;  %v2067_v10 = vpack.i.bf16 %v2597_v31, %v2588_v25 }
  0x1f   : > { %692 = vxpose.xlu1.b32.cont [3/9] (short) %v2577_v19, 128  ;;  %1885 = vmatpush3.bf16.msra.mxu0 %v1884_v18  ;;  %v1911_v45 = vpack.c.bf16 %v2622_v41, %v2619_v40  ;;  %v1898_v47 = vpack.c.bf16 %v2629_v43, %v2626_v42  ;;  %v2643_v50 = vld [vmem:[%s2536_s20 + $0x50] sm:$0xff]  ;;  %v2646_v51 = vld [vmem:[%s2536_s20 + $0x58] sm:$0xff]  ;;  %v2657_v54 = vld [vmem:[%s2536_s20 + $0xe0] sm:$0xff] }
  0x20   : > { %1887 = vmatprep.subr.bf16.mxu0 %v1886_v20  ;;  %v2649_v52 = vld [vmem:[%s2536_s20 + $0x110] sm:$0xff]  ;;  %v2652_v53 = vld [vmem:[%s2536_s20 + $0x118] sm:$0xff]  ;;  %v2660_v55 = vld [vmem:[%s2536_s20 + $0xe8] sm:$0xff]  ;;  %v1900_v56 = vpack.c.bf16 %v2646_v51, %v2643_v50  ;;  %v2069_v20 = vpack.i.bf16 %v2613_v38, %v2601_v32  ;;  %v2073_v31 = vpack.i.bf16 %v2643_v50, %v2626_v42 }
  0x21   : > { %1912 = vmatpush1.bf16.msra.mxu1 %v1911_v45  ;;  %v1914_v57 = vpack.c.bf16 %v2652_v53, %v2649_v52  ;;  %v2667_v58 = vld [vmem:[%s2536_s20 + $0x1b0] sm:$0xff]  ;;  %v1902_v59 = vpack.c.bf16 %v2660_v55, %v2657_v54  ;;  %v2673_v61 = vld [vmem:[%s2536_s20 + $0x60] sm:$0xff]  ;;  %v2676_v62 = vld [vmem:[%s2536_s20 + $0x68] sm:$0xff]  ;;  %v1935_v45 = vpack.c.bf16 %v2561_v7, %v2550_v1  ;;  %v1941_v1 = vpack.c.bf16 %v2636_v46, %v2608_v35 }
  0x22   : > { %2058 = vxpose.xlu0.b32.cont [3/16] %v2057_v21, 128  ;;  %1913 = vmatprep.subr.bf16.mxu1 %v2503_v48  ;;  %v2679_v63 = vld [vmem:[%s2536_s20 + $0x120] sm:$0xff]  ;;  %v2682_v0 = vld [vmem:[%s2536_s20 + $0x128] sm:$0xff]  ;;  %v2687_v3 = vld [vmem:[%s2536_s20 + $0xf0] sm:$0xff]  ;;  %v1904_v5 = vpack.c.bf16 %v2676_v62, %v2673_v61 }
  0x23   : > { %693 = vxpose.xlu1.b32.cont [4/9] (short) %v2591_v27, 128  ;;  %1889 = vmatpush3.bf16.msra.mxu0 %v1888_v26  ;;  %v2690_v4 = vld [vmem:[%s2536_s20 + $0xf8] sm:$0xff]  ;;  %v1917_v6 = vpack.c.bf16 %v2682_v0, %v2679_v63  ;;  %v201_v11 = vld [vmem:[%s2536_s20 + $0x70] sm:$0xff]  ;;  %v2719_v18 = vld [vmem:[%s2536_s20 + $0x1c0] sm:$0xff] }
  0x24   : > { %1891 = vmatprep.subr.bf16.mxu0 %v1890_v28  ;;  %v2697_v8 = vld [vmem:[%s2536_s20 + $0x1b8] sm:$0xff]  ;;  %v1906_v9 = vpack.c.bf16 %v2690_v4, %v2687_v3  ;;  %v2708_v14 = vld [vmem:[%s2536_s20 + $0x130] sm:$0xff]  ;;  %v2724_v21 = vld [vmem:[%s2536_s20 + $0x140] sm:$0xff]  ;;  %v2071_v28 = vpack.i.bf16 %v2616_v39, %v2604_v33 }
  0x25   : > { %1915 = vmatpush1.bf16.msra.mxu1 %v1914_v57  ;;  %v2705_v12 = vld [vmem:[%s2536_s20 + $0x78] sm:$0xff]  ;;  %v2727_v22 = vld [vmem:[%s2536_s20 + $0x148] sm:$0xff]  ;;  %v260_v23 = vld [vmem:[%s2541_s23 + $0x80] sm:$0xff] }
  0x26   : > { %2060 = vxpose.xlu0.b32.cont [4/16] %v2059_v29, 128  ;;  %1916 = vmatprep.subr.bf16.mxu1 %v2503_v48  ;;  %v2711_v15 = vld [vmem:[%s2536_s20 + $0x138] sm:$0xff]  ;;  %v1908_v16 = vpack.c.bf16 %v2705_v12, %v201_v11  ;;  %v261_v24 = vld [vmem:[%s2541_s23 + $0x88] sm:$0xff]  ;;  %v1923_v25 = vpack.c.bf16 %v2727_v22, %v2724_v21  ;;  %v2739_v29 = vld [vmem:[%s2536_s20 + $0x150] sm:$0xff]  ;;  %v2165_v7 = vpack.i.bf16 %v260_v23, %v2619_v40 }
  0x27   : > { %694 = vxpose.xlu1.b32.cont [5/9] (short) %v2608_v35, 128  ;;  %1893 = vmatpush3.bf16.msra.mxu0 %v1892_v34  ;;  %v1920_v17 = vpack.c.bf16 %v2711_v15, %v2708_v14  ;;  %v1946_v26 = vpack.c.bf16 %v261_v24, %v260_v23  ;;  %v2742_v30 = vld [vmem:[%s2536_s20 + $0x158] sm:$0xff]  ;;  %v2749_v34 = vld [vmem:[%s2536_s20 + $0x160] sm:$0xff]  ;;  %v2752_v33 = vld [vmem:[%s2536_s20 + $0x168] sm:$0xff]  ;;  %v2167_v35 = vpack.i.bf16 %v261_v24, %v2622_v41 }
  0x28   : > { %1895 = vmatprep.subr.bf16.mxu0 %v1894_v36  ;;  %v1926_v32 = vpack.c.bf16 %v2742_v30, %v2739_v29  ;;  %v1929_v36 = vpack.c.bf16 %v2752_v33, %v2749_v34  ;;  %v2760_v38 = vld [vmem:[%s2536_s20 + $0x170] sm:$0xff]  ;;  %v2763_v39 = vld [vmem:[%s2536_s20 + $0x178] sm:$0xff]  ;;  %v2789_v50 = vld [vmem:[%s2541_s23 + $0x100] sm:$0xff] }
  0x29   : > { %1918 = vmatpush1.bf16.msra.mxu1 %v1917_v6  ;;  %v1932_v42 = vpack.c.bf16 %v2763_v39, %v2760_v38  ;;  %v2840_v6 = vld [vmem:[%s2541_s23 + $0xa8] sm:$0xff]  ;;  %v2872_v23 = vld [vmem:[%s2541_s23 + $0x130] sm:$0xff] }
  0x2a   : > { %2062 = vxpose.xlu0.b32.cont [5/16] %v2061_v37, 128  ;;  %1919 = vmatprep.subr.bf16.mxu1 %v2503_v48  ;;  %v2075_v37 = vpack.i.bf16 %v2646_v51, %v2629_v43  ;;  %v2079_v43 = vpack.i.bf16 %v2676_v62, %v2660_v55  ;;  %v1944_v51 = vpack.c.bf16 %v2697_v8, %v2667_v58  ;;  %v2804_v55 = vld [vmem:[%s2541_s23 + $0x108] sm:$0xff]  ;;  %v2827_v62 = vld [vmem:[%s2541_s23 + $0xa0] sm:$0xff] }
  0x2b   : > { %695 = vxpose.xlu1.b32.cont [6/9] (short) %v2636_v46, 128  ;;  %1897 = vmatpush3.bf16.msra.mxu0 %v1896_v44  ;;  %v2077_v44 = vpack.i.bf16 %v2673_v61, %v2657_v54  ;;  %v2798_v46 = vld [vmem:[%s2541_s23 + $0x90] sm:$0xff]  ;;  %v2801_v54 = vld [vmem:[%s2541_s23 + $0x8] sm:$0xff] }
  0x2c   : > { %1899 = vmatprep.subr.bf16.mxu0 %v1898_v47  ;;  %v1938_v47 = vpack.c.bf16 %v2591_v27, %v2577_v19  ;;  %v2083_v19 = vpack.i.bf16 %v2705_v12, %v2690_v4  ;;  %v2786_v27 = vld [vmem:[%s2541_s23] sm:$0xff]  ;;  %v2169_v41 = vpack.i.bf16 %v2798_v46, %v2649_v52  ;;  %v2279_v57 = vpack.i.bf16 %v2804_v55, %v2801_v54  ;;  %v2833_v4 = vld [vmem:[%s2541_s23 + $0x118] sm:$0xff]  ;;  %v2856_v12 = vld [vmem:[%s2541_s23 + $0x28] sm:$0xff] }
  0x2d   : > { %1921 = vmatpush1.bf16.msra.mxu1 %v1920_v17  ;;  %v2277_v40 = vpack.i.bf16 %v2789_v50, %v2786_v27 }
  0x2e   : > { %2064 = vxpose.xlu0.b32.cont [6/16] %v2063_v49, 128  ;;  %1922 = vmatprep.subr.bf16.mxu1 %v2503_v48  ;;  %v2081_v49 = vpack.i.bf16 %v201_v11, %v2687_v3  ;;  %v2830_v3 = vld [vmem:[%s2541_s23 + $0x18] sm:$0xff]  ;;  %v2853_v11 = vld [vmem:[%s2541_s23 + $0xb0] sm:$0xff] }
  0x2f   : > { %696 = vxpose.xlu1.b32.cont [7/9] (short) %v2667_v58, 128  ;;  %1901 = vmatpush3.bf16.msra.mxu0 %v1900_v56  ;;  %v3531_v56 = vmov 0.0   ;;  %v2812_v58 = vld [vmem:[%s2541_s23 + $0x98] sm:$0xff]  ;;  %v2177_v17 = vpack.i.bf16 %v2853_v11, %v2708_v14 }
  0x30   : > { %1903 = vmatprep.subr.bf16.mxu0 %v1902_v59  ;;  %v2815_v59 = vld [vmem:[%s2541_s23 + $0x10] sm:$0xff]  ;;  %v2171_v52 = vpack.i.bf16 %v2812_v58, %v2652_v53  ;;  %v2283_v53 = vpack.i.bf16 %v2833_v4, %v2830_v3 }
  0x31   : > { %1924 = vmatpush1.bf16.msra.mxu1 %v1923_v25  ;;  %v2879_v25 = vld [vmem:[%s2541_s23 + $0xc0] sm:$0xff] }
  0x32   : > { %2066 = vxpose.xlu0.b32.cont [7/16] %v2065_v60, 128  ;;  %1925 = vmatprep.subr.bf16.mxu1 %v2503_v48  ;;  %v2818_v60 = vld [vmem:[%s2541_s23 + $0x110] sm:$0xff] }
  0x33   : > { %697 = vxpose.xlu1.b32.cont [8/9] (short) %v2697_v8, 128  ;;  %1905 = vmatpush3.bf16.msra.mxu0 %v1904_v5  ;;  %v2281_v61 = vpack.i.bf16 %v2818_v60, %v2815_v59  ;;  %v2173_v5 = vpack.i.bf16 %v2827_v62, %v2679_v63  ;;  %v2843_v8 = vld [vmem:[%s2541_s23 + $0x20] sm:$0xff] }
  0x34   : > { %1907 = vmatprep.subr.bf16.mxu0 %v1906_v9  ;;  %v2846_v9 = vld [vmem:[%s2541_s23 + $0x120] sm:$0xff] }
  0x35   : > { %1927 = vmatpush1.bf16.msra.mxu1 %v1926_v32  ;;  %v2285_v63 = vpack.i.bf16 %v2846_v9, %v2843_v8  ;;  %v2892_v32 = vld [vmem:[%s2541_s23 + $0xc8] sm:$0xff] }
  0x36   : > { %2068 = vxpose.xlu0.b32.cont [8/16] %v2067_v10, 128  ;;  %1928 = vmatprep.subr.bf16.mxu1 %v2503_v48  ;;  %v2175_v10 = vpack.i.bf16 %v2840_v6, %v2682_v0 }
  0x37   : > { %698 = vxpose.xlu1.b32.end [9/9] (short) %v2719_v18, 128  ;;  %1909 = vmatpush3.bf16.msra.mxu0 %v1908_v16  ;;  %v2859_v16 = vld [vmem:[%s2541_s23 + $0x128] sm:$0xff] }
  0x38   : > { %1947 = vmatprep.subr.bf16.mxu0 %v1946_v26  ;;  %v2287_v0 = vpack.i.bf16 %v2859_v16, %v2856_v12  ;;  %v2882_v26 = vld [vmem:[%s2541_s23 + $0x38] sm:$0xff] }
  0x39   : > { %1930 = vmatpush1.bf16.msra.mxu1 %v1929_v36  ;;  %v2895_v36 = vld [vmem:[%s2541_s23 + $0x40] sm:$0xff] }
  0x3a   : > { %2070 = vxpose.xlu0.b32.cont [9/16] %v2069_v20, 128  ;;  %1931 = vmatprep.subr.bf16.mxu1 %v2503_v48  ;;  %v2869_v20 = vld [vmem:[%s2541_s23 + $0x30] sm:$0xff] }
  0x3b   : > { %v2289_v14 = vpack.i.bf16 %v2872_v23, %v2869_v20 }
  0x3d   : > { %1933 = vmatpush1.bf16.msra.mxu1 %v1932_v42  ;;  %v2183_v42 = vpack.i.bf16 %v2892_v32, %v2727_v22 }
  0x3e   : > { %2072 = vxpose.xlu0.b32.cont [10/16] %v2071_v28, 128  ;;  %1934 = vmatprep.subr.bf16.mxu1 %v2503_v48  ;;  %v2885_v28 = vld [vmem:[%s2541_s23 + $0x138] sm:$0xff] }
  0x41   : > { %1936 = vmatpush1.bf16.msra.mxu1 %v1935_v45  ;;  %v2908_v45 = vld [vmem:[%s2541_s23 + $0x48] sm:$0xff] }
  0x42   : > { %2074 = vxpose.xlu0.b32.cont [11/16] %v2073_v31, 128  ;;  %1937 = vmatprep.subr.bf16.mxu1 %v2503_v48  ;;  %v2181_v31 = vpack.i.bf16 %v2879_v25, %v2724_v21 }
  0x45   : > { %1939 = vmatpush1.bf16.msra.mxu1 %v1938_v47 }
  0x46   : > { %2076 = vxpose.xlu0.b32.cont [12/16] %v2075_v37, 128  ;;  %1940 = vmatprep.subr.bf16.mxu1 %v2503_v48  ;;  %v2898_v37 = vld [vmem:[%s2541_s23 + $0x140] sm:$0xff] }
  0x47   : > { %v2293_v21 = vpack.i.bf16 %v2898_v37, %v2895_v36 }
  0x49   : > { %1942 = vmatpush1.bf16.msra.mxu1 %v1941_v1  ;;  %v2921_v1 = vld [vmem:[%s2541_s23 + $0x50] sm:$0xff] }
  0x4a   : > { %2078 = vxpose.xlu0.b32.cont [13/16] %v2077_v44, 128  ;;  %1943 = vmatprep.subr.bf16.mxu1 %v2503_v48  ;;  %v2905_v44 = vld [vmem:[%s2541_s23 + $0xd0] sm:$0xff] }
  0x4b   : > { %v2185_v47 = vpack.i.bf16 %v2905_v44, %v2739_v29 }
  0x4d   : > { %1945 = vmatpush1.bf16.msra.mxu1 %v1944_v51  ;;  %v2931_v51 = vld [vmem:[%s2541_s23 + $0xe0] sm:$0xff] }
  0x4e   : > { %2080 = vxpose.xlu0.b32.cont [14/16] %v2079_v43, 128  ;;  %964 = vmatprep.subr.mxu1 %v3531_v56  ;;  %v2911_v43 = vld [vmem:[%s2541_s23 + $0x148] sm:$0xff] }
  0x4f   : > { %v2295_v22 = vpack.i.bf16 %v2911_v43, %v2908_v45 }
  0x51   : > { %965 = vmatpush1.msra.mxu1 %v2719_v18  ;;  %v2866_v18 = vld [vmem:[%s2541_s23 + $0xb8] sm:$0xff] }
  0x52   : > { %2082 = vxpose.xlu0.b32.cont [15/16] %v2081_v49, 128  ;;  %2014 = vmatprep.subr.bf16.mxu1 %v2503_v48  ;;  %v2179_v24 = vpack.i.bf16 %v2866_v18, %v2711_v15  ;;  %v2291_v15 = vpack.i.bf16 %v2885_v28, %v2882_v26  ;;  %v2918_v49 = vld [vmem:[%s2541_s23 + $0xd8] sm:$0xff] }
  0x54   : > { %2166 = vxpose.xlu1.b32.start [1/16] %v2165_v7, 128  ;;  %v2924_v7 = vld [vmem:[%s2541_s23 + $0x150] sm:$0xff] }
  0x55   : > { %v2297_v29 = vpack.i.bf16 %v2924_v7, %v2921_v1 }
  0x56   : > { %2084 = vxpose.xlu0.b32.end [16/16] %v2083_v19, 128  ;;  %v2187_v19 = vpack.i.bf16 %v2918_v49, %v2742_v30 }
  0x58   : > { %2168 = vxpose.xlu1.b32.cont [2/16] %v2167_v35, 128  ;;  %v2934_v35 = vld [vmem:[%s2541_s23 + $0x58] sm:$0xff] }
  0x5a   : > { %2278 = vxpose.xlu0.b32.start [1/16] %v2277_v40, 128  ;;  %v2937_v40 = vld [vmem:[%s2541_s23 + $0x158] sm:$0xff] }
  0x5b   : > { %v2299_v30 = vpack.i.bf16 %v2937_v40, %v2934_v35 }
  0x5c   : > { %2170 = vxpose.xlu1.b32.cont [3/16] %v2169_v41, 128  ;;  %v2189_v41 = vpack.i.bf16 %v2931_v51, %v2749_v34 }
  0x5e   : > { %2280 = vxpose.xlu0.b32.cont [2/16] %v2279_v57, 128  ;;  %v2944_v57 = vld [vmem:[%s2541_s23 + $0xe8] sm:$0xff] }
  0x60   : > { %2172 = vxpose.xlu1.b32.cont [4/16] %v2171_v52, 128  ;;  %v2947_v52 = vld [vmem:[%s2541_s23 + $0x60] sm:$0xff] }
  0x62   : > { %2282 = vxpose.xlu0.b32.cont [3/16] %v2281_v61, 128  ;;  %v2950_v61 = vld [vmem:[%s2541_s23 + $0x160] sm:$0xff] }
  0x63   : > { %v2301_v34 = vpack.i.bf16 %v2950_v61, %v2947_v52 }
  0x64   : > { %2174 = vxpose.xlu1.b32.cont [5/16] %v2173_v5, 128  ;;  %v2191_v5 = vpack.i.bf16 %v2944_v57, %v2752_v33 }
  0x66   : > { %2284 = vxpose.xlu0.b32.cont [4/16] %v2283_v53, 128  ;;  %v2957_v53 = vld [vmem:[%s2541_s23 + $0xf0] sm:$0xff] }
  0x68   : > { %2176 = vxpose.xlu1.b32.cont [6/16] %v2175_v10, 128  ;;  %v2960_v10 = vld [vmem:[%s2541_s23 + $0x68] sm:$0xff] }
  0x6a   : > { %2286 = vxpose.xlu0.b32.cont [5/16] %v2285_v63, 128  ;;  %v2963_v63 = vld [vmem:[%s2541_s23 + $0x168] sm:$0xff] }
  0x6b   : > { %v2303_v33 = vpack.i.bf16 %v2963_v63, %v2960_v10 }
  0x6c   : > { %2178 = vxpose.xlu1.b32.cont [7/16] %v2177_v17, 128  ;;  %v2193_v17 = vpack.i.bf16 %v2957_v53, %v2760_v38  ;;  %v2983_v38 = vld [vmem:[%s2541_s23 + $0x78] sm:$0xff] }
  0x6e   : > { %2288 = vxpose.xlu0.b32.cont [6/16] %v2287_v0, 128  ;;  %v2970_v0 = vld [vmem:[%s2541_s23 + $0xf8] sm:$0xff] }
  0x70   : > { %2180 = vxpose.xlu1.b32.cont [8/16] %v2179_v24, 128  ;;  %v2973_v24 = vld [vmem:[%s2541_s23 + $0x70] sm:$0xff] }
  0x72   : > { %2290 = vxpose.xlu0.b32.cont [7/16] %v2289_v14, 128  ;;  %v2976_v14 = vld [vmem:[%s2541_s23 + $0x170] sm:$0xff] }
  0x74   : > { %2182 = vxpose.xlu1.b32.cont [9/16] %v2181_v31, 128  ;;  %v2195_v31 = vpack.i.bf16 %v2970_v0, %v2763_v39  ;;  %v2995_v39 = vld [vmem:[%s2541_s23 + $0x188] sm:$0xff] }
  0x76   : > { %2292 = vxpose.xlu0.b32.cont [8/16] %v2291_v15, 128  ;;  %v2305_v15 = vpack.i.bf16 %v2976_v14, %v2973_v24 }
  0x78   : > { %2184 = vxpose.xlu1.b32.cont [10/16] %v2183_v42, 128  ;;  %v2986_v42 = vld [vmem:[%s2541_s23 + $0x178] sm:$0xff] }
  0x7a   : > { %2294 = vxpose.xlu0.b32.cont [9/16] %v2293_v21, 128  ;;  %v2307_v21 = vpack.i.bf16 %v2986_v42, %v2983_v38 }
  0x7c   : > { %2186 = vxpose.xlu1.b32.cont [11/16] %v2185_v47, 128  ;;  %v2991_v47 = vld [vmem:[%s2541_s23 + $0x180] sm:$0xff] }
  0x7e   : > { %2296 = vxpose.xlu0.b32.cont [10/16] %v2295_v22, 128 }
  0x80   : > { %2188 = vxpose.xlu1.b32.cont [12/16] %v2187_v19, 128  ;;  %v1948_v19 = vpack.c.bf16 %v2801_v54, %v2786_v27 }
  0x82   : > { %2298 = vxpose.xlu0.b32.cont [11/16] %v2297_v29, 128 }
  0x84   : > { %2190 = vxpose.xlu1.b32.cont [13/16] %v2189_v41, 128  ;;  %v3002_v41 = vld [vmem:[%s2541_s23 + $0x190] sm:$0xff] }
  0x86   : > { %2300 = vxpose.xlu0.b32.cont [12/16] %v2299_v30, 128 }
  0x88   : > { %2192 = vxpose.xlu1.b32.cont [14/16] %v2191_v5, 128 }
  0x8a   : > { %2302 = vxpose.xlu0.b32.cont [13/16] %v2301_v34, 128 }
  0x8c   : > { %2194 = vxpose.xlu1.b32.cont [15/16] %v2193_v17, 128  ;;  %v1950_v17 = vpack.c.bf16 %v2812_v58, %v2798_v46  ;;  %v1954_v46 = vpack.c.bf16 %v2840_v6, %v2827_v62  ;;  %v1958_v62 = vpack.c.bf16 %v2866_v18, %v2853_v11  ;;  %v1962_v11 = vpack.c.bf16 %v2892_v32, %v2879_v25  ;;  %v3040_v18 = vld [vmem:[%s2541_s23 + $0x1b0] sm:$0xff] }
  0x8d   : > { %v1966_v25 = vpack.c.bf16 %v2918_v49, %v2905_v44  ;;  %v1970_v44 = vpack.c.bf16 %v2944_v57, %v2931_v51  ;;  %v1976_v57 = vpack.c.bf16 %v2983_v38, %v2973_v24 }
  0x8e   : > { %2304 = vxpose.xlu0.b32.cont [14/16] %v2303_v33, 128 }
  0x90   : > { %2196 = vxpose.xlu1.b32.end [16/16] %v2195_v31, 128  ;;  %v3010_v31 = vld [vmem:[%s2541_s23 + $0x198] sm:$0xff] }
  0x92   : > { %2306 = vxpose.xlu0.b32.cont [15/16] %v2305_v15, 128  ;;  %v1952_v15 = vpack.c.bf16 %v2830_v3, %v2815_v59 }
  0x94   : > { %1157 = vxpose.xlu1.b32.start [1/9] (short) %v2991_v47, 128 }
  0x96   : > { %2308 = vxpose.xlu0.b32.end [16/16] %v2307_v21, 128 }
  0x97   : > { %v706_v22 = vpop.trf.xlu1 }
  0x98   : > { %1684 = vmatprep.mubr.msk.f32.mxu1 %vm722_vm0, %v706_v22  ;;  %1158 = vxpose.xlu1.b32.cont [2/9] (short) %v2995_v39, 128 }
  0x9a   : > { %v2085_v29 = vpop.trf.xlu0 }
  0x9b   : > { %v2086_v30 = vunpack.i.l.bf16 %v2085_v29  ;;  %v2089_v5 = vunpack.i.h.bf16 %v2085_v29  ;;  %v3004_v34 = vpop.trf.xlu1 }
  0x9c   : > { %1159 = vxpose.xlu1.b32.cont [3/9] (short) %v3002_v41, 128 }
  0x9d   : > { %835 = vmatprep.mubr.f32.mxu0 %v2086_v30  ;;  %v3020_v30 = vld [vmem:[%s2541_s23 + $0x1a0] sm:$0xff] }
  0x9e   : > { %v2090_v33 = vpop.trf.xlu0  ;;  %836 = vmatmul.mubr.f32.vlgmr.msra.gmra.mrb[0].mxu0 %v2089_v5  ;;  %v1956_v5 = vpack.c.bf16 %v2856_v12, %v2843_v8 }
  0x9f   : > { %v2091_v21 = vunpack.i.l.bf16 %v2090_v33  ;;  %v2094_v22 = vunpack.i.h.bf16 %v2090_v33  ;;  %1949 = vmatpush3.bf16.msra.mxu0 %v1948_v19  ;;  %v3014_v29 = vpop.trf.xlu1 }
  0xa0   : > { %1951 = vmatprep.subr.bf16.mxu0 %v1950_v17  ;;  %1160 = vxpose.xlu1.b32.cont [4/9] (short) %v3010_v31, 128  ;;  %v3030_v17 = vld [vmem:[%s2541_s23 + $0x1a8] sm:$0xff] }
  0xa1   : > { %840 = vmatprep.mubr.f32.mxu0 %v2091_v21  ;;  %v1960_v21 = vpack.c.bf16 %v2882_v26, %v2869_v20  ;;  %v1964_v26 = vpack.c.bf16 %v2908_v45, %v2895_v36  ;;  %v1968_v36 = vpack.c.bf16 %v2934_v35, %v2921_v1 }
  0xa2   : > { %v2095_v58 = vpop.trf.xlu0  ;;  %841 = vmatmul.mubr.f32.gmra.mrb[2].mxu0 %v2094_v22 }
  0xa3   : > { %v2096_v56 = vunpack.i.l.bf16 %v2095_v58  ;;  %v2099_v33 = vunpack.i.h.bf16 %v2095_v58  ;;  %1953 = vmatpush3.bf16.msra.mxu0 %v1952_v15  ;;  %v3024_v19 = vpop.trf.xlu1 }
  0xa4   : > { %1955 = vmatprep.subr.bf16.mxu0 %v1954_v46  ;;  %1161 = vxpose.xlu1.b32.cont [5/9] (short) %v3020_v30, 128 }
  0xa5   : > { %845 = vmatprep.mubr.f32.mxu0 %v2096_v56 }
  0xa6   : > { %v2100_v6 = vpop.trf.xlu0  ;;  %846 = vmatmul.mubr.f32.gmra.mrb[4].mxu0 %v2099_v33 }
  0xa7   : > { %v2101_v22 = vunpack.i.l.bf16 %v2100_v6  ;;  %v2104_v58 = vunpack.i.h.bf16 %v2100_v6  ;;  %1957 = vmatpush3.bf16.msra.mxu0 %v1956_v5  ;;  %v3034_v15 = vpop.trf.xlu1 }
  0xa8   : > { %1959 = vmatprep.subr.bf16.mxu0 %v1958_v62  ;;  %1162 = vxpose.xlu1.b32.cont [6/9] (short) %v3030_v17, 128  ;;  %v3050_v62 = vld [vmem:[%s2541_s23 + $0x1b8] sm:$0xff] }
  0xa9   : > { %850 = vmatprep.mubr.f32.mxu0 %v2101_v22  ;;  %v3060_v22 = vld [vmem:[%s2541_s23 + $0x1c0] sm:$0xff] }
  0xaa   : > { %v2105_v56 = vpop.trf.xlu0  ;;  %851 = vmatmul.mubr.f32.gmra.mrb[6].mxu0 %v2104_v58  ;;  %v1972_v58 = vpack.c.bf16 %v2960_v10, %v2947_v52 }
  0xab   : > { %v2106_v46 = vunpack.i.l.bf16 %v2105_v56  ;;  %v2109_v33 = vunpack.i.h.bf16 %v2105_v56  ;;  %1961 = vmatpush3.bf16.msra.mxu0 %v1960_v21  ;;  %v3044_v5 = vpop.trf.xlu1  ;;  %v1974_v56 = vpack.c.bf16 %v2970_v0, %v2957_v53 }
  0xac   : > { %1963 = vmatprep.subr.bf16.mxu0 %v1962_v11  ;;  %1163 = vxpose.xlu1.b32.cont [7/9] (short) %v3040_v18, 128 }
  0xad   : > { %855 = vmatprep.mubr.f32.mxu0 %v2106_v46 }
  0xae   : > { %v2110_v32 = vpop.trf.xlu0  ;;  %856 = vmatmul.mubr.f32.gmra.mrb[8].mxu0 %v2109_v33 }
  0xaf   : > { %v2111_v45 = vunpack.i.l.bf16 %v2110_v32  ;;  %v2114_v6 = vunpack.i.h.bf16 %v2110_v32  ;;  %1965 = vmatpush3.bf16.msra.mxu0 %v1964_v26  ;;  %v3054_v21 = vpop.trf.xlu1 }
  0xb0   : > { %1967 = vmatprep.subr.bf16.mxu0 %v1966_v25  ;;  %1164 = vxpose.xlu1.b32.cont [8/9] (short) %v3050_v62, 128 }
  0xb1   : > { %860 = vmatprep.mubr.f32.mxu0 %v2111_v45 }
  0xb2   : > { %v2115_v49 = vpop.trf.xlu0  ;;  %861 = vmatmul.mubr.f32.gmra.mrb[10].mxu0 %v2114_v6 }
  0xb3   : > { %v2116_v1 = vunpack.i.l.bf16 %v2115_v49  ;;  %v2119_v35 = vunpack.i.h.bf16 %v2115_v49  ;;  %1969 = vmatpush3.bf16.msra.mxu0 %v1968_v36  ;;  %v3064_v11 = vpop.trf.xlu1 }
  0xb4   : > { %1971 = vmatprep.subr.bf16.mxu0 %v1970_v44  ;;  %1165 = vxpose.xlu1.b32.end [9/9] (short) %v3060_v22, 128 }
  0xb5   : > { %865 = vmatprep.mubr.f32.mxu0 %v2116_v1 }
  0xb6   : > { %v2120_v51 = vpop.trf.xlu0  ;;  %866 = vmatmul.mubr.f32.gmra.mrb[12].mxu0 %v2119_v35 }
  0xb7   : > { %v2121_v26 = vunpack.i.l.bf16 %v2120_v51  ;;  %v2124_v46 = vunpack.i.h.bf16 %v2120_v51  ;;  %1973 = vmatpush3.bf16.msra.mxu0 %v1972_v58  ;;  %v3071_v52 = vpop.trf.xlu1 }
  0xb8   : > { %1975 = vmatprep.subr.bf16.mxu0 %v1974_v56 }
  0xb9   : > { %870 = vmatprep.mubr.f32.mxu0 %v2121_v26 }
  0xba   : > { %v2125_v10 = vpop.trf.xlu0  ;;  %871 = vmatmul.mubr.f32.gmra.mrb[14].mxu0 %v2124_v46 }
  0xbb   : > { %v2126_v33 = vunpack.i.l.bf16 %v2125_v10  ;;  %v2129_v25 = vunpack.i.h.bf16 %v2125_v10  ;;  %1977 = vmatpush3.bf16.msra.mxu0 %v1976_v57  ;;  %v3073_v53 = vpop.trf.xlu1 }
  0xbc   : > { %1978 = vmatprep.subr.bf16.mxu0 %v2503_v48 }
  0xbd   : > { %875 = vmatprep.mubr.f32.mxu0 %v2126_v33 }
  0xbe   : > { %v2130_v0 = vpop.trf.xlu0  ;;  %876 = vmatmul.mubr.f32.gmra.mrb[16].mxu0 %v2129_v25 }
  0xbf   : > { %v2131_v24 = vunpack.i.l.bf16 %v2130_v0  ;;  %v2134_v38 = vunpack.i.h.bf16 %v2130_v0  ;;  %v3076_v32 = vpop.trf.xlu1 }
  0xc1   : > { %880 = vmatprep.mubr.f32.mxu0 %v2131_v24 }
  0xc2   : > { %v2135_v36 = vpop.trf.xlu0  ;;  %881 = vmatmul.mubr.f32.gmra.mrb[18].mxu0 %v2134_v38 }
  0xc3   : > { %v2136_v45 = vunpack.i.l.bf16 %v2135_v36  ;;  %v2139_v6 = vunpack.i.h.bf16 %v2135_v36  ;;  %v3078_v44 = vpop.trf.xlu1 }
  0xc5   : > { %885 = vmatprep.mubr.f32.mxu0 %v2136_v45 }
  0xc6   : > { %v2140_v49 = vpop.trf.xlu0  ;;  %886 = vmatmul.mubr.f32.gmra.mrb[20].mxu0 %v2139_v6  ;;  %v301_v6 = vsub.f32 %v2553_v2, %v2786_v27 }
  0xc7   : > { %v2141_v58 = vunpack.i.l.bf16 %v2140_v49  ;;  %v2144_v1 = vunpack.i.h.bf16 %v2140_v49  ;;  %v3080_v35 = vpop.trf.xlu1  ;;  %v303_v49 = vsub.f32 %v2567_v13, %v2815_v59 }
  0xc9   : > { %890 = vmatprep.mubr.f32.mxu0 %v2141_v58 }
  0xca   : > { %v2145_v56 = vpop.trf.xlu0  ;;  %891 = vmatmul.mubr.f32.gmra.mrb[22].mxu0 %v2144_v1 }
  0xcb   : > { %v2146_v51 = vunpack.i.l.bf16 %v2145_v56  ;;  %v2149_v57 = vunpack.i.h.bf16 %v2145_v56  ;;  %v3082_v26 = vpop.trf.xlu1 }
  0xcd   : > { %895 = vmatprep.mubr.f32.mxu0 %v2146_v51  ;;  %v358_v51 = vand.u32 2147483647, %v301_v6 }
  0xce   : > { %v2150_v46 = vpop.trf.xlu0  ;;  %896 = vmatmul.mubr.f32.gmra.mrb[24].mxu0 %v2149_v57 }
  0xcf   : > { %v2151_v10 = vunpack.i.l.bf16 %v2150_v46  ;;  %v2154_v33 = vunpack.i.h.bf16 %v2150_v46  ;;  %v3084_v25 = vpop.trf.xlu1  ;;  %415 = vadd.xlane.f32.xlu0 %v358_v51 }
  0xd1   : > { %900 = vmatprep.mubr.f32.mxu0 %v2151_v10  ;;  %v1979_v10 = vpack.c.bf16 %v2804_v55, %v2789_v50  ;;  %v1982_v55 = vpack.c.bf16 %v2833_v4, %v2818_v60  ;;  %v1985_v60 = vpack.c.bf16 %v2859_v16, %v2846_v9  ;;  %v1988_v9 = vpack.c.bf16 %v2885_v28, %v2872_v23 }
  0xd2   : > { %v2155_v0 = vpop.trf.xlu0  ;;  %901 = vmatmul.mubr.f32.gmra.mrb[26].mxu0 %v2154_v33  ;;  %v1991_v23 = vpack.c.bf16 %v2911_v43, %v2898_v37  ;;  %v1994_v37 = vpack.c.bf16 %v2937_v40, %v2924_v7  ;;  %v1997_v7 = vpack.c.bf16 %v2963_v63, %v2950_v61  ;;  %v2000_v61 = vpack.c.bf16 %v2986_v42, %v2976_v14 }
  0xd3   : > { %v2156_v24 = vunpack.i.l.bf16 %v2155_v0  ;;  %v2159_v38 = vunpack.i.h.bf16 %v2155_v0  ;;  %v3086_v36 = vpop.trf.xlu1  ;;  %v360_v0 = vand.u32 2147483647, %v303_v49 }
  0xd5   : > { %905 = vmatprep.mubr.f32.mxu0 %v2156_v24  ;;  %419 = vadd.xlane.f32.xlu0 %v360_v0 }
  0xd6   : > { %v2160_v45 = vpop.trf.xlu0  ;;  %906 = vmatmul.mubr.f32.gmra.mrb[28].mxu0 %v2159_v38 }
  0xd7   : > { %v2161_v58 = vunpack.i.l.bf16 %v2160_v45  ;;  %v2164_v1 = vunpack.i.h.bf16 %v2160_v45  ;;  %v2197_v56 = vpop.trf.xlu1 }
  0xd8   : > { %v2198_v57 = vunpack.i.l.bf16 %v2197_v56  ;;  %v2201_v46 = vunpack.i.h.bf16 %v2197_v56 }
  0xd9   : > { %910 = vmatprep.mubr.f32.mxu0 %v2161_v58 }
  0xda   : > { %911 = vmatmul.mubr.f32.gmra.mrb[30].mxu0 %v2164_v1  ;;  %v3094_v33 = vpop.trf.xlu0  ;;  %981 = vmatmul.mubr.f32.vlgmr.msra.gmra.mrb[0].mxu1 %v2198_v57 }
  0xdb   : > { %v2310_v2 = vunpack.i.l.bf16 %v3094_v33  ;;  %1301 = vmatprep.mubr.f32.mxu0 %v2201_v46  ;;  %v2202_v13 = vpop.trf.xlu1  ;;  %1685 = vmatprep.mubr.msk.f32.mxu1 %vm722_vm0, %v3004_v34 }
  0xdc   : > { %2027 = vmatpush1.bf16.msra.mxu1 %v1979_v10  ;;  %v2203_v27 = vunpack.i.l.bf16 %v2202_v13  ;;  %v2206_v59 = vunpack.i.h.bf16 %v2202_v13 }
  0xdd   : > { %2015 = vmatprep.subr.bf16.mxu1 %v2503_v48 }
  0xde   : > { %1302 = vmatmul.mubr.f32.vlgmr.msra.gmra.mrb[32].mxu0 %v2310_v2  ;;  %v3100_v50 = vpop.trf.xlu0  ;;  %986 = vmatmul.mubr.f32.gmra.mrb[2].mxu1 %v2203_v27 }
  0xdf   : > { %1306 = vmatprep.mubr.f32.mxu0 %v2206_v59  ;;  %v2315_v24 = vunpack.i.l.bf16 %v3100_v50  ;;  %v2207_v38 = vpop.trf.xlu1  ;;  %1686 = vmatprep.mubr.msk.f32.mxu1 %vm722_vm0, %v3014_v29 }
  0xe0   : > { %2028 = vmatpush1.bf16.msra.mxu1 %v1982_v55  ;;  %v2208_v34 = vunpack.i.l.bf16 %v2207_v38  ;;  %v2211_v45 = vunpack.i.h.bf16 %v2207_v38  ;;  %1980 = vmatpush1.bf16.msra.mxu0 %v1979_v10 }
  0xe1   : > { %2016 = vmatprep.subr.bf16.mxu1 %v2503_v48  ;;  %1981 = vmatprep.subr.bf16.mxu0 %v2503_v48 }
  0xe2   : > { %1307 = vmatmul.mubr.f32.gmra.mrb[34].mxu0 %v2315_v24  ;;  %v3108_v6 = vpop.trf.xlu0  ;;  %991 = vmatmul.mubr.f32.gmra.mrb[4].mxu1 %v2208_v34 }
  0xe3   : > { %1311 = vmatprep.mubr.f32.mxu0 %v2211_v45  ;;  %v2320_v4 = vunpack.i.l.bf16 %v3108_v6  ;;  %v2212_v49 = vpop.trf.xlu1  ;;  %1687 = vmatprep.mubr.msk.f32.mxu1 %vm722_vm0, %v3024_v19  ;;  %v2003_v45 = vpack.c.bf16 %v2995_v39, %v2991_v47  ;;  %v2006_v47 = vpack.c.bf16 %v3010_v31, %v3002_v41  ;;  %v2009_v41 = vpack.c.bf16 %v3030_v17, %v3020_v30 }
  0xe4   : > { %2029 = vmatpush1.bf16.msra.mxu1 %v1985_v60  ;;  %v2213_v29 = vunpack.i.l.bf16 %v2212_v49  ;;  %v2216_v58 = vunpack.i.h.bf16 %v2212_v49  ;;  %1983 = vmatpush1.bf16.msra.mxu0 %v1982_v55  ;;  %v2012_v17 = vpack.c.bf16 %v3050_v62, %v3040_v18 }
  0xe5   : > { %2017 = vmatprep.subr.bf16.mxu1 %v2503_v48  ;;  %1984 = vmatprep.subr.bf16.mxu0 %v2503_v48 }
  0xe6   : > { %1312 = vmatmul.mubr.f32.gmra.mrb[36].mxu0 %v2320_v4  ;;  %v3117_v1 = vpop.trf.xlu0  ;;  %996 = vmatmul.mubr.f32.gmra.mrb[6].mxu1 %v2213_v29 }
  0xe7   : > { %1316 = vmatprep.mubr.f32.mxu0 %v2216_v58  ;;  %v2325_v16 = vunpack.i.l.bf16 %v3117_v1  ;;  %v2217_v56 = vpop.trf.xlu1  ;;  %1688 = vmatprep.mubr.msk.f32.mxu1 %vm722_vm0, %v3034_v15 }
  0xe8   : > { %2030 = vmatpush1.bf16.msra.mxu1 %v1988_v9  ;;  %v2218_v19 = vunpack.i.l.bf16 %v2217_v56  ;;  %v2221_v51 = vunpack.i.h.bf16 %v2217_v56  ;;  %1986 = vmatpush1.bf16.msra.mxu0 %v1985_v60 }
  0xe9   : > { %2018 = vmatprep.subr.bf16.mxu1 %v2503_v48  ;;  %1987 = vmatprep.subr.bf16.mxu0 %v2503_v48 }
  0xea   : > { %1317 = vmatmul.mubr.f32.gmra.mrb[38].mxu0 %v2325_v16  ;;  %v3126_v57 = vpop.trf.xlu0  ;;  %1001 = vmatmul.mubr.f32.gmra.mrb[8].mxu1 %v2218_v19  ;;  %v2389_v16 = vld [vmem:[%s2536_s20 + $0x18] sm:$0xff] }
  0xeb   : > { %1321 = vmatprep.mubr.f32.mxu0 %v2221_v51  ;;  %v2330_v28 = vunpack.i.l.bf16 %v3126_v57  ;;  %v2222_v46 = vpop.trf.xlu1  ;;  %1689 = vmatprep.mubr.msk.f32.mxu1 %vm722_vm0, %v3044_v5  ;;  %v304_v56 = vsub.f32 %v2389_v16, %v2830_v3  ;;  %v2313_v16 = vunpack.i.h.bf16 %v3094_v33 }
  0xec   : > { %2031 = vmatpush1.bf16.msra.mxu1 %v1991_v23  ;;  %v2223_v15 = vunpack.i.l.bf16 %v2222_v46  ;;  %v2226_v10 = vunpack.i.h.bf16 %v2222_v46  ;;  %1989 = vmatpush1.bf16.msra.mxu0 %v1988_v9 }
  0xed   : > { %2019 = vmatprep.subr.bf16.mxu1 %v2503_v48  ;;  %1990 = vmatprep.subr.bf16.mxu0 %v2503_v48 }
  0xee   : > { %1322 = vmatmul.mubr.f32.gmra.mrb[40].mxu0 %v2330_v28  ;;  %v3135_v0 = vpop.trf.xlu0  ;;  %1006 = vmatmul.mubr.f32.gmra.mrb[10].mxu1 %v2223_v15  ;;  %v2390_v28 = vld [vmem:[%s2536_s20 + $0x20] sm:$0xff]  ;;  %v2391_v15 = vld [vmem:[%s2536_s20 + $0x8] sm:$0xff] }
  0xef   : > { %1326 = vmatprep.mubr.f32.mxu0 %v2226_v10  ;;  %v2335_v43 = vunpack.i.l.bf16 %v3135_v0  ;;  %v2227_v2 = vpop.trf.xlu1  ;;  %1690 = vmatprep.mubr.msk.f32.mxu1 %vm722_vm0, %v3054_v21  ;;  %v305_v46 = vsub.f32 %v2390_v28, %v2843_v8  ;;  %v302_v18 = vsub.f32 %v2391_v15, %v2801_v54  ;;  %v2392_v8 = vld [vmem:[%s2536_s20 + $0x28] sm:$0xff]  ;;  %v2318_v28 = vunpack.i.h.bf16 %v3100_v50  ;;  %v2403_v15 = vld [vmem:[%s2541_s23 + $0x50] sm:$0xff]  ;;  %v2404_v50 = vld [vmem:[%s2536_s20 + $0x58] sm:$0xff] }
  0xf0   : > { %2032 = vmatpush1.bf16.msra.mxu1 %v1994_v37  ;;  %v2228_v5 = vunpack.i.l.bf16 %v2227_v2  ;;  %v2231_v13 = vunpack.i.h.bf16 %v2227_v2  ;;  %1992 = vmatpush1.bf16.msra.mxu0 %v1991_v23  ;;  %v361_v23 = vand.u32 2147483647, %v304_v56 }
  0xf1   : > { %2020 = vmatprep.subr.bf16.mxu1 %v2503_v48  ;;  %1993 = vmatprep.subr.bf16.mxu0 %v2503_v48  ;;  %v362_v54 = vand.u32 2147483647, %v305_v46  ;;  %v2402_v46 = vld [vmem:[%s2536_s20 + $0x50] sm:$0xff] }
  0xf2   : > { %1327 = vmatmul.mubr.f32.gmra.mrb[42].mxu0 %v2335_v43  ;;  %v3144_v27 = vpop.trf.xlu0  ;;  %1011 = vmatmul.mubr.f32.gmra.mrb[12].mxu1 %v2228_v5  ;;  %v306_v5 = vsub.f32 %v2392_v8, %v2856_v12 }
  0xf3   : > { %1331 = vmatprep.mubr.f32.mxu0 %v2231_v13  ;;  %v2340_v40 = vunpack.i.l.bf16 %v3144_v27  ;;  %v2232_v59 = vpop.trf.xlu1  ;;  %1691 = vmatprep.mubr.msk.f32.mxu1 %vm722_vm0, %v3064_v11  ;;  %v359_v13 = vand.u32 2147483647, %v302_v18  ;;  %v311_v18 = vsub.f32 %v2402_v46, %v2403_v15  ;;  %v2424_v46 = vld [vmem:[%s2536_s20 + $0xd0] sm:$0xff] }
  0xf4   : > { %2033 = vmatpush1.bf16.msra.mxu1 %v1997_v7  ;;  %v2233_v21 = vunpack.i.l.bf16 %v2232_v59  ;;  %v2236_v55 = vunpack.i.h.bf16 %v2232_v59  ;;  %1995 = vmatpush1.bf16.msra.mxu0 %v1994_v37  ;;  %v3533_v37 = vmov 0.0   ;;  %v363_v12 = vand.u32 2147483647, %v306_v5  ;;  %v2407_v5 = vld [vmem:[%s2541_s23 + $0x60] sm:$0xff]  ;;  %v2425_v15 = vld [vmem:[%s2541_s23 + $0xd0] sm:$0xff] }
  0xf5   : > { %2021 = vmatprep.subr.bf16.mxu1 %v2503_v48  ;;  %1996 = vmatprep.subr.bf16.mxu0 %v2503_v48 }
  0xf6   : > { %1332 = vmatmul.mubr.f32.gmra.mrb[44].mxu0 %v2340_v40  ;;  %v3153_v24 = vpop.trf.xlu0  ;;  %1016 = vmatmul.mubr.f32.gmra.mrb[14].mxu1 %v2233_v21  ;;  %v2393_v21 = vld [vmem:[%s2536_s20 + $0x30] sm:$0xff] }
  0xf7   : > { %1336 = vmatprep.mubr.f32.mxu0 %v2236_v55  ;;  %v2345_v63 = vunpack.i.l.bf16 %v3153_v24  ;;  %v2237_v38 = vpop.trf.xlu1  ;;  %1692 = vmatprep.mubr.msk.f32.mxu1 %vm722_vm0, %v3071_v52  ;;  %v307_v55 = vsub.f32 %v2393_v21, %v2869_v20  ;;  %v2410_v21 = vld [vmem:[%s2536_s20 + $0x68] sm:$0xff] }
  0xf8   : > { %2034 = vmatpush1.bf16.msra.mxu1 %v2000_v61  ;;  %v2238_v11 = vunpack.i.l.bf16 %v2237_v38  ;;  %v2241_v34 = vunpack.i.h.bf16 %v2237_v38  ;;  %1998 = vmatpush1.bf16.msra.mxu0 %v1997_v7 }
  0xf9   : > { %2022 = vmatprep.subr.bf16.mxu1 %v2503_v48  ;;  %1999 = vmatprep.subr.bf16.mxu0 %v2503_v48  ;;  %v364_v20 = vand.u32 2147483647, %v307_v55  ;;  %v2411_v55 = vld [vmem:[%s2541_s23 + $0x68] sm:$0xff] }
  0xfa   : > { %1337 = vmatmul.mubr.f32.gmra.mrb[46].mxu0 %v2345_v63  ;;  %v3164_v60 = vpop.trf.xlu0  ;;  %1021 = vmatmul.mubr.f32.gmra.mrb[16].mxu1 %v2238_v11  ;;  %v2394_v11 = vld [vmem:[%s2536_s20 + $0x80] sm:$0xff] }
  0xfb   : > { %1341 = vmatprep.mubr.f32.mxu0 %v2241_v34  ;;  %v2350_v14 = vunpack.i.l.bf16 %v3164_v60  ;;  %v2242_v42 = vpop.trf.xlu1  ;;  %1693 = vmatprep.mubr.msk.f32.mxu1 %vm722_vm0, %v3073_v53  ;;  %v2395_v34 = vld [vmem:[%s2541_s23 + $0x80] sm:$0xff] }
  0xfc   : > { %2035 = vmatpush1.bf16.msra.mxu1 %v2003_v45  ;;  %v2243_v52 = vunpack.i.l.bf16 %v2242_v42  ;;  %v2246_v4 = vunpack.i.h.bf16 %v2242_v42  ;;  %2001 = vmatpush1.bf16.msra.mxu0 %v2000_v61  ;;  %v2396_v42 = vld [vmem:[%s2536_s20 + $0x38] sm:$0xff] }
  0xfd   : > { %2023 = vmatprep.subr.bf16.mxu1 %v2503_v48  ;;  %2002 = vmatprep.subr.bf16.mxu0 %v2503_v48 }
  0xfe   : > { %1342 = vmatmul.mubr.f32.gmra.mrb[48].mxu0 %v2350_v14  ;;  %v3173_v39 = vpop.trf.xlu0  ;;  %1026 = vmatmul.mubr.f32.gmra.mrb[18].mxu1 %v2243_v52  ;;  %v2397_v52 = vld [vmem:[%s2541_s23 + $0x38] sm:$0xff] }
  0xff   : > { %1346 = vmatprep.mubr.f32.mxu0 %v2246_v4  ;;  %v2355_v49 = vunpack.i.l.bf16 %v3173_v39  ;;  %v2247_v29 = vpop.trf.xlu1  ;;  %1694 = vmatprep.mubr.msk.f32.mxu1 %vm722_vm0, %v3076_v32 }
 0x100   : > { %2036 = vmatpush1.bf16.msra.mxu1 %v2006_v47  ;;  %v2248_v53 = vunpack.i.l.bf16 %v2247_v29  ;;  %v2251_v58 = vunpack.i.h.bf16 %v2247_v29  ;;  %2004 = vmatpush1.bf16.msra.mxu0 %v2003_v45  ;;  %v317_v45 = vsub.f32 %v2394_v11, %v2395_v34  ;;  %v2343_v34 = vunpack.i.h.bf16 %v3144_v27 }
 0x101   : > { %2024 = vmatprep.subr.bf16.mxu1 %v2503_v48  ;;  %2005 = vmatprep.subr.bf16.mxu0 %v2503_v48  ;;  %v2348_v27 = vunpack.i.h.bf16 %v3153_v24  ;;  %v2353_v24 = vunpack.i.h.bf16 %v3164_v60  ;;  %v2358_v60 = vunpack.i.h.bf16 %v3173_v39 }
 0x102   : > { %1347 = vmatmul.mubr.f32.gmra.mrb[50].mxu0 %v2355_v49  ;;  %v3182_v31 = vpop.trf.xlu0  ;;  %1031 = vmatmul.mubr.f32.gmra.mrb[20].mxu1 %v2248_v53  ;;  %v374_v4 = vand.u32 2147483647, %v317_v45  ;;  %v2413_v45 = vld [vmem:[%s2541_s23 + $0xa0] sm:$0xff] }
 0x103   : > { %1351 = vmatprep.mubr.f32.mxu0 %v2251_v58  ;;  %v2360_v9 = vunpack.i.l.bf16 %v3182_v31  ;;  %v2252_v32 = vpop.trf.xlu1  ;;  %1695 = vmatprep.mubr.msk.f32.mxu1 %vm722_vm0, %v3078_v44  ;;  %v2363_v39 = vunpack.i.h.bf16 %v3182_v31 }
 0x104   : > { %2037 = vmatpush1.bf16.msra.mxu1 %v2009_v41  ;;  %v2253_v19 = vunpack.i.l.bf16 %v2252_v32  ;;  %v2256_v30 = vunpack.i.h.bf16 %v2252_v32  ;;  %2007 = vmatpush1.bf16.msra.mxu0 %v2006_v47 }
 0x105   : > { %2025 = vmatprep.subr.bf16.mxu1 %v2503_v48  ;;  %2008 = vmatprep.subr.bf16.mxu0 %v2503_v48 }
 0x106   : > { %1352 = vmatmul.mubr.f32.gmra.mrb[52].mxu0 %v2360_v9  ;;  %v3193_v51 = vpop.trf.xlu0  ;;  %1036 = vmatmul.mubr.f32.gmra.mrb[22].mxu1 %v2253_v19  ;;  %v2399_v9 = vld [vmem:[%s2541_s23 + $0x40] sm:$0xff] }
 0x107   : > { %1356 = vmatprep.mubr.f32.mxu0 %v2256_v30  ;;  %v2365_v44 = vunpack.i.l.bf16 %v3193_v51  ;;  %v2257_v3 = vpop.trf.xlu1  ;;  %1696 = vmatprep.mubr.msk.f32.mxu1 %vm722_vm0, %v3080_v35  ;;  %v2400_v30 = vld [vmem:[%s2536_s20 + $0x48] sm:$0xff]  ;;  %v2368_v31 = vunpack.i.h.bf16 %v3193_v51 }
 0x108   : > { %2038 = vmatpush1.bf16.msra.mxu1 %v2012_v17  ;;  %v2258_v62 = vunpack.i.l.bf16 %v2257_v3  ;;  %v2261_v10 = vunpack.i.h.bf16 %v2257_v3  ;;  %2010 = vmatpush1.bf16.msra.mxu0 %v2009_v41  ;;  %v2398_v41 = vld [vmem:[%s2536_s20 + $0x40] sm:$0xff]  ;;  %v2323_v3 = vunpack.i.h.bf16 %v3108_v6  ;;  %v368_v6 = vand.u32 2147483647, %v311_v18 }
 0x109   : > { %2026 = vmatprep.subr.mxu1 %v3533_v37  ;;  %2011 = vmatprep.subr.bf16.mxu0 %v2503_v48  ;;  %v309_v32 = vsub.f32 %v2398_v41, %v2399_v9  ;;  %v2419_v41 = vld [vmem:[%s2541_s23 + $0x78] sm:$0xff]  ;;  %v327_v18 = vsub.f32 %v2424_v46, %v2425_v15 }
 0x10a   : > { %1357 = vmatmul.mubr.f32.gmra.mrb[54].mxu0 %v2365_v44  ;;  %v3204_v43 = vpop.trf.xlu0  ;;  %1041 = vmatmul.mubr.f32.gmra.mrb[24].mxu1 %v2258_v62  ;;  %v2450_v15 = vld [vmem:[%s2536_s20 + $0xf8] sm:$0xff] }
 0x10b   : > { %1361 = vmatprep.mubr.f32.mxu0 %v2261_v10  ;;  %v2370_v35 = vunpack.i.l.bf16 %v3204_v43  ;;  %v2262_v2 = vpop.trf.xlu1  ;;  %1697 = vmatprep.mubr.msk.f32.mxu1 %vm722_vm0, %v3082_v26  ;;  %v366_v19 = vand.u32 2147483647, %v309_v32  ;;  %v2328_v10 = vunpack.i.h.bf16 %v3117_v1  ;;  %v2406_v1 = vld [vmem:[%s2536_s20 + $0x60] sm:$0xff]  ;;  %v2373_v51 = vunpack.i.h.bf16 %v3204_v43 }
 0x10c   : > { %2039 = vmatpush1.msra.mxu1 %v3060_v22  ;;  %v2263_v7 = vunpack.i.l.bf16 %v2262_v2  ;;  %v2266_v40 = vunpack.i.h.bf16 %v2262_v2  ;;  %2013 = vmatpush1.bf16.msra.mxu0 %v2012_v17  ;;  %v2401_v17 = vld [vmem:[%s2541_s23 + $0x48] sm:$0xff] }
 0x10d   : > { %421 = vadd.xlane.f32.xlu0 %v361_v23  ;;  %1430 = vmatprep.subr.mxu0 %v3533_v37  ;;  %v310_v44 = vsub.f32 %v2400_v30, %v2401_v17  ;;  %v2405_v37 = vld [vmem:[%s2541_s23 + $0x58] sm:$0xff] }
 0x10e   : > { %1362 = vmatmul.mubr.f32.gmra.mrb[56].mxu0 %v2370_v35  ;;  %v3213_v48 = vpop.trf.xlu0  ;;  %1046 = vmatmul.mubr.f32.gmra.mrb[26].mxu1 %v2263_v7  ;;  %v312_v35 = vsub.f32 %v2404_v50, %v2405_v37  ;;  %v384_v37 = vand.u32 2147483647, %v327_v18  ;;  %v2451_v18 = vld [vmem:[%s2541_s23 + $0xf8] sm:$0xff] }
 0x10f   : > { %1366 = vmatprep.mubr.f32.mxu0 %v2266_v40  ;;  %v2375_v26 = vunpack.i.l.bf16 %v3213_v48  ;;  %v2267_v59 = vpop.trf.xlu1  ;;  %1698 = vmatprep.mubr.msk.f32.mxu1 %vm722_vm0, %v3084_v25  ;;  %v367_v33 = vand.u32 2147483647, %v310_v44  ;;  %v2338_v40 = vunpack.i.h.bf16 %v3135_v0  ;;  %v2412_v0 = vld [vmem:[%s2536_s20 + $0xa0] sm:$0xff]  ;;  %v2422_v44 = vld [vmem:[%s2536_s20 + $0x88] sm:$0xff]  ;;  %v2378_v43 = vunpack.i.h.bf16 %v3213_v48 }
 0x110   : > { %417 = vadd.xlane.f32.xlu1 %v359_v13  ;;  %v2268_v61 = vunpack.i.l.bf16 %v2267_v59  ;;  %v2271_v63 = vunpack.i.h.bf16 %v2267_v59  ;;  %1431 = vmatpush1.msra.mxu0 %v3060_v22  ;;  %v308_v22 = vsub.f32 %v2396_v42, %v2397_v52  ;;  %v369_v8 = vand.u32 2147483647, %v312_v35  ;;  %v2409_v59 = vld [vmem:[%s2541_s23 + $0x90] sm:$0xff] }
 0x111   : > { %423 = vadd.xlane.f32.xlu0 %v362_v54  ;;  %v2333_v54 = vunpack.i.h.bf16 %v3126_v57  ;;  %v313_v13 = vsub.f32 %v2406_v1, %v2407_v5  ;;  %v2415_v42 = vld [vmem:[%s2541_s23 + $0x70] sm:$0xff]  ;;  %v2430_v5 = vld [vmem:[%s2536_s20 + $0xa8] sm:$0xff] }
 0x112   : > { %1367 = vmatmul.mubr.f32.gmra.mrb[58].mxu0 %v2375_v26  ;;  %v3222_v38 = vpop.trf.xlu0  ;;  %1051 = vmatmul.mubr.f32.gmra.mrb[28].mxu1 %v2268_v61  ;;  %v365_v58 = vand.u32 2147483647, %v308_v22  ;;  %v2408_v26 = vld [vmem:[%s2536_s20 + $0x90] sm:$0xff]  ;;  %v314_v61 = vsub.f32 %v2410_v21, %v2411_v55  ;;  %v2434_v55 = vld [vmem:[%s2536_s20 + $0xb8] sm:$0xff] }
 0x113   : > { %1371 = vmatprep.mubr.f32.mxu0 %v2271_v63  ;;  %v2380_v25 = vunpack.i.l.bf16 %v3222_v38  ;;  %v2272_v14 = vpop.trf.xlu1  ;;  %1699 = vmatprep.mubr.msk.f32.mxu1 %vm722_vm0, %v3086_v36  ;;  %v370_v57 = vand.u32 2147483647, %v313_v13  ;;  %v2431_v13 = vld [vmem:[%s2541_s23 + $0xa8] sm:$0xff]  ;;  %v2383_v48 = vunpack.i.h.bf16 %v3222_v38 }
 0x114   : > { %v2273_v47 = vunpack.i.l.bf16 %v2272_v14  ;;  %v2276_v49 = vunpack.i.h.bf16 %v2272_v14  ;;  %447 = vadd.xlane.f32.xlu1 %v374_v4  ;;  %v371_v14 = vand.u32 2147483647, %v314_v61  ;;  %v2435_v61 = vld [vmem:[%s2541_s23 + $0xb8] sm:$0xff] }
 0x115   : > { %425 = vadd.xlane.f32.xlu0 %v363_v12  ;;  %v319_v12 = vsub.f32 %v2408_v26, %v2409_v59  ;;  %v2432_v59 = vld [vmem:[%s2536_s20 + $0xf0] sm:$0xff] }
 0x116   : > { %1372 = vmatmul.mubr.f32.gmra.mrb[60].mxu0 %v2380_v25  ;;  %v3231_v29 = vpop.trf.xlu0  ;;  %1056 = vmatmul.mubr.f32.gmra.mrb[30].mxu1 %v2273_v47  ;;  %v321_v25 = vsub.f32 %v2412_v0, %v2413_v45  ;;  %v2416_v47 = vld [vmem:[%s2536_s20 + $0xb0] sm:$0xff]  ;;  %v2436_v0 = vld [vmem:[%s2536_s20 + $0x100] sm:$0xff] }
 0x117   : > { %1376 = vmatprep.mubr.f32.mxu0 %v2276_v49  ;;  %v2385_v36 = vunpack.i.l.bf16 %v3231_v29  ;;  %v1173_v53 = vpop.trf.xlu1  ;;  %v376_v63 = vand.u32 2147483647, %v319_v12  ;;  %v2417_v49 = vld [vmem:[%s2541_s23 + $0xb0] sm:$0xff]  ;;  %v2437_v45 = vld [vmem:[%s2541_s23 + $0x100] sm:$0xff]  ;;  %v2388_v38 = vunpack.i.h.bf16 %v3231_v29 }
 0x118   : > { %v378_v22 = vand.u32 2147483647, %v321_v25  ;;  %v2433_v12 = vld [vmem:[%s2541_s23 + $0xf0] sm:$0xff]  ;;  %v333_v25 = vsub.f32 %v2436_v0, %v2437_v45  ;;  %v2452_v29 = vld [vmem:[%s2536_s20 + $0x140] sm:$0xff]  ;;  %v2465_v0 = vld [vmem:[%s2541_s23 + $0x148] sm:$0xff] }
 0x119   : > { %427 = vadd.xlane.f32.xlu0 %v364_v20  ;;  %451 = vadd.xlane.f32.xlu1 %v376_v63  ;;  %v2414_v20 = vld [vmem:[%s2536_s20 + $0x70] sm:$0xff]  ;;  %v324_v63 = vsub.f32 %v2434_v55, %v2435_v61  ;;  %v2462_v61 = vld [vmem:[%s2536_s20 + $0x138] sm:$0xff] }
 0x11a   : > { %1377 = vmatmul.mubr.f32.gmra.mrb[62].mxu0 %v2385_v36  ;;  %v315_v52 = vsub.f32 %v2414_v20, %v2415_v42  ;;  %v323_v36 = vsub.f32 %v2416_v47, %v2417_v49  ;;  %v2438_v20 = vld [vmem:[%s2536_s20 + $0xc8] sm:$0xff]  ;;  %v2441_v47 = vld [vmem:[%s2541_s23 + $0x110] sm:$0xff] }
 0x11b   : > { %1700 = vmatprep.mubr.msk.f32.mxu0 %vm722_vm0, %v1173_v53  ;;  %v1174_v56 = vpop.trf.xlu1  ;;  %v2439_v42 = vld [vmem:[%s2541_s23 + $0xc8] sm:$0xff] }
 0x11c   : > { %v372_v53 = vand.u32 2147483647, %v315_v52  ;;  %v380_v32 = vand.u32 2147483647, %v323_v36  ;;  %v326_v52 = vsub.f32 %v2438_v20, %v2439_v42  ;;  %v2467_v20 = vld [vmem:[%s2541_s23 + $0x158] sm:$0xff] }
 0x11d   : > { %429 = vadd.xlane.f32.xlu0 %v365_v58  ;;  %455 = vadd.xlane.f32.xlu1 %v378_v22  ;;  %v2418_v58 = vld [vmem:[%s2536_s20 + $0x78] sm:$0xff]  ;;  %v390_v22 = vand.u32 2147483647, %v333_v25 }
 0x11e   : > { %1447 = vmatmul.mubr.f32.vlgmr.msra.gmra.mrb[64].mxu0 %v2313_v16  ;;  %v316_v9 = vsub.f32 %v2418_v58, %v2419_v41  ;;  %v383_v36 = vand.u32 2147483647, %v326_v52  ;;  %v2443_v58 = vld [vmem:[%s2541_s23 + $0xd8] sm:$0xff] }
 0x11f   : > { %1701 = vmatprep.mubr.msk.f32.mxu0 %vm722_vm0, %v1174_v56  ;;  %v1175_v23 = vpop.trf.xlu1  ;;  %v2420_v56 = vld [vmem:[%s2536_s20 + $0xc0] sm:$0xff] }
 0x120   : > { %1702 = vmatprep.mubr.msk.f32.mxu1 %vm722_vm0, %v1175_v23  ;;  %v373_v17 = vand.u32 2147483647, %v316_v9 }
 0x121   : > { %431 = vadd.xlane.f32.xlu0 %v366_v19  ;;  %1457 = vmatmul.mubr.f32.vlgmr.msra.gmra.mrb[32].mxu1 %v2323_v3  ;;  %v2421_v19 = vld [vmem:[%s2541_s23 + $0xc0] sm:$0xff]  ;;  %v2423_v3 = vld [vmem:[%s2541_s23 + $0x88] sm:$0xff] }
 0x122   : > { %1452 = vmatmul.mubr.f32.gmra.mrb[66].mxu0 %v2318_v28  ;;  %459 = vadd.xlane.f32.xlu1 %v380_v32  ;;  %v325_v30 = vsub.f32 %v2420_v56, %v2421_v19  ;;  %v318_v23 = vsub.f32 %v2422_v44, %v2423_v3 }
 0x123   : > { %v1176_v62 = vpop.trf.xlu1 }
 0x124   : > { %1703 = vmatprep.mubr.msk.f32.mxu1 %vm722_vm0, %v1176_v62  ;;  %v382_v28 = vand.u32 2147483647, %v325_v30  ;;  %v375_v62 = vand.u32 2147483647, %v318_v23  ;;  %v2446_v30 = vld [vmem:[%s2536_s20 + $0xe8] sm:$0xff] }
 0x125   : > { %433 = vadd.xlane.f32.xlu0 %v367_v33  ;;  %1462 = vmatmul.mubr.f32.gmra.mrb[34].mxu1 %v2328_v10  ;;  %v2426_v10 = vld [vmem:[%s2536_s20 + $0x98] sm:$0xff] }
 0x126   : > { %463 = vadd.xlane.f32.xlu1 %v382_v28  ;;  %v2448_v28 = vld [vmem:[%s2536_s20 + $0x130] sm:$0xff] }
 0x127   : > { %v1177_v2 = vpop.trf.xlu1 }
 0x128   : > { %1704 = vmatprep.mubr.msk.f32.mxu1 %vm722_vm0, %v1177_v2  ;;  %v2428_v2 = vld [vmem:[%s2536_s20 + $0xe0] sm:$0xff] }
 0x129   : > { %435 = vadd.xlane.f32.xlu0 %v368_v6  ;;  %1467 = vmatmul.mubr.f32.gmra.mrb[36].mxu1 %v2333_v54  ;;  %v2427_v6 = vld [vmem:[%s2541_s23 + $0x98] sm:$0xff]  ;;  %v2429_v54 = vld [vmem:[%s2541_s23 + $0xe0] sm:$0xff] }
 0x12a   : > { %v320_v50 = vsub.f32 %v2426_v10, %v2427_v6  ;;  %467 = vadd.xlane.f32.xlu1 %v384_v37  ;;  %v2453_v6 = vld [vmem:[%s2541_s23 + $0x140] sm:$0xff] }
 0x12b   : > { %v1178_v7 = vpop.trf.xlu1 }
 0x12c   : > { %1705 = vmatprep.mubr.msk.f32.mxu1 %vm722_vm0, %v1178_v7  ;;  %v377_v1 = vand.u32 2147483647, %v320_v50  ;;  %v322_v7 = vsub.f32 %v2430_v5, %v2431_v13  ;;  %v341_v50 = vsub.f32 %v2452_v29, %v2453_v6 }
 0x12d   : > { %437 = vadd.xlane.f32.xlu0 %v369_v8  ;;  %1472 = vmatmul.mubr.f32.gmra.mrb[38].mxu1 %v2338_v40  ;;  %v329_v8 = vsub.f32 %v2428_v2, %v2429_v54 }
 0x12e   : > { %v379_v21 = vand.u32 2147483647, %v322_v7  ;;  %v398_v54 = vand.u32 2147483647, %v341_v50  ;;  %v2458_v7 = vld [vmem:[%s2536_s20 + $0x118] sm:$0xff] }
 0x12f   : > { %v1179_v11 = vpop.trf.xlu1  ;;  %v386_v40 = vand.u32 2147483647, %v329_v8  ;;  %v2456_v8 = vld [vmem:[%s2536_s20 + $0x150] sm:$0xff] }
 0x130   : > { %1706 = vmatprep.mubr.msk.f32.mxu1 %vm722_vm0, %v1179_v11 }
 0x131   : > { %439 = vadd.xlane.f32.xlu0 %v370_v57  ;;  %1477 = vmatmul.mubr.f32.gmra.mrb[40].mxu1 %v2343_v34  ;;  %v331_v57 = vsub.f32 %v2432_v59, %v2433_v12  ;;  %v2460_v12 = vld [vmem:[%s2536_s20 + $0x128] sm:$0xff] }
 0x132   : > { %471 = vadd.xlane.f32.xlu1 %v386_v40  ;;  %v2459_v40 = vld [vmem:[%s2541_s23 + $0x118] sm:$0xff] }
 0x133   : > { %v1180_v4 = vpop.trf.xlu1  ;;  %v388_v11 = vand.u32 2147483647, %v331_v57  ;;  %v2461_v57 = vld [vmem:[%s2541_s23 + $0x128] sm:$0xff] }
 0x134   : > { %1707 = vmatprep.mubr.msk.f32.mxu1 %vm722_vm0, %v1180_v4 }
 0x135   : > { %441 = vadd.xlane.f32.xlu0 %v371_v14  ;;  %1482 = vmatmul.mubr.f32.gmra.mrb[42].mxu1 %v2348_v27  ;;  %v381_v14 = vand.u32 2147483647, %v324_v63  ;;  %v2440_v27 = vld [vmem:[%s2536_s20 + $0x110] sm:$0xff]  ;;  %v2463_v63 = vld [vmem:[%s2541_s23 + $0x138] sm:$0xff] }
 0x136   : > { %475 = vadd.xlane.f32.xlu1 %v388_v11  ;;  %v335_v49 = vsub.f32 %v2440_v27, %v2441_v47  ;;  %v340_v11 = vsub.f32 %v2462_v61, %v2463_v63 }
 0x137   : > { %v1181_v16 = vpop.trf.xlu1 }
 0x138   : > { %1708 = vmatprep.mubr.msk.f32.mxu1 %vm722_vm0, %v1181_v16  ;;  %v392_v9 = vand.u32 2147483647, %v335_v49  ;;  %v2444_v16 = vld [vmem:[%s2536_s20 + $0x120] sm:$0xff] }
 0x139   : > { %443 = vadd.xlane.f32.xlu0 %v372_v53  ;;  %1487 = vmatmul.mubr.f32.gmra.mrb[44].mxu1 %v2353_v24  ;;  %v2442_v53 = vld [vmem:[%s2536_s20 + $0xd8] sm:$0xff]  ;;  %v2445_v24 = vld [vmem:[%s2541_s23 + $0x120] sm:$0xff] }
 0x13a   : > { %479 = vadd.xlane.f32.xlu1 %v390_v22  ;;  %v328_v41 = vsub.f32 %v2442_v53, %v2443_v58  ;;  %v337_v56 = vsub.f32 %v2444_v16, %v2445_v24  ;;  %v2470_v58 = vld [vmem:[%s2536_s20 + $0x168] sm:$0xff] }
 0x13b   : > { %v1182_v33 = vpop.trf.xlu1 }
 0x13c   : > { %1709 = vmatprep.mubr.msk.f32.mxu1 %vm722_vm0, %v1182_v33  ;;  %v385_v19 = vand.u32 2147483647, %v328_v41  ;;  %v394_v3 = vand.u32 2147483647, %v337_v56  ;;  %v2449_v33 = vld [vmem:[%s2541_s23 + $0x130] sm:$0xff]  ;;  %v2471_v41 = vld [vmem:[%s2541_s23 + $0x168] sm:$0xff] }
 0x13d   : > { %445 = vadd.xlane.f32.xlu0 %v373_v17  ;;  %1492 = vmatmul.mubr.f32.gmra.mrb[46].mxu1 %v2358_v60  ;;  %v2447_v17 = vld [vmem:[%s2541_s23 + $0xe8] sm:$0xff]  ;;  %v339_v60 = vsub.f32 %v2448_v28, %v2449_v33  ;;  %v2472_v56 = vld [vmem:[%s2536_s20 + $0x170] sm:$0xff]  ;;  %v2475_v28 = vld [vmem:[%s2541_s23 + $0x178] sm:$0xff] }
 0x13e   : > { %483 = vadd.xlane.f32.xlu1 %v392_v9  ;;  %v330_v44 = vsub.f32 %v2446_v30, %v2447_v17  ;;  %v346_v9 = vsub.f32 %v2470_v58, %v2471_v41 }
 0x13f   : > { %v1183_v35 = vpop.trf.xlu1  ;;  %v396_v10 = vand.u32 2147483647, %v339_v60 }
 0x140   : > { %1710 = vmatprep.mubr.msk.f32.mxu1 %vm722_vm0, %v1183_v35  ;;  %v387_v46 = vand.u32 2147483647, %v330_v44  ;;  %v2454_v35 = vld [vmem:[%s2536_s20 + $0x108] sm:$0xff]  ;;  %v403_v24 = vand.u32 2147483647, %v346_v9 }
 0x141   : > { %449 = vadd.xlane.f32.xlu0 %v375_v62  ;;  %1497 = vmatmul.mubr.f32.gmra.mrb[48].mxu1 %v2363_v39  ;;  %v332_v62 = vsub.f32 %v2450_v15, %v2451_v18  ;;  %v2455_v39 = vld [vmem:[%s2541_s23 + $0x108] sm:$0xff]  ;;  %v2476_v15 = vld [vmem:[%s2536_s20 + $0x180] sm:$0xff] }
 0x142   : > { %487 = vadd.xlane.f32.xlu1 %v394_v3  ;;  %v334_v2 = vsub.f32 %v2454_v35, %v2455_v39  ;;  %v2477_v18 = vld [vmem:[%s2541_s23 + $0x180] sm:$0xff]  ;;  %v2479_v35 = vld [vmem:[%s2541_s23 + $0x188] sm:$0xff] }
 0x143   : > { %v1184_v26 = vpop.trf.xlu1  ;;  %v389_v37 = vand.u32 2147483647, %v332_v62  ;;  %v349_v62 = vsub.f32 %v2476_v15, %v2477_v18 }
 0x144   : > { %1711 = vmatprep.mubr.msk.f32.mxu1 %vm722_vm0, %v1184_v26  ;;  %v391_v13 = vand.u32 2147483647, %v334_v2  ;;  %v336_v26 = vsub.f32 %v2458_v7, %v2459_v40 }
 0x145   : > { %453 = vadd.xlane.f32.xlu0 %v377_v1  ;;  %1502 = vmatmul.mubr.f32.gmra.mrb[50].mxu1 %v2368_v31  ;;  %v2457_v1 = vld [vmem:[%s2541_s23 + $0x150] sm:$0xff] }
 0x146   : > { %491 = vadd.xlane.f32.xlu1 %v396_v10  ;;  %v343_v5 = vsub.f32 %v2456_v8, %v2457_v1  ;;  %v393_v59 = vand.u32 2147483647, %v336_v26 }
 0x147   : > { %v1185_v34 = vpop.trf.xlu1 }
 0x148   : > { %1712 = vmatprep.mubr.msk.f32.mxu1 %vm722_vm0, %v1185_v34  ;;  %v400_v31 = vand.u32 2147483647, %v343_v5  ;;  %v397_v34 = vand.u32 2147483647, %v340_v11 }
 0x149   : > { %457 = vadd.xlane.f32.xlu0 %v379_v21  ;;  %1507 = vmatmul.mubr.f32.gmra.mrb[52].mxu1 %v2373_v51  ;;  %v338_v21 = vsub.f32 %v2460_v12, %v2461_v57  ;;  %v2464_v51 = vld [vmem:[%s2536_s20 + $0x148] sm:$0xff] }
 0x14a   : > { %495 = vadd.xlane.f32.xlu1 %v398_v54  ;;  %v342_v45 = vsub.f32 %v2464_v51, %v2465_v0  ;;  %v406_v54 = vand.u32 2147483647, %v349_v62 }
 0x14b   : > { %v1186_v4 = vpop.trf.xlu1  ;;  %v395_v55 = vand.u32 2147483647, %v338_v21 }
 0x14c   : > { %1713 = vmatprep.mubr.msk.f32.mxu1 %vm722_vm0, %v1186_v4  ;;  %v399_v25 = vand.u32 2147483647, %v342_v45  ;;  %v2468_v4 = vld [vmem:[%s2536_s20 + $0x160] sm:$0xff] }
 0x14d   : > { %461 = vadd.xlane.f32.xlu0 %v381_v14  ;;  %1512 = vmatmul.mubr.f32.gmra.mrb[54].mxu1 %v2378_v43  ;;  %v2466_v14 = vld [vmem:[%s2536_s20 + $0x158] sm:$0xff]  ;;  %v2469_v43 = vld [vmem:[%s2541_s23 + $0x160] sm:$0xff] }
 0x14e   : > { %499 = vadd.xlane.f32.xlu1 %v400_v31  ;;  %v344_v42 = vsub.f32 %v2466_v14, %v2467_v20  ;;  %v345_v27 = vsub.f32 %v2468_v4, %v2469_v43 }
 0x14f   : > { %v1187_v32 = vpop.trf.xlu1 }
 0x150   : > { %1714 = vmatprep.mubr.msk.f32.mxu1 %vm722_vm0, %v1187_v32  ;;  %v401_v22 = vand.u32 2147483647, %v344_v42  ;;  %v402_v53 = vand.u32 2147483647, %v345_v27 }
 0x151   : > { %465 = vadd.xlane.f32.xlu0 %v383_v36  ;;  %1517 = vmatmul.mubr.f32.gmra.mrb[56].mxu1 %v2383_v48 }
 0x153   : > { %v1188_v23 = vpop.trf.xlu1 }
 0x154   : > { %1715 = vmatprep.mubr.msk.f32.mxu1 %vm722_vm0, %v1188_v23 }
 0x155   : > { %469 = vadd.xlane.f32.xlu0 %v385_v19  ;;  %1522 = vmatmul.mubr.f32.gmra.mrb[58].mxu1 %v2388_v38  ;;  %v2473_v19 = vld [vmem:[%s2541_s23 + $0x170] sm:$0xff]  ;;  %v2474_v38 = vld [vmem:[%s2536_s20 + $0x178] sm:$0xff] }
 0x156   : > { %v347_v30 = vsub.f32 %v2472_v56, %v2473_v19  ;;  %v348_v33 = vsub.f32 %v2474_v38, %v2475_v28 }
 0x158   : > { %v404_v23 = vand.u32 2147483647, %v347_v30  ;;  %v405_v29 = vand.u32 2147483647, %v348_v33 }
 0x159   : > { %473 = vadd.xlane.f32.xlu0 %v387_v46 }
 0x15d   : > { %477 = vadd.xlane.f32.xlu0 %v389_v37  ;;  %v2478_v37 = vld [vmem:[%s2536_s20 + $0x188] sm:$0xff] }
 0x15e   : > { %v350_v39 = vsub.f32 %v2478_v37, %v2479_v35 }
 0x161   : > { %481 = vadd.xlane.f32.xlu0 %v391_v13  ;;  %v407_v13 = vand.u32 2147483647, %v350_v39 }
 0x165   : > { %485 = vadd.xlane.f32.xlu0 %v393_v59 }
 0x169   : > { %489 = vadd.xlane.f32.xlu0 %v395_v55 }
 0x16d   : > { %493 = vadd.xlane.f32.xlu0 %v397_v34 }
 0x171   : > { %v1750_v52 = vpop.f32.mrb[0].mxu0  ;;  %497 = vadd.xlane.f32.xlu0 %v399_v25 }
 0x172   : > { %v1751_v47 = vpop.f32.mrb[1].mxu0 }
 0x173   : > { %v3338_v49 = vadd.f32 %v1751_v47, %v1750_v52 }
 0x175   : > { %v1753_v36 = vpop.f32.mrb[2].mxu0  ;;  %501 = vadd.xlane.f32.xlu0 %v401_v22 }
 0x176   : > { %v1754_v32 = vpop.f32.mrb[3].mxu0 }
 0x177   : > { %v3342_v48 = vadd.f32 %v1754_v32, %v1753_v36 }
 0x179   : > { %v1756_v16 = vpop.f32.mrb[4].mxu0  ;;  %503 = vadd.xlane.f32.xlu0 %v402_v53 }
 0x17a   : > { %v1757_v17 = vpop.f32.mrb[5].mxu0 }
 0x17b   : > { %v3346_v44 = vadd.f32 %v1757_v17, %v1756_v16 }
 0x17d   : > { %v1759_v3 = vpop.f32.mrb[6].mxu0  ;;  %505 = vadd.xlane.f32.xlu0 %v403_v24 }
 0x17e   : > { %v1760_v60 = vpop.f32.mrb[7].mxu0 }
 0x17f   : > { %v3350_v46 = vadd.f32 %v1760_v60, %v1759_v3  ;;  %v416_v60 = vpop.xlane.xlu0 %415 }
 0x181   : > { %v1762_v10 = vpop.f32.mrb[8].mxu0  ;;  %507 = vadd.xlane.f32.xlu0 %v404_v23 }
 0x182   : > { %v1763_v6 = vpop.f32.mrb[9].mxu0 }
 0x183   : > { %v3354_v50 = vadd.f32 %v1763_v6, %v1762_v10  ;;  %v420_v37 = vpop.xlane.xlu0 %419 }
 0x185   : > { %v1765_v2 = vpop.f32.mrb[10].mxu0  ;;  %509 = vadd.xlane.f32.xlu0 %v405_v29 }
 0x186   : > { %v1766_v8 = vpop.f32.mrb[11].mxu0 }
 0x187   : > { %v3358_v1 = vadd.f32 %v1766_v8, %v1765_v2 }
 0x189   : > { %v1768_v5 = vpop.f32.mrb[12].mxu0  ;;  %511 = vadd.xlane.f32.xlu0 %v406_v54 }
 0x18a   : > { %v1769_v7 = vpop.f32.mrb[13].mxu0 }
 0x18b   : > { %v3360_v40 = vadd.f32 %v1769_v7, %v1768_v5 }
 0x18d   : > { %v1771_v26 = vpop.f32.mrb[14].mxu0  ;;  %513 = vadd.xlane.f32.xlu0 %v407_v13 }
 0x18e   : > { %v1772_v31 = vpop.f32.mrb[15].mxu0 }
 0x18f   : > { %v3362_v59 = vadd.f32 %v1772_v31, %v1771_v26 }
 0x191   : > { %v1774_v12 = vpop.f32.mrb[16].mxu0 }
 0x192   : > { %v1775_v57 = vpop.f32.mrb[17].mxu0 }
 0x193   : > { %v3364_v21 = vadd.f32 %v1775_v57, %v1774_v12 }
 0x195   : > { %v1777_v55 = vpop.f32.mrb[18].mxu0 }
 0x196   : > { %v1778_v61 = vpop.f32.mrb[19].mxu0 }
 0x197   : > { %v3366_v63 = vadd.f32 %v1778_v61, %v1777_v55 }
 0x199   : > { %v1780_v11 = vpop.f32.mrb[20].mxu0 }
 0x19a   : > { %v1781_v34 = vpop.f32.mrb[21].mxu0  ;;  %v422_v31 = vpop.xlane.xlu0 %421 }
 0x19b   : > { %v3368_v51 = vadd.f32 %v1781_v34, %v1780_v11 }
 0x19d   : > { %v1783_v0 = vpop.f32.mrb[22].mxu0 }
 0x19e   : > { %v1784_v45 = vpop.f32.mrb[23].mxu0 }
 0x19f   : > { %v3370_v25 = vadd.f32 %v1784_v45, %v1783_v0  ;;  %v424_v0 = vpop.xlane.xlu0 %423 }
 0x1a1   : > { %v1786_v14 = vpop.f32.mrb[24].mxu0 }
 0x1a2   : > { %v1787_v20 = vpop.f32.mrb[25].mxu0 }
 0x1a3   : > { %v3372_v42 = vadd.f32 %v1787_v20, %v1786_v14 }
 0x1a5   : > { %v1789_v52 = vpop.f32.mrb[26].mxu0 }
 0x1a6   : > { %v1790_v22 = vpop.f32.mrb[27].mxu0 }
 0x1a7   : > { %v3374_v4 = vadd.f32 %v1790_v22, %v1789_v52 }
 0x1a9   : > { %v1792_v43 = vpop.f32.mrb[28].mxu0 }
 0x1aa   : > { %v1793_v27 = vpop.f32.mrb[29].mxu0 }
 0x1ab   : > { %v3376_v47 = vadd.f32 %v1793_v27, %v1792_v43 }
 0x1ad   : > { %v1795_v36 = vpop.f32.mrb[30].mxu0  ;;  %v982_v53 = vpop.f32.mrb[0].mxu1 }
 0x1ae   : > { %v1796_v58 = vpop.f32.mrb[31].mxu0  ;;  %v3379_v41 = vadd.f32 %v3338_v49, %v982_v53  ;;  %v984_v9 = vpop.f32.mrb[1].mxu1 }
 0x1af   : > { %v3381_v32 = vadd.f32 %v1796_v58, %v1795_v36  ;;  %v426_v58 = vpop.xlane.xlu0 %425 }
 0x1b1   : > { %v1830_v16 = vpop.f32.mrb[32].mxu0  ;;  %v987_v24 = vpop.f32.mrb[2].mxu1 }
 0x1b2   : > { %v1831_v56 = vpop.f32.mrb[33].mxu0  ;;  %v3384_v19 = vadd.f32 %v3342_v48, %v987_v24  ;;  %v989_v30 = vpop.f32.mrb[3].mxu1 }
 0x1b3   : > { %v3386_v17 = vadd.f32 %v1831_v56, %v1830_v16 }
 0x1b5   : > { %v1833_v3 = vpop.f32.mrb[34].mxu0  ;;  %v992_v23 = vpop.f32.mrb[4].mxu1 }
 0x1b6   : > { %v1834_v38 = vpop.f32.mrb[35].mxu0  ;;  %v3389_v28 = vadd.f32 %v3346_v44, %v992_v23  ;;  %v994_v49 = vpop.f32.mrb[5].mxu1 }
 0x1b7   : > { %v3391_v33 = vadd.f32 %v1834_v38, %v1833_v3  ;;  %v418_v3 = vpop.xlane.xlu1 %417  ;;  %v428_v38 = vpop.xlane.xlu0 %427 }
 0x1b9   : > { %v1836_v15 = vpop.f32.mrb[36].mxu0  ;;  %v997_v18 = vpop.f32.mrb[6].mxu1 }
 0x1ba   : > { %v1837_v62 = vpop.f32.mrb[37].mxu0  ;;  %v3394_v10 = vadd.f32 %v3350_v46, %v997_v18  ;;  %v999_v48 = vpop.f32.mrb[7].mxu1 }
 0x1bb   : > { %v3396_v29 = vadd.f32 %v1837_v62, %v1836_v15 }
 0x1bd   : > { %v1839_v6 = vpop.f32.mrb[38].mxu0  ;;  %v1002_v35 = vpop.f32.mrb[8].mxu1 }
 0x1be   : > { %v1840_v39 = vpop.f32.mrb[39].mxu0  ;;  %v3399_v44 = vadd.f32 %v3354_v50, %v1002_v35  ;;  %v1004_v2 = vpop.f32.mrb[9].mxu1 }
 0x1bf   : > { %v3401_v54 = vadd.f32 %v1840_v39, %v1839_v6 }
 0x1c1   : > { %v1842_v8 = vpop.f32.mrb[40].mxu0  ;;  %v1007_v5 = vpop.f32.mrb[10].mxu1 }
 0x1c2   : > { %v1843_v13 = vpop.f32.mrb[41].mxu0  ;;  %v3404_v7 = vadd.f32 %v3358_v1, %v1007_v5  ;;  %v1009_v46 = vpop.f32.mrb[11].mxu1 }
 0x1c3   : > { %v3406_v26 = vadd.f32 %v1843_v13, %v1842_v8  ;;  %v430_v13 = vpop.xlane.xlu0 %429 }
 0x1c5   : > { %v1845_v12 = vpop.f32.mrb[42].mxu0  ;;  %v1012_v57 = vpop.f32.mrb[12].mxu1 }
 0x1c6   : > { %v1846_v55 = vpop.f32.mrb[43].mxu0  ;;  %v3409_v61 = vadd.f32 %v3360_v40, %v1012_v57  ;;  %v1014_v50 = vpop.f32.mrb[13].mxu1 }
 0x1c7   : > { %v3411_v11 = vadd.f32 %v1846_v55, %v1845_v12 }
 0x1c9   : > { %v1848_v34 = vpop.f32.mrb[44].mxu0  ;;  %v1017_v45 = vpop.f32.mrb[14].mxu1 }
 0x1ca   : > { %v1849_v14 = vpop.f32.mrb[45].mxu0  ;;  %v3414_v1 = vadd.f32 %v3362_v59, %v1017_v45  ;;  %v1019_v20 = vpop.f32.mrb[15].mxu1 }
 0x1cb   : > { %v3416_v52 = vadd.f32 %v1849_v14, %v1848_v34  ;;  %v432_v45 = vpop.xlane.xlu0 %431 }
 0x1cd   : > { %v1851_v22 = vpop.f32.mrb[46].mxu0  ;;  %v1022_v43 = vpop.f32.mrb[16].mxu1 }
 0x1ce   : > { %v1852_v27 = vpop.f32.mrb[47].mxu0  ;;  %v3419_v36 = vadd.f32 %v3364_v21, %v1022_v43  ;;  %v1024_v40 = vpop.f32.mrb[17].mxu1  ;;  %v529_v21 = vadd.f32 %v418_v3, %v416_v60 }
 0x1cf   : > { %v3421_v53 = vadd.f32 %v1852_v27, %v1851_v22 }
 0x1d1   : > { %v1854_v9 = vpop.f32.mrb[48].mxu0  ;;  %v1027_v16 = vpop.f32.mrb[18].mxu1 }
 0x1d2   : > { %v1855_v24 = vpop.f32.mrb[49].mxu0  ;;  %v3424_v56 = vadd.f32 %v3366_v63, %v1027_v16  ;;  %v1029_v59 = vpop.f32.mrb[19].mxu1  ;;  %v530_v63 = vadd.f32 %v529_v21, %v420_v37 }
 0x1d3   : > { %v3426_v30 = vadd.f32 %v1855_v24, %v1854_v9  ;;  %v434_v59 = vpop.xlane.xlu0 %433 }
 0x1d4   : > { %v531_v57 = vadd.f32 %v530_v63, %v422_v31 }
 0x1d5   : > { %v1857_v23 = vpop.f32.mrb[50].mxu0  ;;  %v1032_v49 = vpop.f32.mrb[20].mxu1 }
 0x1d6   : > { %v1858_v15 = vpop.f32.mrb[51].mxu0  ;;  %v3429_v18 = vadd.f32 %v3368_v51, %v1032_v49  ;;  %v1034_v62 = vpop.f32.mrb[21].mxu1 }
 0x1d7   : > { %v3431_v48 = vadd.f32 %v1858_v15, %v1857_v23  ;;  %v436_v62 = vpop.xlane.xlu0 %435 }
 0x1d9   : > { %v1860_v6 = vpop.f32.mrb[52].mxu0  ;;  %v1037_v35 = vpop.f32.mrb[22].mxu1 }
 0x1da   : > { %v1861_v39 = vpop.f32.mrb[53].mxu0  ;;  %v3434_v2 = vadd.f32 %v3370_v25, %v1037_v35  ;;  %v1039_v8 = vpop.f32.mrb[23].mxu1  ;;  %v532_v25 = vadd.f32 %v531_v57, %v424_v0 }
 0x1db   : > { %v3436_v5 = vadd.f32 %v1861_v39, %v1860_v6 }
 0x1dc   : > { %v533_v9 = vadd.f32 %v532_v25, %v426_v58 }
 0x1dd   : > { %v1863_v46 = vpop.f32.mrb[54].mxu0  ;;  %v1042_v12 = vpop.f32.mrb[24].mxu1 }
 0x1de   : > { %v1864_v60 = vpop.f32.mrb[55].mxu0  ;;  %v3439_v51 = vadd.f32 %v3372_v42, %v1042_v12  ;;  %v1044_v55 = vpop.f32.mrb[25].mxu1 }
 0x1df   : > { %v3441_v50 = vadd.f32 %v1864_v60, %v1863_v46  ;;  %v438_v12 = vpop.xlane.xlu0 %437  ;;  %v2481_v60 = vld [vmem:[%s2541_s23 + $0x190] sm:$0xff] }
 0x1e1   : > { %v1866_v34 = vpop.f32.mrb[56].mxu0  ;;  %v1047_v37 = vpop.f32.mrb[26].mxu1 }
 0x1e2   : > { %v1867_v14 = vpop.f32.mrb[57].mxu0  ;;  %v3444_v20 = vadd.f32 %v3374_v4, %v1047_v37  ;;  %v1049_v22 = vpop.f32.mrb[27].mxu1  ;;  %v534_v4 = vadd.f32 %v533_v9, %v428_v38 }
 0x1e3   : > { %v3446_v43 = vadd.f32 %v1867_v14, %v1866_v34 }
 0x1e4   : > { %v535_v6 = vadd.f32 %v534_v4, %v430_v13 }
 0x1e5   : > { %v1869_v27 = vpop.f32.mrb[58].mxu0  ;;  %v1052_v40 = vpop.f32.mrb[28].mxu1 }
 0x1e6   : > { %v1870_v31 = vpop.f32.mrb[59].mxu0  ;;  %v3449_v42 = vadd.f32 %v3376_v47, %v1052_v40  ;;  %v1054_v16 = vpop.f32.mrb[29].mxu1  ;;  %v536_v46 = vadd.f32 %v535_v6, %v432_v45  ;;  %v2482_v40 = vld [vmem:[%s2536_s20 + $0x198] sm:$0xff] }
 0x1e7   : > { %v3451_v24 = vadd.f32 %v1870_v31, %v1869_v27  ;;  %v2483_v31 = vld [vmem:[%s2541_s23 + $0x198] sm:$0xff] }
 0x1e8   : > { %v537_v22 = vadd.f32 %v536_v46, %v434_v59  ;;  %v352_v9 = vsub.f32 %v2482_v40, %v2483_v31 }
 0x1e9   : > { %v1872_v3 = vpop.f32.mrb[60].mxu0  ;;  %v1057_v23 = vpop.f32.mrb[30].mxu1 }
 0x1ea   : > { %v1873_v0 = vpop.f32.mrb[61].mxu0  ;;  %v3454_v49 = vadd.f32 %v3381_v32, %v1057_v23  ;;  %v1059_v15 = vpop.f32.mrb[31].mxu1  ;;  %v2480_v32 = vld [vmem:[%s2536_s20 + $0x190] sm:$0xff]  ;;  %v538_v59 = vadd.f32 %v537_v22, %v436_v62 }
 0x1eb   : > { %v3456_v21 = vadd.f32 %v1873_v0, %v1872_v3  ;;  %v351_v57 = vsub.f32 %v2480_v32, %v2481_v60  ;;  %v440_v3 = vpop.xlane.xlu0 %439  ;;  %v2487_v60 = vld [vmem:[%s2541_s23 + $0x1a8] sm:$0xff]  ;;  %v2488_v22 = vld [vmem:[%s2536_s20 + $0x1b0] sm:$0xff] }
 0x1ec   : > { %v539_v46 = vadd.f32 %v538_v59, %v438_v12 }
 0x1ed   : > { %v1875_v58 = vpop.f32.mrb[62].mxu0  ;;  %v408_v0 = vand.u32 2147483647, %v351_v57 }
 0x1ee   : > { %v1876_v47 = vpop.f32.mrb[63].mxu0 }
 0x1ef   : > { %v3458_v35 = vadd.f32 %v1876_v47, %v1875_v58  ;;  %v2484_v58 = vld [vmem:[%s2536_s20 + $0x1a0] sm:$0xff] }
 0x1f0   : > { %v2485_v47 = vld [vmem:[%s2541_s23 + $0x1a0] sm:$0xff] }
 0x1f1   : > { %v1448_v39 = vpop.f32.mrb[64].mxu0 }
 0x1f2   : > { %v1449_v63 = vadd.f32 %v3386_v17, %v1448_v39  ;;  %v1450_v8 = vpop.f32.mrb[65].mxu0 }
 0x1f4   : > { %v1527_v38 = vsub.f32 %v3379_v41, %v1449_v63  ;;  %v1458_v34 = vpop.f32.mrb[32].mxu1 }
 0x1f5   : > { %v1453_v55 = vpop.f32.mrb[66].mxu0  ;;  %v1459_v14 = vadd.f32 %v3396_v29, %v1458_v34  ;;  %v1460_v17 = vpop.f32.mrb[33].mxu1 }
 0x1f6   : > { %v1543_v37 = vand.u32 2147483647, %v1527_v38  ;;  %v3465_v13 = vadd.f32 %v3391_v33, %v1453_v55  ;;  %v1455_v25 = vpop.f32.mrb[67].mxu0  ;;  %v442_v38 = vpop.xlane.xlu0 %441 }
 0x1f7   : > { %v1529_v27 = vsub.f32 %v3389_v28, %v1459_v14  ;;  %v353_v28 = vsub.f32 %v2484_v58, %v2485_v47  ;;  %v540_v25 = vadd.f32 %v539_v46, %v440_v3 }
 0x1f8   : > { %v1559_v45 = vmul.f32 0.00048828125, %v1543_v37  ;;  %v1528_v41 = vsub.f32 %v3384_v19, %v3465_v13  ;;  %v1463_v16 = vpop.f32.mrb[34].mxu1 }
 0x1f9   : > { %v1545_v33 = vand.u32 2147483647, %v1529_v27  ;;  %v1464_v23 = vadd.f32 %v3401_v54, %v1463_v16  ;;  %v1465_v29 = vpop.f32.mrb[35].mxu1  ;;  %v409_v54 = vand.u32 2147483647, %v352_v9 }
 0x1fa   : > { %1575 = vadd.xlane.f32.xlu0 %v1559_v45  ;;  %v2489_v45 = vld [vmem:[%s2541_s23 + $0x1b0] sm:$0xff]  ;;  %v444_v40 = vpop.xlane.xlu0 %443  ;;  %v2490_v29 = vld [vmem:[%s2536_s20 + $0x1b8] sm:$0xff] }
 0x1fb   : > { %v1561_v4 = vmul.f32 0.00048828125, %v1545_v33  ;;  %v1530_v15 = vsub.f32 %v3394_v10, %v1464_v23  ;;  %v2486_v10 = vld [vmem:[%s2536_s20 + $0x1a8] sm:$0xff]  ;;  %v541_v33 = vadd.f32 %v540_v25, %v442_v38  ;;  %v2493_v38 = vld [vmem:[%s2541_s23 + $0x1c0] sm:$0xff]  ;;  %v1544_v25 = vand.u32 2147483647, %v1528_v41 }
 0x1fc   : > { %v1468_v6 = vpop.f32.mrb[36].mxu1  ;;  %v354_v57 = vsub.f32 %v2486_v10, %v2487_v60  ;;  %v448_v10 = vpop.xlane.xlu1 %447 }
 0x1fd   : > { %v1546_v39 = vand.u32 2147483647, %v1530_v15  ;;  %v1469_v63 = vadd.f32 %v3406_v26, %v1468_v6  ;;  %v1470_v8 = vpop.f32.mrb[37].mxu1  ;;  %1579 = vadd.xlane.f32.xlu1 %v1561_v4  ;;  %v410_v26 = vand.u32 2147483647, %v353_v28  ;;  %v542_v47 = vadd.f32 %v541_v33, %v444_v40 }
 0x1fe   : > { %515 = vadd.xlane.f32.xlu0 %v408_v0  ;;  %v2491_v0 = vld [vmem:[%s2541_s23 + $0x1b8] sm:$0xff]  ;;  %v446_v28 = vpop.xlane.xlu0 %445  ;;  %v1560_v40 = vmul.f32 0.00048828125, %v1544_v25 }
 0x1ff   : > { %v1562_v62 = vmul.f32 0.00048828125, %v1546_v39  ;;  %v1531_v32 = vsub.f32 %v3399_v44, %v1469_v63  ;;  %v355_v44 = vsub.f32 %v2488_v22, %v2489_v45 }
 0x200   : > { %v1473_v55 = vpop.f32.mrb[38].mxu1 }
 0x201   : > { %v1547_v34 = vand.u32 2147483647, %v1531_v32  ;;  %v1474_v37 = vadd.f32 %v3411_v11, %v1473_v55  ;;  %v1475_v14 = vpop.f32.mrb[39].mxu1  ;;  %1581 = vadd.xlane.f32.xlu1 %v1562_v62  ;;  %v411_v11 = vand.u32 2147483647, %v354_v57  ;;  %v543_v32 = vadd.f32 %v542_v47, %v446_v28 }
 0x202   : > { %517 = vadd.xlane.f32.xlu0 %v409_v54 }
 0x203   : > { %v1563_v17 = vmul.f32 0.00048828125, %v1547_v34  ;;  %v1532_v12 = vsub.f32 %v3404_v7, %v1474_v37  ;;  %v356_v7 = vsub.f32 %v2490_v29, %v2491_v0  ;;  %v450_v34 = vpop.xlane.xlu0 %449 }
 0x204   : > { %v1478_v27 = vpop.f32.mrb[40].mxu1 }
 0x205   : > { %v1548_v31 = vand.u32 2147483647, %v1532_v12  ;;  %v1479_v9 = vadd.f32 %v3416_v52, %v1478_v27  ;;  %v1480_v16 = vpop.f32.mrb[41].mxu1  ;;  %1583 = vadd.xlane.f32.xlu1 %v1563_v17  ;;  %v412_v52 = vand.u32 2147483647, %v355_v44  ;;  %v452_v27 = vpop.xlane.xlu1 %451 }
 0x206   : > { %519 = vadd.xlane.f32.xlu0 %v410_v26  ;;  %v544_v26 = vadd.f32 %v543_v32, %v448_v10 }
 0x207   : > { %v1564_v23 = vmul.f32 0.00048828125, %v1548_v31  ;;  %v1533_v3 = vsub.f32 %v3409_v61, %v1479_v9  ;;  %v413_v61 = vand.u32 2147483647, %v356_v7 }
 0x208   : > { %v1483_v59 = vpop.f32.mrb[42].mxu1  ;;  %v545_v44 = vadd.f32 %v544_v26, %v450_v34 }
 0x209   : > { %v1549_v4 = vand.u32 2147483647, %v1533_v3  ;;  %v1484_v15 = vadd.f32 %v3421_v53, %v1483_v59  ;;  %v1485_v58 = vpop.f32.mrb[43].mxu1  ;;  %1585 = vadd.xlane.f32.xlu1 %v1564_v23  ;;  %v2492_v53 = vld [vmem:[%s2536_s20 + $0x1c0] sm:$0xff]  ;;  %v456_v7 = vpop.xlane.xlu1 %455 }
 0x20a   : > { %521 = vadd.xlane.f32.xlu0 %v411_v11  ;;  %v357_v62 = vsub.f32 %v2492_v53, %v2493_v38  ;;  %v546_v41 = vadd.f32 %v545_v44, %v452_v27 }
 0x20b   : > { %v1565_v6 = vmul.f32 0.00048828125, %v1549_v4  ;;  %v1534_v39 = vsub.f32 %v3414_v1, %v1484_v15 }
 0x20c   : > { %v1488_v63 = vpop.f32.mrb[44].mxu1 }
 0x20d   : > { %v1550_v8 = vand.u32 2147483647, %v1534_v39  ;;  %v1489_v54 = vadd.f32 %v3426_v30, %v1488_v63  ;;  %v1490_v46 = vpop.f32.mrb[45].mxu1  ;;  %1587 = vadd.xlane.f32.xlu1 %v1565_v6  ;;  %v414_v30 = vand.u32 2147483647, %v357_v62 }
 0x20e   : > { %523 = vadd.xlane.f32.xlu0 %v412_v52 }
 0x20f   : > { %v1566_v60 = vmul.f32 0.00048828125, %v1550_v8  ;;  %v1535_v57 = vsub.f32 %v3419_v36, %v1489_v54  ;;  %v460_v8 = vpop.xlane.xlu1 %459 }
 0x210   : > { %v1493_v55 = vpop.f32.mrb[46].mxu1 }
 0x211   : > { %v1551_v37 = vand.u32 2147483647, %v1535_v57  ;;  %v1494_v1 = vadd.f32 %v3431_v48, %v1493_v55  ;;  %v1495_v14 = vpop.f32.mrb[47].mxu1  ;;  %1589 = vadd.xlane.f32.xlu1 %v1566_v60  ;;  %v454_v48 = vpop.xlane.xlu0 %453 }
 0x212   : > { %525 = vadd.xlane.f32.xlu0 %v413_v61  ;;  %v547_v0 = vadd.f32 %v546_v41, %v454_v48 }
 0x213   : > { %v1567_v17 = vmul.f32 0.00048828125, %v1551_v37  ;;  %v1536_v12 = vsub.f32 %v3424_v56, %v1494_v1  ;;  %v464_v55 = vpop.xlane.xlu1 %463 }
 0x214   : > { %v1498_v22 = vpop.f32.mrb[48].mxu1  ;;  %v548_v52 = vadd.f32 %v547_v0, %v456_v7 }
 0x215   : > { %v1499_v36 = vadd.f32 %v3436_v5, %v1498_v22  ;;  %v1500_v45 = vpop.f32.mrb[49].mxu1  ;;  %1591 = vadd.xlane.f32.xlu1 %v1567_v17  ;;  %v1552_v31 = vand.u32 2147483647, %v1536_v12  ;;  %v458_v23 = vpop.xlane.xlu0 %457 }
 0x216   : > { %527 = vadd.xlane.f32.xlu0 %v414_v30  ;;  %v549_v61 = vadd.f32 %v548_v52, %v458_v23 }
 0x217   : > { %v1537_v9 = vsub.f32 %v3429_v18, %v1499_v36  ;;  %v1568_v56 = vmul.f32 0.00048828125, %v1552_v31 }
 0x218   : > { %v1503_v16 = vpop.f32.mrb[50].mxu1  ;;  %v550_v32 = vadd.f32 %v549_v61, %v460_v8 }
 0x219   : > { %v1504_v19 = vadd.f32 %v3441_v50, %v1503_v16  ;;  %v1505_v13 = vpop.f32.mrb[51].mxu1  ;;  %1577 = vadd.xlane.f32.xlu1 %v1560_v40  ;;  %v1553_v11 = vand.u32 2147483647, %v1537_v9  ;;  %v462_v47 = vpop.xlane.xlu0 %461 }
 0x21b   : > { %v1538_v5 = vsub.f32 %v3434_v2, %v1504_v19  ;;  %v1569_v59 = vmul.f32 0.00048828125, %v1553_v11 }
 0x21c   : > { %v1508_v33 = vpop.f32.mrb[52].mxu1 }
 0x21d   : > { %v1509_v3 = vadd.f32 %v3446_v43, %v1508_v33  ;;  %v1510_v29 = vpop.f32.mrb[53].mxu1  ;;  %1593 = vadd.xlane.f32.xlu1 %v1568_v56  ;;  %v1554_v18 = vand.u32 2147483647, %v1538_v5  ;;  %v466_v53 = vpop.xlane.xlu0 %465 }
 0x21f   : > { %v1539_v4 = vsub.f32 %v3439_v51, %v1509_v3  ;;  %v1570_v2 = vmul.f32 0.00048828125, %v1554_v18 }
 0x220   : > { %v1513_v50 = vpop.f32.mrb[54].mxu1 }
 0x221   : > { %v1514_v15 = vadd.f32 %v3451_v24, %v1513_v50  ;;  %v1515_v58 = vpop.f32.mrb[55].mxu1  ;;  %1595 = vadd.xlane.f32.xlu1 %v1569_v59  ;;  %v1555_v28 = vand.u32 2147483647, %v1539_v4  ;;  %v470_v57 = vpop.xlane.xlu0 %469 }
 0x223   : > { %v1540_v6 = vsub.f32 %v3444_v20, %v1514_v15  ;;  %v1571_v54 = vmul.f32 0.00048828125, %v1555_v28 }
 0x224   : > { %v1518_v43 = vpop.f32.mrb[56].mxu1 }
 0x225   : > { %v1519_v39 = vadd.f32 %v3456_v21, %v1518_v43  ;;  %v1520_v63 = vpop.f32.mrb[57].mxu1  ;;  %1597 = vadd.xlane.f32.xlu1 %v1570_v2  ;;  %v1556_v51 = vand.u32 2147483647, %v1540_v6  ;;  %v551_v21 = vadd.f32 %v550_v32, %v462_v47  ;;  %v474_v14 = vpop.xlane.xlu0 %473 }
 0x227   : > { %v1541_v46 = vsub.f32 %v3449_v42, %v1519_v39  ;;  %v1572_v10 = vmul.f32 0.00048828125, %v1556_v51  ;;  %v552_v1 = vadd.f32 %v551_v21, %v464_v55 }
 0x228   : > { %v1523_v24 = vpop.f32.mrb[58].mxu1 }
 0x229   : > { %v1524_v38 = vadd.f32 %v3458_v35, %v1523_v24  ;;  %v1525_v62 = vpop.f32.mrb[59].mxu1  ;;  %1599 = vadd.xlane.f32.xlu1 %v1571_v54  ;;  %v1557_v20 = vand.u32 2147483647, %v1541_v46  ;;  %v553_v30 = vadd.f32 %v552_v1, %v466_v53  ;;  %v468_v35 = vpop.xlane.xlu1 %467 }
 0x22a   : > { %v478_v25 = vpop.xlane.xlu0 %477 }
 0x22b   : > { %v1542_v60 = vsub.f32 %v3454_v49, %v1524_v38  ;;  %v1573_v34 = vmul.f32 0.00048828125, %v1557_v20  ;;  %v554_v26 = vadd.f32 %v553_v30, %v468_v35 }
 0x22d   : > { %1601 = vadd.xlane.f32.xlu1 %v1572_v10  ;;  %v1558_v37 = vand.u32 2147483647, %v1542_v60  ;;  %v555_v17 = vadd.f32 %v554_v26, %v470_v57  ;;  %v472_v12 = vpop.xlane.xlu1 %471 }
 0x22e   : > { %v482_v22 = vpop.xlane.xlu0 %481 }
 0x22f   : > { %v1574_v42 = vmul.f32 0.00048828125, %v1558_v37  ;;  %v556_v36 = vadd.f32 %v555_v17, %v472_v12 }
 0x231   : > { %1603 = vadd.xlane.f32.xlu1 %v1573_v34  ;;  %v557_v49 = vadd.f32 %v556_v36, %v474_v14  ;;  %v476_v44 = vpop.xlane.xlu1 %475 }
 0x232   : > { %v486_v45 = vpop.xlane.xlu0 %485 }
 0x233   : > { %v558_v48 = vadd.f32 %v557_v49, %v476_v44 }
 0x235   : > { %1605 = vadd.xlane.f32.xlu1 %v1574_v42  ;;  %v559_v40 = vadd.f32 %v558_v48, %v478_v25  ;;  %v480_v31 = vpop.xlane.xlu1 %479 }
 0x236   : > { %v490_v27 = vpop.xlane.xlu0 %489 }
 0x237   : > { %v560_v9 = vadd.f32 %v559_v40, %v480_v31 }
 0x239   : > { %v561_v19 = vadd.f32 %v560_v9, %v482_v22  ;;  %v484_v13 = vpop.xlane.xlu1 %483 }
 0x23a   : > { %v494_v16 = vpop.xlane.xlu0 %493 }
 0x23b   : > { %v562_v56 = vadd.f32 %v561_v19, %v484_v13 }
 0x23d   : > { %v563_v11 = vadd.f32 %v562_v56, %v486_v45  ;;  %v488_v5 = vpop.xlane.xlu1 %487 }
 0x23e   : > { %v498_v41 = vpop.xlane.xlu0 %497 }
 0x23f   : > { %v564_v23 = vadd.f32 %v563_v11, %v488_v5 }
 0x241   : > { %v565_v29 = vadd.f32 %v564_v23, %v490_v27  ;;  %v492_v0 = vpop.xlane.xlu1 %491 }
 0x242   : > { %v502_v33 = vpop.xlane.xlu0 %501 }
 0x243   : > { %v566_v7 = vadd.f32 %v565_v29, %v492_v0 }
 0x245   : > { %v567_v18 = vadd.f32 %v566_v7, %v494_v16  ;;  %v496_v4 = vpop.xlane.xlu1 %495  ;;  %v591_v16 = vld [vmem:[%s3529_s2] sm:$0xff] }
 0x246   : > { %v504_v3 = vpop.xlane.xlu0 %503 }
 0x247   : > { %v568_v15 = vadd.f32 %v567_v18, %v496_v4 }
 0x249   : > { %v569_v58 = vadd.f32 %v568_v15, %v498_v41  ;;  %v500_v52 = vpop.xlane.xlu1 %499 }
 0x24a   : > { %v506_v59 = vpop.xlane.xlu0 %505 }
 0x24b   : > { %v570_v2 = vadd.f32 %v569_v58, %v500_v52 }
 0x24d   : > { %v571_v6 = vadd.f32 %v570_v2, %v502_v33 }
 0x24e   : > { %v508_v50 = vpop.xlane.xlu0 %507 }
 0x24f   : > { %v572_v43 = vadd.f32 %v571_v6, %v504_v3 }
 0x251   : > { %v573_v63 = vadd.f32 %v572_v43, %v506_v59 }
 0x252   : > { %v510_v47 = vpop.xlane.xlu0 %509 }
 0x253   : > { %v574_v8 = vadd.f32 %v573_v63, %v508_v50 }
 0x255   : > { %v575_v46 = vadd.f32 %v574_v8, %v510_v47 }
 0x256   : > { %v512_v28 = vpop.xlane.xlu0 %511 }
 0x257   : > { %v576_v38 = vadd.f32 %v575_v46, %v512_v28 }
 0x25a   : > { %v514_v39 = vpop.xlane.xlu0 %513 }
 0x25b   : > { %v577_v10 = vadd.f32 %v576_v38, %v514_v39  ;;  %v1628_v39 = vld [vmem:[%s3530_s3] sm:$0xff] }
 0x287   : > { %v1576_v61 = vpop.xlane.xlu0 %1575 }
 0x28a   : > { %v1580_v54 = vpop.xlane.xlu1 %1579 }
 0x28b   : > { %v516_v51 = vpop.xlane.xlu0 %515 }
 0x28c   : > { %v578_v21 = vadd.f32 %v577_v10, %v516_v51 }
 0x28e   : > { %v1582_v24 = vpop.xlane.xlu1 %1581 }
 0x28f   : > { %v518_v53 = vpop.xlane.xlu0 %517 }
 0x290   : > { %v579_v57 = vadd.f32 %v578_v21, %v518_v53 }
 0x292   : > { %v1584_v62 = vpop.xlane.xlu1 %1583 }
 0x293   : > { %v520_v32 = vpop.xlane.xlu0 %519 }
 0x294   : > { %v580_v37 = vadd.f32 %v579_v57, %v520_v32 }
 0x296   : > { %v1586_v20 = vpop.xlane.xlu1 %1585 }
 0x297   : > { %v522_v60 = vpop.xlane.xlu0 %521 }
 0x298   : > { %v581_v1 = vadd.f32 %v580_v37, %v522_v60 }
 0x29a   : > { %v1588_v55 = vpop.xlane.xlu1 %1587 }
 0x29b   : > { %v524_v34 = vpop.xlane.xlu0 %523 }
 0x29c   : > { %v582_v30 = vadd.f32 %v581_v1, %v524_v34 }
 0x29e   : > { %v1590_v42 = vpop.xlane.xlu1 %1589 }
 0x29f   : > { %v526_v14 = vpop.xlane.xlu0 %525 }
 0x2a0   : > { %v583_v35 = vadd.f32 %v582_v30, %v526_v14 }
 0x2a2   : > { %v1592_v26 = vpop.xlane.xlu1 %1591 }
 0x2a3   : > { %v528_v25 = vpop.xlane.xlu0 %527 }
 0x2a4   : > { %v584_v17 = vadd.f32 %v583_v35, %v528_v25 }
 0x2a6   : > { %v585_v12 = vrot.slane %v584_v17, 4  ;;  %v1578_v22 = vpop.xlane.xlu1 %1577 }
 0x2a7   : > { %v1607_v49 = vadd.f32 %v1578_v22, %v1576_v61 }
 0x2a8   : > { %v586_v36 = vadd.f32 %v585_v12, %v584_v17 }
 0x2a9   : > { %v1608_v44 = vadd.f32 %v1607_v49, %v1580_v54 }
 0x2aa   : > { %v587_v45 = vrot.slane %v586_v36, 2  ;;  %v1594_v48 = vpop.xlane.xlu1 %1593 }
 0x2ab   : > { %v1609_v40 = vadd.f32 %v1608_v44, %v1582_v24 }
 0x2ac   : > { %v588_v27 = vadd.f32 %v587_v45, %v586_v36 }
 0x2ad   : > { %v1610_v9 = vadd.f32 %v1609_v40, %v1584_v62 }
 0x2ae   : > { %v589_v31 = vrot.slane %v588_v27, 1  ;;  %v1596_v19 = vpop.xlane.xlu1 %1595 }
 0x2af   : > { %v1611_v41 = vadd.f32 %v1610_v9, %v1586_v20 }
 0x2b0   : > { %v590_v13 = vadd.f32 %v589_v31, %v588_v27 }
 0x2b1   : > { %v1612_v11 = vadd.f32 %v1611_v41, %v1588_v55 }
 0x2b2   : > { %v592_v56 = vadd.f32 %v591_v16, %v590_v13  ;;  %v1598_v5 = vpop.xlane.xlu1 %1597 }
 0x2b3   : > { %v1613_v33 = vadd.f32 %v1612_v11, %v1590_v42 }
 0x2b4   : > { %593 = vst [vmem:[%s3529_s2] sm:$0xff] %v592_v56 }
 0x2b5   : > { %v1614_v23 = vadd.f32 %v1613_v33, %v1592_v26 }
 0x2b6   : > { %v1600_v3 = vpop.xlane.xlu1 %1599 }
 0x2b7   : > { %v1615_v29 = vadd.f32 %v1614_v23, %v1594_v48 }
 0x2b9   : > { %v1616_v0 = vadd.f32 %v1615_v29, %v1596_v19 }
 0x2ba   : > { %v1602_v7 = vpop.xlane.xlu1 %1601 }
 0x2bb   : > { %v1617_v59 = vadd.f32 %v1616_v0, %v1598_v5 }
 0x2bd   : > { %v1618_v18 = vadd.f32 %v1617_v59, %v1600_v3 }
 0x2be   : > { %v1604_v4 = vpop.xlane.xlu1 %1603 }
 0x2bf   : > { %v1619_v50 = vadd.f32 %v1618_v18, %v1602_v7 }
 0x2c1   : > { %v1620_v15 = vadd.f32 %v1619_v50, %v1604_v4 }
 0x2c2   : > { %v1606_v58 = vpop.xlane.xlu1 %1605 }
 0x2c3   : > { %v1621_v52 = vadd.f32 %v1620_v15, %v1606_v58 }
 0x2c5   : > { %v1622_v47 = vrot.slane %v1621_v52, 4 }
 0x2c7   : > { %v1623_v2 = vadd.f32 %v1622_v47, %v1621_v52 }
 0x2c9   : > { %v1624_v28 = vrot.slane %v1623_v2, 2 }
 0x2cb   : > { %v1625_v6 = vadd.f32 %v1624_v28, %v1623_v2 }
 0x2cd   : > { %v1626_v43 = vrot.slane %v1625_v6, 1 }
 0x2cf   : > { %v1627_v63 = vadd.f32 %v1626_v43, %v1625_v6 }
 0x2d1   : > { %v1629_v61 = vadd.f32 %v1628_v39, %v1627_v63 }
 0x2d3   : > { %1630 = vst [vmem:[%s3530_s3] sm:$0xff] %v1629_v61 }
 0x2d4 PF: > { %s14_s12 = sadd.s32 1, %s2500_s12  }
 0x2d5   : > { %p11_p6 = scmp.ge.s32.totalorder %s14_s12, 4  }
 0x2d7   :  { %13 = sbr.rel (!%p11_p6) target bundleno = 1 (0x1), region = 69 }

// kernel: _forward_impl.11
= control target key start
LH: loop header
LB: loop body
LE: loop exit
PB: predicated region body
PF: predicated region fallthrough
CT: control target
= control target key end

     0   :  { %s2525_s12 = smov 0   ;;  %s3527_s0 = inlined_call_operand.vmem [shape: f32[4,456,128], index: 0, kind: input, shape index: {}, may-alias: {0,1}]   ;;  %s3528_s1 = inlined_call_operand.vmem [shape: f32[4,456,128], index: 1, kind: input, shape index: {}, may-alias: {0,1}]   ;;  %s3529_s2 = inlined_call_operand.vmem [shape: f32[8,128], index: 2, kind: output, shape index: {0}]   ;;  %s3530_s3 = inlined_call_operand.vmem [shape: f32[8,128], index: 3, kind: output, shape index: {1}]  }
   0x1 LB: > { %s1677_s13 = sadd.s32 4294967295, %s2500_s12   ;;  %p1680_p0 = scmp.ge.s32.totalorder %s2500_s12, 1  ;;  %s2500_s12 = sphi %s2525_s12, %s14_s12  }
   0x2   : > { %p144_p1 = scmp.lt.s32.totalorder %s2500_s12, 3 }
   0x4   : > { %p145_p2 = pnand %p1680_p0, %p144_p1 }
   0x5   : > { %p169_p3 = scmp.lt.s32.totalorder (!%p145_p2), %s1677_s13, 3  ;;  %s174_s14 = sadd.s32 (!%p145_p2), 2, %s1677_s13 }
   0x6   : > { %148 = sbr.rel (%p145_p2) target bundleno = 724 (0x2d4), region = 28  ;;  %p175_p4 = scmp.lt.s32.totalorder (!%p145_p2), %s174_s14, 3 }
   0x7   : > { %p1683_p5 = scmp.ne.s32.totalorder (!%p145_p2), %s1677_s13, 0 }
   0xd   : > { %s170_s15 = scalar_select %p169_p3, %s1677_s13, 3 }
   0xe   : > { %s3535_s14 = smov (!%p175_p4, %s174_s14), 3  ;;  %184 = sbr.rel (%p1683_p5) target bundleno = 21 (0x15), region = 32 }
   0xf   : > { %s2040_s16 = smul.u32 456, %s170_s15  ;;  %v2502_v0 = vmov (!%p1683_p5), 0.0  }
  0x10   : > { %s2041_s17 = smul.u32 456, %s3535_s14  ;;  %185 = vst [vmem:[%s3529_s2] sm:$0xff] (!%p1683_p5), %v2502_v0  ;;  %186 = vst [vmem:[%s3530_s3] sm:$0xff] (!%p1683_p5), %v2502_v0 }
  0x11   : > { %s2536_s20 = scalar_lea.vmem %s3527_s0, %s2040_s16 }
  0x12   : > { %s2541_s23 = scalar_lea.vmem %s3528_s1, %s2041_s17 }
  0x15 PF: > { %v2550_v1 = vld [vmem:[%s2536_s20 + $0x180] sm:$0xff]  ;;  %v188_v5 = vld [vmem:[%s2536_s20 + $0x8] sm:$0xff]  ;;  %v205_v11 = vld [vmem:[%s2536_s20 + $0x90] sm:$0xff]  ;;  %v2503_v48 = vmov 0.0|0.0   ;;  %vm722_vm0 = vcmask 588800  }
  0x16   : > { %v2553_v2 = vld [vmem:[%s2536_s20] sm:$0xff]  ;;  %690 = vxpose.xlu1.b32.start [1/9] (short) %v2550_v1, 128  ;;  %v204_v6 = vld [vmem:[%s2536_s20 + $0x88] sm:$0xff]  ;;  %v206_v12 = vld [vmem:[%s2536_s20 + $0x98] sm:$0xff]  ;;  %1910 = vmatprep.subr.bf16.mxu1 %v2503_v48 }
  0x17   : > { %v203_v3 = vld [vmem:[%s2536_s20 + $0x80] sm:$0xff]  ;;  %v2561_v7 = vld [vmem:[%s2536_s20 + $0x188] sm:$0xff]  ;;  %v1880_v9 = vpack.c.bf16 %v188_v5, %v2553_v2  ;;  %v2055_v10 = vpack.i.bf16 %v188_v5, %v204_v6  ;;  %v2567_v13 = vld [vmem:[%s2536_s20 + $0x10] sm:$0xff]  ;;  %v1882_v15 = vpack.c.bf16 %v206_v12, %v205_v11 }
  0x18   : > { %v2053_v4 = vpack.i.bf16 %v2553_v2, %v203_v3  ;;  %v1878_v8 = vpack.c.bf16 %v204_v6, %v203_v3  ;;  %v190_v14 = vld [vmem:[%s2536_s20 + $0x18] sm:$0xff]  ;;  %v207_v16 = vld [vmem:[%s2536_s20 + $0xa0] sm:$0xff]  ;;  %v2573_v17 = vld [vmem:[%s2536_s20 + $0xa8] sm:$0xff]  ;;  %v2057_v21 = vpack.i.bf16 %v2567_v13, %v205_v11 }
  0x19   : > { %v1884_v18 = vpack.c.bf16 %v190_v14, %v2567_v13  ;;  %v2577_v19 = vld [vmem:[%s2536_s20 + $0x190] sm:$0xff]  ;;  %v1886_v20 = vpack.c.bf16 %v2573_v17, %v207_v16  ;;  %v191_v22 = vld [vmem:[%s2536_s20 + $0x20] sm:$0xff]  ;;  %v192_v23 = vld [vmem:[%s2536_s20 + $0x28] sm:$0xff]  ;;  %v2059_v29 = vpack.i.bf16 %v190_v14, %v206_v12 }
  0x1a   : > { %2054 = vxpose.xlu0.b32.start [1/16] %v2053_v4, 128  ;;  %1879 = vmatprep.subr.bf16.mxu0 %v1878_v8  ;;  %v2585_v24 = vld [vmem:[%s2536_s20 + $0xb0] sm:$0xff]  ;;  %v2588_v25 = vld [vmem:[%s2536_s20 + $0xb8] sm:$0xff]  ;;  %v1888_v26 = vpack.c.bf16 %v192_v23, %v191_v22  ;;  %v2601_v32 = vld [vmem:[%s2536_s20 + $0xc0] sm:$0xff]  ;;  %v2061_v37 = vpack.i.bf16 %v191_v22, %v207_v16  ;;  %v2063_v49 = vpack.i.bf16 %v192_v23, %v2573_v17 }
  0x1b   : > { %691 = vxpose.xlu1.b32.cont [2/9] (short) %v2561_v7, 128  ;;  %1881 = vmatpush3.bf16.msra.mxu0 %v1880_v9  ;;  %v2591_v27 = vld [vmem:[%s2536_s20 + $0x198] sm:$0xff]  ;;  %v1890_v28 = vpack.c.bf16 %v2588_v25, %v2585_v24  ;;  %v193_v30 = vld [vmem:[%s2536_s20 + $0x30] sm:$0xff]  ;;  %v2604_v33 = vld [vmem:[%s2536_s20 + $0xc8] sm:$0xff] }
  0x1c   : > { %1883 = vmatprep.subr.bf16.mxu0 %v1882_v15  ;;  %v2597_v31 = vld [vmem:[%s2536_s20 + $0x38] sm:$0xff]  ;;  %v2608_v35 = vld [vmem:[%s2536_s20 + $0x1a0] sm:$0xff]  ;;  %v1894_v36 = vpack.c.bf16 %v2604_v33, %v2601_v32  ;;  %v2616_v39 = vld [vmem:[%s2536_s20 + $0x48] sm:$0xff]  ;;  %v2065_v60 = vpack.i.bf16 %v193_v30, %v2585_v24 }
  0x1d   : > { %v1892_v34 = vpack.c.bf16 %v2597_v31, %v193_v30  ;;  %v2613_v38 = vld [vmem:[%s2536_s20 + $0x40] sm:$0xff]  ;;  %v2622_v41 = vld [vmem:[%s2536_s20 + $0x108] sm:$0xff]  ;;  %v2626_v42 = vld [vmem:[%s2536_s20 + $0xd0] sm:$0xff] }
  0x1e   : > { %2056 = vxpose.xlu0.b32.cont [2/16] %v2055_v10, 128  ;;  %v2619_v40 = vld [vmem:[%s2536_s20 + $0x100] sm:$0xff]  ;;  %v2629_v43 = vld [vmem:[%s2536_s20 + $0xd8] sm:$0xff]  ;;  %v1896_v44 = vpack.c.bf16 %v2616_v39, %v2613_v38  ;;  %v2636_v46 = vld [vmem:[%s2536_s20 + $0x1a8] sm:$0xff]  ;;  %v2067_v10 = vpack.i.bf16 %v2597_v31, %v2588_v25 }
  0x1f   : > { %692 = vxpose.xlu1.b32.cont [3/9] (short) %v2577_v19, 128  ;;  %1885 = vmatpush3.bf16.msra.mxu0 %v1884_v18  ;;  %v1911_v45 = vpack.c.bf16 %v2622_v41, %v2619_v40  ;;  %v1898_v47 = vpack.c.bf16 %v2629_v43, %v2626_v42  ;;  %v2643_v50 = vld [vmem:[%s2536_s20 + $0x50] sm:$0xff]  ;;  %v2646_v51 = vld [vmem:[%s2536_s20 + $0x58] sm:$0xff]  ;;  %v2657_v54 = vld [vmem:[%s2536_s20 + $0xe0] sm:$0xff] }
  0x20   : > { %1887 = vmatprep.subr.bf16.mxu0 %v1886_v20  ;;  %v2649_v52 = vld [vmem:[%s2536_s20 + $0x110] sm:$0xff]  ;;  %v2652_v53 = vld [vmem:[%s2536_s20 + $0x118] sm:$0xff]  ;;  %v2660_v55 = vld [vmem:[%s2536_s20 + $0xe8] sm:$0xff]  ;;  %v1900_v56 = vpack.c.bf16 %v2646_v51, %v2643_v50  ;;  %v2069_v20 = vpack.i.bf16 %v2613_v38, %v2601_v32  ;;  %v2073_v31 = vpack.i.bf16 %v2643_v50, %v2626_v42 }
  0x21   : > { %1912 = vmatpush1.bf16.msra.mxu1 %v1911_v45  ;;  %v1914_v57 = vpack.c.bf16 %v2652_v53, %v2649_v52  ;;  %v2667_v58 = vld [vmem:[%s2536_s20 + $0x1b0] sm:$0xff]  ;;  %v1902_v59 = vpack.c.bf16 %v2660_v55, %v2657_v54  ;;  %v2673_v61 = vld [vmem:[%s2536_s20 + $0x60] sm:$0xff]  ;;  %v2676_v62 = vld [vmem:[%s2536_s20 + $0x68] sm:$0xff]  ;;  %v1935_v45 = vpack.c.bf16 %v2561_v7, %v2550_v1  ;;  %v1941_v1 = vpack.c.bf16 %v2636_v46, %v2608_v35 }
  0x22   : > { %2058 = vxpose.xlu0.b32.cont [3/16] %v2057_v21, 128  ;;  %1913 = vmatprep.subr.bf16.mxu1 %v2503_v48  ;;  %v2679_v63 = vld [vmem:[%s2536_s20 + $0x120] sm:$0xff]  ;;  %v2682_v0 = vld [vmem:[%s2536_s20 + $0x128] sm:$0xff]  ;;  %v2687_v3 = vld [vmem:[%s2536_s20 + $0xf0] sm:$0xff]  ;;  %v1904_v5 = vpack.c.bf16 %v2676_v62, %v2673_v61 }
  0x23   : > { %693 = vxpose.xlu1.b32.cont [4/9] (short) %v2591_v27, 128  ;;  %1889 = vmatpush3.bf16.msra.mxu0 %v1888_v26  ;;  %v2690_v4 = vld [vmem:[%s2536_s20 + $0xf8] sm:$0xff]  ;;  %v1917_v6 = vpack.c.bf16 %v2682_v0, %v2679_v63  ;;  %v201_v11 = vld [vmem:[%s2536_s20 + $0x70] sm:$0xff]  ;;  %v2719_v18 = vld [vmem:[%s2536_s20 + $0x1c0] sm:$0xff] }
  0x24   : > { %1891 = vmatprep.subr.bf16.mxu0 %v1890_v28  ;;  %v2697_v8 = vld [vmem:[%s2536_s20 + $0x1b8] sm:$0xff]  ;;  %v1906_v9 = vpack.c.bf16 %v2690_v4, %v2687_v3  ;;  %v2708_v14 = vld [vmem:[%s2536_s20 + $0x130] sm:$0xff]  ;;  %v2724_v21 = vld [vmem:[%s2536_s20 + $0x140] sm:$0xff]  ;;  %v2071_v28 = vpack.i.bf16 %v2616_v39, %v2604_v33 }
  0x25   : > { %1915 = vmatpush1.bf16.msra.mxu1 %v1914_v57  ;;  %v2705_v12 = vld [vmem:[%s2536_s20 + $0x78] sm:$0xff]  ;;  %v2727_v22 = vld [vmem:[%s2536_s20 + $0x148] sm:$0xff]  ;;  %v260_v23 = vld [vmem:[%s2541_s23 + $0x80] sm:$0xff] }
  0x26   : > { %2060 = vxpose.xlu0.b32.cont [4/16] %v2059_v29, 128  ;;  %1916 = vmatprep.subr.bf16.mxu1 %v2503_v48  ;;  %v2711_v15 = vld [vmem:[%s2536_s20 + $0x138] sm:$0xff]  ;;  %v1908_v16 = vpack.c.bf16 %v2705_v12, %v201_v11  ;;  %v261_v24 = vld [vmem:[%s2541_s23 + $0x88] sm:$0xff]  ;;  %v1923_v25 = vpack.c.bf16 %v2727_v22, %v2724_v21  ;;  %v2739_v29 = vld [vmem:[%s2536_s20 + $0x150] sm:$0xff]  ;;  %v2165_v7 = vpack.i.bf16 %v260_v23, %v2619_v40 }
  0x27   : > { %694 = vxpose.xlu1.b32.cont [5/9] (short) %v2608_v35, 128  ;;  %1893 = vmatpush3.bf16.msra.mxu0 %v1892_v34  ;;  %v1920_v17 = vpack.c.bf16 %v2711_v15, %v2708_v14  ;;  %v1946_v26 = vpack.c.bf16 %v261_v24, %v260_v23  ;;  %v2742_v30 = vld [vmem:[%s2536_s20 + $0x158] sm:$0xff]  ;;  %v2749_v34 = vld [vmem:[%s2536_s20 + $0x160] sm:$0xff]  ;;  %v2752_v33 = vld [vmem:[%s2536_s20 + $0x168] sm:$0xff]  ;;  %v2167_v35 = vpack.i.bf16 %v261_v24, %v2622_v41 }
  0x28   : > { %1895 = vmatprep.subr.bf16.mxu0 %v1894_v36  ;;  %v1926_v32 = vpack.c.bf16 %v2742_v30, %v2739_v29  ;;  %v1929_v36 = vpack.c.bf16 %v2752_v33, %v2749_v34  ;;  %v2760_v38 = vld [vmem:[%s2536_s20 + $0x170] sm:$0xff]  ;;  %v2763_v39 = vld [vmem:[%s2536_s20 + $0x178] sm:$0xff]  ;;  %v2789_v50 = vld [vmem:[%s2541_s23 + $0x100] sm:$0xff] }
  0x29   : > { %1918 = vmatpush1.bf16.msra.mxu1 %v1917_v6  ;;  %v1932_v42 = vpack.c.bf16 %v2763_v39, %v2760_v38  ;;  %v2840_v6 = vld [vmem:[%s2541_s23 + $0xa8] sm:$0xff]  ;;  %v2872_v23 = vld [vmem:[%s2541_s23 + $0x130] sm:$0xff] }
  0x2a   : > { %2062 = vxpose.xlu0.b32.cont [5/16] %v2061_v37, 128  ;;  %1919 = vmatprep.subr.bf16.mxu1 %v2503_v48  ;;  %v2075_v37 = vpack.i.bf16 %v2646_v51, %v2629_v43  ;;  %v2079_v43 = vpack.i.bf16 %v2676_v62, %v2660_v55  ;;  %v1944_v51 = vpack.c.bf16 %v2697_v8, %v2667_v58  ;;  %v2804_v55 = vld [vmem:[%s2541_s23 + $0x108] sm:$0xff]  ;;  %v2827_v62 = vld [vmem:[%s2541_s23 + $0xa0] sm:$0xff] }
  0x2b   : > { %695 = vxpose.xlu1.b32.cont [6/9] (short) %v2636_v46, 128  ;;  %1897 = vmatpush3.bf16.msra.mxu0 %v1896_v44  ;;  %v2077_v44 = vpack.i.bf16 %v2673_v61, %v2657_v54  ;;  %v2798_v46 = vld [vmem:[%s2541_s23 + $0x90] sm:$0xff]  ;;  %v2801_v54 = vld [vmem:[%s2541_s23 + $0x8] sm:$0xff] }
  0x2c   : > { %1899 = vmatprep.subr.bf16.mxu0 %v1898_v47  ;;  %v1938_v47 = vpack.c.bf16 %v2591_v27, %v2577_v19  ;;  %v2083_v19 = vpack.i.bf16 %v2705_v12, %v2690_v4  ;;  %v2786_v27 = vld [vmem:[%s2541_s23] sm:$0xff]  ;;  %v2169_v41 = vpack.i.bf16 %v2798_v46, %v2649_v52  ;;  %v2279_v57 = vpack.i.bf16 %v2804_v55, %v2801_v54  ;;  %v2833_v4 = vld [vmem:[%s2541_s23 + $0x118] sm:$0xff]  ;;  %v2856_v12 = vld [vmem:[%s2541_s23 + $0x28] sm:$0xff] }
  0x2d   : > { %1921 = vmatpush1.bf16.msra.mxu1 %v1920_v17  ;;  %v2277_v40 = vpack.i.bf16 %v2789_v50, %v2786_v27 }
  0x2e   : > { %2064 = vxpose.xlu0.b32.cont [6/16] %v2063_v49, 128  ;;  %1922 = vmatprep.subr.bf16.mxu1 %v2503_v48  ;;  %v2081_v49 = vpack.i.bf16 %v201_v11, %v2687_v3  ;;  %v2830_v3 = vld [vmem:[%s2541_s23 + $0x18] sm:$0xff]  ;;  %v2853_v11 = vld [vmem:[%s2541_s23 + $0xb0] sm:$0xff] }
  0x2f   : > { %696 = vxpose.xlu1.b32.cont [7/9] (short) %v2667_v58, 128  ;;  %1901 = vmatpush3.bf16.msra.mxu0 %v1900_v56  ;;  %v3531_v56 = vmov 0.0   ;;  %v2812_v58 = vld [vmem:[%s2541_s23 + $0x98] sm:$0xff]  ;;  %v2177_v17 = vpack.i.bf16 %v2853_v11, %v2708_v14 }
  0x30   : > { %1903 = vmatprep.subr.bf16.mxu0 %v1902_v59  ;;  %v2815_v59 = vld [vmem:[%s2541_s23 + $0x10] sm:$0xff]  ;;  %v2171_v52 = vpack.i.bf16 %v2812_v58, %v2652_v53  ;;  %v2283_v53 = vpack.i.bf16 %v2833_v4, %v2830_v3 }
  0x31   : > { %1924 = vmatpush1.bf16.msra.mxu1 %v1923_v25  ;;  %v2879_v25 = vld [vmem:[%s2541_s23 + $0xc0] sm:$0xff] }
  0x32   : > { %2066 = vxpose.xlu0.b32.cont [7/16] %v2065_v60, 128  ;;  %1925 = vmatprep.subr.bf16.mxu1 %v2503_v48  ;;  %v2818_v60 = vld [vmem:[%s2541_s23 + $0x110] sm:$0xff] }
  0x33   : > { %697 = vxpose.xlu1.b32.cont [8/9] (short) %v2697_v8, 128  ;;  %1905 = vmatpush3.bf16.msra.mxu0 %v1904_v5  ;;  %v2281_v61 = vpack.i.bf16 %v2818_v60, %v2815_v59  ;;  %v2173_v5 = vpack.i.bf16 %v2827_v62, %v2679_v63  ;;  %v2843_v8 = vld [vmem:[%s2541_s23 + $0x20] sm:$0xff] }
  0x34   : > { %1907 = vmatprep.subr.bf16.mxu0 %v1906_v9  ;;  %v2846_v9 = vld [vmem:[%s2541_s23 + $0x120] sm:$0xff] }
  0x35   : > { %1927 = vmatpush1.bf16.msra.mxu1 %v1926_v32  ;;  %v2285_v63 = vpack.i.bf16 %v2846_v9, %v2843_v8  ;;  %v2892_v32 = vld [vmem:[%s2541_s23 + $0xc8] sm:$0xff] }
  0x36   : > { %2068 = vxpose.xlu0.b32.cont [8/16] %v2067_v10, 128  ;;  %1928 = vmatprep.subr.bf16.mxu1 %v2503_v48  ;;  %v2175_v10 = vpack.i.bf16 %v2840_v6, %v2682_v0 }
  0x37   : > { %698 = vxpose.xlu1.b32.end [9/9] (short) %v2719_v18, 128  ;;  %1909 = vmatpush3.bf16.msra.mxu0 %v1908_v16  ;;  %v2859_v16 = vld [vmem:[%s2541_s23 + $0x128] sm:$0xff] }
  0x38   : > { %1947 = vmatprep.subr.bf16.mxu0 %v1946_v26  ;;  %v2287_v0 = vpack.i.bf16 %v2859_v16, %v2856_v12  ;;  %v2882_v26 = vld [vmem:[%s2541_s23 + $0x38] sm:$0xff] }
  0x39   : > { %1930 = vmatpush1.bf16.msra.mxu1 %v1929_v36  ;;  %v2895_v36 = vld [vmem:[%s2541_s23 + $0x40] sm:$0xff] }
  0x3a   : > { %2070 = vxpose.xlu0.b32.cont [9/16] %v2069_v20, 128  ;;  %1931 = vmatprep.subr.bf16.mxu1 %v2503_v48  ;;  %v2869_v20 = vld [vmem:[%s2541_s23 + $0x30] sm:$0xff] }
  0x3b   : > { %v2289_v14 = vpack.i.bf16 %v2872_v23, %v2869_v20 }
  0x3d   : > { %1933 = vmatpush1.bf16.msra.mxu1 %v1932_v42  ;;  %v2183_v42 = vpack.i.bf16 %v2892_v32, %v2727_v22 }
  0x3e   : > { %2072 = vxpose.xlu0.b32.cont [10/16] %v2071_v28, 128  ;;  %1934 = vmatprep.subr.bf16.mxu1 %v2503_v48  ;;  %v2885_v28 = vld [vmem:[%s2541_s23 + $0x138] sm:$0xff] }
  0x41   : > { %1936 = vmatpush1.bf16.msra.mxu1 %v1935_v45  ;;  %v2908_v45 = vld [vmem:[%s2541_s23 + $0x48] sm:$0xff] }
  0x42   : > { %2074 = vxpose.xlu0.b32.cont [11/16] %v2073_v31, 128  ;;  %1937 = vmatprep.subr.bf16.mxu1 %v2503_v48  ;;  %v2181_v31 = vpack.i.bf16 %v2879_v25, %v2724_v21 }
  0x45   : > { %1939 = vmatpush1.bf16.msra.mxu1 %v1938_v47 }
  0x46   : > { %2076 = vxpose.xlu0.b32.cont [12/16] %v2075_v37, 128  ;;  %1940 = vmatprep.subr.bf16.mxu1 %v2503_v48  ;;  %v2898_v37 = vld [vmem:[%s2541_s23 + $0x140] sm:$0xff] }
  0x47   : > { %v2293_v21 = vpack.i.bf16 %v2898_v37, %v2895_v36 }
  0x49   : > { %1942 = vmatpush1.bf16.msra.mxu1 %v1941_v1  ;;  %v2921_v1 = vld [vmem:[%s2541_s23 + $0x50] sm:$0xff] }
  0x4a   : > { %2078 = vxpose.xlu0.b32.cont [13/16] %v2077_v44, 128  ;;  %1943 = vmatprep.subr.bf16.mxu1 %v2503_v48  ;;  %v2905_v44 = vld [vmem:[%s2541_s23 + $0xd0] sm:$0xff] }
  0x4b   : > { %v2185_v47 = vpack.i.bf16 %v2905_v44, %v2739_v29 }
  0x4d   : > { %1945 = vmatpush1.bf16.msra.mxu1 %v1944_v51  ;;  %v2931_v51 = vld [vmem:[%s2541_s23 + $0xe0] sm:$0xff] }
  0x4e   : > { %2080 = vxpose.xlu0.b32.cont [14/16] %v2079_v43, 128  ;;  %964 = vmatprep.subr.mxu1 %v3531_v56  ;;  %v2911_v43 = vld [vmem:[%s2541_s23 + $0x148] sm:$0xff] }
  0x4f   : > { %v2295_v22 = vpack.i.bf16 %v2911_v43, %v2908_v45 }
  0x51   : > { %965 = vmatpush1.msra.mxu1 %v2719_v18  ;;  %v2866_v18 = vld [vmem:[%s2541_s23 + $0xb8] sm:$0xff] }
  0x52   : > { %2082 = vxpose.xlu0.b32.cont [15/16] %v2081_v49, 128  ;;  %2014 = vmatprep.subr.bf16.mxu1 %v2503_v48  ;;  %v2179_v24 = vpack.i.bf16 %v2866_v18, %v2711_v15  ;;  %v2291_v15 = vpack.i.bf16 %v2885_v28, %v2882_v26  ;;  %v2918_v49 = vld [vmem:[%s2541_s23 + $0xd8] sm:$0xff] }
  0x54   : > { %2166 = vxpose.xlu1.b32.start [1/16] %v2165_v7, 128  ;;  %v2924_v7 = vld [vmem:[%s2541_s23 + $0x150] sm:$0xff] }
  0x55   : > { %v2297_v29 = vpack.i.bf16 %v2924_v7, %v2921_v1 }
  0x56   : > { %2084 = vxpose.xlu0.b32.end [16/16] %v2083_v19, 128  ;;  %v2187_v19 = vpack.i.bf16 %v2918_v49, %v2742_v30 }
  0x58   : > { %2168 = vxpose.xlu1.b32.cont [2/16] %v2167_v35, 128  ;;  %v2934_v35 = vld [vmem:[%s2541_s23 + $0x58] sm:$0xff] }
  0x5a   : > { %2278 = vxpose.xlu0.b32.start [1/16] %v2277_v40, 128  ;;  %v2937_v40 = vld [vmem:[%s2541_s23 + $0x158] sm:$0xff] }
  0x5b   : > { %v2299_v30 = vpack.i.bf16 %v2937_v40, %v2934_v35 }
  0x5c   : > { %2170 = vxpose.xlu1.b32.cont [3/16] %v2169_v41, 128  ;;  %v2189_v41 = vpack.i.bf16 %v2931_v51, %v2749_v34 }
  0x5e   : > { %2280 = vxpose.xlu0.b32.cont [2/16] %v2279_v57, 128  ;;  %v2944_v57 = vld [vmem:[%s2541_s23 + $0xe8] sm:$0xff] }
  0x60   : > { %2172 = vxpose.xlu1.b32.cont [4/16] %v2171_v52, 128  ;;  %v2947_v52 = vld [vmem:[%s2541_s23 + $0x60] sm:$0xff] }
  0x62   : > { %2282 = vxpose.xlu0.b32.cont [3/16] %v2281_v61, 128  ;;  %v2950_v61 = vld [vmem:[%s2541_s23 + $0x160] sm:$0xff] }
  0x63   : > { %v2301_v34 = vpack.i.bf16 %v2950_v61, %v2947_v52 }
  0x64   : > { %2174 = vxpose.xlu1.b32.cont [5/16] %v2173_v5, 128  ;;  %v2191_v5 = vpack.i.bf16 %v2944_v57, %v2752_v33 }
  0x66   : > { %2284 = vxpose.xlu0.b32.cont [4/16] %v2283_v53, 128  ;;  %v2957_v53 = vld [vmem:[%s2541_s23 + $0xf0] sm:$0xff] }
  0x68   : > { %2176 = vxpose.xlu1.b32.cont [6/16] %v2175_v10, 128  ;;  %v2960_v10 = vld [vmem:[%s2541_s23 + $0x68] sm:$0xff] }
  0x6a   : > { %2286 = vxpose.xlu0.b32.cont [5/16] %v2285_v63, 128  ;;  %v2963_v63 = vld [vmem:[%s2541_s23 + $0x168] sm:$0xff] }
  0x6b   : > { %v2303_v33 = vpack.i.bf16 %v2963_v63, %v2960_v10 }
  0x6c   : > { %2178 = vxpose.xlu1.b32.cont [7/16] %v2177_v17, 128  ;;  %v2193_v17 = vpack.i.bf16 %v2957_v53, %v2760_v38  ;;  %v2983_v38 = vld [vmem:[%s2541_s23 + $0x78] sm:$0xff] }
  0x6e   : > { %2288 = vxpose.xlu0.b32.cont [6/16] %v2287_v0, 128  ;;  %v2970_v0 = vld [vmem:[%s2541_s23 + $0xf8] sm:$0xff] }
  0x70   : > { %2180 = vxpose.xlu1.b32.cont [8/16] %v2179_v24, 128  ;;  %v2973_v24 = vld [vmem:[%s2541_s23 + $0x70] sm:$0xff] }
  0x72   : > { %2290 = vxpose.xlu0.b32.cont [7/16] %v2289_v14, 128  ;;  %v2976_v14 = vld [vmem:[%s2541_s23 + $0x170] sm:$0xff] }
  0x74   : > { %2182 = vxpose.xlu1.b32.cont [9/16] %v2181_v31, 128  ;;  %v2195_v31 = vpack.i.bf16 %v2970_v0, %v2763_v39  ;;  %v2995_v39 = vld [vmem:[%s2541_s23 + $0x188] sm:$0xff] }
  0x76   : > { %2292 = vxpose.xlu0.b32.cont [8/16] %v2291_v15, 128  ;;  %v2305_v15 = vpack.i.bf16 %v2976_v14, %v2973_v24 }
  0x78   : > { %2184 = vxpose.xlu1.b32.cont [10/16] %v2183_v42, 128  ;;  %v2986_v42 = vld [vmem:[%s2541_s23 + $0x178] sm:$0xff] }
  0x7a   : > { %2294 = vxpose.xlu0.b32.cont [9/16] %v2293_v21, 128  ;;  %v2307_v21 = vpack.i.bf16 %v2986_v42, %v2983_v38 }
  0x7c   : > { %2186 = vxpose.xlu1.b32.cont [11/16] %v2185_v47, 128  ;;  %v2991_v47 = vld [vmem:[%s2541_s23 + $0x180] sm:$0xff] }
  0x7e   : > { %2296 = vxpose.xlu0.b32.cont [10/16] %v2295_v22, 128 }
  0x80   : > { %2188 = vxpose.xlu1.b32.cont [12/16] %v2187_v19, 128  ;;  %v1948_v19 = vpack.c.bf16 %v2801_v54, %v2786_v27 }
  0x82   : > { %2298 = vxpose.xlu0.b32.cont [11/16] %v2297_v29, 128 }
  0x84   : > { %2190 = vxpose.xlu1.b32.cont [13/16] %v2189_v41, 128  ;;  %v3002_v41 = vld [vmem:[%s2541_s23 + $0x190] sm:$0xff] }
  0x86   : > { %2300 = vxpose.xlu0.b32.cont [12/16] %v2299_v30, 128 }
  0x88   : > { %2192 = vxpose.xlu1.b32.cont [14/16] %v2191_v5, 128 }
  0x8a   : > { %2302 = vxpose.xlu0.b32.cont [13/16] %v2301_v34, 128 }
  0x8c   : > { %2194 = vxpose.xlu1.b32.cont [15/16] %v2193_v17, 128  ;;  %v1950_v17 = vpack.c.bf16 %v2812_v58, %v2798_v46  ;;  %v1954_v46 = vpack.c.bf16 %v2840_v6, %v2827_v62  ;;  %v1958_v62 = vpack.c.bf16 %v2866_v18, %v2853_v11  ;;  %v1962_v11 = vpack.c.bf16 %v2892_v32, %v2879_v25  ;;  %v3040_v18 = vld [vmem:[%s2541_s23 + $0x1b0] sm:$0xff] }
  0x8d   : > { %v1966_v25 = vpack.c.bf16 %v2918_v49, %v2905_v44  ;;  %v1970_v44 = vpack.c.bf16 %v2944_v57, %v2931_v51  ;;  %v1976_v57 = vpack.c.bf16 %v2983_v38, %v2973_v24 }
  0x8e   : > { %2304 = vxpose.xlu0.b32.cont [14/16] %v2303_v33, 128 }
  0x90   : > { %2196 = vxpose.xlu1.b32.end [16/16] %v2195_v31, 128  ;;  %v3010_v31 = vld [vmem:[%s2541_s23 + $0x198] sm:$0xff] }
  0x92   : > { %2306 = vxpose.xlu0.b32.cont [15/16] %v2305_v15, 128  ;;  %v1952_v15 = vpack.c.bf16 %v2830_v3, %v2815_v59 }
  0x94   : > { %1157 = vxpose.xlu1.b32.start [1/9] (short) %v2991_v47, 128 }
  0x96   : > { %2308 = vxpose.xlu0.b32.end [16/16] %v2307_v21, 128 }
  0x97   : > { %v706_v22 = vpop.trf.xlu1 }
  0x98   : > { %1684 = vmatprep.mubr.msk.f32.mxu1 %vm722_vm0, %v706_v22  ;;  %1158 = vxpose.xlu1.b32.cont [2/9] (short) %v2995_v39, 128 }
  0x9a   : > { %v2085_v29 = vpop.trf.xlu0 }
  0x9b   : > { %v2086_v30 = vunpack.i.l.bf16 %v2085_v29  ;;  %v2089_v5 = vunpack.i.h.bf16 %v2085_v29  ;;  %v3004_v34 = vpop.trf.xlu1 }
  0x9c   : > { %1159 = vxpose.xlu1.b32.cont [3/9] (short) %v3002_v41, 128 }
  0x9d   : > { %835 = vmatprep.mubr.f32.mxu0 %v2086_v30  ;;  %v3020_v30 = vld [vmem:[%s2541_s23 + $0x1a0] sm:$0xff] }
  0x9e   : > { %v2090_v33 = vpop.trf.xlu0  ;;  %836 = vmatmul.mubr.f32.vlgmr.msra.gmra.mrb[0].mxu0 %v2089_v5  ;;  %v1956_v5 = vpack.c.bf16 %v2856_v12, %v2843_v8 }
  0x9f   : > { %v2091_v21 = vunpack.i.l.bf16 %v2090_v33  ;;  %v2094_v22 = vunpack.i.h.bf16 %v2090_v33  ;;  %1949 = vmatpush3.bf16.msra.mxu0 %v1948_v19  ;;  %v3014_v29 = vpop.trf.xlu1 }
  0xa0   : > { %1951 = vmatprep.subr.bf16.mxu0 %v1950_v17  ;;  %1160 = vxpose.xlu1.b32.cont [4/9] (short) %v3010_v31, 128  ;;  %v3030_v17 = vld [vmem:[%s2541_s23 + $0x1a8] sm:$0xff] }
  0xa1   : > { %840 = vmatprep.mubr.f32.mxu0 %v2091_v21  ;;  %v1960_v21 = vpack.c.bf16 %v2882_v26, %v2869_v20  ;;  %v1964_v26 = vpack.c.bf16 %v2908_v45, %v2895_v36  ;;  %v1968_v36 = vpack.c.bf16 %v2934_v35, %v2921_v1 }
  0xa2   : > { %v2095_v58 = vpop.trf.xlu0  ;;  %841 = vmatmul.mubr.f32.gmra.mrb[2].mxu0 %v2094_v22 }
  0xa3   : > { %v2096_v56 = vunpack.i.l.bf16 %v2095_v58  ;;  %v2099_v33 = vunpack.i.h.bf16 %v2095_v58  ;;  %1953 = vmatpush3.bf16.msra.mxu0 %v1952_v15  ;;  %v3024_v19 = vpop.trf.xlu1 }
  0xa4   : > { %1955 = vmatprep.subr.bf16.mxu0 %v1954_v46  ;;  %1161 = vxpose.xlu1.b32.cont [5/9] (short) %v3020_v30, 128 }
  0xa5   : > { %845 = vmatprep.mubr.f32.mxu0 %v2096_v56 }
  0xa6   : > { %v2100_v6 = vpop.trf.xlu0  ;;  %846 = vmatmul.mubr.f32.gmra.mrb[4].mxu0 %v2099_v33 }
  0xa7   : > { %v2101_v22 = vunpack.i.l.bf16 %v2100_v6  ;;  %v2104_v58 = vunpack.i.h.bf16 %v2100_v6  ;;  %1957 = vmatpush3.bf16.msra.mxu0 %v1956_v5  ;;  %v3034_v15 = vpop.trf.xlu1 }
  0xa8   : > { %1959 = vmatprep.subr.bf16.mxu0 %v1958_v62  ;;  %1162 = vxpose.xlu1.b32.cont [6/9] (short) %v3030_v17, 128  ;;  %v3050_v62 = vld [vmem:[%s2541_s23 + $0x1b8] sm:$0xff] }
  0xa9   : > { %850 = vmatprep.mubr.f32.mxu0 %v2101_v22  ;;  %v3060_v22 = vld [vmem:[%s2541_s23 + $0x1c0] sm:$0xff] }
  0xaa   : > { %v2105_v56 = vpop.trf.xlu0  ;;  %851 = vmatmul.mubr.f32.gmra.mrb[6].mxu0 %v2104_v58  ;;  %v1972_v58 = vpack.c.bf16 %v2960_v10, %v2947_v52 }
  0xab   : > { %v2106_v46 = vunpack.i.l.bf16 %v2105_v56  ;;  %v2109_v33 = vunpack.i.h.bf16 %v2105_v56  ;;  %1961 = vmatpush3.bf16.msra.mxu0 %v1960_v21  ;;  %v3044_v5 = vpop.trf.xlu1  ;;  %v1974_v56 = vpack.c.bf16 %v2970_v0, %v2957_v53 }
  0xac   : > { %1963 = vmatprep.subr.bf16.mxu0 %v1962_v11  ;;  %1163 = vxpose.xlu1.b32.cont [7/9] (short) %v3040_v18, 128 }
  0xad   : > { %855 = vmatprep.mubr.f32.mxu0 %v2106_v46 }
  0xae   : > { %v2110_v32 = vpop.trf.xlu0  ;;  %856 = vmatmul.mubr.f32.gmra.mrb[8].mxu0 %v2109_v33 }
  0xaf   : > { %v2111_v45 = vunpack.i.l.bf16 %v2110_v32  ;;  %v2114_v6 = vunpack.i.h.bf16 %v2110_v32  ;;  %1965 = vmatpush3.bf16.msra.mxu0 %v1964_v26  ;;  %v3054_v21 = vpop.trf.xlu1 }
  0xb0   : > { %1967 = vmatprep.subr.bf16.mxu0 %v1966_v25  ;;  %1164 = vxpose.xlu1.b32.cont [8/9] (short) %v3050_v62, 128 }
  0xb1   : > { %860 = vmatprep.mubr.f32.mxu0 %v2111_v45 }
  0xb2   : > { %v2115_v49 = vpop.trf.xlu0  ;;  %861 = vmatmul.mubr.f32.gmra.mrb[10].mxu0 %v2114_v6 }
  0xb3   : > { %v2116_v1 = vunpack.i.l.bf16 %v2115_v49  ;;  %v2119_v35 = vunpack.i.h.bf16 %v2115_v49  ;;  %1969 = vmatpush3.bf16.msra.mxu0 %v1968_v36  ;;  %v3064_v11 = vpop.trf.xlu1 }
  0xb4   : > { %1971 = vmatprep.subr.bf16.mxu0 %v1970_v44  ;;  %1165 = vxpose.xlu1.b32.end [9/9] (short) %v3060_v22, 128 }
  0xb5   : > { %865 = vmatprep.mubr.f32.mxu0 %v2116_v1 }
  0xb6   : > { %v2120_v51 = vpop.trf.xlu0  ;;  %866 = vmatmul.mubr.f32.gmra.mrb[12].mxu0 %v2119_v35 }
  0xb7   : > { %v2121_v26 = vunpack.i.l.bf16 %v2120_v51  ;;  %v2124_v46 = vunpack.i.h.bf16 %v2120_v51  ;;  %1973 = vmatpush3.bf16.msra.mxu0 %v1972_v58  ;;  %v3071_v52 = vpop.trf.xlu1 }
  0xb8   : > { %1975 = vmatprep.subr.bf16.mxu0 %v1974_v56 }
  0xb9   : > { %870 = vmatprep.mubr.f32.mxu0 %v2121_v26 }
  0xba   : > { %v2125_v10 = vpop.trf.xlu0  ;;  %871 = vmatmul.mubr.f32.gmra.mrb[14].mxu0 %v2124_v46 }
  0xbb   : > { %v2126_v33 = vunpack.i.l.bf16 %v2125_v10  ;;  %v2129_v25 = vunpack.i.h.bf16 %v2125_v10  ;;  %1977 = vmatpush3.bf16.msra.mxu0 %v1976_v57  ;;  %v3073_v53 = vpop.trf.xlu1 }
  0xbc   : > { %1978 = vmatprep.subr.bf16.mxu0 %v2503_v48 }
  0xbd   : > { %875 = vmatprep.mubr.f32.mxu0 %v2126_v33 }
  0xbe   : > { %v2130_v0 = vpop.trf.xlu0  ;;  %876 = vmatmul.mubr.f32.gmra.mrb[16].mxu0 %v2129_v25 }
  0xbf   : > { %v2131_v24 = vunpack.i.l.bf16 %v2130_v0  ;;  %v2134_v38 = vunpack.i.h.bf16 %v2130_v0  ;;  %v3076_v32 = vpop.trf.xlu1 }
  0xc1   : > { %880 = vmatprep.mubr.f32.mxu0 %v2131_v24 }
  0xc2   : > { %v2135_v36 = vpop.trf.xlu0  ;;  %881 = vmatmul.mubr.f32.gmra.mrb[18].mxu0 %v2134_v38 }
  0xc3   : > { %v2136_v45 = vunpack.i.l.bf16 %v2135_v36  ;;  %v2139_v6 = vunpack.i.h.bf16 %v2135_v36  ;;  %v3078_v44 = vpop.trf.xlu1 }
  0xc5   : > { %885 = vmatprep.mubr.f32.mxu0 %v2136_v45 }
  0xc6   : > { %v2140_v49 = vpop.trf.xlu0  ;;  %886 = vmatmul.mubr.f32.gmra.mrb[20].mxu0 %v2139_v6  ;;  %v301_v6 = vsub.f32 %v2553_v2, %v2786_v27 }
  0xc7   : > { %v2141_v58 = vunpack.i.l.bf16 %v2140_v49  ;;  %v2144_v1 = vunpack.i.h.bf16 %v2140_v49  ;;  %v3080_v35 = vpop.trf.xlu1  ;;  %v303_v49 = vsub.f32 %v2567_v13, %v2815_v59 }
  0xc9   : > { %890 = vmatprep.mubr.f32.mxu0 %v2141_v58 }
  0xca   : > { %v2145_v56 = vpop.trf.xlu0  ;;  %891 = vmatmul.mubr.f32.gmra.mrb[22].mxu0 %v2144_v1 }
  0xcb   : > { %v2146_v51 = vunpack.i.l.bf16 %v2145_v56  ;;  %v2149_v57 = vunpack.i.h.bf16 %v2145_v56  ;;  %v3082_v26 = vpop.trf.xlu1 }
  0xcd   : > { %895 = vmatprep.mubr.f32.mxu0 %v2146_v51  ;;  %v358_v51 = vand.u32 2147483647, %v301_v6 }
  0xce   : > { %v2150_v46 = vpop.trf.xlu0  ;;  %896 = vmatmul.mubr.f32.gmra.mrb[24].mxu0 %v2149_v57 }
  0xcf   : > { %v2151_v10 = vunpack.i.l.bf16 %v2150_v46  ;;  %v2154_v33 = vunpack.i.h.bf16 %v2150_v46  ;;  %v3084_v25 = vpop.trf.xlu1  ;;  %415 = vadd.xlane.f32.xlu0 %v358_v51 }
  0xd1   : > { %900 = vmatprep.mubr.f32.mxu0 %v2151_v10  ;;  %v1979_v10 = vpack.c.bf16 %v2804_v55, %v2789_v50  ;;  %v1982_v55 = vpack.c.bf16 %v2833_v4, %v2818_v60  ;;  %v1985_v60 = vpack.c.bf16 %v2859_v16, %v2846_v9  ;;  %v1988_v9 = vpack.c.bf16 %v2885_v28, %v2872_v23 }
  0xd2   : > { %v2155_v0 = vpop.trf.xlu0  ;;  %901 = vmatmul.mubr.f32.gmra.mrb[26].mxu0 %v2154_v33  ;;  %v1991_v23 = vpack.c.bf16 %v2911_v43, %v2898_v37  ;;  %v1994_v37 = vpack.c.bf16 %v2937_v40, %v2924_v7  ;;  %v1997_v7 = vpack.c.bf16 %v2963_v63, %v2950_v61  ;;  %v2000_v61 = vpack.c.bf16 %v2986_v42, %v2976_v14 }
  0xd3   : > { %v2156_v24 = vunpack.i.l.bf16 %v2155_v0  ;;  %v2159_v38 = vunpack.i.h.bf16 %v2155_v0  ;;  %v3086_v36 = vpop.trf.xlu1  ;;  %v360_v0 = vand.u32 2147483647, %v303_v49 }
  0xd5   : > { %905 = vmatprep.mubr.f32.mxu0 %v2156_v24  ;;  %419 = vadd.xlane.f32.xlu0 %v360_v0 }
  0xd6   : > { %v2160_v45 = vpop.trf.xlu0  ;;  %906 = vmatmul.mubr.f32.gmra.mrb[28].mxu0 %v2159_v38 }
  0xd7   : > { %v2161_v58 = vunpack.i.l.bf16 %v2160_v45  ;;  %v2164_v1 = vunpack.i.h.bf16 %v2160_v45  ;;  %v2197_v56 = vpop.trf.xlu1 }
  0xd8   : > { %v2198_v57 = vunpack.i.l.bf16 %v2197_v56  ;;  %v2201_v46 = vunpack.i.h.bf16 %v2197_v56 }
  0xd9   : > { %910 = vmatprep.mubr.f32.mxu0 %v2161_v58 }
  0xda   : > { %911 = vmatmul.mubr.f32.gmra.mrb[30].mxu0 %v2164_v1  ;;  %v3094_v33 = vpop.trf.xlu0  ;;  %981 = vmatmul.mubr.f32.vlgmr.msra.gmra.mrb[0].mxu1 %v2198_v57 }
  0xdb   : > { %v2310_v2 = vunpack.i.l.bf16 %v3094_v33  ;;  %1301 = vmatprep.mubr.f32.mxu0 %v2201_v46  ;;  %v2202_v13 = vpop.trf.xlu1  ;;  %1685 = vmatprep.mubr.msk.f32.mxu1 %vm722_vm0, %v3004_v34 }
  0xdc   : > { %2027 = vmatpush1.bf16.msra.mxu1 %v1979_v10  ;;  %v2203_v27 = vunpack.i.l.bf16 %v2202_v13  ;;  %v2206_v59 = vunpack.i.h.bf16 %v2202_v13 }
  0xdd   : > { %2015 = vmatprep.subr.bf16.mxu1 %v2503_v48 }
  0xde   : > { %1302 = vmatmul.mubr.f32.vlgmr.msra.gmra.mrb[32].mxu0 %v2310_v2  ;;  %v3100_v50 = vpop.trf.xlu0  ;;  %986 = vmatmul.mubr.f32.gmra.mrb[2].mxu1 %v2203_v27 }
  0xdf   : > { %1306 = vmatprep.mubr.f32.mxu0 %v2206_v59  ;;  %v2315_v24 = vunpack.i.l.bf16 %v3100_v50  ;;  %v2207_v38 = vpop.trf.xlu1  ;;  %1686 = vmatprep.mubr.msk.f32.mxu1 %vm722_vm0, %v3014_v29 }
  0xe0   : > { %2028 = vmatpush1.bf16.msra.mxu1 %v1982_v55  ;;  %v2208_v34 = vunpack.i.l.bf16 %v2207_v38  ;;  %v2211_v45 = vunpack.i.h.bf16 %v2207_v38  ;;  %1980 = vmatpush1.bf16.msra.mxu0 %v1979_v10 }
  0xe1   : > { %2016 = vmatprep.subr.bf16.mxu1 %v2503_v48  ;;  %1981 = vmatprep.subr.bf16.mxu0 %v2503_v48 }
  0xe2   : > { %1307 = vmatmul.mubr.f32.gmra.mrb[34].mxu0 %v2315_v24  ;;  %v3108_v6 = vpop.trf.xlu0  ;;  %991 = vmatmul.mubr.f32.gmra.mrb[4].mxu1 %v2208_v34 }
  0xe3   : > { %1311 = vmatprep.mubr.f32.mxu0 %v2211_v45  ;;  %v2320_v4 = vunpack.i.l.bf16 %v3108_v6  ;;  %v2212_v49 = vpop.trf.xlu1  ;;  %1687 = vmatprep.mubr.msk.f32.mxu1 %vm722_vm0, %v3024_v19  ;;  %v2003_v45 = vpack.c.bf16 %v2995_v39, %v2991_v47  ;;  %v2006_v47 = vpack.c.bf16 %v3010_v31, %v3002_v41  ;;  %v2009_v41 = vpack.c.bf16 %v3030_v17, %v3020_v30 }
  0xe4   : > { %2029 = vmatpush1.bf16.msra.mxu1 %v1985_v60  ;;  %v2213_v29 = vunpack.i.l.bf16 %v2212_v49  ;;  %v2216_v58 = vunpack.i.h.bf16 %v2212_v49  ;;  %1983 = vmatpush1.bf16.msra.mxu0 %v1982_v55  ;;  %v2012_v17 = vpack.c.bf16 %v3050_v62, %v3040_v18 }
  0xe5   : > { %2017 = vmatprep.subr.bf16.mxu1 %v2503_v48  ;;  %1984 = vmatprep.subr.bf16.mxu0 %v2503_v48 }
  0xe6   : > { %1312 = vmatmul.mubr.f32.gmra.mrb[36].mxu0 %v2320_v4  ;;  %v3117_v1 = vpop.trf.xlu0  ;;  %996 = vmatmul.mubr.f32.gmra.mrb[6].mxu1 %v2213_v29 }
  0xe7   : > { %1316 = vmatprep.mubr.f32.mxu0 %v2216_v58  ;;  %v2325_v16 = vunpack.i.l.bf16 %v3117_v1  ;;  %v2217_v56 = vpop.trf.xlu1  ;;  %1688 = vmatprep.mubr.msk.f32.mxu1 %vm722_vm0, %v3034_v15 }
  0xe8   : > { %2030 = vmatpush1.bf16.msra.mxu1 %v1988_v9  ;;  %v2218_v19 = vunpack.i.l.bf16 %v2217_v56  ;;  %v2221_v51 = vunpack.i.h.bf16 %v2217_v56  ;;  %1986 = vmatpush1.bf16.msra.mxu0 %v1985_v60 }
  0xe9   : > { %2018 = vmatprep.subr.bf16.mxu1 %v2503_v48  ;;  %1987 = vmatprep.subr.bf16.mxu0 %v2503_v48 }
  0xea   : > { %1317 = vmatmul.mubr.f32.gmra.mrb[38].mxu0 %v2325_v16  ;;  %v3126_v57 = vpop.trf.xlu0  ;;  %1001 = vmatmul.mubr.f32.gmra.mrb[8].mxu1 %v2218_v19  ;;  %v2389_v16 = vld [vmem:[%s2536_s20 + $0x18] sm:$0xff] }
  0xeb   : > { %1321 = vmatprep.mubr.f32.mxu0 %v2221_v51  ;;  %v2330_v28 = vunpack.i.l.bf16 %v3126_v57  ;;  %v2222_v46 = vpop.trf.xlu1  ;;  %1689 = vmatprep.mubr.msk.f32.mxu1 %vm722_vm0, %v3044_v5  ;;  %v304_v56 = vsub.f32 %v2389_v16, %v2830_v3  ;;  %v2313_v16 = vunpack.i.h.bf16 %v3094_v33 }
  0xec   : > { %2031 = vmatpush1.bf16.msra.mxu1 %v1991_v23  ;;  %v2223_v15 = vunpack.i.l.bf16 %v2222_v46  ;;  %v2226_v10 = vunpack.i.h.bf16 %v2222_v46  ;;  %1989 = vmatpush1.bf16.msra.mxu0 %v1988_v9 }
  0xed   : > { %2019 = vmatprep.subr.bf16.mxu1 %v2503_v48  ;;  %1990 = vmatprep.subr.bf16.mxu0 %v2503_v48 }
  0xee   : > { %1322 = vmatmul.mubr.f32.gmra.mrb[40].mxu0 %v2330_v28  ;;  %v3135_v0 = vpop.trf.xlu0  ;;  %1006 = vmatmul.mubr.f32.gmra.mrb[10].mxu1 %v2223_v15  ;;  %v2390_v28 = vld [vmem:[%s2536_s20 + $0x20] sm:$0xff]  ;;  %v2391_v15 = vld [vmem:[%s2536_s20 + $0x8] sm:$0xff] }
  0xef   : > { %1326 = vmatprep.mubr.f32.mxu0 %v2226_v10  ;;  %v2335_v43 = vunpack.i.l.bf16 %v3135_v0  ;;  %v2227_v2 = vpop.trf.xlu1  ;;  %1690 = vmatprep.mubr.msk.f32.mxu1 %vm722_vm0, %v3054_v21  ;;  %v305_v46 = vsub.f32 %v2390_v28, %v2843_v8  ;;  %v302_v18 = vsub.f32 %v2391_v15, %v2801_v54  ;;  %v2392_v8 = vld [vmem:[%s2536_s20 + $0x28] sm:$0xff]  ;;  %v2318_v28 = vunpack.i.h.bf16 %v3100_v50  ;;  %v2403_v15 = vld [vmem:[%s2541_s23 + $0x50] sm:$0xff]  ;;  %v2404_v50 = vld [vmem:[%s2536_s20 + $0x58] sm:$0xff] }
  0xf0   : > { %2032 = vmatpush1.bf16.msra.mxu1 %v1994_v37  ;;  %v2228_v5 = vunpack.i.l.bf16 %v2227_v2  ;;  %v2231_v13 = vunpack.i.h.bf16 %v2227_v2  ;;  %1992 = vmatpush1.bf16.msra.mxu0 %v1991_v23  ;;  %v361_v23 = vand.u32 2147483647, %v304_v56 }
  0xf1   : > { %2020 = vmatprep.subr.bf16.mxu1 %v2503_v48  ;;  %1993 = vmatprep.subr.bf16.mxu0 %v2503_v48  ;;  %v362_v54 = vand.u32 2147483647, %v305_v46  ;;  %v2402_v46 = vld [vmem:[%s2536_s20 + $0x50] sm:$0xff] }
  0xf2   : > { %1327 = vmatmul.mubr.f32.gmra.mrb[42].mxu0 %v2335_v43  ;;  %v3144_v27 = vpop.trf.xlu0  ;;  %1011 = vmatmul.mubr.f32.gmra.mrb[12].mxu1 %v2228_v5  ;;  %v306_v5 = vsub.f32 %v2392_v8, %v2856_v12 }
  0xf3   : > { %1331 = vmatprep.mubr.f32.mxu0 %v2231_v13  ;;  %v2340_v40 = vunpack.i.l.bf16 %v3144_v27  ;;  %v2232_v59 = vpop.trf.xlu1  ;;  %1691 = vmatprep.mubr.msk.f32.mxu1 %vm722_vm0, %v3064_v11  ;;  %v359_v13 = vand.u32 2147483647, %v302_v18  ;;  %v311_v18 = vsub.f32 %v2402_v46, %v2403_v15  ;;  %v2424_v46 = vld [vmem:[%s2536_s20 + $0xd0] sm:$0xff] }
  0xf4   : > { %2033 = vmatpush1.bf16.msra.mxu1 %v1997_v7  ;;  %v2233_v21 = vunpack.i.l.bf16 %v2232_v59  ;;  %v2236_v55 = vunpack.i.h.bf16 %v2232_v59  ;;  %1995 = vmatpush1.bf16.msra.mxu0 %v1994_v37  ;;  %v3533_v37 = vmov 0.0   ;;  %v363_v12 = vand.u32 2147483647, %v306_v5  ;;  %v2407_v5 = vld [vmem:[%s2541_s23 + $0x60] sm:$0xff]  ;;  %v2425_v15 = vld [vmem:[%s2541_s23 + $0xd0] sm:$0xff] }
  0xf5   : > { %2021 = vmatprep.subr.bf16.mxu1 %v2503_v48  ;;  %1996 = vmatprep.subr.bf16.mxu0 %v2503_v48 }
  0xf6   : > { %1332 = vmatmul.mubr.f32.gmra.mrb[44].mxu0 %v2340_v40  ;;  %v3153_v24 = vpop.trf.xlu0  ;;  %1016 = vmatmul.mubr.f32.gmra.mrb[14].mxu1 %v2233_v21  ;;  %v2393_v21 = vld [vmem:[%s2536_s20 + $0x30] sm:$0xff] }
  0xf7   : > { %1336 = vmatprep.mubr.f32.mxu0 %v2236_v55  ;;  %v2345_v63 = vunpack.i.l.bf16 %v3153_v24  ;;  %v2237_v38 = vpop.trf.xlu1  ;;  %1692 = vmatprep.mubr.msk.f32.mxu1 %vm722_vm0, %v3071_v52  ;;  %v307_v55 = vsub.f32 %v2393_v21, %v2869_v20  ;;  %v2410_v21 = vld [vmem:[%s2536_s20 + $0x68] sm:$0xff] }
  0xf8   : > { %2034 = vmatpush1.bf16.msra.mxu1 %v2000_v61  ;;  %v2238_v11 = vunpack.i.l.bf16 %v2237_v38  ;;  %v2241_v34 = vunpack.i.h.bf16 %v2237_v38  ;;  %1998 = vmatpush1.bf16.msra.mxu0 %v1997_v7 }
  0xf9   : > { %2022 = vmatprep.subr.bf16.mxu1 %v2503_v48  ;;  %1999 = vmatprep.subr.bf16.mxu0 %v2503_v48  ;;  %v364_v20 = vand.u32 2147483647, %v307_v55  ;;  %v2411_v55 = vld [vmem:[%s2541_s23 + $0x68] sm:$0xff] }
  0xfa   : > { %1337 = vmatmul.mubr.f32.gmra.mrb[46].mxu0 %v2345_v63  ;;  %v3164_v60 = vpop.trf.xlu0  ;;  %1021 = vmatmul.mubr.f32.gmra.mrb[16].mxu1 %v2238_v11  ;;  %v2394_v11 = vld [vmem:[%s2536_s20 + $0x80] sm:$0xff] }
  0xfb   : > { %1341 = vmatprep.mubr.f32.mxu0 %v2241_v34  ;;  %v2350_v14 = vunpack.i.l.bf16 %v3164_v60  ;;  %v2242_v42 = vpop.trf.xlu1  ;;  %1693 = vmatprep.mubr.msk.f32.mxu1 %vm722_vm0, %v3073_v53  ;;  %v2395_v34 = vld [vmem:[%s2541_s23 + $0x80] sm:$0xff] }
  0xfc   : > { %2035 = vmatpush1.bf16.msra.mxu1 %v2003_v45  ;;  %v2243_v52 = vunpack.i.l.bf16 %v2242_v42  ;;  %v2246_v4 = vunpack.i.h.bf16 %v2242_v42  ;;  %2001 = vmatpush1.bf16.msra.mxu0 %v2000_v61  ;;  %v2396_v42 = vld [vmem:[%s2536_s20 + $0x38] sm:$0xff] }
  0xfd   : > { %2023 = vmatprep.subr.bf16.mxu1 %v2503_v48  ;;  %2002 = vmatprep.subr.bf16.mxu0 %v2503_v48 }
  0xfe   : > { %1342 = vmatmul.mubr.f32.gmra.mrb[48].mxu0 %v2350_v14  ;;  %v3173_v39 = vpop.trf.xlu0  ;;  %1026 = vmatmul.mubr.f32.gmra.mrb[18].mxu1 %v2243_v52  ;;  %v2397_v52 = vld [vmem:[%s2541_s23 + $0x38] sm:$0xff] }
  0xff   : > { %1346 = vmatprep.mubr.f32.mxu0 %v2246_v4  ;;  %v2355_v49 = vunpack.i.l.bf16 %v3173_v39  ;;  %v2247_v29 = vpop.trf.xlu1  ;;  %1694 = vmatprep.mubr.msk.f32.mxu1 %vm722_vm0, %v3076_v32 }
 0x100   : > { %2036 = vmatpush1.bf16.msra.mxu1 %v2006_v47  ;;  %v2248_v53 = vunpack.i.l.bf16 %v2247_v29  ;;  %v2251_v58 = vunpack.i.h.bf16 %v2247_v29  ;;  %2004 = vmatpush1.bf16.msra.mxu0 %v2003_v45  ;;  %v317_v45 = vsub.f32 %v2394_v11, %v2395_v34  ;;  %v2343_v34 = vunpack.i.h.bf16 %v3144_v27 }
 0x101   : > { %2024 = vmatprep.subr.bf16.mxu1 %v2503_v48  ;;  %2005 = vmatprep.subr.bf16.mxu0 %v2503_v48  ;;  %v2348_v27 = vunpack.i.h.bf16 %v3153_v24  ;;  %v2353_v24 = vunpack.i.h.bf16 %v3164_v60  ;;  %v2358_v60 = vunpack.i.h.bf16 %v3173_v39 }
 0x102   : > { %1347 = vmatmul.mubr.f32.gmra.mrb[50].mxu0 %v2355_v49  ;;  %v3182_v31 = vpop.trf.xlu0  ;;  %1031 = vmatmul.mubr.f32.gmra.mrb[20].mxu1 %v2248_v53  ;;  %v374_v4 = vand.u32 2147483647, %v317_v45  ;;  %v2413_v45 = vld [vmem:[%s2541_s23 + $0xa0] sm:$0xff] }
 0x103   : > { %1351 = vmatprep.mubr.f32.mxu0 %v2251_v58  ;;  %v2360_v9 = vunpack.i.l.bf16 %v3182_v31  ;;  %v2252_v32 = vpop.trf.xlu1  ;;  %1695 = vmatprep.mubr.msk.f32.mxu1 %vm722_vm0, %v3078_v44  ;;  %v2363_v39 = vunpack.i.h.bf16 %v3182_v31 }
 0x104   : > { %2037 = vmatpush1.bf16.msra.mxu1 %v2009_v41  ;;  %v2253_v19 = vunpack.i.l.bf16 %v2252_v32  ;;  %v2256_v30 = vunpack.i.h.bf16 %v2252_v32  ;;  %2007 = vmatpush1.bf16.msra.mxu0 %v2006_v47 }
 0x105   : > { %2025 = vmatprep.subr.bf16.mxu1 %v2503_v48  ;;  %2008 = vmatprep.subr.bf16.mxu0 %v2503_v48 }
 0x106   : > { %1352 = vmatmul.mubr.f32.gmra.mrb[52].mxu0 %v2360_v9  ;;  %v3193_v51 = vpop.trf.xlu0  ;;  %1036 = vmatmul.mubr.f32.gmra.mrb[22].mxu1 %v2253_v19  ;;  %v2399_v9 = vld [vmem:[%s2541_s23 + $0x40] sm:$0xff] }
 0x107   : > { %1356 = vmatprep.mubr.f32.mxu0 %v2256_v30  ;;  %v2365_v44 = vunpack.i.l.bf16 %v3193_v51  ;;  %v2257_v3 = vpop.trf.xlu1  ;;  %1696 = vmatprep.mubr.msk.f32.mxu1 %vm722_vm0, %v3080_v35  ;;  %v2400_v30 = vld [vmem:[%s2536_s20 + $0x48] sm:$0xff]  ;;  %v2368_v31 = vunpack.i.h.bf16 %v3193_v51 }
 0x108   : > { %2038 = vmatpush1.bf16.msra.mxu1 %v2012_v17  ;;  %v2258_v62 = vunpack.i.l.bf16 %v2257_v3  ;;  %v2261_v10 = vunpack.i.h.bf16 %v2257_v3  ;;  %2010 = vmatpush1.bf16.msra.mxu0 %v2009_v41  ;;  %v2398_v41 = vld [vmem:[%s2536_s20 + $0x40] sm:$0xff]  ;;  %v2323_v3 = vunpack.i.h.bf16 %v3108_v6  ;;  %v368_v6 = vand.u32 2147483647, %v311_v18 }
 0x109   : > { %2026 = vmatprep.subr.mxu1 %v3533_v37  ;;  %2011 = vmatprep.subr.bf16.mxu0 %v2503_v48  ;;  %v309_v32 = vsub.f32 %v2398_v41, %v2399_v9  ;;  %v2419_v41 = vld [vmem:[%s2541_s23 + $0x78] sm:$0xff]  ;;  %v327_v18 = vsub.f32 %v2424_v46, %v2425_v15 }
 0x10a   : > { %1357 = vmatmul.mubr.f32.gmra.mrb[54].mxu0 %v2365_v44  ;;  %v3204_v43 = vpop.trf.xlu0  ;;  %1041 = vmatmul.mubr.f32.gmra.mrb[24].mxu1 %v2258_v62  ;;  %v2450_v15 = vld [vmem:[%s2536_s20 + $0xf8] sm:$0xff] }
 0x10b   : > { %1361 = vmatprep.mubr.f32.mxu0 %v2261_v10  ;;  %v2370_v35 = vunpack.i.l.bf16 %v3204_v43  ;;  %v2262_v2 = vpop.trf.xlu1  ;;  %1697 = vmatprep.mubr.msk.f32.mxu1 %vm722_vm0, %v3082_v26  ;;  %v366_v19 = vand.u32 2147483647, %v309_v32  ;;  %v2328_v10 = vunpack.i.h.bf16 %v3117_v1  ;;  %v2406_v1 = vld [vmem:[%s2536_s20 + $0x60] sm:$0xff]  ;;  %v2373_v51 = vunpack.i.h.bf16 %v3204_v43 }
 0x10c   : > { %2039 = vmatpush1.msra.mxu1 %v3060_v22  ;;  %v2263_v7 = vunpack.i.l.bf16 %v2262_v2  ;;  %v2266_v40 = vunpack.i.h.bf16 %v2262_v2  ;;  %2013 = vmatpush1.bf16.msra.mxu0 %v2012_v17  ;;  %v2401_v17 = vld [vmem:[%s2541_s23 + $0x48] sm:$0xff] }
 0x10d   : > { %421 = vadd.xlane.f32.xlu0 %v361_v23  ;;  %1430 = vmatprep.subr.mxu0 %v3533_v37  ;;  %v310_v44 = vsub.f32 %v2400_v30, %v2401_v17  ;;  %v2405_v37 = vld [vmem:[%s2541_s23 + $0x58] sm:$0xff] }
 0x10e   : > { %1362 = vmatmul.mubr.f32.gmra.mrb[56].mxu0 %v2370_v35  ;;  %v3213_v48 = vpop.trf.xlu0  ;;  %1046 = vmatmul.mubr.f32.gmra.mrb[26].mxu1 %v2263_v7  ;;  %v312_v35 = vsub.f32 %v2404_v50, %v2405_v37  ;;  %v384_v37 = vand.u32 2147483647, %v327_v18  ;;  %v2451_v18 = vld [vmem:[%s2541_s23 + $0xf8] sm:$0xff] }
 0x10f   : > { %1366 = vmatprep.mubr.f32.mxu0 %v2266_v40  ;;  %v2375_v26 = vunpack.i.l.bf16 %v3213_v48  ;;  %v2267_v59 = vpop.trf.xlu1  ;;  %1698 = vmatprep.mubr.msk.f32.mxu1 %vm722_vm0, %v3084_v25  ;;  %v367_v33 = vand.u32 2147483647, %v310_v44  ;;  %v2338_v40 = vunpack.i.h.bf16 %v3135_v0  ;;  %v2412_v0 = vld [vmem:[%s2536_s20 + $0xa0] sm:$0xff]  ;;  %v2422_v44 = vld [vmem:[%s2536_s20 + $0x88] sm:$0xff]  ;;  %v2378_v43 = vunpack.i.h.bf16 %v3213_v48 }
 0x110   : > { %417 = vadd.xlane.f32.xlu1 %v359_v13  ;;  %v2268_v61 = vunpack.i.l.bf16 %v2267_v59  ;;  %v2271_v63 = vunpack.i.h.bf16 %v2267_v59  ;;  %1431 = vmatpush1.msra.mxu0 %v3060_v22  ;;  %v308_v22 = vsub.f32 %v2396_v42, %v2397_v52  ;;  %v369_v8 = vand.u32 2147483647, %v312_v35  ;;  %v2409_v59 = vld [vmem:[%s2541_s23 + $0x90] sm:$0xff] }
 0x111   : > { %423 = vadd.xlane.f32.xlu0 %v362_v54  ;;  %v2333_v54 = vunpack.i.h.bf16 %v3126_v57  ;;  %v313_v13 = vsub.f32 %v2406_v1, %v2407_v5  ;;  %v2415_v42 = vld [vmem:[%s2541_s23 + $0x70] sm:$0xff]  ;;  %v2430_v5 = vld [vmem:[%s2536_s20 + $0xa8] sm:$0xff] }
 0x112   : > { %1367 = vmatmul.mubr.f32.gmra.mrb[58].mxu0 %v2375_v26  ;;  %v3222_v38 = vpop.trf.xlu0  ;;  %1051 = vmatmul.mubr.f32.gmra.mrb[28].mxu1 %v2268_v61  ;;  %v365_v58 = vand.u32 2147483647, %v308_v22  ;;  %v2408_v26 = vld [vmem:[%s2536_s20 + $0x90] sm:$0xff]  ;;  %v314_v61 = vsub.f32 %v2410_v21, %v2411_v55  ;;  %v2434_v55 = vld [vmem:[%s2536_s20 + $0xb8] sm:$0xff] }
 0x113   : > { %1371 = vmatprep.mubr.f32.mxu0 %v2271_v63  ;;  %v2380_v25 = vunpack.i.l.bf16 %v3222_v38  ;;  %v2272_v14 = vpop.trf.xlu1  ;;  %1699 = vmatprep.mubr.msk.f32.mxu1 %vm722_vm0, %v3086_v36  ;;  %v370_v57 = vand.u32 2147483647, %v313_v13  ;;  %v2431_v13 = vld [vmem:[%s2541_s23 + $0xa8] sm:$0xff]  ;;  %v2383_v48 = vunpack.i.h.bf16 %v3222_v38 }
 0x114   : > { %v2273_v47 = vunpack.i.l.bf16 %v2272_v14  ;;  %v2276_v49 = vunpack.i.h.bf16 %v2272_v14  ;;  %447 = vadd.xlane.f32.xlu1 %v374_v4  ;;  %v371_v14 = vand.u32 2147483647, %v314_v61  ;;  %v2435_v61 = vld [vmem:[%s2541_s23 + $0xb8] sm:$0xff] }
 0x115   : > { %425 = vadd.xlane.f32.xlu0 %v363_v12  ;;  %v319_v12 = vsub.f32 %v2408_v26, %v2409_v59  ;;  %v2432_v59 = vld [vmem:[%s2536_s20 + $0xf0] sm:$0xff] }
 0x116   : > { %1372 = vmatmul.mubr.f32.gmra.mrb[60].mxu0 %v2380_v25  ;;  %v3231_v29 = vpop.trf.xlu0  ;;  %1056 = vmatmul.mubr.f32.gmra.mrb[30].mxu1 %v2273_v47  ;;  %v321_v25 = vsub.f32 %v2412_v0, %v2413_v45  ;;  %v2416_v47 = vld [vmem:[%s2536_s20 + $0xb0] sm:$0xff]  ;;  %v2436_v0 = vld [vmem:[%s2536_s20 + $0x100] sm:$0xff] }
 0x117   : > { %1376 = vmatprep.mubr.f32.mxu0 %v2276_v49  ;;  %v2385_v36 = vunpack.i.l.bf16 %v3231_v29  ;;  %v1173_v53 = vpop.trf.xlu1  ;;  %v376_v63 = vand.u32 2147483647, %v319_v12  ;;  %v2417_v49 = vld [vmem:[%s2541_s23 + $0xb0] sm:$0xff]  ;;  %v2437_v45 = vld [vmem:[%s2541_s23 + $0x100] sm:$0xff]  ;;  %v2388_v38 = vunpack.i.h.bf16 %v3231_v29 }
 0x118   : > { %v378_v22 = vand.u32 2147483647, %v321_v25  ;;  %v2433_v12 = vld [vmem:[%s2541_s23 + $0xf0] sm:$0xff]  ;;  %v333_v25 = vsub.f32 %v2436_v0, %v2437_v45  ;;  %v2452_v29 = vld [vmem:[%s2536_s20 + $0x140] sm:$0xff]  ;;  %v2465_v0 = vld [vmem:[%s2541_s23 + $0x148] sm:$0xff] }
 0x119   : > { %427 = vadd.xlane.f32.xlu0 %v364_v20  ;;  %451 = vadd.xlane.f32.xlu1 %v376_v63  ;;  %v2414_v20 = vld [vmem:[%s2536_s20 + $0x70] sm:$0xff]  ;;  %v324_v63 = vsub.f32 %v2434_v55, %v2435_v61  ;;  %v2462_v61 = vld [vmem:[%s2536_s20 + $0x138] sm:$0xff] }
 0x11a   : > { %1377 = vmatmul.mubr.f32.gmra.mrb[62].mxu0 %v2385_v36  ;;  %v315_v52 = vsub.f32 %v2414_v20, %v2415_v42  ;;  %v323_v36 = vsub.f32 %v2416_v47, %v2417_v49  ;;  %v2438_v20 = vld [vmem:[%s2536_s20 + $0xc8] sm:$0xff]  ;;  %v2441_v47 = vld [vmem:[%s2541_s23 + $0x110] sm:$0xff] }
 0x11b   : > { %1700 = vmatprep.mubr.msk.f32.mxu0 %vm722_vm0, %v1173_v53  ;;  %v1174_v56 = vpop.trf.xlu1  ;;  %v2439_v42 = vld [vmem:[%s2541_s23 + $0xc8] sm:$0xff] }
 0x11c   : > { %v372_v53 = vand.u32 2147483647, %v315_v52  ;;  %v380_v32 = vand.u32 2147483647, %v323_v36  ;;  %v326_v52 = vsub.f32 %v2438_v20, %v2439_v42  ;;  %v2467_v20 = vld [vmem:[%s2541_s23 + $0x158] sm:$0xff] }
 0x11d   : > { %429 = vadd.xlane.f32.xlu0 %v365_v58  ;;  %455 = vadd.xlane.f32.xlu1 %v378_v22  ;;  %v2418_v58 = vld [vmem:[%s2536_s20 + $0x78] sm:$0xff]  ;;  %v390_v22 = vand.u32 2147483647, %v333_v25 }
 0x11e   : > { %1447 = vmatmul.mubr.f32.vlgmr.msra.gmra.mrb[64].mxu0 %v2313_v16  ;;  %v316_v9 = vsub.f32 %v2418_v58, %v2419_v41  ;;  %v383_v36 = vand.u32 2147483647, %v326_v52  ;;  %v2443_v58 = vld [vmem:[%s2541_s23 + $0xd8] sm:$0xff] }
 0x11f   : > { %1701 = vmatprep.mubr.msk.f32.mxu0 %vm722_vm0, %v1174_v56  ;;  %v1175_v23 = vpop.trf.xlu1  ;;  %v2420_v56 = vld [vmem:[%s2536_s20 + $0xc0] sm:$0xff] }
 0x120   : > { %1702 = vmatprep.mubr.msk.f32.mxu1 %vm722_vm0, %v1175_v23  ;;  %v373_v17 = vand.u32 2147483647, %v316_v9 }
 0x121   : > { %431 = vadd.xlane.f32.xlu0 %v366_v19  ;;  %1457 = vmatmul.mubr.f32.vlgmr.msra.gmra.mrb[32].mxu1 %v2323_v3  ;;  %v2421_v19 = vld [vmem:[%s2541_s23 + $0xc0] sm:$0xff]  ;;  %v2423_v3 = vld [vmem:[%s2541_s23 + $0x88] sm:$0xff] }
 0x122   : > { %1452 = vmatmul.mubr.f32.gmra.mrb[66].mxu0 %v2318_v28  ;;  %459 = vadd.xlane.f32.xlu1 %v380_v32  ;;  %v325_v30 = vsub.f32 %v2420_v56, %v2421_v19  ;;  %v318_v23 = vsub.f32 %v2422_v44, %v2423_v3 }
 0x123   : > { %v1176_v62 = vpop.trf.xlu1 }
 0x124   : > { %1703 = vmatprep.mubr.msk.f32.mxu1 %vm722_vm0, %v1176_v62  ;;  %v382_v28 = vand.u32 2147483647, %v325_v30  ;;  %v375_v62 = vand.u32 2147483647, %v318_v23  ;;  %v2446_v30 = vld [vmem:[%s2536_s20 + $0xe8] sm:$0xff] }
 0x125   : > { %433 = vadd.xlane.f32.xlu0 %v367_v33  ;;  %1462 = vmatmul.mubr.f32.gmra.mrb[34].mxu1 %v2328_v10  ;;  %v2426_v10 = vld [vmem:[%s2536_s20 + $0x98] sm:$0xff] }
 0x126   : > { %463 = vadd.xlane.f32.xlu1 %v382_v28  ;;  %v2448_v28 = vld [vmem:[%s2536_s20 + $0x130] sm:$0xff] }
 0x127   : > { %v1177_v2 = vpop.trf.xlu1 }
 0x128   : > { %1704 = vmatprep.mubr.msk.f32.mxu1 %vm722_vm0, %v1177_v2  ;;  %v2428_v2 = vld [vmem:[%s2536_s20 + $0xe0] sm:$0xff] }
 0x129   : > { %435 = vadd.xlane.f32.xlu0 %v368_v6  ;;  %1467 = vmatmul.mubr.f32.gmra.mrb[36].mxu1 %v2333_v54  ;;  %v2427_v6 = vld [vmem:[%s2541_s23 + $0x98] sm:$0xff]  ;;  %v2429_v54 = vld [vmem:[%s2541_s23 + $0xe0] sm:$0xff] }
 0x12a   : > { %v320_v50 = vsub.f32 %v2426_v10, %v2427_v6  ;;  %467 = vadd.xlane.f32.xlu1 %v384_v37  ;;  %v2453_v6 = vld [vmem:[%s2541_s23 + $0x140] sm:$0xff] }
 0x12b   : > { %v1178_v7 = vpop.trf.xlu1 }
 0x12c   : > { %1705 = vmatprep.mubr.msk.f32.mxu1 %vm722_vm0, %v1178_v7  ;;  %v377_v1 = vand.u32 2147483647, %v320_v50  ;;  %v322_v7 = vsub.f32 %v2430_v5, %v2431_v13  ;;  %v341_v50 = vsub.f32 %v2452_v29, %v2453_v6 }
 0x12d   : > { %437 = vadd.xlane.f32.xlu0 %v369_v8  ;;  %1472 = vmatmul.mubr.f32.gmra.mrb[38].mxu1 %v2338_v40  ;;  %v329_v8 = vsub.f32 %v2428_v2, %v2429_v54 }
 0x12e   : > { %v379_v21 = vand.u32 2147483647, %v322_v7  ;;  %v398_v54 = vand.u32 2147483647, %v341_v50  ;;  %v2458_v7 = vld [vmem:[%s2536_s20 + $0x118] sm:$0xff] }
 0x12f   : > { %v1179_v11 = vpop.trf.xlu1  ;;  %v386_v40 = vand.u32 2147483647, %v329_v8  ;;  %v2456_v8 = vld [vmem:[%s2536_s20 + $0x150] sm:$0xff] }
 0x130   : > { %1706 = vmatprep.mubr.msk.f32.mxu1 %vm722_vm0, %v1179_v11 }
 0x131   : > { %439 = vadd.xlane.f32.xlu0 %v370_v57  ;;  %1477 = vmatmul.mubr.f32.gmra.mrb[40].mxu1 %v2343_v34  ;;  %v331_v57 = vsub.f32 %v2432_v59, %v2433_v12  ;;  %v2460_v12 = vld [vmem:[%s2536_s20 + $0x128] sm:$0xff] }
 0x132   : > { %471 = vadd.xlane.f32.xlu1 %v386_v40  ;;  %v2459_v40 = vld [vmem:[%s2541_s23 + $0x118] sm:$0xff] }
 0x133   : > { %v1180_v4 = vpop.trf.xlu1  ;;  %v388_v11 = vand.u32 2147483647, %v331_v57  ;;  %v2461_v57 = vld [vmem:[%s2541_s23 + $0x128] sm:$0xff] }
 0x134   : > { %1707 = vmatprep.mubr.msk.f32.mxu1 %vm722_vm0, %v1180_v4 }
 0x135   : > { %441 = vadd.xlane.f32.xlu0 %v371_v14  ;;  %1482 = vmatmul.mubr.f32.gmra.mrb[42].mxu1 %v2348_v27  ;;  %v381_v14 = vand.u32 2147483647, %v324_v63  ;;  %v2440_v27 = vld [vmem:[%s2536_s20 + $0x110] sm:$0xff]  ;;  %v2463_v63 = vld [vmem:[%s2541_s23 + $0x138] sm:$0xff] }
 0x136   : > { %475 = vadd.xlane.f32.xlu1 %v388_v11  ;;  %v335_v49 = vsub.f32 %v2440_v27, %v2441_v47  ;;  %v340_v11 = vsub.f32 %v2462_v61, %v2463_v63 }
 0x137   : > { %v1181_v16 = vpop.trf.xlu1 }
 0x138   : > { %1708 = vmatprep.mubr.msk.f32.mxu1 %vm722_vm0, %v1181_v16  ;;  %v392_v9 = vand.u32 2147483647, %v335_v49  ;;  %v2444_v16 = vld [vmem:[%s2536_s20 + $0x120] sm:$0xff] }
 0x139   : > { %443 = vadd.xlane.f32.xlu0 %v372_v53  ;;  %1487 = vmatmul.mubr.f32.gmra.mrb[44].mxu1 %v2353_v24  ;;  %v2442_v53 = vld [vmem:[%s2536_s20 + $0xd8] sm:$0xff]  ;;  %v2445_v24 = vld [vmem:[%s2541_s23 + $0x120] sm:$0xff] }
 0x13a   : > { %479 = vadd.xlane.f32.xlu1 %v390_v22  ;;  %v328_v41 = vsub.f32 %v2442_v53, %v2443_v58  ;;  %v337_v56 = vsub.f32 %v2444_v16, %v2445_v24  ;;  %v2470_v58 = vld [vmem:[%s2536_s20 + $0x168] sm:$0xff] }
 0x13b   : > { %v1182_v33 = vpop.trf.xlu1 }
 0x13c   : > { %1709 = vmatprep.mubr.msk.f32.mxu1 %vm722_vm0, %v1182_v33  ;;  %v385_v19 = vand.u32 2147483647, %v328_v41  ;;  %v394_v3 = vand.u32 2147483647, %v337_v56  ;;  %v2449_v33 = vld [vmem:[%s2541_s23 + $0x130] sm:$0xff]  ;;  %v2471_v41 = vld [vmem:[%s2541_s23 + $0x168] sm:$0xff] }
 0x13d   : > { %445 = vadd.xlane.f32.xlu0 %v373_v17  ;;  %1492 = vmatmul.mubr.f32.gmra.mrb[46].mxu1 %v2358_v60  ;;  %v2447_v17 = vld [vmem:[%s2541_s23 + $0xe8] sm:$0xff]  ;;  %v339_v60 = vsub.f32 %v2448_v28, %v2449_v33  ;;  %v2472_v56 = vld [vmem:[%s2536_s20 + $0x170] sm:$0xff]  ;;  %v2475_v28 = vld [vmem:[%s2541_s23 + $0x178] sm:$0xff] }
 0x13e   : > { %483 = vadd.xlane.f32.xlu1 %v392_v9  ;;  %v330_v44 = vsub.f32 %v2446_v30, %v2447_v17  ;;  %v346_v9 = vsub.f32 %v2470_v58, %v2471_v41 }
 0x13f   : > { %v1183_v35 = vpop.trf.xlu1  ;;  %v396_v10 = vand.u32 2147483647, %v339_v60 }
 0x140   : > { %1710 = vmatprep.mubr.msk.f32.mxu1 %vm722_vm0, %v1183_v35  ;;  %v387_v46 = vand.u32 2147483647, %v330_v44  ;;  %v2454_v35 = vld [vmem:[%s2536_s20 + $0x108] sm:$0xff]  ;;  %v403_v24 = vand.u32 2147483647, %v346_v9 }
 0x141   : > { %449 = vadd.xlane.f32.xlu0 %v375_v62  ;;  %1497 = vmatmul.mubr.f32.gmra.mrb[48].mxu1 %v2363_v39  ;;  %v332_v62 = vsub.f32 %v2450_v15, %v2451_v18  ;;  %v2455_v39 = vld [vmem:[%s2541_s23 + $0x108] sm:$0xff]  ;;  %v2476_v15 = vld [vmem:[%s2536_s20 + $0x180] sm:$0xff] }
 0x142   : > { %487 = vadd.xlane.f32.xlu1 %v394_v3  ;;  %v334_v2 = vsub.f32 %v2454_v35, %v2455_v39  ;;  %v2477_v18 = vld [vmem:[%s2541_s23 + $0x180] sm:$0xff]  ;;  %v2479_v35 = vld [vmem:[%s2541_s23 + $0x188] sm:$0xff] }
 0x143   : > { %v1184_v26 = vpop.trf.xlu1  ;;  %v389_v37 = vand.u32 2147483647, %v332_v62  ;;  %v349_v62 = vsub.f32 %v2476_v15, %v2477_v18 }
 0x144   : > { %1711 = vmatprep.mubr.msk.f32.mxu1 %vm722_vm0, %v1184_v26  ;;  %v391_v13 = vand.u32 2147483647, %v334_v2  ;;  %v336_v26 = vsub.f32 %v2458_v7, %v2459_v40 }
 0x145   : > { %453 = vadd.xlane.f32.xlu0 %v377_v1  ;;  %1502 = vmatmul.mubr.f32.gmra.mrb[50].mxu1 %v2368_v31  ;;  %v2457_v1 = vld [vmem:[%s2541_s23 + $0x150] sm:$0xff] }
 0x146   : > { %491 = vadd.xlane.f32.xlu1 %v396_v10  ;;  %v343_v5 = vsub.f32 %v2456_v8, %v2457_v1  ;;  %v393_v59 = vand.u32 2147483647, %v336_v26 }
 0x147   : > { %v1185_v34 = vpop.trf.xlu1 }
 0x148   : > { %1712 = vmatprep.mubr.msk.f32.mxu1 %vm722_vm0, %v1185_v34  ;;  %v400_v31 = vand.u32 2147483647, %v343_v5  ;;  %v397_v34 = vand.u32 2147483647, %v340_v11 }
 0x149   : > { %457 = vadd.xlane.f32.xlu0 %v379_v21  ;;  %1507 = vmatmul.mubr.f32.gmra.mrb[52].mxu1 %v2373_v51  ;;  %v338_v21 = vsub.f32 %v2460_v12, %v2461_v57  ;;  %v2464_v51 = vld [vmem:[%s2536_s20 + $0x148] sm:$0xff] }
 0x14a   : > { %495 = vadd.xlane.f32.xlu1 %v398_v54  ;;  %v342_v45 = vsub.f32 %v2464_v51, %v2465_v0  ;;  %v406_v54 = vand.u32 2147483647, %v349_v62 }
 0x14b   : > { %v1186_v4 = vpop.trf.xlu1  ;;  %v395_v55 = vand.u32 2147483647, %v338_v21 }
 0x14c   : > { %1713 = vmatprep.mubr.msk.f32.mxu1 %vm722_vm0, %v1186_v4  ;;  %v399_v25 = vand.u32 2147483647, %v342_v45  ;;  %v2468_v4 = vld [vmem:[%s2536_s20 + $0x160] sm:$0xff] }
 0x14d   : > { %461 = vadd.xlane.f32.xlu0 %v381_v14  ;;  %1512 = vmatmul.mubr.f32.gmra.mrb[54].mxu1 %v2378_v43  ;;  %v2466_v14 = vld [vmem:[%s2536_s20 + $0x158] sm:$0xff]  ;;  %v2469_v43 = vld [vmem:[%s2541_s23 + $0x160] sm:$0xff] }
 0x14e   : > { %499 = vadd.xlane.f32.xlu1 %v400_v31  ;;  %v344_v42 = vsub.f32 %v2466_v14, %v2467_v20  ;;  %v345_v27 = vsub.f32 %v2468_v4, %v2469_v43 }
 0x14f   : > { %v1187_v32 = vpop.trf.xlu1 }
 0x150   : > { %1714 = vmatprep.mubr.msk.f32.mxu1 %vm722_vm0, %v1187_v32  ;;  %v401_v22 = vand.u32 2147483647, %v344_v42  ;;  %v402_v53 = vand.u32 2147483647, %v345_v27 }
 0x151   : > { %465 = vadd.xlane.f32.xlu0 %v383_v36  ;;  %1517 = vmatmul.mubr.f32.gmra.mrb[56].mxu1 %v2383_v48 }
 0x153   : > { %v1188_v23 = vpop.trf.xlu1 }
 0x154   : > { %1715 = vmatprep.mubr.msk.f32.mxu1 %vm722_vm0, %v1188_v23 }
 0x155   : > { %469 = vadd.xlane.f32.xlu0 %v385_v19  ;;  %1522 = vmatmul.mubr.f32.gmra.mrb[58].mxu1 %v2388_v38  ;;  %v2473_v19 = vld [vmem:[%s2541_s23 + $0x170] sm:$0xff]  ;;  %v2474_v38 = vld [vmem:[%s2536_s20 + $0x178] sm:$0xff] }
 0x156   : > { %v347_v30 = vsub.f32 %v2472_v56, %v2473_v19  ;;  %v348_v33 = vsub.f32 %v2474_v38, %v2475_v28 }
 0x158   : > { %v404_v23 = vand.u32 2147483647, %v347_v30  ;;  %v405_v29 = vand.u32 2147483647, %v348_v33 }
 0x159   : > { %473 = vadd.xlane.f32.xlu0 %v387_v46 }
 0x15d   : > { %477 = vadd.xlane.f32.xlu0 %v389_v37  ;;  %v2478_v37 = vld [vmem:[%s2536_s20 + $0x188] sm:$0xff] }
 0x15e   : > { %v350_v39 = vsub.f32 %v2478_v37, %v2479_v35 }
 0x161   : > { %481 = vadd.xlane.f32.xlu0 %v391_v13  ;;  %v407_v13 = vand.u32 2147483647, %v350_v39 }
 0x165   : > { %485 = vadd.xlane.f32.xlu0 %v393_v59 }
 0x169   : > { %489 = vadd.xlane.f32.xlu0 %v395_v55 }
 0x16d   : > { %493 = vadd.xlane.f32.xlu0 %v397_v34 }
 0x171   : > { %v1750_v52 = vpop.f32.mrb[0].mxu0  ;;  %497 = vadd.xlane.f32.xlu0 %v399_v25 }
 0x172   : > { %v1751_v47 = vpop.f32.mrb[1].mxu0 }
 0x173   : > { %v3338_v49 = vadd.f32 %v1751_v47, %v1750_v52 }
 0x175   : > { %v1753_v36 = vpop.f32.mrb[2].mxu0  ;;  %501 = vadd.xlane.f32.xlu0 %v401_v22 }
 0x176   : > { %v1754_v32 = vpop.f32.mrb[3].mxu0 }
 0x177   : > { %v3342_v48 = vadd.f32 %v1754_v32, %v1753_v36 }
 0x179   : > { %v1756_v16 = vpop.f32.mrb[4].mxu0  ;;  %503 = vadd.xlane.f32.xlu0 %v402_v53 }
 0x17a   : > { %v1757_v17 = vpop.f32.mrb[5].mxu0 }
 0x17b   : > { %v3346_v44 = vadd.f32 %v1757_v17, %v1756_v16 }
 0x17d   : > { %v1759_v3 = vpop.f32.mrb[6].mxu0  ;;  %505 = vadd.xlane.f32.xlu0 %v403_v24 }
 0x17e   : > { %v1760_v60 = vpop.f32.mrb[7].mxu0 }
 0x17f   : > { %v3350_v46 = vadd.f32 %v1760_v60, %v1759_v3  ;;  %v416_v60 = vpop.xlane.xlu0 %415 }
 0x181   : > { %v1762_v10 = vpop.f32.mrb[8].mxu0  ;;  %507 = vadd.xlane.f32.xlu0 %v404_v23 }
 0x182   : > { %v1763_v6 = vpop.f32.mrb[9].mxu0 }
 0x183   : > { %v3354_v50 = vadd.f32 %v1763_v6, %v1762_v10  ;;  %v420_v37 = vpop.xlane.xlu0 %419 }
 0x185   : > { %v1765_v2 = vpop.f32.mrb[10].mxu0  ;;  %509 = vadd.xlane.f32.xlu0 %v405_v29 }
 0x186   : > { %v1766_v8 = vpop.f32.mrb[11].mxu0 }
 0x187   : > { %v3358_v1 = vadd.f32 %v1766_v8, %v1765_v2 }
 0x189   : > { %v1768_v5 = vpop.f32.mrb[12].mxu0  ;;  %511 = vadd.xlane.f32.xlu0 %v406_v54 }
 0x18a   : > { %v1769_v7 = vpop.f32.mrb[13].mxu0 }
 0x18b   : > { %v3360_v40 = vadd.f32 %v1769_v7, %v1768_v5 }
 0x18d   : > { %v1771_v26 = vpop.f32.mrb[14].mxu0  ;;  %513 = vadd.xlane.f32.xlu0 %v407_v13 }
 0x18e   : > { %v1772_v31 = vpop.f32.mrb[15].mxu0 }
 0x18f   : > { %v3362_v59 = vadd.f32 %v1772_v31, %v1771_v26 }
 0x191   : > { %v1774_v12 = vpop.f32.mrb[16].mxu0 }
 0x192   : > { %v1775_v57 = vpop.f32.mrb[17].mxu0 }
 0x193   : > { %v3364_v21 = vadd.f32 %v1775_v57, %v1774_v12 }
 0x195   : > { %v1777_v55 = vpop.f32.mrb[18].mxu0 }
 0x196   : > { %v1778_v61 = vpop.f32.mrb[19].mxu0 }
 0x197   : > { %v3366_v63 = vadd.f32 %v1778_v61, %v1777_v55 }
 0x199   : > { %v1780_v11 = vpop.f32.mrb[20].mxu0 }
 0x19a   : > { %v1781_v34 = vpop.f32.mrb[21].mxu0  ;;  %v422_v31 = vpop.xlane.xlu0 %421 }
 0x19b   : > { %v3368_v51 = vadd.f32 %v1781_v34, %v1780_v11 }
 0x19d   : > { %v1783_v0 = vpop.f32.mrb[22].mxu0 }
 0x19e   : > { %v1784_v45 = vpop.f32.mrb[23].mxu0 }
 0x19f   : > { %v3370_v25 = vadd.f32 %v1784_v45, %v1783_v0  ;;  %v424_v0 = vpop.xlane.xlu0 %423 }
 0x1a1   : > { %v1786_v14 = vpop.f32.mrb[24].mxu0 }
 0x1a2   : > { %v1787_v20 = vpop.f32.mrb[25].mxu0 }
 0x1a3   : > { %v3372_v42 = vadd.f32 %v1787_v20, %v1786_v14 }
 0x1a5   : > { %v1789_v52 = vpop.f32.mrb[26].mxu0 }
 0x1a6   : > { %v1790_v22 = vpop.f32.mrb[27].mxu0 }
 0x1a7   : > { %v3374_v4 = vadd.f32 %v1790_v22, %v1789_v52 }
 0x1a9   : > { %v1792_v43 = vpop.f32.mrb[28].mxu0 }
 0x1aa   : > { %v1793_v27 = vpop.f32.mrb[29].mxu0 }
 0x1ab   : > { %v3376_v47 = vadd.f32 %v1793_v27, %v1792_v43 }
 0x1ad   : > { %v1795_v36 = vpop.f32.mrb[30].mxu0  ;;  %v982_v53 = vpop.f32.mrb[0].mxu1 }
 0x1ae   : > { %v1796_v58 = vpop.f32.mrb[31].mxu0  ;;  %v3379_v41 = vadd.f32 %v3338_v49, %v982_v53  ;;  %v984_v9 = vpop.f32.mrb[1].mxu1 }
 0x1af   : > { %v3381_v32 = vadd.f32 %v1796_v58, %v1795_v36  ;;  %v426_v58 = vpop.xlane.xlu0 %425 }
 0x1b1   : > { %v1830_v16 = vpop.f32.mrb[32].mxu0  ;;  %v987_v24 = vpop.f32.mrb[2].mxu1 }
 0x1b2   : > { %v1831_v56 = vpop.f32.mrb[33].mxu0  ;;  %v3384_v19 = vadd.f32 %v3342_v48, %v987_v24  ;;  %v989_v30 = vpop.f32.mrb[3].mxu1 }
 0x1b3   : > { %v3386_v17 = vadd.f32 %v1831_v56, %v1830_v16 }
 0x1b5   : > { %v1833_v3 = vpop.f32.mrb[34].mxu0  ;;  %v992_v23 = vpop.f32.mrb[4].mxu1 }
 0x1b6   : > { %v1834_v38 = vpop.f32.mrb[35].mxu0  ;;  %v3389_v28 = vadd.f32 %v3346_v44, %v992_v23  ;;  %v994_v49 = vpop.f32.mrb[5].mxu1 }
 0x1b7   : > { %v3391_v33 = vadd.f32 %v1834_v38, %v1833_v3  ;;  %v418_v3 = vpop.xlane.xlu1 %417  ;;  %v428_v38 = vpop.xlane.xlu0 %427 }
 0x1b9   : > { %v1836_v15 = vpop.f32.mrb[36].mxu0  ;;  %v997_v18 = vpop.f32.mrb[6].mxu1 }
 0x1ba   : > { %v1837_v62 = vpop.f32.mrb[37].mxu0  ;;  %v3394_v10 = vadd.f32 %v3350_v46, %v997_v18  ;;  %v999_v48 = vpop.f32.mrb[7].mxu1 }
 0x1bb   : > { %v3396_v29 = vadd.f32 %v1837_v62, %v1836_v15 }
 0x1bd   : > { %v1839_v6 = vpop.f32.mrb[38].mxu0  ;;  %v1002_v35 = vpop.f32.mrb[8].mxu1 }
 0x1be   : > { %v1840_v39 = vpop.f32.mrb[39].mxu0  ;;  %v3399_v44 = vadd.f32 %v3354_v50, %v1002_v35  ;;  %v1004_v2 = vpop.f32.mrb[9].mxu1 }
 0x1bf   : > { %v3401_v54 = vadd.f32 %v1840_v39, %v1839_v6 }
 0x1c1   : > { %v1842_v8 = vpop.f32.mrb[40].mxu0  ;;  %v1007_v5 = vpop.f32.mrb[10].mxu1 }
 0x1c2   : > { %v1843_v13 = vpop.f32.mrb[41].mxu0  ;;  %v3404_v7 = vadd.f32 %v3358_v1, %v1007_v5  ;;  %v1009_v46 = vpop.f32.mrb[11].mxu1 }
 0x1c3   : > { %v3406_v26 = vadd.f32 %v1843_v13, %v1842_v8  ;;  %v430_v13 = vpop.xlane.xlu0 %429 }
 0x1c5   : > { %v1845_v12 = vpop.f32.mrb[42].mxu0  ;;  %v1012_v57 = vpop.f32.mrb[12].mxu1 }
 0x1c6   : > { %v1846_v55 = vpop.f32.mrb[43].mxu0  ;;  %v3409_v61 = vadd.f32 %v3360_v40, %v1012_v57  ;;  %v1014_v50 = vpop.f32.mrb[13].mxu1 }
 0x1c7   : > { %v3411_v11 = vadd.f32 %v1846_v55, %v1845_v12 }
 0x1c9   : > { %v1848_v34 = vpop.f32.mrb[44].mxu0  ;;  %v1017_v45 = vpop.f32.mrb[14].mxu1 }
 0x1ca   : > { %v1849_v14 = vpop.f32.mrb[45].mxu0  ;;  %v3414_v1 = vadd.f32 %v3362_v59, %v1017_v45  ;;  %v1019_v20 = vpop.f32.mrb[15].mxu1 }
 0x1cb   : > { %v3416_v52 = vadd.f32 %v1849_v14, %v1848_v34  ;;  %v432_v45 = vpop.xlane.xlu0 %431 }
 0x1cd   : > { %v1851_v22 = vpop.f32.mrb[46].mxu0  ;;  %v1022_v43 = vpop.f32.mrb[16].mxu1 }
 0x1ce   : > { %v1852_v27 = vpop.f32.mrb[47].mxu0  ;;  %v3419_v36 = vadd.f32 %v3364_v21, %v1022_v43  ;;  %v1024_v40 = vpop.f32.mrb[17].mxu1  ;;  %v529_v21 = vadd.f32 %v418_v3, %v416_v60 }
 0x1cf   : > { %v3421_v53 = vadd.f32 %v1852_v27, %v1851_v22 }
 0x1d1   : > { %v1854_v9 = vpop.f32.mrb[48].mxu0  ;;  %v1027_v16 = vpop.f32.mrb[18].mxu1 }
 0x1d2   : > { %v1855_v24 = vpop.f32.mrb[49].mxu0  ;;  %v3424_v56 = vadd.f32 %v3366_v63, %v1027_v16  ;;  %v1029_v59 = vpop.f32.mrb[19].mxu1  ;;  %v530_v63 = vadd.f32 %v529_v21, %v420_v37 }
 0x1d3   : > { %v3426_v30 = vadd.f32 %v1855_v24, %v1854_v9  ;;  %v434_v59 = vpop.xlane.xlu0 %433 }
 0x1d4   : > { %v531_v57 = vadd.f32 %v530_v63, %v422_v31 }
 0x1d5   : > { %v1857_v23 = vpop.f32.mrb[50].mxu0  ;;  %v1032_v49 = vpop.f32.mrb[20].mxu1 }
 0x1d6   : > { %v1858_v15 = vpop.f32.mrb[51].mxu0  ;;  %v3429_v18 = vadd.f32 %v3368_v51, %v1032_v49  ;;  %v1034_v62 = vpop.f32.mrb[21].mxu1 }
 0x1d7   : > { %v3431_v48 = vadd.f32 %v1858_v15, %v1857_v23  ;;  %v436_v62 = vpop.xlane.xlu0 %435 }
 0x1d9   : > { %v1860_v6 = vpop.f32.mrb[52].mxu0  ;;  %v1037_v35 = vpop.f32.mrb[22].mxu1 }
 0x1da   : > { %v1861_v39 = vpop.f32.mrb[53].mxu0  ;;  %v3434_v2 = vadd.f32 %v3370_v25, %v1037_v35  ;;  %v1039_v8 = vpop.f32.mrb[23].mxu1  ;;  %v532_v25 = vadd.f32 %v531_v57, %v424_v0 }
 0x1db   : > { %v3436_v5 = vadd.f32 %v1861_v39, %v1860_v6 }
 0x1dc   : > { %v533_v9 = vadd.f32 %v532_v25, %v426_v58 }
 0x1dd   : > { %v1863_v46 = vpop.f32.mrb[54].mxu0  ;;  %v1042_v12 = vpop.f32.mrb[24].mxu1 }
 0x1de   : > { %v1864_v60 = vpop.f32.mrb[55].mxu0  ;;  %v3439_v51 = vadd.f32 %v3372_v42, %v1042_v12  ;;  %v1044_v55 = vpop.f32.mrb[25].mxu1 }
 0x1df   : > { %v3441_v50 = vadd.f32 %v1864_v60, %v1863_v46  ;;  %v438_v12 = vpop.xlane.xlu0 %437  ;;  %v2481_v60 = vld [vmem:[%s2541_s23 + $0x190] sm:$0xff] }
 0x1e1   : > { %v1866_v34 = vpop.f32.mrb[56].mxu0  ;;  %v1047_v37 = vpop.f32.mrb[26].mxu1 }
 0x1e2   : > { %v1867_v14 = vpop.f32.mrb[57].mxu0  ;;  %v3444_v20 = vadd.f32 %v3374_v4, %v1047_v37  ;;  %v1049_v22 = vpop.f32.mrb[27].mxu1  ;;  %v534_v4 = vadd.f32 %v533_v9, %v428_v38 }
 0x1e3   : > { %v3446_v43 = vadd.f32 %v1867_v14, %v1866_v34 }
 0x1e4   : > { %v535_v6 = vadd.f32 %v534_v4, %v430_v13 }
 0x1e5   : > { %v1869_v27 = vpop.f32.mrb[58].mxu0  ;;  %v1052_v40 = vpop.f32.mrb[28].mxu1 }
 0x1e6   : > { %v1870_v31 = vpop.f32.mrb[59].mxu0  ;;  %v3449_v42 = vadd.f32 %v3376_v47, %v1052_v40  ;;  %v1054_v16 = vpop.f32.mrb[29].mxu1  ;;  %v536_v46 = vadd.f32 %v535_v6, %v432_v45  ;;  %v2482_v40 = vld [vmem:[%s2536_s20 + $0x198] sm:$0xff] }
 0x1e7   : > { %v3451_v24 = vadd.f32 %v1870_v31, %v1869_v27  ;;  %v2483_v31 = vld [vmem:[%s2541_s23 + $0x198] sm:$0xff] }
 0x1e8   : > { %v537_v22 = vadd.f32 %v536_v46, %v434_v59  ;;  %v352_v9 = vsub.f32 %v2482_v40, %v2483_v31 }
 0x1e9   : > { %v1872_v3 = vpop.f32.mrb[60].mxu0  ;;  %v1057_v23 = vpop.f32.mrb[30].mxu1 }
 0x1ea   : > { %v1873_v0 = vpop.f32.mrb[61].mxu0  ;;  %v3454_v49 = vadd.f32 %v3381_v32, %v1057_v23  ;;  %v1059_v15 = vpop.f32.mrb[31].mxu1  ;;  %v2480_v32 = vld [vmem:[%s2536_s20 + $0x190] sm:$0xff]  ;;  %v538_v59 = vadd.f32 %v537_v22, %v436_v62 }
 0x1eb   : > { %v3456_v21 = vadd.f32 %v1873_v0, %v1872_v3  ;;  %v351_v57 = vsub.f32 %v2480_v32, %v2481_v60  ;;  %v440_v3 = vpop.xlane.xlu0 %439  ;;  %v2487_v60 = vld [vmem:[%s2541_s23 + $0x1a8] sm:$0xff]  ;;  %v2488_v22 = vld [vmem:[%s2536_s20 + $0x1b0] sm:$0xff] }
 0x1ec   : > { %v539_v46 = vadd.f32 %v538_v59, %v438_v12 }
 0x1ed   : > { %v1875_v58 = vpop.f32.mrb[62].mxu0  ;;  %v408_v0 = vand.u32 2147483647, %v351_v57 }
 0x1ee   : > { %v1876_v47 = vpop.f32.mrb[63].mxu0 }
 0x1ef   : > { %v3458_v35 = vadd.f32 %v1876_v47, %v1875_v58  ;;  %v2484_v58 = vld [vmem:[%s2536_s20 + $0x1a0] sm:$0xff] }
 0x1f0   : > { %v2485_v47 = vld [vmem:[%s2541_s23 + $0x1a0] sm:$0xff] }
 0x1f1   : > { %v1448_v39 = vpop.f32.mrb[64].mxu0 }
 0x1f2   : > { %v1449_v63 = vadd.f32 %v3386_v17, %v1448_v39  ;;  %v1450_v8 = vpop.f32.mrb[65].mxu0 }
 0x1f4   : > { %v1527_v38 = vsub.f32 %v3379_v41, %v1449_v63  ;;  %v1458_v34 = vpop.f32.mrb[32].mxu1 }
 0x1f5   : > { %v1453_v55 = vpop.f32.mrb[66].mxu0  ;;  %v1459_v14 = vadd.f32 %v3396_v29, %v1458_v34  ;;  %v1460_v17 = vpop.f32.mrb[33].mxu1 }
 0x1f6   : > { %v1543_v37 = vand.u32 2147483647, %v1527_v38  ;;  %v3465_v13 = vadd.f32 %v3391_v33, %v1453_v55  ;;  %v1455_v25 = vpop.f32.mrb[67].mxu0  ;;  %v442_v38 = vpop.xlane.xlu0 %441 }
 0x1f7   : > { %v1529_v27 = vsub.f32 %v3389_v28, %v1459_v14  ;;  %v353_v28 = vsub.f32 %v2484_v58, %v2485_v47  ;;  %v540_v25 = vadd.f32 %v539_v46, %v440_v3 }
 0x1f8   : > { %v1559_v45 = vmul.f32 0.00024414063, %v1543_v37  ;;  %v1528_v41 = vsub.f32 %v3384_v19, %v3465_v13  ;;  %v1463_v16 = vpop.f32.mrb[34].mxu1 }
 0x1f9   : > { %v1545_v33 = vand.u32 2147483647, %v1529_v27  ;;  %v1464_v23 = vadd.f32 %v3401_v54, %v1463_v16  ;;  %v1465_v29 = vpop.f32.mrb[35].mxu1  ;;  %v409_v54 = vand.u32 2147483647, %v352_v9 }
 0x1fa   : > { %1575 = vadd.xlane.f32.xlu0 %v1559_v45  ;;  %v2489_v45 = vld [vmem:[%s2541_s23 + $0x1b0] sm:$0xff]  ;;  %v444_v40 = vpop.xlane.xlu0 %443  ;;  %v2490_v29 = vld [vmem:[%s2536_s20 + $0x1b8] sm:$0xff] }
 0x1fb   : > { %v1561_v4 = vmul.f32 0.00024414063, %v1545_v33  ;;  %v1530_v15 = vsub.f32 %v3394_v10, %v1464_v23  ;;  %v2486_v10 = vld [vmem:[%s2536_s20 + $0x1a8] sm:$0xff]  ;;  %v541_v33 = vadd.f32 %v540_v25, %v442_v38  ;;  %v2493_v38 = vld [vmem:[%s2541_s23 + $0x1c0] sm:$0xff]  ;;  %v1544_v25 = vand.u32 2147483647, %v1528_v41 }
 0x1fc   : > { %v1468_v6 = vpop.f32.mrb[36].mxu1  ;;  %v354_v57 = vsub.f32 %v2486_v10, %v2487_v60  ;;  %v448_v10 = vpop.xlane.xlu1 %447 }
 0x1fd   : > { %v1546_v39 = vand.u32 2147483647, %v1530_v15  ;;  %v1469_v63 = vadd.f32 %v3406_v26, %v1468_v6  ;;  %v1470_v8 = vpop.f32.mrb[37].mxu1  ;;  %1579 = vadd.xlane.f32.xlu1 %v1561_v4  ;;  %v410_v26 = vand.u32 2147483647, %v353_v28  ;;  %v542_v47 = vadd.f32 %v541_v33, %v444_v40 }
 0x1fe   : > { %515 = vadd.xlane.f32.xlu0 %v408_v0  ;;  %v2491_v0 = vld [vmem:[%s2541_s23 + $0x1b8] sm:$0xff]  ;;  %v446_v28 = vpop.xlane.xlu0 %445  ;;  %v1560_v40 = vmul.f32 0.00024414063, %v1544_v25 }
 0x1ff   : > { %v1562_v62 = vmul.f32 0.00024414063, %v1546_v39  ;;  %v1531_v32 = vsub.f32 %v3399_v44, %v1469_v63  ;;  %v355_v44 = vsub.f32 %v2488_v22, %v2489_v45 }
 0x200   : > { %v1473_v55 = vpop.f32.mrb[38].mxu1 }
 0x201   : > { %v1547_v34 = vand.u32 2147483647, %v1531_v32  ;;  %v1474_v37 = vadd.f32 %v3411_v11, %v1473_v55  ;;  %v1475_v14 = vpop.f32.mrb[39].mxu1  ;;  %1581 = vadd.xlane.f32.xlu1 %v1562_v62  ;;  %v411_v11 = vand.u32 2147483647, %v354_v57  ;;  %v543_v32 = vadd.f32 %v542_v47, %v446_v28 }
 0x202   : > { %517 = vadd.xlane.f32.xlu0 %v409_v54 }
 0x203   : > { %v1563_v17 = vmul.f32 0.00024414063, %v1547_v34  ;;  %v1532_v12 = vsub.f32 %v3404_v7, %v1474_v37  ;;  %v356_v7 = vsub.f32 %v2490_v29, %v2491_v0  ;;  %v450_v34 = vpop.xlane.xlu0 %449 }
 0x204   : > { %v1478_v27 = vpop.f32.mrb[40].mxu1 }
 0x205   : > { %v1548_v31 = vand.u32 2147483647, %v1532_v12  ;;  %v1479_v9 = vadd.f32 %v3416_v52, %v1478_v27  ;;  %v1480_v16 = vpop.f32.mrb[41].mxu1  ;;  %1583 = vadd.xlane.f32.xlu1 %v1563_v17  ;;  %v412_v52 = vand.u32 2147483647, %v355_v44  ;;  %v452_v27 = vpop.xlane.xlu1 %451 }
 0x206   : > { %519 = vadd.xlane.f32.xlu0 %v410_v26  ;;  %v544_v26 = vadd.f32 %v543_v32, %v448_v10 }
 0x207   : > { %v1564_v23 = vmul.f32 0.00024414063, %v1548_v31  ;;  %v1533_v3 = vsub.f32 %v3409_v61, %v1479_v9  ;;  %v413_v61 = vand.u32 2147483647, %v356_v7 }
 0x208   : > { %v1483_v59 = vpop.f32.mrb[42].mxu1  ;;  %v545_v44 = vadd.f32 %v544_v26, %v450_v34 }
 0x209   : > { %v1549_v4 = vand.u32 2147483647, %v1533_v3  ;;  %v1484_v15 = vadd.f32 %v3421_v53, %v1483_v59  ;;  %v1485_v58 = vpop.f32.mrb[43].mxu1  ;;  %1585 = vadd.xlane.f32.xlu1 %v1564_v23  ;;  %v2492_v53 = vld [vmem:[%s2536_s20 + $0x1c0] sm:$0xff]  ;;  %v456_v7 = vpop.xlane.xlu1 %455 }
 0x20a   : > { %521 = vadd.xlane.f32.xlu0 %v411_v11  ;;  %v357_v62 = vsub.f32 %v2492_v53, %v2493_v38  ;;  %v546_v41 = vadd.f32 %v545_v44, %v452_v27 }
 0x20b   : > { %v1565_v6 = vmul.f32 0.00024414063, %v1549_v4  ;;  %v1534_v39 = vsub.f32 %v3414_v1, %v1484_v15 }
 0x20c   : > { %v1488_v63 = vpop.f32.mrb[44].mxu1 }
 0x20d   : > { %v1550_v8 = vand.u32 2147483647, %v1534_v39  ;;  %v1489_v54 = vadd.f32 %v3426_v30, %v1488_v63  ;;  %v1490_v46 = vpop.f32.mrb[45].mxu1  ;;  %1587 = vadd.xlane.f32.xlu1 %v1565_v6  ;;  %v414_v30 = vand.u32 2147483647, %v357_v62 }
 0x20e   : > { %523 = vadd.xlane.f32.xlu0 %v412_v52 }
 0x20f   : > { %v1566_v60 = vmul.f32 0.00024414063, %v1550_v8  ;;  %v1535_v57 = vsub.f32 %v3419_v36, %v1489_v54  ;;  %v460_v8 = vpop.xlane.xlu1 %459 }
 0x210   : > { %v1493_v55 = vpop.f32.mrb[46].mxu1 }
 0x211   : > { %v1551_v37 = vand.u32 2147483647, %v1535_v57  ;;  %v1494_v1 = vadd.f32 %v3431_v48, %v1493_v55  ;;  %v1495_v14 = vpop.f32.mrb[47].mxu1  ;;  %1589 = vadd.xlane.f32.xlu1 %v1566_v60  ;;  %v454_v48 = vpop.xlane.xlu0 %453 }
 0x212   : > { %525 = vadd.xlane.f32.xlu0 %v413_v61  ;;  %v547_v0 = vadd.f32 %v546_v41, %v454_v48 }
 0x213   : > { %v1567_v17 = vmul.f32 0.00024414063, %v1551_v37  ;;  %v1536_v12 = vsub.f32 %v3424_v56, %v1494_v1  ;;  %v464_v55 = vpop.xlane.xlu1 %463 }
 0x214   : > { %v1498_v22 = vpop.f32.mrb[48].mxu1  ;;  %v548_v52 = vadd.f32 %v547_v0, %v456_v7 }
 0x215   : > { %v1499_v36 = vadd.f32 %v3436_v5, %v1498_v22  ;;  %v1500_v45 = vpop.f32.mrb[49].mxu1  ;;  %1591 = vadd.xlane.f32.xlu1 %v1567_v17  ;;  %v1552_v31 = vand.u32 2147483647, %v1536_v12  ;;  %v458_v23 = vpop.xlane.xlu0 %457 }
 0x216   : > { %527 = vadd.xlane.f32.xlu0 %v414_v30  ;;  %v549_v61 = vadd.f32 %v548_v52, %v458_v23 }
 0x217   : > { %v1537_v9 = vsub.f32 %v3429_v18, %v1499_v36  ;;  %v1568_v56 = vmul.f32 0.00024414063, %v1552_v31 }
 0x218   : > { %v1503_v16 = vpop.f32.mrb[50].mxu1  ;;  %v550_v32 = vadd.f32 %v549_v61, %v460_v8 }
 0x219   : > { %v1504_v19 = vadd.f32 %v3441_v50, %v1503_v16  ;;  %v1505_v13 = vpop.f32.mrb[51].mxu1  ;;  %1577 = vadd.xlane.f32.xlu1 %v1560_v40  ;;  %v1553_v11 = vand.u32 2147483647, %v1537_v9  ;;  %v462_v47 = vpop.xlane.xlu0 %461 }
 0x21b   : > { %v1538_v5 = vsub.f32 %v3434_v2, %v1504_v19  ;;  %v1569_v59 = vmul.f32 0.00024414063, %v1553_v11 }
 0x21c   : > { %v1508_v33 = vpop.f32.mrb[52].mxu1 }
 0x21d   : > { %v1509_v3 = vadd.f32 %v3446_v43, %v1508_v33  ;;  %v1510_v29 = vpop.f32.mrb[53].mxu1  ;;  %1593 = vadd.xlane.f32.xlu1 %v1568_v56  ;;  %v1554_v18 = vand.u32 2147483647, %v1538_v5  ;;  %v466_v53 = vpop.xlane.xlu0 %465 }
 0x21f   : > { %v1539_v4 = vsub.f32 %v3439_v51, %v1509_v3  ;;  %v1570_v2 = vmul.f32 0.00024414063, %v1554_v18 }
 0x220   : > { %v1513_v50 = vpop.f32.mrb[54].mxu1 }
 0x221   : > { %v1514_v15 = vadd.f32 %v3451_v24, %v1513_v50  ;;  %v1515_v58 = vpop.f32.mrb[55].mxu1  ;;  %1595 = vadd.xlane.f32.xlu1 %v1569_v59  ;;  %v1555_v28 = vand.u32 2147483647, %v1539_v4  ;;  %v470_v57 = vpop.xlane.xlu0 %469 }
 0x223   : > { %v1540_v6 = vsub.f32 %v3444_v20, %v1514_v15  ;;  %v1571_v54 = vmul.f32 0.00024414063, %v1555_v28 }
 0x224   : > { %v1518_v43 = vpop.f32.mrb[56].mxu1 }
 0x225   : > { %v1519_v39 = vadd.f32 %v3456_v21, %v1518_v43  ;;  %v1520_v63 = vpop.f32.mrb[57].mxu1  ;;  %1597 = vadd.xlane.f32.xlu1 %v1570_v2  ;;  %v1556_v51 = vand.u32 2147483647, %v1540_v6  ;;  %v551_v21 = vadd.f32 %v550_v32, %v462_v47  ;;  %v474_v14 = vpop.xlane.xlu0 %473 }
 0x227   : > { %v1541_v46 = vsub.f32 %v3449_v42, %v1519_v39  ;;  %v1572_v10 = vmul.f32 0.00024414063, %v1556_v51  ;;  %v552_v1 = vadd.f32 %v551_v21, %v464_v55 }
 0x228   : > { %v1523_v24 = vpop.f32.mrb[58].mxu1 }
 0x229   : > { %v1524_v38 = vadd.f32 %v3458_v35, %v1523_v24  ;;  %v1525_v62 = vpop.f32.mrb[59].mxu1  ;;  %1599 = vadd.xlane.f32.xlu1 %v1571_v54  ;;  %v1557_v20 = vand.u32 2147483647, %v1541_v46  ;;  %v553_v30 = vadd.f32 %v552_v1, %v466_v53  ;;  %v468_v35 = vpop.xlane.xlu1 %467 }
 0x22a   : > { %v478_v25 = vpop.xlane.xlu0 %477 }
 0x22b   : > { %v1542_v60 = vsub.f32 %v3454_v49, %v1524_v38  ;;  %v1573_v34 = vmul.f32 0.00024414063, %v1557_v20  ;;  %v554_v26 = vadd.f32 %v553_v30, %v468_v35 }
 0x22d   : > { %1601 = vadd.xlane.f32.xlu1 %v1572_v10  ;;  %v1558_v37 = vand.u32 2147483647, %v1542_v60  ;;  %v555_v17 = vadd.f32 %v554_v26, %v470_v57  ;;  %v472_v12 = vpop.xlane.xlu1 %471 }
 0x22e   : > { %v482_v22 = vpop.xlane.xlu0 %481 }
 0x22f   : > { %v1574_v42 = vmul.f32 0.00024414063, %v1558_v37  ;;  %v556_v36 = vadd.f32 %v555_v17, %v472_v12 }
 0x231   : > { %1603 = vadd.xlane.f32.xlu1 %v1573_v34  ;;  %v557_v49 = vadd.f32 %v556_v36, %v474_v14  ;;  %v476_v44 = vpop.xlane.xlu1 %475 }
 0x232   : > { %v486_v45 = vpop.xlane.xlu0 %485 }
 0x233   : > { %v558_v48 = vadd.f32 %v557_v49, %v476_v44 }
 0x235   : > { %1605 = vadd.xlane.f32.xlu1 %v1574_v42  ;;  %v559_v40 = vadd.f32 %v558_v48, %v478_v25  ;;  %v480_v31 = vpop.xlane.xlu1 %479 }
 0x236   : > { %v490_v27 = vpop.xlane.xlu0 %489 }
 0x237   : > { %v560_v9 = vadd.f32 %v559_v40, %v480_v31 }
 0x239   : > { %v561_v19 = vadd.f32 %v560_v9, %v482_v22  ;;  %v484_v13 = vpop.xlane.xlu1 %483 }
 0x23a   : > { %v494_v16 = vpop.xlane.xlu0 %493 }
 0x23b   : > { %v562_v56 = vadd.f32 %v561_v19, %v484_v13 }
 0x23d   : > { %v563_v11 = vadd.f32 %v562_v56, %v486_v45  ;;  %v488_v5 = vpop.xlane.xlu1 %487 }
 0x23e   : > { %v498_v41 = vpop.xlane.xlu0 %497 }
 0x23f   : > { %v564_v23 = vadd.f32 %v563_v11, %v488_v5 }
 0x241   : > { %v565_v29 = vadd.f32 %v564_v23, %v490_v27  ;;  %v492_v0 = vpop.xlane.xlu1 %491 }
 0x242   : > { %v502_v33 = vpop.xlane.xlu0 %501 }
 0x243   : > { %v566_v7 = vadd.f32 %v565_v29, %v492_v0 }
 0x245   : > { %v567_v18 = vadd.f32 %v566_v7, %v494_v16  ;;  %v496_v4 = vpop.xlane.xlu1 %495  ;;  %v591_v16 = vld [vmem:[%s3529_s2] sm:$0xff] }
 0x246   : > { %v504_v3 = vpop.xlane.xlu0 %503 }
 0x247   : > { %v568_v15 = vadd.f32 %v567_v18, %v496_v4 }
 0x249   : > { %v569_v58 = vadd.f32 %v568_v15, %v498_v41  ;;  %v500_v52 = vpop.xlane.xlu1 %499 }
 0x24a   : > { %v506_v59 = vpop.xlane.xlu0 %505 }
 0x24b   : > { %v570_v2 = vadd.f32 %v569_v58, %v500_v52 }
 0x24d   : > { %v571_v6 = vadd.f32 %v570_v2, %v502_v33 }
 0x24e   : > { %v508_v50 = vpop.xlane.xlu0 %507 }
 0x24f   : > { %v572_v43 = vadd.f32 %v571_v6, %v504_v3 }
 0x251   : > { %v573_v63 = vadd.f32 %v572_v43, %v506_v59 }
 0x252   : > { %v510_v47 = vpop.xlane.xlu0 %509 }
 0x253   : > { %v574_v8 = vadd.f32 %v573_v63, %v508_v50 }
 0x255   : > { %v575_v46 = vadd.f32 %v574_v8, %v510_v47 }
 0x256   : > { %v512_v28 = vpop.xlane.xlu0 %511 }
 0x257   : > { %v576_v38 = vadd.f32 %v575_v46, %v512_v28 }
 0x25a   : > { %v514_v39 = vpop.xlane.xlu0 %513 }
 0x25b   : > { %v577_v10 = vadd.f32 %v576_v38, %v514_v39  ;;  %v1628_v39 = vld [vmem:[%s3530_s3] sm:$0xff] }
 0x287   : > { %v1576_v61 = vpop.xlane.xlu0 %1575 }
 0x28a   : > { %v1580_v54 = vpop.xlane.xlu1 %1579 }
 0x28b   : > { %v516_v51 = vpop.xlane.xlu0 %515 }
 0x28c   : > { %v578_v21 = vadd.f32 %v577_v10, %v516_v51 }
 0x28e   : > { %v1582_v24 = vpop.xlane.xlu1 %1581 }
 0x28f   : > { %v518_v53 = vpop.xlane.xlu0 %517 }
 0x290   : > { %v579_v57 = vadd.f32 %v578_v21, %v518_v53 }
 0x292   : > { %v1584_v62 = vpop.xlane.xlu1 %1583 }
 0x293   : > { %v520_v32 = vpop.xlane.xlu0 %519 }
 0x294   : > { %v580_v37 = vadd.f32 %v579_v57, %v520_v32 }
 0x296   : > { %v1586_v20 = vpop.xlane.xlu1 %1585 }
 0x297   : > { %v522_v60 = vpop.xlane.xlu0 %521 }
 0x298   : > { %v581_v1 = vadd.f32 %v580_v37, %v522_v60 }
 0x29a   : > { %v1588_v55 = vpop.xlane.xlu1 %1587 }
 0x29b   : > { %v524_v34 = vpop.xlane.xlu0 %523 }
 0x29c   : > { %v582_v30 = vadd.f32 %v581_v1, %v524_v34 }
 0x29e   : > { %v1590_v42 = vpop.xlane.xlu1 %1589 }
 0x29f   : > { %v526_v14 = vpop.xlane.xlu0 %525 }
 0x2a0   : > { %v583_v35 = vadd.f32 %v582_v30, %v526_v14 }
 0x2a2   : > { %v1592_v26 = vpop.xlane.xlu1 %1591 }
 0x2a3   : > { %v528_v25 = vpop.xlane.xlu0 %527 }
 0x2a4   : > { %v584_v17 = vadd.f32 %v583_v35, %v528_v25 }
 0x2a6   : > { %v585_v12 = vrot.slane %v584_v17, 4  ;;  %v1578_v22 = vpop.xlane.xlu1 %1577 }
 0x2a7   : > { %v1607_v49 = vadd.f32 %v1578_v22, %v1576_v61 }
 0x2a8   : > { %v586_v36 = vadd.f32 %v585_v12, %v584_v17 }
 0x2a9   : > { %v1608_v44 = vadd.f32 %v1607_v49, %v1580_v54 }
 0x2aa   : > { %v587_v45 = vrot.slane %v586_v36, 2  ;;  %v1594_v48 = vpop.xlane.xlu1 %1593 }
 0x2ab   : > { %v1609_v40 = vadd.f32 %v1608_v44, %v1582_v24 }
 0x2ac   : > { %v588_v27 = vadd.f32 %v587_v45, %v586_v36 }
 0x2ad   : > { %v1610_v9 = vadd.f32 %v1609_v40, %v1584_v62 }
 0x2ae   : > { %v589_v31 = vrot.slane %v588_v27, 1  ;;  %v1596_v19 = vpop.xlane.xlu1 %1595 }
 0x2af   : > { %v1611_v41 = vadd.f32 %v1610_v9, %v1586_v20 }
 0x2b0   : > { %v590_v13 = vadd.f32 %v589_v31, %v588_v27 }
 0x2b1   : > { %v1612_v11 = vadd.f32 %v1611_v41, %v1588_v55 }
 0x2b2   : > { %v592_v56 = vadd.f32 %v591_v16, %v590_v13  ;;  %v1598_v5 = vpop.xlane.xlu1 %1597 }
 0x2b3   : > { %v1613_v33 = vadd.f32 %v1612_v11, %v1590_v42 }
 0x2b4   : > { %593 = vst [vmem:[%s3529_s2] sm:$0xff] %v592_v56 }
 0x2b5   : > { %v1614_v23 = vadd.f32 %v1613_v33, %v1592_v26 }
 0x2b6   : > { %v1600_v3 = vpop.xlane.xlu1 %1599 }
 0x2b7   : > { %v1615_v29 = vadd.f32 %v1614_v23, %v1594_v48 }
 0x2b9   : > { %v1616_v0 = vadd.f32 %v1615_v29, %v1596_v19 }
 0x2ba   : > { %v1602_v7 = vpop.xlane.xlu1 %1601 }
 0x2bb   : > { %v1617_v59 = vadd.f32 %v1616_v0, %v1598_v5 }
 0x2bd   : > { %v1618_v18 = vadd.f32 %v1617_v59, %v1600_v3 }
 0x2be   : > { %v1604_v4 = vpop.xlane.xlu1 %1603 }
 0x2bf   : > { %v1619_v50 = vadd.f32 %v1618_v18, %v1602_v7 }
 0x2c1   : > { %v1620_v15 = vadd.f32 %v1619_v50, %v1604_v4 }
 0x2c2   : > { %v1606_v58 = vpop.xlane.xlu1 %1605 }
 0x2c3   : > { %v1621_v52 = vadd.f32 %v1620_v15, %v1606_v58 }
 0x2c5   : > { %v1622_v47 = vrot.slane %v1621_v52, 4 }
 0x2c7   : > { %v1623_v2 = vadd.f32 %v1622_v47, %v1621_v52 }
 0x2c9   : > { %v1624_v28 = vrot.slane %v1623_v2, 2 }
 0x2cb   : > { %v1625_v6 = vadd.f32 %v1624_v28, %v1623_v2 }
 0x2cd   : > { %v1626_v43 = vrot.slane %v1625_v6, 1 }
 0x2cf   : > { %v1627_v63 = vadd.f32 %v1626_v43, %v1625_v6 }
 0x2d1   : > { %v1629_v61 = vadd.f32 %v1628_v39, %v1627_v63 }
 0x2d3   : > { %1630 = vst [vmem:[%s3530_s3] sm:$0xff] %v1629_v61 }
 0x2d4 PF: > { %s14_s12 = sadd.s32 1, %s2500_s12  }
 0x2d5   : > { %p11_p6 = scmp.ge.s32.totalorder %s14_s12, 4  }
 0x2d7   :  { %13 = sbr.rel (!%p11_p6) target bundleno = 1 (0x1), region = 69 }

// kernel: _forward_impl.8
= control target key start
LH: loop header
LB: loop body
LE: loop exit
PB: predicated region body
PF: predicated region fallthrough
CT: control target
= control target key end

     0   :  { %s15503_s15 = smov 0   ;;  %s18663_s0 = inlined_call_operand.vmem [shape: f32[4,456,128], index: 0, kind: input, shape index: {}]   ;;  %s18664_s1 = inlined_call_operand.vmem [shape: f32[9,128,128], index: 1, kind: input, shape index: {}]   ;;  %s18665_s2 = inlined_call_operand.vmem [shape: f32[1,128], index: 2, kind: input, shape index: {}]   ;;  %s18666_s3 = inlined_call_operand.vmem [shape: f32[384,1], index: 3, kind: input, shape index: {}]   ;;  %s18667_s4 = inlined_call_operand.vmem [shape: f32[4,456,128], index: 4, kind: output, shape index: {}]  }
   0x1 LB: > { %s8889_s16 = sadd.s32 4294967295, %s15474_s15   ;;  %p8893_p0 = scmp.ge.s32.totalorder %s15474_s15, 1  ;;  %s15474_s15 = sphi %s15503_s15, %s14_s15  }
   0x2   : > { %p162_p1 = scmp.lt.s32.totalorder %s15474_s15, 5 }
   0x4   : > { %p163_p2 = pnand %p8893_p0, %p162_p1 }
   0x5   : > { %v8896_v0 = vld [vmem:[%s18664_s1 + $0x80] sm:$0xff] (!%p163_p2)  ;;  %v8897_v1 = vld [vmem:[%s18664_s1 + $0x88] sm:$0xff] (!%p163_p2)  ;;  %v8898_v2 = vld [vmem:[%s18664_s1 + $0x90] sm:$0xff] (!%p163_p2)  ;;  %p188_p3 = scmp.lt.s32.totalorder (!%p163_p2), %s8889_s16, 3  ;;  %vm365_vm0 = vcmask (!%p163_p2), 1040384   ;;  %vm514_vm1 = vcmask (!%p163_p2), 1046528  }
   0x6   : > { %166 = sbr.rel (%p163_p2) target bundleno = 1107 (0x453), region = 36  ;;  %v13339_v3 = vpack.c.bf16 (!%p163_p2), %v8897_v1, %v8896_v0  ;;  %v8899_v4 = vld [vmem:[%s18664_s1 + $0x98] sm:$0xff] (!%p163_p2)  ;;  %v8900_v6 = vld [vmem:[%s18664_s1 + $0xa0] sm:$0xff] (!%p163_p2)  ;;  %v8901_v7 = vld [vmem:[%s18664_s1 + $0xa8] sm:$0xff] (!%p163_p2) }
   0x7   : > { %v13343_v5 = vpack.c.bf16 (!%p163_p2), %v8899_v4, %v8898_v2  ;;  %v13347_v8 = vpack.c.bf16 (!%p163_p2), %v8901_v7, %v8900_v6  ;;  %v8902_v9 = vld [vmem:[%s18664_s1 + $0xb0] sm:$0xff] (!%p163_p2)  ;;  %v8903_v10 = vld [vmem:[%s18664_s1 + $0xb8] sm:$0xff] (!%p163_p2)  ;;  %v8904_v14 = vld [vmem:[%s18664_s1 + $0xc0] sm:$0xff] (!%p163_p2) }
   0x8   : > { %13340 = vmatprep.subr.bf16.mxu0 (!%p163_p2), %v13339_v3  ;;  %13628 = vmatprep.subr.bf16.mxu1 (!%p163_p2), %v13339_v3  ;;  %v13351_v13 = vpack.c.bf16 (!%p163_p2), %v8903_v10, %v8902_v9  ;;  %v8905_v15 = vld [vmem:[%s18664_s1 + $0xc8] sm:$0xff] (!%p163_p2)  ;;  %v8906_v17 = vld [vmem:[%s18664_s1 + $0xd0] sm:$0xff] (!%p163_p2)  ;;  %v8907_v18 = vld [vmem:[%s18664_s1 + $0xd8] sm:$0xff] (!%p163_p2) }
   0x9   : > { %13342 = vmatpush3.bf16.msra.mxu0 (!%p163_p2), %v13339_v3  ;;  %13630 = vmatpush3.bf16.msra.mxu1 (!%p163_p2), %v13339_v3  ;;  %v13355_v16 = vpack.c.bf16 (!%p163_p2), %v8905_v15, %v8904_v14  ;;  %v13359_v19 = vpack.c.bf16 (!%p163_p2), %v8907_v18, %v8906_v17  ;;  %v8908_v20 = vld [vmem:[%s18664_s1 + $0xe0] sm:$0xff] (!%p163_p2)  ;;  %v8909_v21 = vld [vmem:[%s18664_s1 + $0xe8] sm:$0xff] (!%p163_p2)  ;;  %v8910_v23 = vld [vmem:[%s18664_s1 + $0xf0] sm:$0xff] (!%p163_p2) }
   0xa   : > { %13344 = vmatprep.subr.bf16.mxu0 (!%p163_p2), %v13343_v5  ;;  %13632 = vmatprep.subr.bf16.mxu1 (!%p163_p2), %v13343_v5  ;;  %v13363_v22 = vpack.c.bf16 (!%p163_p2), %v8909_v21, %v8908_v20  ;;  %v8911_v24 = vld [vmem:[%s18664_s1 + $0xf8] sm:$0xff] (!%p163_p2)  ;;  %v218_v26 = vld [vmem:[%s18664_s1] sm:$0xff] (!%p163_p2)  ;;  %v219_v27 = vld [vmem:[%s18664_s1 + $0x8] sm:$0xff] (!%p163_p2) }
   0xb   : > { %v13367_v25 = vpack.c.bf16 (!%p163_p2), %v8911_v24, %v8910_v23  ;;  %v13371_v28 = vpack.c.bf16 (!%p163_p2), %v219_v27, %v218_v26  ;;  %v220_v29 = vld [vmem:[%s18664_s1 + $0x10] sm:$0xff] (!%p163_p2)  ;;  %v221_v30 = vld [vmem:[%s18664_s1 + $0x18] sm:$0xff] (!%p163_p2)  ;;  %v222_v34 = vld [vmem:[%s18664_s1 + $0x20] sm:$0xff] (!%p163_p2) }
   0xc   : > { %v13375_v33 = vpack.c.bf16 (!%p163_p2), %v221_v30, %v220_v29  ;;  %v223_v35 = vld [vmem:[%s18664_s1 + $0x28] sm:$0xff] (!%p163_p2)  ;;  %v224_v41 = vld [vmem:[%s18664_s1 + $0x30] sm:$0xff] (!%p163_p2)  ;;  %v225_v42 = vld [vmem:[%s18664_s1 + $0x38] sm:$0xff] (!%p163_p2) }
   0xd   : > { %s18671_s16 = smov (!%p188_p3, %s8889_s16), 3  ;;  %13346 = vmatpush3.bf16.msra.mxu0 %v13343_v5  ;;  %13634 = vmatpush3.bf16.msra.mxu1 %v13343_v5  ;;  %v13379_v40 = vpack.c.bf16 %v223_v35, %v222_v34  ;;  %v13383_v49 = vpack.c.bf16 %v225_v42, %v224_v41  ;;  %v226_v50 = vld [vmem:[%s18664_s1 + $0x40] sm:$0xff]  ;;  %v227_v51 = vld [vmem:[%s18664_s1 + $0x48] sm:$0xff]  ;;  %v228_v60 = vld [vmem:[%s18664_s1 + $0x50] sm:$0xff] }
   0xe   : > { %s15451_s29 = smul.u32 456, %s18671_s16  ;;  %13348 = vmatprep.subr.bf16.mxu0 %v13347_v8  ;;  %13636 = vmatprep.subr.bf16.mxu1 %v13347_v8  ;;  %v13387_v59 = vpack.c.bf16 %v227_v51, %v226_v50  ;;  %v229_v61 = vld [vmem:[%s18664_s1 + $0x58] sm:$0xff]  ;;  %v230_v1 = vld [vmem:[%s18664_s1 + $0x60] sm:$0xff]  ;;  %v231_v2 = vld [vmem:[%s18664_s1 + $0x68] sm:$0xff] }
   0xf   : > { %v13391_v0 = vpack.c.bf16 %v229_v61, %v228_v60  ;;  %v13395_v3 = vpack.c.bf16 %v231_v2, %v230_v1  ;;  %v232_v4 = vld [vmem:[%s18664_s1 + $0x70] sm:$0xff]  ;;  %v233_v5 = vld [vmem:[%s18664_s1 + $0x78] sm:$0xff]  ;;  %v8912_v7 = vld [vmem:[%s18664_s1 + $0x100] sm:$0xff] }
  0x10   : > { %s15543_s10 = scalar_lea.vmem %s18663_s0, %s15451_s29  ;;  %v13399_v6 = vpack.c.bf16 %v233_v5, %v232_v4  ;;  %v8914_v14 = vld [vmem:[%s18664_s1 + $0x110] sm:$0xff]  ;;  %v8915_v15 = vld [vmem:[%s18664_s1 + $0x118] sm:$0xff]  ;;  %v8916_v23 = vld [vmem:[%s18664_s1 + $0x120] sm:$0xff]  ;;  %s16760_s13 = scalar_lea.vmem %s18667_s4, %s15451_s29 }
  0x11   : > { %v15546_v11 = vld [vmem:[%s15543_s10 + $0x8] sm:$0xff]  ;;  %13350 = vmatpush3.bf16.msra.mxu0 %v13347_v8  ;;  %13638 = vmatpush3.bf16.msra.mxu1 %v13347_v8  ;;  %v15590_v31 = vld [vmem:[%s15543_s10 + $0x10] sm:$0xff]  ;;  %v15604_v36 = vld [vmem:[%s15543_s10 + $0x18] sm:$0xff] }
  0x12   : > { %v15549_v12 = vld [vmem:[%s15543_s10 + $0x48] sm:$0xff]  ;;  %10995 = vmatprep.mubr.f32.mxu0 %v15546_v11  ;;  %13352 = vmatprep.subr.bf16.mxu0 %v13351_v13  ;;  %v15593_v32 = vld [vmem:[%s15543_s10 + $0x50] sm:$0xff]  ;;  %v15607_v37 = vld [vmem:[%s15543_s10 + $0x58] sm:$0xff]  ;;  %v367_v52 = vrot.slane %v15546_v11, 7  ;;  %v369_v9 = vrot.slane %v15590_v31, 7 }
  0x13   : > { %11391 = vmatprep.mubr.f32.mxu1 %v15549_v12  ;;  %13640 = vmatprep.subr.bf16.mxu1 %v13351_v13  ;;  %v15610_v38 = vld [vmem:[%s15543_s10 + $0x20] sm:$0xff]  ;;  %v15626_v43 = vld [vmem:[%s15543_s10 + $0x28] sm:$0xff]  ;;  %v15632_v45 = vld [vmem:[%s15543_s10 + $0x30] sm:$0xff]  ;;  %v1816_v53 = vrot.slane %v15549_v12, 7  ;;  %v1818_v10 = vrot.slane %v15593_v32, 7  ;;  %v1820_v17 = vrot.slane %v15607_v37, 7 }
  0x14   : > { %v15613_v39 = vld [vmem:[%s15543_s10 + $0x60] sm:$0xff]  ;;  %v15629_v44 = vld [vmem:[%s15543_s10 + $0x68] sm:$0xff]  ;;  %v15635_v46 = vld [vmem:[%s15543_s10 + $0x70] sm:$0xff]  ;;  %v373_v18 = vrot.slane %v15610_v38, 7  ;;  %v370_v20 = vsel %vm365_vm0, %v367_v52, %v369_v9  ;;  %v377_v29 = vrot.slane %v15632_v45, 7  ;;  %v1962_v60 = vrot.slane %v15549_v12, 1 }
  0x15   : > { %13354 = vmatpush3.bf16.msra.mxu0 %v13351_v13  ;;  %13642 = vmatpush3.bf16.msra.mxu1 %v13351_v13  ;;  %v15638_v47 = vld [vmem:[%s15543_s10 + $0x40] sm:$0xff]  ;;  %v15654_v54 = vld [vmem:[%s15543_s10 + $0x38] sm:$0xff]  ;;  %v8913_v8 = vld [vmem:[%s18664_s1 + $0x108] sm:$0xff]  ;;  %v15712_v21 = vsel %vm365_vm0, %v1816_v53, %v1818_v10  ;;  %v1824_v26 = vrot.slane %v15629_v44, 7  ;;  %v1826_v30 = vrot.slane %v15635_v46, 7  ;;  %v15771_v1 = vrot.slane %v15593_v32, 1 }
  0x16   : > { %13356 = vmatprep.subr.bf16.mxu0 %v13355_v16  ;;  %13644 = vmatprep.subr.bf16.mxu1 %v13355_v16  ;;  %v208_v48 = vld [vmem:[%s15543_s10] sm:$0xff]  ;;  %v15657_v55 = vld [vmem:[%s15543_s10 + $0x78] sm:$0xff]  ;;  %v381_v56 = vrot.slane %v15638_v47, 7  ;;  %v13403_v13 = vpack.c.bf16 %v8913_v8, %v8912_v7  ;;  %v8917_v24 = vld [vmem:[%s18664_s1 + $0x128] sm:$0xff]  ;;  %v379_v42 = vrot.slane %v15654_v54, 7 }
  0x17   : > { %v366_v57 = vrot.slane %v208_v48, 7  ;;  %v15661_v58 = vld [vmem:[%s15543_s10 + $0x80] sm:$0xff]  ;;  %v13411_v35 = vpack.c.bf16 %v8917_v24, %v8916_v23  ;;  %v8919_v41 = vld [vmem:[%s18664_s1 + $0x138] sm:$0xff]  ;;  %v1828_v48 = vrot.slane %v15657_v55, 7  ;;  %v8922_v5 = vld [vmem:[%s18664_s1 + $0x150] sm:$0xff]  ;;  %v1964_v7 = vsel %vm514_vm1, %v1962_v60, %v15771_v1 }
  0x18   : > { %v15677_v63 = vsel %vm365_vm0, %v381_v56, %v1816_v53  ;;  %v1830_v51 = vrot.slane %v15661_v58, 7  ;;  %v15757_v53 = vsel %vm365_vm0, %v1824_v26, %v1826_v30  ;;  %v8920_v61 = vld [vmem:[%s18664_s1 + $0x140] sm:$0xff]  ;;  %v8930_v23 = vld [vmem:[%s18664_s1 + $0x190] sm:$0xff]  ;;  %v8931_v24 = vld [vmem:[%s18664_s1 + $0x198] sm:$0xff] }
  0x19   : > { %13358 = vmatpush3.bf16.msra.mxu0 %v13355_v16  ;;  %13646 = vmatpush3.bf16.msra.mxu1 %v13355_v16  ;;  %v368_v62 = vsel %vm365_vm0, %v366_v57, %v367_v52  ;;  %v371_v16 = vrot.slane %v15604_v36, 7  ;;  %v15779_v2 = vsel %vm365_vm0, %v1826_v30, %v1828_v48 }
  0x1a   : > { %13360 = vmatprep.subr.bf16.mxu0 %v13359_v19  ;;  %13648 = vmatprep.subr.bf16.mxu1 %v13359_v19 }
  0x1b   : > { %v372_v27 = vsel %vm365_vm0, %v369_v9, %v371_v16  ;;  %v8924_v9 = vld [vmem:[%s18664_s1 + $0x160] sm:$0xff] }
  0x1d   : > { %13362 = vmatpush3.bf16.msra.mxu0 %v13359_v19  ;;  %13650 = vmatpush3.bf16.msra.mxu1 %v13359_v19  ;;  %v1822_v19 = vrot.slane %v15613_v39, 7 }
  0x1e   : > { %13364 = vmatprep.subr.bf16.mxu0 %v13363_v22  ;;  %13652 = vmatprep.subr.bf16.mxu1 %v13363_v22 }
  0x1f   : > { %v15733_v34 = vsel %vm365_vm0, %v1820_v17, %v1822_v19  ;;  %v15750_v50 = vsel %vm365_vm0, %v1822_v19, %v1824_v26  ;;  %v518_v19 = vrot.slane %v15604_v36, 1  ;;  %v522_v26 = vrot.slane %v15626_v43, 1 }
  0x21   : > { %13366 = vmatpush3.bf16.msra.mxu0 %v13363_v22  ;;  %13654 = vmatpush3.bf16.msra.mxu1 %v13363_v22  ;;  %v13407_v22 = vpack.c.bf16 %v8915_v15, %v8914_v14  ;;  %v8926_v14 = vld [vmem:[%s18664_s1 + $0x170] sm:$0xff]  ;;  %v8927_v15 = vld [vmem:[%s18664_s1 + $0x178] sm:$0xff] }
  0x22   : > { %13368 = vmatprep.subr.bf16.mxu0 %v13367_v25  ;;  %13656 = vmatprep.subr.bf16.mxu1 %v13367_v25 }
  0x25   : > { %13370 = vmatpush3.bf16.msra.mxu0 %v13367_v25  ;;  %13658 = vmatpush3.bf16.msra.mxu1 %v13367_v25  ;;  %v375_v25 = vrot.slane %v15626_v43, 7 }
  0x26   : > { %13372 = vmatprep.subr.bf16.mxu0 %v13371_v28  ;;  %13660 = vmatprep.subr.bf16.mxu1 %v13371_v28 }
  0x27   : > { %v15754_v52 = vsel %vm365_vm0, %v375_v25, %v377_v29 }
  0x28   : > { %10996 = vmatmul.mubr.f32.vlgmr.msra.gmra.mrb[0].mxu0 %v15590_v31  ;;  %11392 = vmatmul.mubr.f32.vlgmr.msra.gmra.mrb[0].mxu1 %v15593_v32 }
  0x29   : > { %13374 = vmatpush3.bf16.msra.mxu0 %v13371_v28  ;;  %13662 = vmatpush3.bf16.msra.mxu1 %v13371_v28  ;;  %v15725_v28 = vsel %vm365_vm0, %v1818_v10, %v1820_v17  ;;  %v8925_v10 = vld [vmem:[%s18664_s1 + $0x168] sm:$0xff]  ;;  %v8928_v17 = vld [vmem:[%s18664_s1 + $0x180] sm:$0xff] }
  0x2a   : > { %13376 = vmatprep.subr.bf16.mxu0 %v13375_v33  ;;  %13664 = vmatprep.subr.bf16.mxu1 %v13375_v33 }
  0x2b   : > { %10998 = vmatprep.mubr.f32.mxu0 %v15604_v36  ;;  %11394 = vmatprep.mubr.f32.mxu1 %v15607_v37  ;;  %v1967_v36 = vrot.slane %v15613_v39, 1 }
  0x2c   : > { %10999 = vmatmul.mubr.f32.gmra.mrb[2].mxu0 %v15610_v38  ;;  %11395 = vmatmul.mubr.f32.gmra.mrb[2].mxu1 %v15613_v39 }
  0x2d   : > { %13378 = vmatpush3.bf16.msra.mxu0 %v13375_v33  ;;  %13666 = vmatpush3.bf16.msra.mxu1 %v13375_v33  ;;  %v15730_v33 = vsel %vm365_vm0, %v371_v16, %v373_v18  ;;  %v13431_v16 = vpack.c.bf16 %v8927_v15, %v8926_v14 }
  0x2e   : > { %13380 = vmatprep.subr.bf16.mxu0 %v13379_v40  ;;  %13668 = vmatprep.subr.bf16.mxu1 %v13379_v40 }
  0x2f   : > { %11001 = vmatprep.mubr.f32.mxu0 %v15626_v43  ;;  %11397 = vmatprep.mubr.f32.mxu1 %v15629_v44 }
  0x30   : > { %11002 = vmatmul.mubr.f32.gmra.mrb[4].mxu0 %v15632_v45  ;;  %11398 = vmatmul.mubr.f32.gmra.mrb[4].mxu1 %v15635_v46 }
  0x31   : > { %13382 = vmatpush3.bf16.msra.mxu0 %v13379_v40  ;;  %13670 = vmatpush3.bf16.msra.mxu1 %v13379_v40  ;;  %v8918_v40 = vld [vmem:[%s18664_s1 + $0x130] sm:$0xff] }
  0x32   : > { %13384 = vmatprep.subr.bf16.mxu0 %v13383_v49  ;;  %13672 = vmatprep.subr.bf16.mxu1 %v13383_v49  ;;  %v13415_v57 = vpack.c.bf16 %v8919_v41, %v8918_v40  ;;  %v8932_v40 = vld [vmem:[%s18664_s1 + $0x1a0] sm:$0xff]  ;;  %v8933_v41 = vld [vmem:[%s18664_s1 + $0x1a8] sm:$0xff] }
  0x33   : > { %11004 = vmatprep.mubr.f32.mxu0 %v15654_v54  ;;  %11400 = vmatprep.mubr.f32.mxu1 %v15657_v55 }
  0x34   : > { %11005 = vmatmul.mubr.f32.gmra.mrb[6].mxu0 %v15638_v47  ;;  %11401 = vmatmul.mubr.f32.gmra.mrb[6].mxu1 %v15661_v58 }
  0x35   : > { %13386 = vmatpush3.bf16.msra.mxu0 %v13383_v49  ;;  %13674 = vmatpush3.bf16.msra.mxu1 %v13383_v49  ;;  %v15747_v49 = vsel %vm365_vm0, %v373_v18, %v375_v25  ;;  %v8929_v18 = vld [vmem:[%s18664_s1 + $0x188] sm:$0xff]  ;;  %v520_v25 = vrot.slane %v15610_v38, 1 }
  0x36   : > { %13388 = vmatprep.subr.bf16.mxu0 %v13387_v59  ;;  %13676 = vmatprep.subr.bf16.mxu1 %v13387_v59 }
  0x37   : > { %11039 = vmatprep.mubr.f32.mxu0 %v368_v62  ;;  %11435 = vmatprep.mubr.f32.mxu1 %v15677_v63  ;;  %v8921_v62 = vld [vmem:[%s18664_s1 + $0x148] sm:$0xff] }
  0x38   : > { %v13419_v4 = vpack.c.bf16 %v8921_v62, %v8920_v61  ;;  %v526_v61 = vrot.slane %v15654_v54, 1  ;;  %v1973_v62 = vrot.slane %v15657_v55, 1 }
  0x39   : > { %13390 = vmatpush3.bf16.msra.mxu0 %v13387_v59  ;;  %13678 = vmatpush3.bf16.msra.mxu1 %v13387_v59  ;;  %v515_v59 = vrot.slane %v15546_v11, 1  ;;  %v15776_v11 = vsel %vm365_vm0, %v377_v29, %v379_v42 }
  0x3a   : > { %13392 = vmatprep.subr.bf16.mxu0 %v13391_v0  ;;  %13680 = vmatprep.subr.bf16.mxu1 %v13391_v0 }
  0x3d   : > { %13394 = vmatpush3.bf16.msra.mxu0 %v13391_v0  ;;  %13682 = vmatpush3.bf16.msra.mxu1 %v13391_v0  ;;  %v516_v0 = vrot.slane %v15590_v31, 1  ;;  %v15789_v31 = vsel %vm365_vm0, %v1828_v48, %v1830_v51  ;;  %v1971_v48 = vrot.slane %v15635_v46, 1 }
  0x3e   : > { %13396 = vmatprep.subr.bf16.mxu0 %v13395_v3  ;;  %13684 = vmatprep.subr.bf16.mxu1 %v13395_v3 }
  0x3f   : > { %v519_v29 = vsel %vm514_vm1, %v516_v0, %v518_v19  ;;  %v15889_v15 = vsel %vm514_vm1, %v1971_v48, %v1973_v62 }
  0x41   : > { %13398 = vmatpush3.bf16.msra.mxu0 %v13395_v3  ;;  %13686 = vmatpush3.bf16.msra.mxu1 %v13395_v3  ;;  %v15784_v3 = vsel %vm365_vm0, %v379_v42, %v381_v56  ;;  %v517_v56 = vsel %vm514_vm1, %v515_v59, %v516_v0  ;;  %v524_v42 = vrot.slane %v15632_v45, 1  ;;  %v15859_v0 = vsel %vm514_vm1, %v520_v25, %v522_v26 }
  0x42   : > { %13400 = vmatprep.subr.bf16.mxu0 %v13399_v6  ;;  %13688 = vmatprep.subr.bf16.mxu1 %v13399_v6 }
  0x43   : > { %v15886_v14 = vsel %vm514_vm1, %v524_v42, %v526_v61 }
  0x45   : > { %13402 = vmatpush3.bf16.msra.mxu0 %v13399_v6  ;;  %13690 = vmatpush3.bf16.msra.mxu1 %v13399_v6  ;;  %v8923_v6 = vld [vmem:[%s18664_s1 + $0x158] sm:$0xff] }
  0x46   : > { %13404 = vmatprep.subr.bf16.mxu0 %v13403_v13  ;;  %13692 = vmatprep.subr.bf16.mxu1 %v13403_v13  ;;  %v13423_v8 = vpack.c.bf16 %v8923_v6, %v8922_v5  ;;  %v13443_v5 = vpack.c.bf16 %v8933_v41, %v8932_v40  ;;  %v15865_v6 = vld [vmem:[%s15543_s10 + $0x88] sm:$0xff]  ;;  %v8942_v41 = vld [vmem:[%s18664_s1 + $0x1f0] sm:$0xff] }
  0x48   : > { %11040 = vmatmul.mubr.f32.vlgmr.msra.gmra.mrb[0].mxu0 %v370_v20  ;;  %11436 = vmatmul.mubr.f32.vlgmr.msra.gmra.mrb[0].mxu1 %v15712_v21  ;;  %v15826_v20 = vrot.slane %v15607_v37, 1 }
  0x49   : > { %13406 = vmatpush3.bf16.msra.mxu0 %v13403_v13  ;;  %13694 = vmatpush3.bf16.msra.mxu1 %v13403_v13  ;;  %v13427_v13 = vpack.c.bf16 %v8925_v10, %v8924_v9  ;;  %v1975_v9 = vrot.slane %v15661_v58, 1  ;;  %v15880_v10 = vsel %vm514_vm1, %v522_v26, %v524_v42  ;;  %v8938_v26 = vld [vmem:[%s18664_s1 + $0x1d0] sm:$0xff]  ;;  %v8943_v42 = vld [vmem:[%s18664_s1 + $0x1f8] sm:$0xff] }
  0x4a   : > { %13408 = vmatprep.subr.bf16.mxu0 %v13407_v22  ;;  %13696 = vmatprep.subr.bf16.mxu1 %v13407_v22  ;;  %v15842_v30 = vsel %vm514_vm1, %v15771_v1, %v15826_v20  ;;  %v1968_v59 = vsel %vm514_vm1, %v15826_v20, %v1967_v36 }
  0x4b   : > { %11042 = vmatprep.mubr.f32.mxu0 %v372_v27  ;;  %11438 = vmatprep.mubr.f32.mxu1 %v15725_v28  ;;  %v1969_v27 = vrot.slane %v15629_v44, 1 }
  0x4c   : > { %11043 = vmatmul.mubr.f32.gmra.mrb[2].mxu0 %v15730_v33  ;;  %11439 = vmatmul.mubr.f32.gmra.mrb[2].mxu1 %v15733_v34 }
  0x4d   : > { %13410 = vmatpush3.bf16.msra.mxu0 %v13407_v22  ;;  %13698 = vmatpush3.bf16.msra.mxu1 %v13407_v22  ;;  %v13435_v22 = vpack.c.bf16 %v8929_v18, %v8928_v17  ;;  %v8936_v18 = vld [vmem:[%s18664_s1 + $0x1c0] sm:$0xff] }
  0x4e   : > { %13412 = vmatprep.subr.bf16.mxu0 %v13411_v35  ;;  %13700 = vmatprep.subr.bf16.mxu1 %v13411_v35 }
  0x4f   : > { %11045 = vmatprep.mubr.f32.mxu0 %v15747_v49  ;;  %11441 = vmatprep.mubr.f32.mxu1 %v15750_v50 }
  0x50   : > { %11046 = vmatmul.mubr.f32.gmra.mrb[4].mxu0 %v15754_v52  ;;  %11442 = vmatmul.mubr.f32.gmra.mrb[4].mxu1 %v15757_v53 }
  0x51   : > { %13414 = vmatpush3.bf16.msra.mxu0 %v13411_v35  ;;  %13702 = vmatpush3.bf16.msra.mxu1 %v13411_v35  ;;  %v13439_v35 = vpack.c.bf16 %v8931_v24, %v8930_v23  ;;  %v15907_v23 = vsel %vm514_vm1, %v1973_v62, %v1975_v9 }
  0x52   : > { %13416 = vmatprep.subr.bf16.mxu0 %v13415_v57  ;;  %13704 = vmatprep.subr.bf16.mxu1 %v13415_v57 }
  0x53   : > { %11048 = vmatprep.mubr.f32.mxu0 %v15776_v11  ;;  %11444 = vmatprep.mubr.f32.mxu1 %v15779_v2 }
  0x54   : > { %11049 = vmatmul.mubr.f32.gmra.mrb[6].mxu0 %v15784_v3  ;;  %11445 = vmatmul.mubr.f32.gmra.mrb[6].mxu1 %v15789_v31 }
  0x55   : > { %13418 = vmatpush3.bf16.msra.mxu0 %v13415_v57  ;;  %13706 = vmatpush3.bf16.msra.mxu1 %v13415_v57  ;;  %v521_v57 = vsel %vm514_vm1, %v518_v19, %v520_v25  ;;  %v8937_v19 = vld [vmem:[%s18664_s1 + $0x1c8] sm:$0xff] }
  0x56   : > { %13420 = vmatprep.subr.bf16.mxu0 %v13419_v4  ;;  %13708 = vmatprep.subr.bf16.mxu1 %v13419_v4 }
  0x57   : > { %11083 = vmatprep.mubr.f32.mxu0 %v517_v56  ;;  %11479 = vmatprep.mubr.f32.mxu1 %v1964_v7  ;;  %v8934_v56 = vld [vmem:[%s18664_s1 + $0x1b0] sm:$0xff]  ;;  %v8935_v7 = vld [vmem:[%s18664_s1 + $0x1b8] sm:$0xff] }
  0x58   : > { %v13447_v17 = vpack.c.bf16 %v8935_v7, %v8934_v56  ;;  %v8949_v56 = vld [vmem:[%s18664_s1 + $0x228] sm:$0xff]  ;;  %v15962_v7 = vrot.slane %v15865_v6, 7 }
  0x59   : > { %13422 = vmatpush3.bf16.msra.mxu0 %v13419_v4  ;;  %13710 = vmatpush3.bf16.msra.mxu1 %v13419_v4  ;;  %v15862_v4 = vsel %vm514_vm1, %v1967_v36, %v1969_v27  ;;  %v13451_v36 = vpack.c.bf16 %v8937_v19, %v8936_v18  ;;  %v15968_v18 = vld [vmem:[%s15543_s10 + $0x98] sm:$0xff]  ;;  %v8950_v19 = vld [vmem:[%s18664_s1 + $0x230] sm:$0xff] }
  0x5a   : > { %13424 = vmatprep.subr.bf16.mxu0 %v13423_v8  ;;  %13712 = vmatprep.subr.bf16.mxu1 %v13423_v8 }
  0x5d   : > { %13426 = vmatpush3.bf16.msra.mxu0 %v13423_v8  ;;  %13714 = vmatpush3.bf16.msra.mxu1 %v13423_v8  ;;  %v15874_v8 = vrot.slane %v15638_v47, 1 }
  0x5e   : > { %13428 = vmatprep.subr.bf16.mxu0 %v13427_v13  ;;  %13716 = vmatprep.subr.bf16.mxu1 %v13427_v13 }
  0x5f   : > { %v531_v24 = vsel %vm514_vm1, %v15874_v8, %v1962_v60 }
  0x61   : > { %13430 = vmatpush3.bf16.msra.mxu0 %v13427_v13  ;;  %13718 = vmatpush3.bf16.msra.mxu1 %v13427_v13  ;;  %v15883_v13 = vsel %vm514_vm1, %v1969_v27, %v1971_v48  ;;  %v8939_v27 = vld [vmem:[%s18664_s1 + $0x1d8] sm:$0xff]  ;;  %v8945_v48 = vld [vmem:[%s18664_s1 + $0x208] sm:$0xff] }
  0x62   : > { %13432 = vmatprep.subr.bf16.mxu0 %v13431_v16  ;;  %13720 = vmatprep.subr.bf16.mxu1 %v13431_v16  ;;  %v13455_v60 = vpack.c.bf16 %v8939_v27, %v8938_v26  ;;  %v8956_v27 = vld [vmem:[%s18664_s1 + $0x260] sm:$0xff] }
  0x65   : > { %13434 = vmatpush3.bf16.msra.mxu0 %v13431_v16  ;;  %13722 = vmatpush3.bf16.msra.mxu1 %v13431_v16  ;;  %v1977_v16 = vrot.slane %v15865_v6, 1 }
  0x66   : > { %13436 = vmatprep.subr.bf16.mxu0 %v13435_v22  ;;  %13724 = vmatprep.subr.bf16.mxu1 %v13435_v22 }
  0x67   : > { %v15916_v25 = vsel %vm514_vm1, %v1975_v9, %v1977_v16  ;;  %v15965_v9 = vld [vmem:[%s15543_s10 + $0x90] sm:$0xff] }
  0x68   : > { %11084 = vmatmul.mubr.f32.vlgmr.msra.gmra.mrb[0].mxu0 %v519_v29  ;;  %11480 = vmatmul.mubr.f32.vlgmr.msra.gmra.mrb[0].mxu1 %v15842_v30  ;;  %v8940_v29 = vld [vmem:[%s18664_s1 + $0x1e0] sm:$0xff] }
  0x69   : > { %13438 = vmatpush3.bf16.msra.mxu0 %v13435_v22  ;;  %13726 = vmatpush3.bf16.msra.mxu1 %v13435_v22  ;;  %v15904_v22 = vsel %vm514_vm1, %v526_v61, %v15874_v8  ;;  %v8947_v61 = vld [vmem:[%s18664_s1 + $0x218] sm:$0xff] }
  0x6a   : > { %13440 = vmatprep.subr.bf16.mxu0 %v13439_v35  ;;  %13728 = vmatprep.subr.bf16.mxu1 %v13439_v35 }
  0x6b   : > { %11086 = vmatprep.mubr.f32.mxu0 %v521_v57  ;;  %11482 = vmatprep.mubr.f32.mxu1 %v1968_v59  ;;  %v8946_v59 = vld [vmem:[%s18664_s1 + $0x210] sm:$0xff] }
  0x6c   : > { %11087 = vmatmul.mubr.f32.gmra.mrb[2].mxu0 %v15859_v0  ;;  %11483 = vmatmul.mubr.f32.gmra.mrb[2].mxu1 %v15862_v4  ;;  %v13471_v62 = vpack.c.bf16 %v8947_v61, %v8946_v59  ;;  %v8966_v59 = vld [vmem:[%s18664_s1 + $0x2b0] sm:$0xff]  ;;  %v8967_v61 = vld [vmem:[%s18664_s1 + $0x2b8] sm:$0xff] }
  0x6d   : > { %13442 = vmatpush3.bf16.msra.mxu0 %v13439_v35  ;;  %13730 = vmatpush3.bf16.msra.mxu1 %v13439_v35  ;;  %v8941_v35 = vld [vmem:[%s18664_s1 + $0x1e8] sm:$0xff] }
  0x6e   : > { %13444 = vmatprep.subr.bf16.mxu0 %v13443_v5  ;;  %13732 = vmatprep.subr.bf16.mxu1 %v13443_v5  ;;  %v13459_v40 = vpack.c.bf16 %v8941_v35, %v8940_v29  ;;  %v8959_v29 = vld [vmem:[%s18664_s1 + $0x278] sm:$0xff]  ;;  %v8961_v35 = vld [vmem:[%s18664_s1 + $0x288] sm:$0xff] }
  0x6f   : > { %11089 = vmatprep.mubr.f32.mxu0 %v15880_v10  ;;  %11485 = vmatprep.mubr.f32.mxu1 %v15883_v13 }
  0x70   : > { %11090 = vmatmul.mubr.f32.gmra.mrb[4].mxu0 %v15886_v14  ;;  %11486 = vmatmul.mubr.f32.gmra.mrb[4].mxu1 %v15889_v15 }
  0x71   : > { %13446 = vmatpush3.bf16.msra.mxu0 %v13443_v5  ;;  %13734 = vmatpush3.bf16.msra.mxu1 %v13443_v5  ;;  %v8948_v5 = vld [vmem:[%s18664_s1 + $0x220] sm:$0xff] }
  0x72   : > { %13448 = vmatprep.subr.bf16.mxu0 %v13447_v17  ;;  %13736 = vmatprep.subr.bf16.mxu1 %v13447_v17 }
  0x73   : > { %11092 = vmatprep.mubr.f32.mxu0 %v15904_v22  ;;  %11488 = vmatprep.mubr.f32.mxu1 %v15907_v23 }
  0x74   : > { %11093 = vmatmul.mubr.f32.gmra.mrb[6].mxu0 %v531_v24  ;;  %11489 = vmatmul.mubr.f32.gmra.mrb[6].mxu1 %v15916_v25  ;;  %v2147_v24 = vsel %vm365_vm0, %v1830_v51, %v15962_v7 }
  0x75   : > { %13450 = vmatpush3.bf16.msra.mxu0 %v13447_v17  ;;  %13738 = vmatpush3.bf16.msra.mxu1 %v13447_v17  ;;  %v13475_v17 = vpack.c.bf16 %v8949_v56, %v8948_v5  ;;  %v8977_v5 = vld [vmem:[%s18664_s1 + $0x308] sm:$0xff] }
  0x76   : > { %13452 = vmatprep.subr.bf16.mxu0 %v13451_v36  ;;  %13740 = vmatprep.subr.bf16.mxu1 %v13451_v36 }
  0x77   : > { %11127 = vmatprep.mubr.f32.mxu0 %v15730_v33  ;;  %11523 = vmatprep.mubr.f32.mxu1 %v15733_v34  ;;  %v13463_v33 = vpack.c.bf16 %v8943_v42, %v8942_v41  ;;  %v8944_v34 = vld [vmem:[%s18664_s1 + $0x200] sm:$0xff]  ;;  %v8962_v41 = vld [vmem:[%s18664_s1 + $0x290] sm:$0xff]  ;;  %v8963_v42 = vld [vmem:[%s18664_s1 + $0x298] sm:$0xff] }
  0x78   : > { %v13467_v57 = vpack.c.bf16 %v8945_v48, %v8944_v34  ;;  %v8964_v34 = vld [vmem:[%s18664_s1 + $0x2a0] sm:$0xff]  ;;  %v8965_v48 = vld [vmem:[%s18664_s1 + $0x2a8] sm:$0xff] }
  0x79   : > { %13454 = vmatpush3.bf16.msra.mxu0 %v13451_v36  ;;  %13742 = vmatpush3.bf16.msra.mxu1 %v13451_v36  ;;  %v2150_v36 = vrot.slane %v15968_v18, 7 }
  0x7a   : > { %13456 = vmatprep.subr.bf16.mxu0 %v13455_v60  ;;  %13744 = vmatprep.subr.bf16.mxu1 %v13455_v60 }
  0x7d   : > { %13458 = vmatpush3.bf16.msra.mxu0 %v13455_v60  ;;  %13746 = vmatpush3.bf16.msra.mxu1 %v13455_v60  ;;  %v8957_v60 = vld [vmem:[%s18664_s1 + $0x268] sm:$0xff] }
  0x7e   : > { %13460 = vmatprep.subr.bf16.mxu0 %v13459_v40  ;;  %13748 = vmatprep.subr.bf16.mxu1 %v13459_v40 }
  0x81   : > { %13462 = vmatpush3.bf16.msra.mxu0 %v13459_v40  ;;  %13750 = vmatpush3.bf16.msra.mxu1 %v13459_v40 }
  0x82   : > { %13464 = vmatprep.subr.bf16.mxu0 %v13463_v33  ;;  %13752 = vmatprep.subr.bf16.mxu1 %v13463_v33 }
  0x85   : > { %13466 = vmatpush3.bf16.msra.mxu0 %v13463_v33  ;;  %13754 = vmatpush3.bf16.msra.mxu1 %v13463_v33  ;;  %v13503_v33 = vpack.c.bf16 %v8963_v42, %v8962_v41 }
  0x86   : > { %13468 = vmatprep.subr.bf16.mxu0 %v13467_v57  ;;  %13756 = vmatprep.subr.bf16.mxu1 %v13467_v57 }
  0x88   : > { %11128 = vmatmul.mubr.f32.vlgmr.msra.gmra.mrb[0].mxu0 %v15747_v49  ;;  %11524 = vmatmul.mubr.f32.vlgmr.msra.gmra.mrb[0].mxu1 %v15750_v50  ;;  %v8951_v49 = vld [vmem:[%s18664_s1 + $0x238] sm:$0xff]  ;;  %v2148_v50 = vrot.slane %v15965_v9, 7 }
  0x89   : > { %13470 = vmatpush3.bf16.msra.mxu0 %v13467_v57  ;;  %13758 = vmatpush3.bf16.msra.mxu1 %v13467_v57  ;;  %v13507_v57 = vpack.c.bf16 %v8965_v48, %v8964_v34  ;;  %v8986_v34 = vld [vmem:[%s18664_s1 + $0x350] sm:$0xff]  ;;  %v8987_v48 = vld [vmem:[%s18664_s1 + $0x358] sm:$0xff] }
  0x8a   : > { %13472 = vmatprep.subr.bf16.mxu0 %v13471_v62  ;;  %13760 = vmatprep.subr.bf16.mxu1 %v13471_v62  ;;  %v15997_v51 = vsel %vm365_vm0, %v15962_v7, %v2148_v50 }
  0x8b   : > { %11130 = vmatprep.mubr.f32.mxu0 %v15754_v52  ;;  %11526 = vmatprep.mubr.f32.mxu1 %v15757_v53  ;;  %v13479_v52 = vpack.c.bf16 %v8951_v49, %v8950_v19  ;;  %v8952_v53 = vld [vmem:[%s18664_s1 + $0x240] sm:$0xff]  ;;  %v8979_v19 = vld [vmem:[%s18664_s1 + $0x318] sm:$0xff] }
  0x8c   : > { %11131 = vmatmul.mubr.f32.gmra.mrb[2].mxu0 %v15776_v11  ;;  %11527 = vmatmul.mubr.f32.gmra.mrb[2].mxu1 %v15779_v2  ;;  %v8953_v11 = vld [vmem:[%s18664_s1 + $0x248] sm:$0xff]  ;;  %v16002_v2 = vsel %vm365_vm0, %v2148_v50, %v2150_v36  ;;  %v8980_v50 = vld [vmem:[%s18664_s1 + $0x320] sm:$0xff] }
  0x8d   : > { %13474 = vmatpush3.bf16.msra.mxu0 %v13471_v62  ;;  %13762 = vmatpush3.bf16.msra.mxu1 %v13471_v62  ;;  %v13483_v26 = vpack.c.bf16 %v8953_v11, %v8952_v53  ;;  %v8969_v62 = vld [vmem:[%s18664_s1 + $0x2c8] sm:$0xff]  ;;  %v16114_v11 = vrot.slane %v15965_v9, 1 }
  0x8e   : > { %13476 = vmatprep.subr.bf16.mxu0 %v13475_v17  ;;  %13764 = vmatprep.subr.bf16.mxu1 %v13475_v17 }
  0x8f   : > { %11133 = vmatprep.mubr.f32.mxu0 %v15784_v3  ;;  %11529 = vmatprep.mubr.f32.mxu1 %v15789_v31  ;;  %v8954_v3 = vld [vmem:[%s18664_s1 + $0x250] sm:$0xff] }
  0x90   : > { %11134 = vmatmul.mubr.f32.gmra.mrb[4].mxu0 %v15677_v63  ;;  %11530 = vmatmul.mubr.f32.gmra.mrb[4].mxu1 %v2147_v24  ;;  %v8955_v63 = vld [vmem:[%s18664_s1 + $0x258] sm:$0xff]  ;;  %v8981_v24 = vld [vmem:[%s18664_s1 + $0x328] sm:$0xff] }
  0x91   : > { %13478 = vmatpush3.bf16.msra.mxu0 %v13475_v17  ;;  %13766 = vmatpush3.bf16.msra.mxu1 %v13475_v17  ;;  %v13487_v31 = vpack.c.bf16 %v8955_v63, %v8954_v3  ;;  %v8978_v17 = vld [vmem:[%s18664_s1 + $0x310] sm:$0xff]  ;;  %v16117_v3 = vld [vmem:[%s15543_s10 + $0x60] sm:$0xff] }
  0x92   : > { %13480 = vmatprep.subr.bf16.mxu0 %v13479_v52  ;;  %13768 = vmatprep.subr.bf16.mxu1 %v13479_v52  ;;  %v13535_v49 = vpack.c.bf16 %v8979_v19, %v8978_v17  ;;  %v16120_v63 = vld [vmem:[%s15543_s10 + $0xa0] sm:$0xff] }
  0x93   : > { %11136 = vmatprep.mubr.f32.mxu0 %v15712_v21  ;;  %11532 = vmatprep.mubr.f32.mxu1 %v15997_v51  ;;  %v13491_v21 = vpack.c.bf16 %v8957_v60, %v8956_v27  ;;  %v1113_v60 = vld [vmem:[%s15543_s10 + $0x30] sm:$0xff] }
  0x94   : > { %11137 = vmatmul.mubr.f32.gmra.mrb[6].mxu0 %v15725_v28  ;;  %11533 = vmatmul.mubr.f32.gmra.mrb[6].mxu1 %v16002_v2  ;;  %v8958_v28 = vld [vmem:[%s18664_s1 + $0x270] sm:$0xff] }
  0x95   : > { %13482 = vmatpush3.bf16.msra.mxu0 %v13479_v52  ;;  %13770 = vmatpush3.bf16.msra.mxu1 %v13479_v52  ;;  %v15464_v52 = vld [vmem:[%s15543_s10 + $0x48] sm:$0xff] }
  0x96   : > { %13484 = vmatprep.subr.bf16.mxu0 %v13483_v26  ;;  %13772 = vmatprep.subr.bf16.mxu1 %v13483_v26  ;;  %v984_v53 = vrot.slane %v15464_v52, 1  ;;  %v8996_v52 = vld [vmem:[%s18664_s1 + $0x3a0] sm:$0xff] }
  0x97   : > { %11171 = vmatprep.mubr.f32.mxu0 %v15610_v38  ;;  %11567 = vmatprep.mubr.f32.mxu1 %v15613_v39  ;;  %v13495_v38 = vpack.c.bf16 %v8959_v29, %v8958_v28  ;;  %v8960_v39 = vld [vmem:[%s18664_s1 + $0x280] sm:$0xff]  ;;  %v16155_v28 = vld [vmem:[%s15543_s10 + $0x78] sm:$0xff] }
  0x98   : > { %v13499_v40 = vpack.c.bf16 %v8961_v35, %v8960_v39  ;;  %v985_v27 = vsel %vm514_vm1, %v15874_v8, %v984_v53  ;;  %v16152_v8 = vld [vmem:[%s15543_s10 + $0x70] sm:$0xff]  ;;  %v8984_v29 = vld [vmem:[%s18664_s1 + $0x340] sm:$0xff]  ;;  %v1149_v39 = vrot.slane %v1113_v60, 7  ;;  %v2593_v41 = vrot.slane %v16155_v28, 7 }
  0x99   : > { %13486 = vmatpush3.bf16.msra.mxu0 %v13483_v26  ;;  %13774 = vmatpush3.bf16.msra.mxu1 %v13483_v26  ;;  %v13539_v26 = vpack.c.bf16 %v8981_v24, %v8980_v50  ;;  %v16237_v50 = vld [vmem:[%s15543_s10 + $0x58] sm:$0xff]  ;;  %v16253_v60 = vrot.slane %v16120_v63, 7 }
  0x9a   : > { %13488 = vmatprep.subr.bf16.mxu0 %v13487_v31  ;;  %13776 = vmatprep.subr.bf16.mxu1 %v13487_v31 }
  0x9d   : > { %13490 = vmatpush3.bf16.msra.mxu0 %v13487_v31  ;;  %13778 = vmatpush3.bf16.msra.mxu1 %v13487_v31  ;;  %v2432_v31 = vrot.slane %v15968_v18, 1 }
  0x9e   : > { %13492 = vmatprep.subr.bf16.mxu0 %v13491_v21  ;;  %13780 = vmatprep.subr.bf16.mxu1 %v13491_v21 }
  0xa1   : > { %13494 = vmatpush3.bf16.msra.mxu0 %v13491_v21  ;;  %13782 = vmatpush3.bf16.msra.mxu1 %v13491_v21  ;;  %v987_v21 = vsel %vm514_vm1, %v984_v53, %v15771_v1  ;;  %v8997_v53 = vld [vmem:[%s18664_s1 + $0x3a8] sm:$0xff] }
  0xa2   : > { %13496 = vmatprep.subr.bf16.mxu0 %v13495_v38  ;;  %13784 = vmatprep.subr.bf16.mxu1 %v13495_v38 }
  0xa5   : > { %13498 = vmatpush3.bf16.msra.mxu0 %v13495_v38  ;;  %13786 = vmatpush3.bf16.msra.mxu1 %v13495_v38  ;;  %v16166_v38 = vsel %vm514_vm1, %v16114_v11, %v2432_v31 }
  0xa6   : > { %13500 = vmatprep.subr.bf16.mxu0 %v13499_v40  ;;  %13788 = vmatprep.subr.bf16.mxu1 %v13499_v40 }
  0xa8   : > { %11172 = vmatmul.mubr.f32.vlgmr.msra.gmra.mrb[0].mxu0 %v15626_v43  ;;  %11568 = vmatmul.mubr.f32.vlgmr.msra.gmra.mrb[0].mxu1 %v15629_v44  ;;  %v13511_v43 = vpack.c.bf16 %v8967_v61, %v8966_v59  ;;  %v8968_v44 = vld [vmem:[%s18664_s1 + $0x2c0] sm:$0xff]  ;;  %v13551_v59 = vpack.c.bf16 %v8987_v48, %v8986_v34  ;;  %v8989_v61 = vld [vmem:[%s18664_s1 + $0x368] sm:$0xff] }
  0xa9   : > { %13502 = vmatpush3.bf16.msra.mxu0 %v13499_v40  ;;  %13790 = vmatpush3.bf16.msra.mxu1 %v13499_v40  ;;  %v2592_v40 = vrot.slane %v16152_v8, 7  ;;  %v9000_v48 = vld [vmem:[%s18664_s1 + $0x3c0] sm:$0xff] }
  0xaa   : > { %13504 = vmatprep.subr.bf16.mxu0 %v13503_v33  ;;  %13792 = vmatprep.subr.bf16.mxu1 %v13503_v33 }
  0xab   : > { %11174 = vmatprep.mubr.f32.mxu0 %v15632_v45  ;;  %11570 = vmatprep.mubr.f32.mxu1 %v15635_v46  ;;  %v13515_v45 = vpack.c.bf16 %v8969_v62, %v8968_v44  ;;  %v8970_v46 = vld [vmem:[%s18664_s1 + $0x2d0] sm:$0xff]  ;;  %v8991_v62 = vld [vmem:[%s18664_s1 + $0x378] sm:$0xff] }
  0xac   : > { %11175 = vmatmul.mubr.f32.gmra.mrb[2].mxu0 %v15654_v54  ;;  %11571 = vmatmul.mubr.f32.gmra.mrb[2].mxu1 %v15657_v55  ;;  %v8971_v54 = vld [vmem:[%s18664_s1 + $0x2d8] sm:$0xff]  ;;  %v8973_v55 = vld [vmem:[%s18664_s1 + $0x2e8] sm:$0xff]  ;;  %v8990_v44 = vld [vmem:[%s18664_s1 + $0x370] sm:$0xff] }
  0xad   : > { %13506 = vmatpush3.bf16.msra.mxu0 %v13503_v33  ;;  %13794 = vmatpush3.bf16.msra.mxu1 %v13503_v33 }
  0xae   : > { %13508 = vmatprep.subr.bf16.mxu0 %v13507_v57  ;;  %13796 = vmatprep.subr.bf16.mxu1 %v13507_v57 }
  0xaf   : > { %11177 = vmatprep.mubr.f32.mxu0 %v15638_v47  ;;  %11573 = vmatprep.mubr.f32.mxu1 %v15661_v58  ;;  %v8972_v47 = vld [vmem:[%s18664_s1 + $0x2e0] sm:$0xff]  ;;  %v8975_v58 = vld [vmem:[%s18664_s1 + $0x2f8] sm:$0xff] }
  0xb0   : > { %11178 = vmatmul.mubr.f32.gmra.mrb[4].mxu0 %v15549_v12  ;;  %11574 = vmatmul.mubr.f32.gmra.mrb[4].mxu1 %v15865_v6  ;;  %v13519_v12 = vpack.c.bf16 %v8971_v54, %v8970_v46  ;;  %v16204_v46 = vld [vmem:[%s15543_s10 + $0x40] sm:$0xff] }
  0xb1   : > { %13510 = vmatpush3.bf16.msra.mxu0 %v13507_v57  ;;  %13798 = vmatpush3.bf16.msra.mxu1 %v13507_v57  ;;  %v2594_v57 = vsel %vm365_vm0, %v2592_v40, %v2593_v41  ;;  %v16207_v54 = vld [vmem:[%s15543_s10 + $0x80] sm:$0xff] }
  0xb2   : > { %13512 = vmatprep.subr.bf16.mxu0 %v13511_v43  ;;  %13800 = vmatprep.subr.bf16.mxu1 %v13511_v43 }
  0xb3   : > { %11180 = vmatprep.mubr.f32.mxu0 %v15593_v32  ;;  %11576 = vmatprep.mubr.f32.mxu1 %v15965_v9  ;;  %v13523_v32 = vpack.c.bf16 %v8973_v55, %v8972_v47  ;;  %v8993_v47 = vld [vmem:[%s18664_s1 + $0x388] sm:$0xff]  ;;  %v1152_v55 = vrot.slane %v16204_v46, 7 }
  0xb4   : > { %11181 = vmatmul.mubr.f32.gmra.mrb[6].mxu0 %v15607_v37  ;;  %11577 = vmatmul.mubr.f32.gmra.mrb[6].mxu1 %v15968_v18  ;;  %v8974_v37 = vld [vmem:[%s18664_s1 + $0x2f0] sm:$0xff] }
  0xb5   : > { %13514 = vmatpush3.bf16.msra.mxu0 %v13511_v43  ;;  %13802 = vmatpush3.bf16.msra.mxu1 %v13511_v43 }
  0xb6   : > { %13516 = vmatprep.subr.bf16.mxu0 %v13515_v45  ;;  %13804 = vmatprep.subr.bf16.mxu1 %v13515_v45 }
  0xb7   : > { %11215 = vmatprep.mubr.f32.mxu0 %v15859_v0  ;;  %11611 = vmatprep.mubr.f32.mxu1 %v15862_v4  ;;  %v13527_v0 = vpack.c.bf16 %v8975_v58, %v8974_v37  ;;  %v8976_v4 = vld [vmem:[%s18664_s1 + $0x300] sm:$0xff]  ;;  %v16220_v37 = vld [vmem:[%s15543_s10 + $0x48] sm:$0xff] }
  0xb8   : > { %v13531_v56 = vpack.c.bf16 %v8977_v5, %v8976_v4  ;;  %v8994_v4 = vld [vmem:[%s18664_s1 + $0x390] sm:$0xff]  ;;  %v8995_v5 = vld [vmem:[%s18664_s1 + $0x398] sm:$0xff] }
  0xb9   : > { %13518 = vmatpush3.bf16.msra.mxu0 %v13515_v45  ;;  %13806 = vmatpush3.bf16.msra.mxu1 %v13515_v45  ;;  %v13559_v45 = vpack.c.bf16 %v8991_v62, %v8990_v44  ;;  %v13567_v24 = vpack.c.bf16 %v8995_v5, %v8994_v4  ;;  %v9004_v44 = vld [vmem:[%s18664_s1 + $0x3e0] sm:$0xff]  ;;  %v9005_v62 = vld [vmem:[%s18664_s1 + $0x3e8] sm:$0xff]  ;;  %v9007_v4 = vld [vmem:[%s18664_s1 + $0x3f8] sm:$0xff] }
  0xba   : > { %13520 = vmatprep.subr.bf16.mxu0 %v13519_v12  ;;  %13808 = vmatprep.subr.bf16.mxu1 %v13519_v12  ;;  %v1598_v5 = vld [vmem:[%s18666_s3 + $0x18] sm:$0xff] }
  0xbd   : > { %13522 = vmatpush3.bf16.msra.mxu0 %v13519_v12  ;;  %13810 = vmatpush3.bf16.msra.mxu1 %v13519_v12  ;;  %v8992_v12 = vld [vmem:[%s18664_s1 + $0x380] sm:$0xff] }
  0xbe   : > { %13524 = vmatprep.subr.bf16.mxu0 %v13523_v32  ;;  %13812 = vmatprep.subr.bf16.mxu1 %v13523_v32  ;;  %v13563_v58 = vpack.c.bf16 %v8993_v47, %v8992_v12  ;;  %v1597_v12 = vld [vmem:[%s18666_s3 + $0x10] sm:$0xff]  ;;  %v1595_v47 = vld [vmem:[%s18666_s3] sm:$0xff] }
  0xc1   : > { %13526 = vmatpush3.bf16.msra.mxu0 %v13523_v32  ;;  %13814 = vmatpush3.bf16.msra.mxu1 %v13523_v32  ;;  %v16217_v32 = vrot.slane %v16207_v54, 7 }
  0xc2   : > { %13528 = vmatprep.subr.bf16.mxu0 %v13527_v0  ;;  %13816 = vmatprep.subr.bf16.mxu1 %v13527_v0 }
  0xc3   : > { %v2596_v19 = vsel %vm365_vm0, %v2593_v41, %v16217_v32 }
  0xc5   : > { %13530 = vmatpush3.bf16.msra.mxu0 %v13527_v0  ;;  %13818 = vmatpush3.bf16.msra.mxu1 %v13527_v0  ;;  %v16223_v0 = vld [vmem:[%s15543_s10 + $0x50] sm:$0xff] }
  0xc6   : > { %13532 = vmatprep.subr.bf16.mxu0 %v13531_v56  ;;  %13820 = vmatprep.subr.bf16.mxu1 %v13531_v56 }
  0xc8   : > { %11216 = vmatmul.mubr.f32.vlgmr.msra.gmra.mrb[0].mxu0 %v15880_v10  ;;  %11612 = vmatmul.mubr.f32.vlgmr.msra.gmra.mrb[0].mxu1 %v15883_v13  ;;  %v8982_v10 = vld [vmem:[%s18664_s1 + $0x330] sm:$0xff]  ;;  %v8983_v13 = vld [vmem:[%s18664_s1 + $0x338] sm:$0xff] }
  0xc9   : > { %13534 = vmatpush3.bf16.msra.mxu0 %v13531_v56  ;;  %13822 = vmatpush3.bf16.msra.mxu1 %v13531_v56  ;;  %v13543_v1 = vpack.c.bf16 %v8983_v13, %v8982_v10  ;;  %v1154_v56 = vrot.slane %v16220_v37, 7  ;;  %v2598_v10 = vsel %vm365_vm0, %v16217_v32, %v15962_v7  ;;  %v1158_v13 = vrot.slane %v16237_v50, 7  ;;  %v8998_v7 = vld [vmem:[%s18664_s1 + $0x3b0] sm:$0xff] }
  0xca   : > { %13536 = vmatprep.subr.bf16.mxu0 %v13535_v49  ;;  %13824 = vmatprep.subr.bf16.mxu1 %v13535_v49 }
  0xcb   : > { %11218 = vmatprep.mubr.f32.mxu0 %v15886_v14  ;;  %11614 = vmatprep.mubr.f32.mxu1 %v15889_v15  ;;  %v2431_v14 = vsel %vm514_vm1, %v1977_v16, %v16114_v11  ;;  %v16143_v15 = vrot.slane %v16117_v3, 1  ;;  %v8985_v16 = vld [vmem:[%s18664_s1 + $0x348] sm:$0xff] }
  0xcc   : > { %11219 = vmatmul.mubr.f32.gmra.mrb[2].mxu0 %v15904_v22  ;;  %11615 = vmatmul.mubr.f32.gmra.mrb[2].mxu1 %v15907_v23  ;;  %v16146_v22 = vrot.slane %v16120_v63, 1  ;;  %v16149_v23 = vld [vmem:[%s15543_s10 + $0x38] sm:$0xff]  ;;  %v13547_v33 = vpack.c.bf16 %v8985_v16, %v8984_v29  ;;  %v16262_v29 = vld [vmem:[%s15543_s10 + $0xb0] sm:$0xff] }
  0xcd   : > { %13538 = vmatpush3.bf16.msra.mxu0 %v13535_v49  ;;  %13826 = vmatpush3.bf16.msra.mxu1 %v13535_v49  ;;  %v1150_v35 = vrot.slane %v16149_v23, 7  ;;  %v991_v42 = vsel %vm514_vm1, %v15826_v20, %v16143_v15  ;;  %v1156_v49 = vrot.slane %v16223_v0, 7  ;;  %v8999_v16 = vld [vmem:[%s18664_s1 + $0x3b8] sm:$0xff]  ;;  %v2607_v34 = vrot.slane %v16262_v29, 7 }
  0xce   : > { %13540 = vmatprep.subr.bf16.mxu0 %v13539_v26  ;;  %13828 = vmatprep.subr.bf16.mxu1 %v13539_v26 }
  0xcf   : > { %11221 = vmatprep.mubr.f32.mxu0 %v985_v27  ;;  %11617 = vmatprep.mubr.f32.mxu1 %v15916_v25  ;;  %v16176_v25 = vsel %vm514_vm1, %v2432_v31, %v16146_v22  ;;  %v1151_v20 = vsel %vm365_vm0, %v1149_v39, %v1150_v35  ;;  %v1153_v17 = vsel %vm365_vm0, %v1150_v35, %v1152_v55  ;;  %v1160_v27 = vrot.slane %v16117_v3, 7 }
  0xd0   : > { %11222 = vmatmul.mubr.f32.gmra.mrb[4].mxu0 %v987_v21  ;;  %11618 = vmatmul.mubr.f32.gmra.mrb[4].mxu1 %v2431_v14  ;;  %v1157_v31 = vsel %vm365_vm0, %v1154_v56, %v1156_v49  ;;  %v16256_v21 = vld [vmem:[%s15543_s10 + $0x68] sm:$0xff]  ;;  %v1159_v39 = vsel %vm365_vm0, %v1156_v49, %v1158_v13 }
  0xd1   : > { %13542 = vmatpush3.bf16.msra.mxu0 %v13539_v26  ;;  %13830 = vmatpush3.bf16.msra.mxu1 %v13539_v26  ;;  %v1155_v26 = vsel %vm365_vm0, %v1152_v55, %v1154_v56  ;;  %v16259_v14 = vld [vmem:[%s15543_s10 + $0xa8] sm:$0xff]  ;;  %v1162_v35 = vrot.slane %v16256_v21, 7  ;;  %v13587_v55 = vpack.c.bf16 %v9005_v62, %v9004_v44  ;;  %v3033_v44 = vld [vmem:[%s18666_s3 + $0x58] sm:$0xff]  ;;  %v3032_v62 = vld [vmem:[%s18666_s3 + $0x50] sm:$0xff] }
  0xd2   : > { %13544 = vmatprep.subr.bf16.mxu0 %v13543_v1  ;;  %13832 = vmatprep.subr.bf16.mxu1 %v13543_v1  ;;  %v2605_v41 = vrot.slane %v16259_v14, 7  ;;  %v1596_v56 = vld [vmem:[%s18666_s3 + $0x8] sm:$0xff] }
  0xd3   : > { %11224 = vmatprep.mubr.f32.mxu0 %v15842_v30  ;;  %11620 = vmatprep.mubr.f32.mxu1 %v16166_v38  ;;  %v8988_v30 = vld [vmem:[%s18664_s1 + $0x360] sm:$0xff]  ;;  %v9009_v49 = vld [vmem:[%s18664_s1 + $0x408] sm:$0xff] }
  0xd4   : > { %11225 = vmatmul.mubr.f32.gmra.mrb[6].mxu0 %v991_v42  ;;  %11621 = vmatmul.mubr.f32.gmra.mrb[6].mxu1 %v16176_v25  ;;  %v13555_v43 = vpack.c.bf16 %v8989_v61, %v8988_v30  ;;  %v1161_v42 = vsel %vm365_vm0, %v1158_v13, %v1160_v27  ;;  %v16298_v30 = vsel %vm365_vm0, %v2605_v41, %v2607_v34  ;;  %v9002_v61 = vld [vmem:[%s18664_s1 + $0x3d0] sm:$0xff]  ;;  %v1602_v13 = vld [vmem:[%s18666_s3 + $0x38] sm:$0xff] }
  0xd5   : > { %13546 = vmatpush3.bf16.msra.mxu0 %v13543_v1  ;;  %13834 = vmatpush3.bf16.msra.mxu1 %v13543_v1  ;;  %v13571_v1 = vpack.c.bf16 %v8997_v53, %v8996_v52  ;;  %v1599_v52 = vld [vmem:[%s18666_s3 + $0x20] sm:$0xff] }
  0xd6   : > { %13548 = vmatprep.subr.bf16.mxu0 %v13547_v33  ;;  %13836 = vmatprep.subr.bf16.mxu1 %v13547_v33 }
  0xd7   : > { %11259 = vmatprep.mubr.f32.mxu0 %v1151_v20  ;;  %11655 = vmatprep.mubr.f32.mxu1 %v2594_v57  ;;  %v9001_v20 = vld [vmem:[%s18664_s1 + $0x3c8] sm:$0xff]  ;;  %v16290_v57 = vsel %vm365_vm0, %v16253_v60, %v2605_v41 }
  0xd9   : > { %13550 = vmatpush3.bf16.msra.mxu0 %v13547_v33  ;;  %13838 = vmatpush3.bf16.msra.mxu1 %v13547_v33  ;;  %v2604_v33 = vsel %vm365_vm0, %v2150_v36, %v16253_v60  ;;  %v1163_v36 = vsel %vm365_vm0, %v1160_v27, %v1162_v35 }
  0xda   : > { %13552 = vmatprep.subr.bf16.mxu0 %v13551_v59  ;;  %13840 = vmatprep.subr.bf16.mxu1 %v13551_v59 }
  0xdd   : > { %13554 = vmatpush3.bf16.msra.mxu0 %v13551_v59  ;;  %13842 = vmatpush3.bf16.msra.mxu1 %v13551_v59  ;;  %v1165_v59 = vsel %vm365_vm0, %v1162_v35, %v2592_v40  ;;  %v9015_v35 = vld [vmem:[%s18664_s1 + $0x438] sm:$0xff] }
  0xde   : > { %13556 = vmatprep.subr.bf16.mxu0 %v13555_v43  ;;  %13844 = vmatprep.subr.bf16.mxu1 %v13555_v43 }
  0xe1   : > { %13558 = vmatpush3.bf16.msra.mxu0 %v13555_v43  ;;  %13846 = vmatpush3.bf16.msra.mxu1 %v13555_v43  ;;  %v9003_v43 = vld [vmem:[%s18664_s1 + $0x3d8] sm:$0xff] }
  0xe2   : > { %13560 = vmatprep.subr.bf16.mxu0 %v13559_v45  ;;  %13848 = vmatprep.subr.bf16.mxu1 %v13559_v45  ;;  %v13583_v40 = vpack.c.bf16 %v9003_v43, %v9002_v61  ;;  %v9020_v43 = vld [vmem:[%s18664_s1 + $0x460] sm:$0xff] }
  0xe5   : > { %13562 = vmatpush3.bf16.msra.mxu0 %v13559_v45  ;;  %13850 = vmatpush3.bf16.msra.mxu1 %v13559_v45  ;;  %v15476_v45 = vmov 0  }
  0xe6   : > { %13564 = vmatprep.subr.bf16.mxu0 %v13563_v58  ;;  %13852 = vmatprep.subr.bf16.mxu1 %v13563_v58 }
  0xe7   : > { %15463 = vset.pattern.permute.xlu1 %v15476_v45  ;;  %15462 = vset.pattern.permute.xlu0 %v15476_v45 }
  0xe8   : > { %11260 = vmatmul.mubr.f32.vlgmr.msra.gmra.mrb[0].mxu0 %v1153_v17  ;;  %11656 = vmatmul.mubr.f32.vlgmr.msra.gmra.mrb[0].mxu1 %v2596_v19  ;;  %v9008_v19 = vld [vmem:[%s18664_s1 + $0x400] sm:$0xff] }
  0xe9   : > { %13566 = vmatpush3.bf16.msra.mxu0 %v13563_v58  ;;  %13854 = vmatpush3.bf16.msra.mxu1 %v13563_v58  ;;  %v9006_v58 = vld [vmem:[%s18664_s1 + $0x3f0] sm:$0xff]  ;;  %v13595_v53 = vpack.c.bf16 %v9009_v49, %v9008_v19  ;;  %v15465_v19 = vld [vmem:[%s15543_s10 + $0x88] sm:$0xff] }
  0xea   : > { %13568 = vmatprep.subr.bf16.mxu0 %v13567_v24  ;;  %13856 = vmatprep.subr.bf16.mxu1 %v13567_v24  ;;  %v13591_v17 = vpack.c.bf16 %v9007_v4, %v9006_v58  ;;  %v3034_v58 = vld [vmem:[%s18666_s3 + $0x60] sm:$0xff]  ;;  %v2879_v49 = vrot.slane %v15465_v19, 1 }
  0xeb   : > { %11262 = vmatprep.mubr.f32.mxu0 %v1155_v26  ;;  %11658 = vmatprep.mubr.f32.mxu1 %v2598_v10  ;;  %v9010_v26 = vld [vmem:[%s18664_s1 + $0x410] sm:$0xff]  ;;  %v9011_v10 = vld [vmem:[%s18664_s1 + $0x418] sm:$0xff] }
  0xec   : > { %11263 = vmatmul.mubr.f32.gmra.mrb[2].mxu0 %v1157_v31  ;;  %11659 = vmatmul.mubr.f32.gmra.mrb[2].mxu1 %v15997_v51  ;;  %v13575_v51 = vpack.c.bf16 %v8999_v16, %v8998_v7  ;;  %v1601_v31 = vld [vmem:[%s18666_s3 + $0x30] sm:$0xff]  ;;  %v13599_v27 = vpack.c.bf16 %v9011_v10, %v9010_v26  ;;  %v9013_v7 = vld [vmem:[%s18664_s1 + $0x428] sm:$0xff]  ;;  %v1440_v26 = vrot.slane %v16223_v0, 1 }
  0xed   : > { %13570 = vmatpush3.bf16.msra.mxu0 %v13567_v24  ;;  %13858 = vmatpush3.bf16.msra.mxu1 %v13567_v24  ;;  %v1600_v24 = vld [vmem:[%s18666_s3 + $0x28] sm:$0xff]  ;;  %v9155_v10 = vld [vmem:[%s18664_s1 + $0x90] sm:$0xff] }
  0xee   : > { %13572 = vmatprep.subr.bf16.mxu0 %v13571_v1  ;;  %13860 = vmatprep.subr.bf16.mxu1 %v13571_v1 }
  0xef   : > { %11265 = vmatprep.mubr.f32.mxu0 %v1159_v39  ;;  %11661 = vmatprep.mubr.f32.mxu1 %v16002_v2  ;;  %v13579_v2 = vpack.c.bf16 %v9001_v20, %v9000_v48  ;;  %v9014_v39 = vld [vmem:[%s18664_s1 + $0x430] sm:$0xff]  ;;  %v2877_v48 = vrot.slane %v16207_v54, 1 }
  0xf0   : > { %11266 = vmatmul.mubr.f32.gmra.mrb[4].mxu0 %v1161_v42  ;;  %11662 = vmatmul.mubr.f32.gmra.mrb[4].mxu1 %v2604_v33  ;;  %v13607_v41 = vpack.c.bf16 %v9015_v35, %v9014_v39  ;;  %v9016_v42 = vld [vmem:[%s18664_s1 + $0x440] sm:$0xff]  ;;  %v9017_v33 = vld [vmem:[%s18664_s1 + $0x448] sm:$0xff]  ;;  %v2887_v39 = vrot.slane %v16259_v14, 1 }
  0xf1   : > { %13574 = vmatpush3.bf16.msra.mxu0 %v13571_v1  ;;  %13862 = vmatpush3.bf16.msra.mxu1 %v13571_v1  ;;  %v9012_v1 = vld [vmem:[%s18664_s1 + $0x420] sm:$0xff]  ;;  %v13611_v20 = vpack.c.bf16 %v9017_v33, %v9016_v42  ;;  %v1448_v42 = vrot.slane %v16152_v8, 1  ;;  %v2889_v33 = vrot.slane %v16262_v29, 1 }
  0xf2   : > { %13576 = vmatprep.subr.bf16.mxu0 %v13575_v51  ;;  %13864 = vmatprep.subr.bf16.mxu1 %v13575_v51  ;;  %v13603_v16 = vpack.c.bf16 %v9013_v7, %v9012_v1  ;;  %v2882_v1 = vsel %vm514_vm1, %v2879_v49, %v16114_v11  ;;  %v16479_v11 = vld [vmem:[%s15543_s10 + $0xb8] sm:$0xff] }
  0xf3   : > { %11268 = vmatprep.mubr.f32.mxu0 %v1163_v36  ;;  %11664 = vmatprep.mubr.f32.mxu1 %v16290_v57 }
  0xf4   : > { %11269 = vmatmul.mubr.f32.gmra.mrb[6].mxu0 %v1165_v59  ;;  %11665 = vmatmul.mubr.f32.gmra.mrb[6].mxu1 %v16298_v30  ;;  %v3031_v59 = vld [vmem:[%s18666_s3 + $0x48] sm:$0xff] }
  0xf5   : > { %13578 = vmatpush3.bf16.msra.mxu0 %v13575_v51  ;;  %13866 = vmatpush3.bf16.msra.mxu1 %v13575_v51  ;;  %v2876_v51 = vrot.slane %v16155_v28, 1 }
  0xf6   : > { %13580 = vmatprep.subr.bf16.mxu0 %v13579_v2  ;;  %13868 = vmatprep.subr.bf16.mxu1 %v13579_v2 }
  0xf7   : > { %11303 = vmatprep.mubr.f32.mxu0 %v16149_v23  ;;  %11699 = vmatprep.mubr.f32.mxu1 %v16155_v28  ;;  %v2878_v36 = vsel %vm514_vm1, %v2876_v51, %v2877_v48  ;;  %v9164_v28 = vld [vmem:[%s18664_s1 + $0xd8] sm:$0xff] }
  0xf8   : > { %1615 = vperm.xlu1 %15463, %v1597_v12   ;;  %1605 = vperm.xlu0 %15462, %v1595_v47   ;;  %v9022_v12 = vld [vmem:[%s18664_s1 + $0x470] sm:$0xff]  ;;  %v9023_v47 = vld [vmem:[%s18664_s1 + $0x478] sm:$0xff] }
  0xf9   : > { %13582 = vmatpush3.bf16.msra.mxu0 %v13579_v2  ;;  %13870 = vmatpush3.bf16.msra.mxu1 %v13579_v2  ;;  %v3030_v2 = vld [vmem:[%s18666_s3 + $0x40] sm:$0xff]  ;;  %v13623_v4 = vpack.c.bf16 %v9023_v47, %v9022_v12 }
  0xfa   : > { %13584 = vmatprep.subr.bf16.mxu0 %v13583_v40  ;;  %13872 = vmatprep.subr.bf16.mxu1 %v13583_v40  ;;  %v3104_v47 = vld [vmem:[%s18664_s1] sm:$0xff] }
  0xfc   : > { %1620 = vperm.xlu1 %15463, %v1598_v5   ;;  %1610 = vperm.xlu0 %15462, %v1596_v56   ;;  %v9153_v5 = vld [vmem:[%s18664_s1 + $0x80] sm:$0xff]  ;;  %v9154_v56 = vld [vmem:[%s18664_s1 + $0x88] sm:$0xff] }
  0xfd   : > { %13586 = vmatpush3.bf16.msra.mxu0 %v13583_v40  ;;  %13874 = vmatpush3.bf16.msra.mxu1 %v13583_v40  ;;  %v9021_v40 = vld [vmem:[%s18664_s1 + $0x468] sm:$0xff] }
  0xfe   : > { %13588 = vmatprep.subr.bf16.mxu0 %v13587_v55  ;;  %13876 = vmatprep.subr.bf16.mxu1 %v13587_v55  ;;  %v13619_v45 = vpack.c.bf16 %v9021_v40, %v9020_v43  ;;  %v9165_v43 = vld [vmem:[%s18664_s1 + $0xe0] sm:$0xff]  ;;  %v9166_v40 = vld [vmem:[%s18664_s1 + $0xe8] sm:$0xff] }
 0x100   : > { %1630 = vperm.xlu1 %15463, %v1600_v24   ;;  %1625 = vperm.xlu0 %15462, %v1599_v52   ;;  %v3037_v24 = vld [vmem:[%s18666_s3 + $0x78] sm:$0xff]  ;;  %v3036_v52 = vld [vmem:[%s18666_s3 + $0x70] sm:$0xff] }
 0x101   : > { %13590 = vmatpush3.bf16.msra.mxu0 %v13587_v55  ;;  %13878 = vmatpush3.bf16.msra.mxu1 %v13587_v55  ;;  %v3035_v55 = vld [vmem:[%s18666_s3 + $0x68] sm:$0xff] }
 0x102   : > { %13592 = vmatprep.subr.bf16.mxu0 %v13591_v17  ;;  %13880 = vmatprep.subr.bf16.mxu1 %v13591_v17 }
 0x104   : > { %1640 = vperm.xlu1 %15463, %v1602_v13   ;;  %1635 = vperm.xlu0 %15462, %v1601_v31   ;;  %v1442_v31 = vrot.slane %v16237_v50, 1 }
 0x105   : > { %13594 = vmatpush3.bf16.msra.mxu0 %v13591_v17  ;;  %13882 = vmatpush3.bf16.msra.mxu1 %v13591_v17  ;;  %v1438_v17 = vrot.slane %v16220_v37, 1 }
 0x106   : > { %13596 = vmatprep.subr.bf16.mxu0 %v13595_v53  ;;  %13884 = vmatprep.subr.bf16.mxu1 %v13595_v53  ;;  %v1445_v35 = vsel %vm514_vm1, %v1442_v31, %v16143_v15 }
 0x108   : > { %11304 = vmatmul.mubr.f32.vlgmr.msra.gmra.mrb[0].mxu0 %v16204_v46  ;;  %11700 = vmatmul.mubr.f32.vlgmr.msra.gmra.mrb[0].mxu1 %v16207_v54  ;;  %v9158_v54 = vld [vmem:[%s18664_s1 + $0xa8] sm:$0xff] }
 0x109   : > { %13598 = vmatpush3.bf16.msra.mxu0 %v13595_v53  ;;  %13886 = vmatpush3.bf16.msra.mxu1 %v13595_v53  ;;  %v13915_v53 = vpack.c.bf16 %v9154_v56, %v9153_v5  ;;  %v3107_v5 = vld [vmem:[%s18664_s1 + $0x18] sm:$0xff]  ;;  %v16560_v56 = vld [vmem:[%s15543_s10 + $0x90] sm:$0xff] }
 0x10a   : > { %13600 = vmatprep.subr.bf16.mxu0 %v13599_v27  ;;  %13888 = vmatprep.subr.bf16.mxu1 %v13599_v27 }
 0x10b   : > { %11306 = vmatprep.mubr.f32.mxu0 %v16220_v37  ;;  %11702 = vmatprep.mubr.f32.mxu1 %v15865_v6  ;;  %v1435_v6 = vrot.slane %v16149_v23, 1  ;;  %v9156_v37 = vld [vmem:[%s18664_s1 + $0x98] sm:$0xff] }
 0x10c   : > { %11307 = vmatmul.mubr.f32.gmra.mrb[2].mxu0 %v16223_v0  ;;  %11703 = vmatmul.mubr.f32.gmra.mrb[2].mxu1 %v15965_v9  ;;  %v1436_v9 = vrot.slane %v16204_v46, 1  ;;  %v2880_v0 = vsel %vm514_vm1, %v2877_v48, %v2879_v49  ;;  %v13919_v7 = vpack.c.bf16 %v9156_v37, %v9155_v10  ;;  %v9157_v46 = vld [vmem:[%s18664_s1 + $0xa0] sm:$0xff]  ;;  %v2891_v48 = vrot.slane %v16479_v11, 1  ;;  %v3110_v37 = vld [vmem:[%s18664_s1 + $0x30] sm:$0xff] }
 0x10d   : > { %13602 = vmatpush3.bf16.msra.mxu0 %v13599_v27  ;;  %13890 = vmatpush3.bf16.msra.mxu1 %v13599_v27  ;;  %v1441_v27 = vsel %vm514_vm1, %v1438_v17, %v1440_v26  ;;  %v3108_v49 = vld [vmem:[%s18664_s1 + $0x20] sm:$0xff] }
 0x10e   : > { %13604 = vmatprep.subr.bf16.mxu0 %v13603_v16  ;;  %13892 = vmatprep.subr.bf16.mxu1 %v13603_v16  ;;  %v1437_v23 = vsel %vm514_vm1, %v1435_v6, %v1436_v9  ;;  %v1439_v13 = vsel %vm514_vm1, %v1436_v9, %v1438_v17  ;;  %v9160_v6 = vld [vmem:[%s18664_s1 + $0xb8] sm:$0xff]  ;;  %v16563_v17 = vld [vmem:[%s15543_s10 + $0xd0] sm:$0xff] }
 0x10f   : > { %11309 = vmatprep.mubr.f32.mxu0 %v16237_v50  ;;  %11705 = vmatprep.mubr.f32.mxu1 %v15968_v18  ;;  %v9018_v18 = vld [vmem:[%s18664_s1 + $0x450] sm:$0xff]  ;;  %v1443_v50 = vsel %vm514_vm1, %v1440_v26, %v1442_v31  ;;  %v16580_v26 = vld [vmem:[%s15543_s10 + $0xe0] sm:$0xff] }
 0x110   : > { %11310 = vmatmul.mubr.f32.gmra.mrb[4].mxu0 %v16117_v3  ;;  %11706 = vmatmul.mubr.f32.gmra.mrb[4].mxu1 %v16120_v63  ;;  %v9019_v3 = vld [vmem:[%s18664_s1 + $0x458] sm:$0xff]  ;;  %v16596_v31 = vld [vmem:[%s15543_s10 + $0xf0] sm:$0xff] }
 0x111   : > { %13606 = vmatpush3.bf16.msra.mxu0 %v13603_v16  ;;  %13894 = vmatpush3.bf16.msra.mxu1 %v13603_v16  ;;  %v13615_v61 = vpack.c.bf16 %v9019_v3, %v9018_v18  ;;  %v1446_v16 = vrot.slane %v16256_v21, 1  ;;  %v9162_v3 = vld [vmem:[%s18664_s1 + $0xc8] sm:$0xff] }
 0x112   : > { %13608 = vmatprep.subr.bf16.mxu0 %v13607_v41  ;;  %13896 = vmatprep.subr.bf16.mxu1 %v13607_v41 }
 0x113   : > { %11312 = vmatprep.mubr.f32.mxu0 %v16256_v21  ;;  %11708 = vmatprep.mubr.f32.mxu1 %v16259_v14  ;;  %v9159_v21 = vld [vmem:[%s18664_s1 + $0xb0] sm:$0xff]  ;;  %v1447_v9 = vsel %vm514_vm1, %v16143_v15, %v1446_v16  ;;  %v9161_v15 = vld [vmem:[%s18664_s1 + $0xc0] sm:$0xff] }
 0x114   : > { %11313 = vmatmul.mubr.f32.gmra.mrb[6].mxu0 %v16152_v8  ;;  %11709 = vmatmul.mubr.f32.gmra.mrb[6].mxu1 %v16262_v29  ;;  %v16496_v8 = vsel %vm514_vm1, %v16146_v22, %v2887_v39  ;;  %v13927_v18 = vpack.c.bf16 %v9160_v6, %v9159_v21  ;;  %v3116_v6 = vld [vmem:[%s18664_s1 + $0x60] sm:$0xff] }
 0x115   : > { %13610 = vmatpush3.bf16.msra.mxu0 %v13607_v41  ;;  %13898 = vmatpush3.bf16.msra.mxu1 %v13607_v41  ;;  %v13923_v41 = vpack.c.bf16 %v9158_v54, %v9157_v46 }
 0x116   : > { %13612 = vmatprep.subr.bf16.mxu0 %v13611_v20  ;;  %13900 = vmatprep.subr.bf16.mxu1 %v13611_v20 }
 0x117   : > { %11347 = vmatprep.mubr.f32.mxu0 %v1437_v23  ;;  %11743 = vmatprep.mubr.f32.mxu1 %v2878_v36  ;;  %v16517_v23 = vsel %vm514_vm1, %v2889_v33, %v2891_v48  ;;  %v13931_v36 = vpack.c.bf16 %v9162_v3, %v9161_v15  ;;  %v9169_v3 = vld [vmem:[%s18664_s1 + $0x100] sm:$0xff] }
 0x118   : > { %3045 = vperm.xlu1 %15463, %v3031_v59   ;;  %3040 = vperm.xlu0 %15462, %v3030_v2   ;;  %v9163_v59 = vld [vmem:[%s18664_s1 + $0xd0] sm:$0xff]  ;;  %v16531_v2 = vld [vmem:[%s15543_s10 + $0xc8] sm:$0xff] }
 0x119   : > { %13614 = vmatpush3.bf16.msra.mxu0 %v13611_v20  ;;  %13902 = vmatpush3.bf16.msra.mxu1 %v13611_v20  ;;  %v16502_v20 = vsel %vm514_vm1, %v2887_v39, %v2889_v33  ;;  %v4686_v54 = vrot.slane %v16531_v2, 7  ;;  %v16620_v39 = vld [vmem:[%s15543_s10 + $0x100] sm:$0xff] }
 0x11a   : > { %13616 = vmatprep.subr.bf16.mxu0 %v13615_v61  ;;  %13904 = vmatprep.subr.bf16.mxu1 %v13615_v61 }
 0x11c   : > { %3055 = vperm.xlu1 %15463, %v3033_v44   ;;  %3050 = vperm.xlu0 %15462, %v3032_v62   ;;  %v13939_v44 = vpack.c.bf16 %v9166_v40, %v9165_v43  ;;  %v9167_v62 = vld [vmem:[%s18664_s1 + $0xf0] sm:$0xff]  ;;  %v9172_v43 = vld [vmem:[%s18664_s1 + $0x118] sm:$0xff] }
 0x11d   : > { %13618 = vmatpush3.bf16.msra.mxu0 %v13615_v61  ;;  %13906 = vmatpush3.bf16.msra.mxu1 %v13615_v61  ;;  %v13935_v61 = vpack.c.bf16 %v9164_v28, %v9163_v59  ;;  %v4688_v59 = vrot.slane %v16563_v17, 7 }
 0x11e   : > { %13620 = vmatprep.subr.bf16.mxu0 %v13619_v45  ;;  %13908 = vmatprep.subr.bf16.mxu1 %v13619_v45 }
 0x120   : > { %3065 = vperm.xlu1 %15463, %v3035_v55   ;;  %3060 = vperm.xlu0 %15462, %v3034_v58   ;;  %v3105_v55 = vld [vmem:[%s18664_s1 + $0x8] sm:$0xff] }
 0x121   : > { %13622 = vmatpush3.bf16.msra.mxu0 %v13619_v45  ;;  %13910 = vmatpush3.bf16.msra.mxu1 %v13619_v45  ;;  %v9168_v45 = vld [vmem:[%s18664_s1 + $0xf8] sm:$0xff]  ;;  %v13947_v58 = vpack.c.bf16 %v3105_v55, %v3104_v47  ;;  %v9173_v55 = vld [vmem:[%s18664_s1 + $0x120] sm:$0xff] }
 0x122   : > { %13624 = vmatprep.subr.bf16.mxu0 %v13623_v4  ;;  %13912 = vmatprep.subr.bf16.mxu1 %v13623_v4  ;;  %v13943_v12 = vpack.c.bf16 %v9168_v45, %v9167_v62  ;;  %v4692_v62 = vrot.slane %v16580_v26, 7 }
 0x124   : > { %3075 = vperm.xlu1 %15463, %v3037_v24   ;;  %3070 = vperm.xlu0 %15462, %v3036_v52   ;;  %v3109_v24 = vld [vmem:[%s18664_s1 + $0x28] sm:$0xff]  ;;  %v16574_v52 = vld [vmem:[%s15543_s10 + $0x98] sm:$0xff] }
 0x125   : > { %13626 = vmatpush3.bf16.msra.mxu0 %v13623_v4  ;;  %13914 = vmatpush3.bf16.msra.mxu1 %v13623_v4  ;;  %v3106_v4 = vld [vmem:[%s18664_s1 + $0x10] sm:$0xff]  ;;  %v13955_v10 = vpack.c.bf16 %v3109_v24, %v3108_v49  ;;  %v16663_v40 = vrot.slane %v16574_v52, 7  ;;  %v4696_v49 = vrot.slane %v16596_v31, 7 }
 0x126   : > { %13916 = vmatprep.subr.bf16.mxu0 %v13915_v53  ;;  %14204 = vmatprep.subr.bf16.mxu1 %v13915_v53  ;;  %v13951_v19 = vpack.c.bf16 %v3107_v5, %v3106_v4 }
 0x127   : > { %v3258_v24 = vsel %vm365_vm0, %v16663_v40, %v16253_v60 }
 0x128   : > { %11348 = vmatmul.mubr.f32.vlgmr.msra.gmra.mrb[0].mxu0 %v1439_v13  ;;  %11744 = vmatmul.mubr.f32.vlgmr.msra.gmra.mrb[0].mxu1 %v2880_v0  ;;  %v3111_v13 = vld [vmem:[%s18664_s1 + $0x38] sm:$0xff]  ;;  %v16593_v0 = vld [vmem:[%s15543_s10 + $0xe8] sm:$0xff] }
 0x129   : > { %13918 = vmatpush3.bf16.msra.mxu0 %v13915_v53  ;;  %14206 = vmatpush3.bf16.msra.mxu1 %v13915_v53  ;;  %v16577_v53 = vld [vmem:[%s15543_s10 + $0xd8] sm:$0xff]  ;;  %v4694_v4 = vrot.slane %v16593_v0, 7 }
 0x12a   : > { %11350 = vmatprep.mubr.f32.mxu0 %v1441_v27  ;;  %11746 = vmatprep.mubr.f32.mxu1 %v2882_v1  ;;  %v16599_v27 = vld [vmem:[%s15543_s10 + $0xc0] sm:$0xff]  ;;  %v13959_v1 = vpack.c.bf16 %v3111_v13, %v3110_v37  ;;  %v9175_v13 = vld [vmem:[%s18664_s1 + $0x130] sm:$0xff] }
 0x12b   : > { %13920 = vmatprep.subr.bf16.mxu0 %v13919_v7  ;;  %14208 = vmatprep.subr.bf16.mxu1 %v13919_v7 }
 0x12c   : > { %11351 = vmatmul.mubr.f32.gmra.mrb[2].mxu0 %v1443_v50  ;;  %11747 = vmatmul.mubr.f32.gmra.mrb[2].mxu1 %v16166_v38  ;;  %v1449_v38 = vsel %vm514_vm1, %v1446_v16, %v1448_v42  ;;  %v16614_v50 = vld [vmem:[%s15543_s10 + $0xf8] sm:$0xff]  ;;  %v16617_v16 = vrot.slane %v16599_v27, 7 }
 0x12d   : > { %13922 = vmatpush3.bf16.msra.mxu0 %v13919_v7  ;;  %14210 = vmatpush3.bf16.msra.mxu1 %v13919_v7  ;;  %v3112_v7 = vld [vmem:[%s18664_s1 + $0x40] sm:$0xff]  ;;  %v4698_v60 = vrot.slane %v16614_v50, 7 }
 0x12e   : > { %11353 = vmatprep.mubr.f32.mxu0 %v1445_v35  ;;  %11749 = vmatprep.mubr.f32.mxu1 %v16176_v25  ;;  %v1451_v25 = vsel %vm514_vm1, %v1448_v42, %v2876_v51  ;;  %v16528_v51 = vld [vmem:[%s15543_s10 + $0x88] sm:$0xff]  ;;  %v3114_v35 = vld [vmem:[%s18664_s1 + $0x50] sm:$0xff]  ;;  %v4687_v33 = vsel %vm365_vm0, %v16617_v16, %v4686_v54 }
 0x12f   : > { %13924 = vmatprep.subr.bf16.mxu0 %v13923_v41  ;;  %14212 = vmatprep.subr.bf16.mxu1 %v13923_v41  ;;  %v3251_v46 = vrot.slane %v16528_v51, 7 }
 0x130   : > { %11354 = vmatmul.mubr.f32.gmra.mrb[4].mxu0 %v1447_v9  ;;  %11750 = vmatmul.mubr.f32.gmra.mrb[4].mxu1 %v16496_v8  ;;  %v3117_v9 = vld [vmem:[%s18664_s1 + $0x68] sm:$0xff] }
 0x131   : > { %13926 = vmatpush3.bf16.msra.mxu0 %v13923_v41  ;;  %14214 = vmatpush3.bf16.msra.mxu1 %v13923_v41  ;;  %v3115_v41 = vld [vmem:[%s18664_s1 + $0x58] sm:$0xff]  ;;  %v3252_v42 = vsel %vm365_vm0, %v16217_v32, %v3251_v46  ;;  %v13971_v32 = vpack.c.bf16 %v3117_v9, %v3116_v6  ;;  %v3398_v6 = vrot.slane %v16560_v56, 1  ;;  %v4833_v9 = vrot.slane %v16563_v17, 1 }
 0x132   : > { %11356 = vmatprep.mubr.f32.mxu0 %v1449_v38  ;;  %11752 = vmatprep.mubr.f32.mxu1 %v16502_v20  ;;  %v13967_v21 = vpack.c.bf16 %v3115_v41, %v3114_v35  ;;  %v3118_v38 = vld [vmem:[%s18664_s1 + $0x70] sm:$0xff]  ;;  %v3397_v35 = vrot.slane %v16528_v51, 1  ;;  %v4832_v41 = vrot.slane %v16531_v2, 1 }
 0x133   : > { %13928 = vmatprep.subr.bf16.mxu0 %v13927_v18  ;;  %14216 = vmatprep.subr.bf16.mxu1 %v13927_v18 }
 0x134   : > { %11357 = vmatmul.mubr.f32.gmra.mrb[6].mxu0 %v1451_v25  ;;  %11753 = vmatmul.mubr.f32.gmra.mrb[6].mxu1 %v16517_v23  ;;  %v9170_v25 = vld [vmem:[%s18664_s1 + $0x108] sm:$0xff] }
 0x135   : > { %13930 = vmatpush3.bf16.msra.mxu0 %v13927_v18  ;;  %14218 = vmatpush3.bf16.msra.mxu1 %v13927_v18  ;;  %v3119_v18 = vld [vmem:[%s18664_s1 + $0x78] sm:$0xff]  ;;  %v13979_v28 = vpack.c.bf16 %v9170_v25, %v9169_v3  ;;  %v9181_v3 = vld [vmem:[%s18664_s1 + $0x160] sm:$0xff]  ;;  %v9182_v25 = vld [vmem:[%s18664_s1 + $0x168] sm:$0xff] }
 0x136   : > { %13932 = vmatprep.subr.bf16.mxu0 %v13931_v36  ;;  %14220 = vmatprep.subr.bf16.mxu1 %v13931_v36  ;;  %v13975_v15 = vpack.c.bf16 %v3119_v18, %v3118_v38  ;;  %v3399_v38 = vsel %vm514_vm1, %v3397_v35, %v3398_v6  ;;  %v4834_v18 = vsel %vm514_vm1, %v4832_v41, %v4833_v9  ;;  %v16818_v35 = vld [vmem:[%s15543_s10 + $0x108] sm:$0xff] }
 0x137   : > { %11787 = vmatprep.mubr.f32.mxu0 %v16528_v51  ;;  %12183 = vmatprep.mubr.f32.mxu1 %v16531_v2 }
 0x139   : > { %13934 = vmatpush3.bf16.msra.mxu0 %v13931_v36  ;;  %14222 = vmatpush3.bf16.msra.mxu1 %v13931_v36  ;;  %v3253_v36 = vrot.slane %v16560_v56, 7 }
 0x13a   : > { %13936 = vmatprep.subr.bf16.mxu0 %v13935_v61  ;;  %14224 = vmatprep.subr.bf16.mxu1 %v13935_v61 }
 0x13b   : > { %v3254_v45 = vsel %vm365_vm0, %v3251_v46, %v3253_v36  ;;  %v3256_v5 = vsel %vm365_vm0, %v3253_v36, %v16663_v40  ;;  %v4700_v46 = vrot.slane %v16620_v39, 7  ;;  %v14003_v36 = vpack.c.bf16 %v9182_v25, %v9181_v3  ;;  %v9196_v3 = vld [vmem:[%s18664_s1 + $0x1d8] sm:$0xff]  ;;  %v9197_v25 = vld [vmem:[%s18664_s1 + $0x1e0] sm:$0xff] }
 0x13d   : > { %13938 = vmatpush3.bf16.msra.mxu0 %v13935_v61  ;;  %14226 = vmatpush3.bf16.msra.mxu1 %v13935_v61  ;;  %v9171_v61 = vld [vmem:[%s18664_s1 + $0x110] sm:$0xff] }
 0x13e   : > { %13940 = vmatprep.subr.bf16.mxu0 %v13939_v44  ;;  %14228 = vmatprep.subr.bf16.mxu1 %v13939_v44  ;;  %v13983_v47 = vpack.c.bf16 %v9172_v43, %v9171_v61  ;;  %v9184_v61 = vld [vmem:[%s18664_s1 + $0x178] sm:$0xff] }
 0x141   : > { %13942 = vmatpush3.bf16.msra.mxu0 %v13939_v44  ;;  %14230 = vmatpush3.bf16.msra.mxu1 %v13939_v44  ;;  %v16666_v44 = vrot.slane %v16577_v53, 7 }
 0x142   : > { %13944 = vmatprep.subr.bf16.mxu0 %v13943_v12  ;;  %14232 = vmatprep.subr.bf16.mxu1 %v13943_v12 }
 0x145   : > { %13946 = vmatpush3.bf16.msra.mxu0 %v13943_v12  ;;  %14234 = vmatpush3.bf16.msra.mxu1 %v13943_v12  ;;  %v4689_v12 = vsel %vm365_vm0, %v4686_v54, %v4688_v59  ;;  %v16704_v54 = vsel %vm365_vm0, %v4694_v4, %v4696_v49 }
 0x146   : > { %13948 = vmatprep.subr.bf16.mxu0 %v13947_v58  ;;  %14236 = vmatprep.subr.bf16.mxu1 %v13947_v58 }
 0x148   : > { %11788 = vmatmul.mubr.f32.vlgmr.msra.gmra.mrb[8].mxu0 %v16560_v56  ;;  %12184 = vmatmul.mubr.f32.vlgmr.msra.gmra.mrb[8].mxu1 %v16563_v17  ;;  %v4841_v56 = vrot.slane %v16596_v31, 1 }
 0x149   : > { %13950 = vmatpush3.bf16.msra.mxu0 %v13947_v58  ;;  %14238 = vmatpush3.bf16.msra.mxu1 %v13947_v58  ;;  %v9174_v58 = vld [vmem:[%s18664_s1 + $0x128] sm:$0xff] }
 0x14a   : > { %13952 = vmatprep.subr.bf16.mxu0 %v13951_v19  ;;  %14240 = vmatprep.subr.bf16.mxu1 %v13951_v19  ;;  %v13987_v37 = vpack.c.bf16 %v9174_v58, %v9173_v55  ;;  %v9187_v58 = vld [vmem:[%s18664_s1 + $0x190] sm:$0xff] }
 0x14b   : > { %11790 = vmatprep.mubr.f32.mxu0 %v16574_v52  ;;  %12186 = vmatprep.mubr.f32.mxu1 %v16577_v53 }
 0x14c   : > { %11791 = vmatmul.mubr.f32.gmra.mrb[10].mxu0 %v16120_v63  ;;  %12187 = vmatmul.mubr.f32.gmra.mrb[10].mxu1 %v16580_v26  ;;  %v3113_v63 = vld [vmem:[%s18664_s1 + $0x48] sm:$0xff] }
 0x14d   : > { %13954 = vmatpush3.bf16.msra.mxu0 %v13951_v19  ;;  %14242 = vmatpush3.bf16.msra.mxu1 %v13951_v19  ;;  %v4691_v19 = vsel %vm365_vm0, %v4688_v59, %v16666_v44  ;;  %v15477_v59 = vmov 0.0  }
 0x14e   : > { %13956 = vmatprep.subr.bf16.mxu0 %v13955_v10  ;;  %14244 = vmatprep.subr.bf16.mxu1 %v13955_v10  ;;  %199 = vst [vmem:[%s16760_s13] sm:$0xff] %v15477_v59  ;;  %200 = vst [vmem:[%s16760_s13 + $0x8] sm:$0xff] %v15477_v59 }
 0x14f   : > { %11793 = vmatprep.mubr.f32.mxu0 %v16259_v14  ;;  %12189 = vmatprep.mubr.f32.mxu1 %v16593_v0  ;;  %v13963_v14 = vpack.c.bf16 %v3113_v63, %v3112_v7  ;;  %v3263_v7 = vrot.slane %v16479_v11, 7  ;;  %v16700_v63 = vsel %vm365_vm0, %v4692_v62, %v4694_v4  ;;  %201 = vst [vmem:[%s16760_s13 + $0x10] sm:$0xff] %v15477_v59  ;;  %202 = vst [vmem:[%s16760_s13 + $0x18] sm:$0xff] %v15477_v59  ;;  %v9188_v4 = vld [vmem:[%s18664_s1 + $0x198] sm:$0xff] }
 0x150   : > { %11794 = vmatmul.mubr.f32.gmra.mrb[12].mxu0 %v16262_v29  ;;  %12190 = vmatmul.mubr.f32.gmra.mrb[12].mxu1 %v16596_v31  ;;  %203 = vst [vmem:[%s16760_s13 + $0x1a0] sm:$0xff] %v15477_v59  ;;  %204 = vst [vmem:[%s16760_s13 + $0x1a8] sm:$0xff] %v15477_v59 }
 0x151   : > { %13958 = vmatpush3.bf16.msra.mxu0 %v13955_v10  ;;  %14246 = vmatpush3.bf16.msra.mxu1 %v13955_v10  ;;  %v16688_v10 = vsel %vm365_vm0, %v16666_v44, %v4692_v62  ;;  %v3264_v51 = vsel %vm365_vm0, %v2607_v34, %v3263_v7  ;;  %v9179_v34 = vld [vmem:[%s18664_s1 + $0x150] sm:$0xff]  ;;  %205 = vst [vmem:[%s16760_s13 + $0x1b0] sm:$0xff] %v15477_v59  ;;  %206 = vst [vmem:[%s16760_s13 + $0x1b8] sm:$0xff] %v15477_v59  ;;  %v9185_v62 = vld [vmem:[%s18664_s1 + $0x180] sm:$0xff] }
 0x152   : > { %13960 = vmatprep.subr.bf16.mxu0 %v13959_v1  ;;  %14248 = vmatprep.subr.bf16.mxu1 %v13959_v1  ;;  %207 = vst [vmem:[%s16760_s13 + $0x1c0] sm:$0xff] %v15477_v59  ;;  %v9199_v59 = vld [vmem:[%s18664_s1 + $0x1f0] sm:$0xff] }
 0x153   : > { %11796 = vmatprep.mubr.f32.mxu0 %v16479_v11  ;;  %12192 = vmatprep.mubr.f32.mxu1 %v16614_v50 }
 0x154   : > { %11797 = vmatmul.mubr.f32.gmra.mrb[14].mxu0 %v16599_v27  ;;  %12193 = vmatmul.mubr.f32.gmra.mrb[14].mxu1 %v16620_v39 }
 0x155   : > { %13962 = vmatpush3.bf16.msra.mxu0 %v13959_v1  ;;  %14250 = vmatpush3.bf16.msra.mxu1 %v13959_v1  ;;  %v9176_v1 = vld [vmem:[%s18664_s1 + $0x138] sm:$0xff] }
 0x156   : > { %13964 = vmatprep.subr.bf16.mxu0 %v13963_v14  ;;  %14252 = vmatprep.subr.bf16.mxu1 %v13963_v14 }
 0x157   : > { %11831 = vmatprep.mubr.f32.mxu0 %v3252_v42  ;;  %12227 = vmatprep.mubr.f32.mxu1 %v4687_v33  ;;  %v9177_v42 = vld [vmem:[%s18664_s1 + $0x140] sm:$0xff]  ;;  %v9178_v33 = vld [vmem:[%s18664_s1 + $0x148] sm:$0xff] }
 0x158   : > { %v13995_v29 = vpack.c.bf16 %v9178_v33, %v9177_v42  ;;  %v9192_v42 = vld [vmem:[%s18664_s1 + $0x1b8] sm:$0xff]  ;;  %v16827_v33 = vrot.slane %v16599_v27, 1 }
 0x159   : > { %13966 = vmatpush3.bf16.msra.mxu0 %v13963_v14  ;;  %14254 = vmatpush3.bf16.msra.mxu1 %v13963_v14  ;;  %v13991_v14 = vpack.c.bf16 %v9176_v1, %v9175_v13  ;;  %v9190_v13 = vld [vmem:[%s18664_s1 + $0x1a8] sm:$0xff] }
 0x15a   : > { %13968 = vmatprep.subr.bf16.mxu0 %v13967_v21  ;;  %14256 = vmatprep.subr.bf16.mxu1 %v13967_v21 }
 0x15d   : > { %13970 = vmatpush3.bf16.msra.mxu0 %v13967_v21  ;;  %14258 = vmatpush3.bf16.msra.mxu1 %v13967_v21  ;;  %v16722_v21 = vsel %vm365_vm0, %v4696_v49, %v4698_v60 }
 0x15e   : > { %13972 = vmatprep.subr.bf16.mxu0 %v13971_v32  ;;  %14260 = vmatprep.subr.bf16.mxu1 %v13971_v32 }
 0x161   : > { %13974 = vmatpush3.bf16.msra.mxu0 %v13971_v32  ;;  %14262 = vmatpush3.bf16.msra.mxu1 %v13971_v32  ;;  %v9180_v32 = vld [vmem:[%s18664_s1 + $0x158] sm:$0xff] }
 0x162   : > { %13976 = vmatprep.subr.bf16.mxu0 %v13975_v15  ;;  %14264 = vmatprep.subr.bf16.mxu1 %v13975_v15 }
 0x165   : > { %13978 = vmatpush3.bf16.msra.mxu0 %v13975_v15  ;;  %14266 = vmatpush3.bf16.msra.mxu1 %v13975_v15  ;;  %v13999_v15 = vpack.c.bf16 %v9180_v32, %v9179_v34  ;;  %v9194_v32 = vld [vmem:[%s18664_s1 + $0x1c8] sm:$0xff] }
 0x166   : > { %13980 = vmatprep.subr.bf16.mxu0 %v13979_v28  ;;  %14268 = vmatprep.subr.bf16.mxu1 %v13979_v28 }
 0x168   : > { %11832 = vmatmul.mubr.f32.vlgmr.msra.gmra.mrb[8].mxu0 %v3254_v45  ;;  %12228 = vmatmul.mubr.f32.vlgmr.msra.gmra.mrb[8].mxu1 %v4689_v12  ;;  %v9186_v45 = vld [vmem:[%s18664_s1 + $0x188] sm:$0xff]  ;;  %v3400_v12 = vrot.slane %v16574_v52, 1  ;;  %v4839_v52 = vrot.slane %v16593_v0, 1 }
 0x169   : > { %13982 = vmatpush3.bf16.msra.mxu0 %v13979_v28  ;;  %14270 = vmatpush3.bf16.msra.mxu1 %v13979_v28  ;;  %v9183_v28 = vld [vmem:[%s18664_s1 + $0x170] sm:$0xff]  ;;  %v14011_v55 = vpack.c.bf16 %v9186_v45, %v9185_v62  ;;  %v9202_v62 = vld [vmem:[%s18664_s1 + $0x208] sm:$0xff] }
 0x16a   : > { %13984 = vmatprep.subr.bf16.mxu0 %v13983_v47  ;;  %14272 = vmatprep.subr.bf16.mxu1 %v13983_v47  ;;  %v14007_v43 = vpack.c.bf16 %v9184_v61, %v9183_v28  ;;  %v3403_v17 = vsel %vm514_vm1, %v3400_v12, %v16146_v22  ;;  %v9191_v22 = vld [vmem:[%s18664_s1 + $0x1b0] sm:$0xff]  ;;  %v9200_v28 = vld [vmem:[%s18664_s1 + $0x1f8] sm:$0xff]  ;;  %v16893_v61 = vld [vmem:[%s15543_s10 + $0xa8] sm:$0xff] }
 0x16b   : > { %11834 = vmatprep.mubr.f32.mxu0 %v3256_v5  ;;  %12230 = vmatprep.mubr.f32.mxu1 %v4691_v19  ;;  %v4837_v5 = vrot.slane %v16580_v26, 1  ;;  %v3401_v19 = vsel %vm514_vm1, %v3398_v6, %v3400_v12  ;;  %v16833_v6 = vsel %vm514_vm1, %v4839_v52, %v4841_v56  ;;  %v14023_v34 = vpack.c.bf16 %v9192_v42, %v9191_v22  ;;  %v16903_v12 = vld [vmem:[%s15543_s10 + $0xb0] sm:$0xff] }
 0x16c   : > { %11835 = vmatmul.mubr.f32.gmra.mrb[10].mxu0 %v3258_v24  ;;  %12231 = vmatmul.mubr.f32.gmra.mrb[10].mxu1 %v16688_v10  ;;  %v14015_v24 = vpack.c.bf16 %v9188_v4, %v9187_v58  ;;  %v3573_v45 = vrot.slane %v16893_v61, 7  ;;  %v16906_v58 = vld [vmem:[%s15543_s10 + $0xb8] sm:$0xff]  ;;  %v9203_v4 = vld [vmem:[%s18664_s1 + $0x210] sm:$0xff] }
 0x16d   : > { %13986 = vmatpush3.bf16.msra.mxu0 %v13983_v47  ;;  %14274 = vmatpush3.bf16.msra.mxu1 %v13983_v47  ;;  %v16785_v47 = vrot.slane %v16577_v53, 1  ;;  %v16939_v22 = vld [vmem:[%s15543_s10 + $0xd0] sm:$0xff] }
 0x16e   : > { %13988 = vmatprep.subr.bf16.mxu0 %v13987_v37  ;;  %14276 = vmatprep.subr.bf16.mxu1 %v13987_v37  ;;  %v16942_v42 = vld [vmem:[%s15543_s10 + $0x110] sm:$0xff] }
 0x16f   : > { %11837 = vmatprep.mubr.f32.mxu0 %v16290_v57  ;;  %12233 = vmatprep.mubr.f32.mxu1 %v16700_v63  ;;  %v3266_v57 = vsel %vm365_vm0, %v3263_v7, %v16617_v16  ;;  %v4836_v49 = vsel %vm514_vm1, %v4833_v9, %v16785_v47  ;;  %v4838_v1 = vsel %vm514_vm1, %v16785_v47, %v4837_v5  ;;  %v4843_v7 = vrot.slane %v16614_v50, 1 }
 0x170   : > { %11838 = vmatmul.mubr.f32.gmra.mrb[12].mxu0 %v16298_v30  ;;  %12234 = vmatmul.mubr.f32.gmra.mrb[12].mxu1 %v16704_v54  ;;  %v16731_v30 = vsel %vm365_vm0, %v4698_v60, %v4700_v46  ;;  %v16815_v60 = vsel %vm514_vm1, %v4837_v5, %v4839_v52  ;;  %v9204_v5 = vld [vmem:[%s18664_s1 + $0x218] sm:$0xff]  ;;  %v3575_v52 = vrot.slane %v16903_v12, 7 }
 0x171   : > { %13990 = vmatpush3.bf16.msra.mxu0 %v13987_v37  ;;  %14278 = vmatpush3.bf16.msra.mxu1 %v13987_v37  ;;  %v9189_v37 = vld [vmem:[%s18664_s1 + $0x1a0] sm:$0xff]  ;;  %v16836_v9 = vsel %vm514_vm1, %v4841_v56, %v4843_v7  ;;  %v9206_v56 = vld [vmem:[%s18664_s1 + $0x228] sm:$0xff] }
 0x172   : > { %13992 = vmatprep.subr.bf16.mxu0 %v13991_v14  ;;  %14280 = vmatprep.subr.bf16.mxu1 %v13991_v14 }
 0x173   : > { %11840 = vmatprep.mubr.f32.mxu0 %v3264_v51  ;;  %12236 = vmatprep.mubr.f32.mxu1 %v16722_v21  ;;  %v4845_v51 = vrot.slane %v16620_v39, 1 }
 0x174   : > { %11841 = vmatmul.mubr.f32.gmra.mrb[14].mxu0 %v3266_v57  ;;  %12237 = vmatmul.mubr.f32.gmra.mrb[14].mxu1 %v16731_v30  ;;  %v4847_v57 = vrot.slane %v16818_v35, 1 }
 0x175   : > { %13994 = vmatpush3.bf16.msra.mxu0 %v13991_v14  ;;  %14282 = vmatpush3.bf16.msra.mxu1 %v13991_v14  ;;  %v14019_v14 = vpack.c.bf16 %v9190_v13, %v9189_v37  ;;  %v16920_v37 = vld [vmem:[%s15543_s10 + $0xc8] sm:$0xff]  ;;  %v9205_v13 = vld [vmem:[%s18664_s1 + $0x220] sm:$0xff] }
 0x176   : > { %13996 = vmatprep.subr.bf16.mxu0 %v13995_v29  ;;  %14284 = vmatprep.subr.bf16.mxu1 %v13995_v29 }
 0x177   : > { %11875 = vmatprep.mubr.f32.mxu0 %v3399_v38  ;;  %12271 = vmatprep.mubr.f32.mxu1 %v4834_v18  ;;  %v3411_v38 = vsel %vm514_vm1, %v2891_v48, %v16827_v33  ;;  %v16857_v18 = vsel %vm514_vm1, %v4843_v7, %v4845_v51  ;;  %v9195_v48 = vld [vmem:[%s18664_s1 + $0x1d0] sm:$0xff]  ;;  %v16935_v7 = vrot.slane %v16920_v37, 7 }
 0x179   : > { %13998 = vmatpush3.bf16.msra.mxu0 %v13995_v29  ;;  %14286 = vmatpush3.bf16.msra.mxu1 %v13995_v29  ;;  %v16840_v29 = vld [vmem:[%s15543_s10 + $0xa0] sm:$0xff] }
 0x17a   : > { %14000 = vmatprep.subr.bf16.mxu0 %v13999_v15  ;;  %14288 = vmatprep.subr.bf16.mxu1 %v13999_v15 }
 0x17d   : > { %14002 = vmatpush3.bf16.msra.mxu0 %v13999_v15  ;;  %14290 = vmatpush3.bf16.msra.mxu1 %v13999_v15  ;;  %v3571_v15 = vrot.slane %v16840_v29, 7 }
 0x17e   : > { %14004 = vmatprep.subr.bf16.mxu0 %v14003_v36  ;;  %14292 = vmatprep.subr.bf16.mxu1 %v14003_v36 }
 0x17f   : > { %v3572_v2 = vsel %vm365_vm0, %v16663_v40, %v3571_v15 }
 0x181   : > { %14006 = vmatpush3.bf16.msra.mxu0 %v14003_v36  ;;  %14294 = vmatpush3.bf16.msra.mxu1 %v14003_v36  ;;  %v9198_v36 = vld [vmem:[%s18664_s1 + $0x1e8] sm:$0xff] }
 0x182   : > { %14008 = vmatprep.subr.bf16.mxu0 %v14007_v43  ;;  %14296 = vmatprep.subr.bf16.mxu1 %v14007_v43  ;;  %v14035_v40 = vpack.c.bf16 %v9198_v36, %v9197_v25  ;;  %v9211_v25 = vld [vmem:[%s18664_s1 + $0x250] sm:$0xff]  ;;  %v9212_v36 = vld [vmem:[%s18664_s1 + $0x258] sm:$0xff] }
 0x185   : > { %14010 = vmatpush3.bf16.msra.mxu0 %v14007_v43  ;;  %14298 = vmatpush3.bf16.msra.mxu1 %v14007_v43  ;;  %v9201_v43 = vld [vmem:[%s18664_s1 + $0x200] sm:$0xff] }
 0x186   : > { %14012 = vmatprep.subr.bf16.mxu0 %v14011_v55  ;;  %14300 = vmatprep.subr.bf16.mxu1 %v14011_v55 }
 0x188   : > { %11876 = vmatmul.mubr.f32.vlgmr.msra.gmra.mrb[8].mxu0 %v3401_v19  ;;  %12272 = vmatmul.mubr.f32.vlgmr.msra.gmra.mrb[8].mxu1 %v4836_v49  ;;  %v3574_v19 = vsel %vm365_vm0, %v3571_v15, %v3573_v45  ;;  %v16917_v49 = vrot.slane %v16906_v58, 7  ;;  %v16963_v15 = vrot.slane %v16942_v42, 7 }
 0x189   : > { %14014 = vmatpush3.bf16.msra.mxu0 %v14011_v55  ;;  %14302 = vmatpush3.bf16.msra.mxu1 %v14011_v55  ;;  %v14043_v55 = vpack.c.bf16 %v9202_v62, %v9201_v43  ;;  %v9216_v43 = vld [vmem:[%s18664_s1 + $0x278] sm:$0xff] }
 0x18a   : > { %14016 = vmatprep.subr.bf16.mxu0 %v14015_v24  ;;  %14304 = vmatprep.subr.bf16.mxu1 %v14015_v24 }
 0x18b   : > { %11878 = vmatprep.mubr.f32.mxu0 %v3403_v17  ;;  %12274 = vmatprep.mubr.f32.mxu1 %v4838_v1  ;;  %v3576_v17 = vsel %vm365_vm0, %v3573_v45, %v3575_v52  ;;  %v16932_v1 = vsel %vm365_vm0, %v3575_v52, %v16917_v49  ;;  %v9218_v45 = vld [vmem:[%s18664_s1 + $0x288] sm:$0xff] }
 0x18c   : > { %11879 = vmatmul.mubr.f32.gmra.mrb[10].mxu0 %v16496_v8  ;;  %12275 = vmatmul.mubr.f32.gmra.mrb[10].mxu1 %v16815_v60  ;;  %v9193_v8 = vld [vmem:[%s18664_s1 + $0x1c0] sm:$0xff] }
 0x18d   : > { %14018 = vmatpush3.bf16.msra.mxu0 %v14015_v24  ;;  %14306 = vmatpush3.bf16.msra.mxu1 %v14015_v24  ;;  %v14027_v11 = vpack.c.bf16 %v9194_v32, %v9193_v8  ;;  %v14047_v24 = vpack.c.bf16 %v9204_v5, %v9203_v4  ;;  %v9208_v8 = vld [vmem:[%s18664_s1 + $0x238] sm:$0xff]  ;;  %v3580_v32 = vsel %vm365_vm0, %v16917_v49, %v16617_v16  ;;  %v9219_v4 = vld [vmem:[%s18664_s1 + $0x290] sm:$0xff] }
 0x18e   : > { %14020 = vmatprep.subr.bf16.mxu0 %v14019_v14  ;;  %14308 = vmatprep.subr.bf16.mxu1 %v14019_v14  ;;  %v9220_v5 = vld [vmem:[%s18664_s1 + $0x298] sm:$0xff] }
 0x18f   : > { %11881 = vmatprep.mubr.f32.mxu0 %v16502_v20  ;;  %12277 = vmatprep.mubr.f32.mxu1 %v16833_v6  ;;  %v3413_v20 = vsel %vm514_vm1, %v16827_v33, %v4832_v41  ;;  %v14031_v41 = vpack.c.bf16 %v9196_v3, %v9195_v48  ;;  %v9209_v48 = vld [vmem:[%s18664_s1 + $0x240] sm:$0xff]  ;;  %v9210_v3 = vld [vmem:[%s18664_s1 + $0x248] sm:$0xff]  ;;  %v14079_v52 = vpack.c.bf16 %v9220_v5, %v9219_v4  ;;  %v17128_v5 = vrot.slane %v16939_v22, 1 }
 0x190   : > { %11882 = vmatmul.mubr.f32.gmra.mrb[12].mxu0 %v16517_v23  ;;  %12278 = vmatmul.mubr.f32.gmra.mrb[12].mxu1 %v16836_v9  ;;  %v16867_v23 = vsel %vm514_vm1, %v4845_v51, %v4847_v57  ;;  %v16945_v51 = vld [vmem:[%s15543_s10 + $0x118] sm:$0xff] }
 0x191   : > { %14022 = vmatpush3.bf16.msra.mxu0 %v14019_v14  ;;  %14310 = vmatpush3.bf16.msra.mxu1 %v14019_v14  ;;  %v5016_v14 = vrot.slane %v16818_v35, 7 }
 0x192   : > { %14024 = vmatprep.subr.bf16.mxu0 %v14023_v34  ;;  %14312 = vmatprep.subr.bf16.mxu1 %v14023_v34 }
 0x193   : > { %11884 = vmatprep.mubr.f32.mxu0 %v3411_v38  ;;  %12280 = vmatprep.mubr.f32.mxu1 %v16857_v18  ;;  %v16960_v38 = vrot.slane %v16939_v22, 7 }
 0x194   : > { %11885 = vmatmul.mubr.f32.gmra.mrb[14].mxu0 %v3413_v20  ;;  %12281 = vmatmul.mubr.f32.gmra.mrb[14].mxu1 %v16867_v23  ;;  %v5020_v20 = vrot.slane %v16945_v51, 7 }
 0x195   : > { %14026 = vmatpush3.bf16.msra.mxu0 %v14023_v34  ;;  %14314 = vmatpush3.bf16.msra.mxu1 %v14023_v34  ;;  %v9207_v34 = vld [vmem:[%s18664_s1 + $0x230] sm:$0xff] }
 0x196   : > { %14028 = vmatprep.subr.bf16.mxu0 %v14027_v11  ;;  %14316 = vmatprep.subr.bf16.mxu1 %v14027_v11 }
 0x197   : > { %11919 = vmatprep.mubr.f32.mxu0 %v3572_v2  ;;  %12315 = vmatprep.mubr.f32.mxu1 %v16688_v10  ;;  %v14039_v10 = vpack.c.bf16 %v9200_v28, %v9199_v59  ;;  %v3586_v2 = vsel %vm365_vm0, %v16960_v38, %v16666_v44  ;;  %v14063_v44 = vpack.c.bf16 %v9212_v36, %v9211_v25  ;;  %v9214_v59 = vld [vmem:[%s18664_s1 + $0x268] sm:$0xff] }
 0x199   : > { %14030 = vmatpush3.bf16.msra.mxu0 %v14027_v11  ;;  %14318 = vmatpush3.bf16.msra.mxu1 %v14027_v11  ;;  %v14055_v11 = vpack.c.bf16 %v9208_v8, %v9207_v34  ;;  %v9227_v8 = vld [vmem:[%s18664_s1 + $0x2d0] sm:$0xff] }
 0x19a   : > { %14032 = vmatprep.subr.bf16.mxu0 %v14031_v41  ;;  %14320 = vmatprep.subr.bf16.mxu1 %v14031_v41 }
 0x19d   : > { %14034 = vmatpush3.bf16.msra.mxu0 %v14031_v41  ;;  %14322 = vmatpush3.bf16.msra.mxu1 %v14031_v41  ;;  %v14059_v41 = vpack.c.bf16 %v9210_v3, %v9209_v48  ;;  %v17085_v48 = vpop.permute.xlu0 %1605  ;;  %v9233_v3 = vld [vmem:[%s18664_s1 + $0x300] sm:$0xff] }
 0x19e   : > { %14036 = vmatprep.subr.bf16.mxu0 %v14035_v40  ;;  %14324 = vmatprep.subr.bf16.mxu1 %v14035_v40 }
 0x1a1   : > { %14038 = vmatpush3.bf16.msra.mxu0 %v14035_v40  ;;  %14326 = vmatpush3.bf16.msra.mxu1 %v14035_v40  ;;  %v9213_v40 = vld [vmem:[%s18664_s1 + $0x260] sm:$0xff]  ;;  %v17096_v36 = vpop.permute.xlu0 %1610 }
 0x1a2   : > { %14040 = vmatprep.subr.bf16.mxu0 %v14039_v10  ;;  %14328 = vmatprep.subr.bf16.mxu1 %v14039_v10  ;;  %v14067_v28 = vpack.c.bf16 %v9214_v59, %v9213_v40  ;;  %v9236_v40 = vld [vmem:[%s18664_s1 + $0x318] sm:$0xff]  ;;  %v17105_v59 = vrot.slane %v16906_v58, 1 }
 0x1a4   : > { %v3862_v4 = vsel %vm514_vm1, %v17105_v59, %v16827_v33 }
 0x1a5   : > { %14042 = vmatpush3.bf16.msra.mxu0 %v14039_v10  ;;  %14330 = vmatpush3.bf16.msra.mxu1 %v14039_v10  ;;  %v9215_v10 = vld [vmem:[%s18664_s1 + $0x270] sm:$0xff] }
 0x1a6   : > { %14044 = vmatprep.subr.bf16.mxu0 %v14043_v55  ;;  %14332 = vmatprep.subr.bf16.mxu1 %v14043_v55  ;;  %v14071_v62 = vpack.c.bf16 %v9216_v43, %v9215_v10  ;;  %v9237_v10 = vld [vmem:[%s18664_s1 + $0x320] sm:$0xff]  ;;  %v9238_v43 = vld [vmem:[%s18664_s1 + $0x328] sm:$0xff] }
 0x1a8   : > { %11920 = vmatmul.mubr.f32.vlgmr.msra.gmra.mrb[8].mxu0 %v3574_v19  ;;  %12316 = vmatmul.mubr.f32.vlgmr.msra.gmra.mrb[8].mxu1 %v16700_v63  ;;  %v14051_v63 = vpack.c.bf16 %v9206_v56, %v9205_v13  ;;  %v9221_v19 = vld [vmem:[%s18664_s1 + $0x2a0] sm:$0xff]  ;;  %v9223_v56 = vld [vmem:[%s18664_s1 + $0x2b0] sm:$0xff] }
 0x1a9   : > { %14046 = vmatpush3.bf16.msra.mxu0 %v14043_v55  ;;  %14334 = vmatpush3.bf16.msra.mxu1 %v14043_v55 }
 0x1aa   : > { %14048 = vmatprep.subr.bf16.mxu0 %v14047_v24  ;;  %14336 = vmatprep.subr.bf16.mxu1 %v14047_v24 }
 0x1ab   : > { %11922 = vmatprep.mubr.f32.mxu0 %v3576_v17  ;;  %12318 = vmatprep.mubr.f32.mxu1 %v16704_v54  ;;  %v3582_v54 = vsel %vm365_vm0, %v16617_v16, %v16935_v7  ;;  %v16982_v16 = vsel %vm365_vm0, %v16935_v7, %v16960_v38  ;;  %v9224_v17 = vld [vmem:[%s18664_s1 + $0x2b8] sm:$0xff] }
 0x1ac   : > { %11923 = vmatmul.mubr.f32.gmra.mrb[10].mxu0 %v16932_v1  ;;  %12319 = vmatmul.mubr.f32.gmra.mrb[10].mxu1 %v16722_v21  ;;  %v5017_v21 = vsel %vm365_vm0, %v4700_v46, %v5016_v14  ;;  %v5019_v46 = vsel %vm365_vm0, %v5016_v14, %v16963_v15  ;;  %v9225_v14 = vld [vmem:[%s18664_s1 + $0x2c0] sm:$0xff] }
 0x1ad   : > { %14050 = vmatpush3.bf16.msra.mxu0 %v14047_v24  ;;  %14338 = vmatpush3.bf16.msra.mxu1 %v14047_v24  ;;  %v9222_v24 = vld [vmem:[%s18664_s1 + $0x2a8] sm:$0xff] }
 0x1ae   : > { %14052 = vmatprep.subr.bf16.mxu0 %v14051_v63  ;;  %14340 = vmatprep.subr.bf16.mxu1 %v14051_v63  ;;  %v14083_v13 = vpack.c.bf16 %v9222_v24, %v9221_v19  ;;  %v17134_v19 = vld [vmem:[%s15543_s10 + $0xe0] sm:$0xff] }
 0x1af   : > { %11925 = vmatprep.mubr.f32.mxu0 %v3580_v32  ;;  %12321 = vmatprep.mubr.f32.mxu1 %v16731_v30  ;;  %v16993_v30 = vsel %vm365_vm0, %v16963_v15, %v5020_v20  ;;  %v9230_v32 = vld [vmem:[%s18664_s1 + $0x2e8] sm:$0xff]  ;;  %v17137_v24 = vld [vmem:[%s15543_s10 + $0x120] sm:$0xff] }
 0x1b0   : > { %11926 = vmatmul.mubr.f32.gmra.mrb[12].mxu0 %v3582_v54  ;;  %12322 = vmatmul.mubr.f32.gmra.mrb[12].mxu1 %v5017_v21  ;;  %v9231_v54 = vld [vmem:[%s18664_s1 + $0x2f0] sm:$0xff]  ;;  %v9232_v21 = vld [vmem:[%s18664_s1 + $0x2f8] sm:$0xff] }
 0x1b1   : > { %14054 = vmatpush3.bf16.msra.mxu0 %v14051_v63  ;;  %14342 = vmatpush3.bf16.msra.mxu1 %v14051_v63  ;;  %v9226_v63 = vld [vmem:[%s18664_s1 + $0x2c8] sm:$0xff] }
 0x1b2   : > { %14056 = vmatprep.subr.bf16.mxu0 %v14055_v11  ;;  %14344 = vmatprep.subr.bf16.mxu1 %v14055_v11  ;;  %v14091_v34 = vpack.c.bf16 %v9226_v63, %v9225_v14  ;;  %v17164_v63 = vrot.slane %v17137_v24, 1 }
 0x1b3   : > { %11928 = vmatprep.mubr.f32.mxu0 %v16982_v16  ;;  %12324 = vmatprep.mubr.f32.mxu1 %v5019_v46  ;;  %v9234_v46 = vld [vmem:[%s18664_s1 + $0x308] sm:$0xff] }
 0x1b4   : > { %11929 = vmatmul.mubr.f32.gmra.mrb[14].mxu0 %v3586_v2  ;;  %12325 = vmatmul.mubr.f32.gmra.mrb[14].mxu1 %v16993_v30  ;;  %v3857_v2 = vrot.slane %v16903_v12, 1 }
 0x1b5   : > { %14058 = vmatpush3.bf16.msra.mxu0 %v14055_v11  ;;  %14346 = vmatpush3.bf16.msra.mxu1 %v14055_v11  ;;  %v17083_v11 = vpop.permute.xlu1 %1615 }
 0x1b6   : > { %14060 = vmatprep.subr.bf16.mxu0 %v14059_v41  ;;  %14348 = vmatprep.subr.bf16.mxu1 %v14059_v41 }
 0x1b7   : > { %11963 = vmatprep.mubr.f32.mxu0 %v16840_v29  ;;  %12359 = vmatprep.mubr.f32.mxu1 %v16580_v26  ;;  %v9217_v26 = vld [vmem:[%s18664_s1 + $0x280] sm:$0xff] }
 0x1b8   : > { %v14075_v55 = vpack.c.bf16 %v9218_v45, %v9217_v26  ;;  %v17117_v26 = vpop.permute.xlu0 %1625  ;;  %v3860_v45 = vsel %vm514_vm1, %v3857_v2, %v17105_v59 }
 0x1b9   : > { %14062 = vmatpush3.bf16.msra.mxu0 %v14059_v41  ;;  %14350 = vmatpush3.bf16.msra.mxu1 %v14059_v41  ;;  %v14107_v41 = vpack.c.bf16 %v9234_v46, %v9233_v3  ;;  %v17094_v25 = vpop.permute.xlu1 %1620 }
 0x1ba   : > { %14064 = vmatprep.subr.bf16.mxu0 %v14063_v44  ;;  %14352 = vmatprep.subr.bf16.mxu1 %v14063_v44 }
 0x1bd   : > { %14066 = vmatpush3.bf16.msra.mxu0 %v14063_v44  ;;  %14354 = vmatpush3.bf16.msra.mxu1 %v14063_v44  ;;  %v9235_v44 = vld [vmem:[%s18664_s1 + $0x310] sm:$0xff] }
 0x1be   : > { %14068 = vmatprep.subr.bf16.mxu0 %v14067_v28  ;;  %14356 = vmatprep.subr.bf16.mxu1 %v14067_v28 }
 0x1c1   : > { %14070 = vmatpush3.bf16.msra.mxu0 %v14067_v28  ;;  %14358 = vmatpush3.bf16.msra.mxu1 %v14067_v28  ;;  %v14111_v28 = vpack.c.bf16 %v9236_v40, %v9235_v44  ;;  %v17223_v44 = vld [vmem:[%s18665_s2] ss:$0 sm:$0xff] }
 0x1c2   : > { %14072 = vmatprep.subr.bf16.mxu0 %v14071_v62  ;;  %14360 = vmatprep.subr.bf16.mxu1 %v14071_v62 }
 0x1c5   : > { %14074 = vmatpush3.bf16.msra.mxu0 %v14071_v62  ;;  %14362 = vmatpush3.bf16.msra.mxu1 %v14071_v62  ;;  %v17115_v62 = vpop.permute.xlu1 %1630 }
 0x1c6   : > { %14076 = vmatprep.subr.bf16.mxu0 %v14075_v55  ;;  %14364 = vmatprep.subr.bf16.mxu1 %v14075_v55 }
 0x1c8   : > { %11964 = vmatmul.mubr.f32.vlgmr.msra.gmra.mrb[8].mxu0 %v16893_v61  ;;  %12360 = vmatmul.mubr.f32.vlgmr.msra.gmra.mrb[8].mxu1 %v16593_v0  ;;  %v14087_v0 = vpack.c.bf16 %v9224_v17, %v9223_v56  ;;  %v9240_v56 = vld [vmem:[%s18664_s1 + $0x338] sm:$0xff] }
 0x1c9   : > { %14078 = vmatpush3.bf16.msra.mxu0 %v14075_v55  ;;  %14366 = vmatpush3.bf16.msra.mxu1 %v14075_v55  ;;  %v17122_v55 = vrot.slane %v16920_v37, 1 }
 0x1ca   : > { %14080 = vmatprep.subr.bf16.mxu0 %v14079_v52  ;;  %14368 = vmatprep.subr.bf16.mxu1 %v14079_v52 }
 0x1cb   : > { %11966 = vmatprep.mubr.f32.mxu0 %v16903_v12  ;;  %12362 = vmatprep.mubr.f32.mxu1 %v16596_v31  ;;  %v3854_v31 = vrot.slane %v16840_v29, 1  ;;  %v3864_v17 = vsel %vm514_vm1, %v16827_v33, %v17122_v55  ;;  %v17154_v14 = vsel %vm514_vm1, %v17122_v55, %v17128_v5  ;;  %v17167_v33 = vld [vmem:[%s15543_s10 + $0xf0] sm:$0xff] }
 0x1cc   : > { %11967 = vmatmul.mubr.f32.gmra.mrb[10].mxu0 %v16906_v58  ;;  %12363 = vmatmul.mubr.f32.gmra.mrb[10].mxu1 %v16614_v50  ;;  %v3855_v50 = vrot.slane %v16893_v61, 1  ;;  %v9229_v61 = vld [vmem:[%s18664_s1 + $0x2e0] sm:$0xff] }
 0x1cd   : > { %14082 = vmatpush3.bf16.msra.mxu0 %v14079_v52  ;;  %14370 = vmatpush3.bf16.msra.mxu1 %v14079_v52  ;;  %v14115_v52 = vpack.c.bf16 %v9238_v43, %v9237_v10 }
 0x1ce   : > { %14084 = vmatprep.subr.bf16.mxu0 %v14083_v13  ;;  %14372 = vmatprep.subr.bf16.mxu1 %v14083_v13  ;;  %v3858_v12 = vsel %vm514_vm1, %v3855_v50, %v3857_v2  ;;  %v9245_v2 = vld [vmem:[%s18664_s1 + $0x360] sm:$0xff] }
 0x1cf   : > { %11969 = vmatprep.mubr.f32.mxu0 %v16599_v27  ;;  %12365 = vmatprep.mubr.f32.mxu1 %v16620_v39  ;;  %v9228_v27 = vld [vmem:[%s18664_s1 + $0x2d8] sm:$0xff]  ;;  %v3856_v39 = vsel %vm514_vm1, %v3854_v31, %v3855_v50 }
 0x1d0   : > { %11970 = vmatmul.mubr.f32.gmra.mrb[12].mxu0 %v16920_v37  ;;  %12366 = vmatmul.mubr.f32.gmra.mrb[12].mxu1 %v16818_v35  ;;  %v14095_v29 = vpack.c.bf16 %v9228_v27, %v9227_v8  ;;  %v17170_v31 = vld [vmem:[%s15543_s10 + $0xf8] sm:$0xff]  ;;  %v17174_v8 = vpop.permute.xlu0 %1635  ;;  %v9241_v35 = vld [vmem:[%s18664_s1 + $0x340] sm:$0xff]  ;;  %v3868_v27 = vsel %vm514_vm1, %v17128_v5, %v16785_v47 }
 0x1d1   : > { %14086 = vmatpush3.bf16.msra.mxu0 %v14083_v13  ;;  %14374 = vmatpush3.bf16.msra.mxu1 %v14083_v13  ;;  %v9239_v13 = vld [vmem:[%s18664_s1 + $0x330] sm:$0xff] }
 0x1d2   : > { %14088 = vmatprep.subr.bf16.mxu0 %v14087_v0  ;;  %14376 = vmatprep.subr.bf16.mxu1 %v14087_v0  ;;  %v14119_v50 = vpack.c.bf16 %v9240_v56, %v9239_v13 }
 0x1d3   : > { %11972 = vmatprep.mubr.f32.mxu0 %v16939_v22  ;;  %12368 = vmatprep.mubr.f32.mxu1 %v16942_v42 }
 0x1d4   : > { %11973 = vmatmul.mubr.f32.gmra.mrb[14].mxu0 %v16577_v53  ;;  %12369 = vmatmul.mubr.f32.gmra.mrb[14].mxu1 %v16945_v51  ;;  %v14099_v53 = vpack.c.bf16 %v9230_v32, %v9229_v61  ;;  %v5463_v61 = vrot.slane %v17170_v31, 7 }
 0x1d5   : > { %14090 = vmatpush3.bf16.msra.mxu0 %v14087_v0  ;;  %14378 = vmatpush3.bf16.msra.mxu1 %v14087_v0  ;;  %v5302_v0 = vrot.slane %v16945_v51, 1 }
 0x1d6   : > { %14092 = vmatprep.subr.bf16.mxu0 %v14091_v34  ;;  %14380 = vmatprep.subr.bf16.mxu1 %v14091_v34 }
 0x1d7   : > { %12007 = vmatprep.mubr.f32.mxu0 %v3856_v39  ;;  %12403 = vmatprep.mubr.f32.mxu1 %v16815_v60  ;;  %v14103_v60 = vpack.c.bf16 %v9232_v21, %v9231_v54  ;;  %v17198_v32 = vsel %vm514_vm1, %v5302_v0, %v17164_v63  ;;  %v9243_v54 = vld [vmem:[%s18664_s1 + $0x350] sm:$0xff]  ;;  %v9244_v21 = vld [vmem:[%s18664_s1 + $0x358] sm:$0xff] }
 0x1d8   : > { %v14127_v46 = vpack.c.bf16 %v9244_v21, %v9243_v54 }
 0x1d9   : > { %14094 = vmatpush3.bf16.msra.mxu0 %v14091_v34  ;;  %14382 = vmatpush3.bf16.msra.mxu1 %v14091_v34  ;;  %v17172_v34 = vpop.permute.xlu1 %1640 }
 0x1da   : > { %14096 = vmatprep.subr.bf16.mxu0 %v14095_v29  ;;  %14384 = vmatprep.subr.bf16.mxu1 %v14095_v29 }
 0x1dd   : > { %14098 = vmatpush3.bf16.msra.mxu0 %v14095_v29  ;;  %14386 = vmatpush3.bf16.msra.mxu1 %v14095_v29  ;;  %v18668_v29 = vrot.slane %v17167_v33, 7 }
 0x1de   : > { %14100 = vmatprep.subr.bf16.mxu0 %v14099_v53  ;;  %14388 = vmatprep.subr.bf16.mxu1 %v14099_v53 }
 0x1df   : > { %v5464_v3 = vsel %vm365_vm0, %v18668_v29, %v5463_v61 }
 0x1e1   : > { %14102 = vmatpush3.bf16.msra.mxu0 %v14099_v53  ;;  %14390 = vmatpush3.bf16.msra.mxu1 %v14099_v53 }
 0x1e2   : > { %14104 = vmatprep.subr.bf16.mxu0 %v14103_v60  ;;  %14392 = vmatprep.subr.bf16.mxu1 %v14103_v60 }
 0x1e5   : > { %14106 = vmatpush3.bf16.msra.mxu0 %v14103_v60  ;;  %14394 = vmatpush3.bf16.msra.mxu1 %v14103_v60  ;;  %v3046_v60 = vpop.permute.xlu1 %3045 }
 0x1e6   : > { %14108 = vmatprep.subr.bf16.mxu0 %v14107_v41  ;;  %14396 = vmatprep.subr.bf16.mxu1 %v14107_v41 }
 0x1e8   : > { %12008 = vmatmul.mubr.f32.vlgmr.msra.gmra.mrb[8].mxu0 %v3858_v12  ;;  %12404 = vmatmul.mubr.f32.vlgmr.msra.gmra.mrb[8].mxu1 %v16833_v6  ;;  %v17131_v6 = vrot.slane %v16942_v42, 1 }
 0x1e9   : > { %14110 = vmatpush3.bf16.msra.mxu0 %v14107_v41  ;;  %14398 = vmatpush3.bf16.msra.mxu1 %v14107_v41  ;;  %v9246_v41 = vld [vmem:[%s18664_s1 + $0x368] sm:$0xff]  ;;  %v17225_v12 = vpop.permute.xlu1 %3055 }
 0x1ea   : > { %14112 = vmatprep.subr.bf16.mxu0 %v14111_v28  ;;  %14400 = vmatprep.subr.bf16.mxu1 %v14111_v28  ;;  %v17189_v39 = vsel %vm514_vm1, %v17131_v6, %v5302_v0  ;;  %v14131_v40 = vpack.c.bf16 %v9246_v41, %v9245_v2  ;;  %v17241_v0 = vld [vmem:[%s15543_s10 + $0x100] sm:$0xff] }
 0x1eb   : > { %12010 = vmatprep.mubr.f32.mxu0 %v3860_v45  ;;  %12406 = vmatprep.mubr.f32.mxu1 %v16836_v9  ;;  %v5301_v9 = vsel %vm514_vm1, %v4847_v57, %v17131_v6  ;;  %v9242_v57 = vld [vmem:[%s18664_s1 + $0x348] sm:$0xff]  ;;  %v9248_v45 = vld [vmem:[%s18664_s1 + $0x378] sm:$0xff]  ;;  %v5465_v41 = vrot.slane %v17241_v0, 7 }
 0x1ec   : > { %12011 = vmatmul.mubr.f32.gmra.mrb[10].mxu0 %v3862_v4  ;;  %12407 = vmatmul.mubr.f32.gmra.mrb[10].mxu1 %v16857_v18  ;;  %v17161_v18 = vrot.slane %v17134_v19, 1  ;;  %v14123_v53 = vpack.c.bf16 %v9242_v57, %v9241_v35  ;;  %v17236_v4 = vld [vmem:[%s15543_s10 + $0xc0] sm:$0xff] }
 0x1ed   : > { %14114 = vmatpush3.bf16.msra.mxu0 %v14111_v28  ;;  %14402 = vmatpush3.bf16.msra.mxu1 %v14111_v28 }
 0x1ee   : > { %14116 = vmatprep.subr.bf16.mxu0 %v14115_v52  ;;  %14404 = vmatprep.subr.bf16.mxu1 %v14115_v52 }
 0x1ef   : > { %12013 = vmatprep.mubr.f32.mxu0 %v3864_v17  ;;  %12409 = vmatprep.mubr.f32.mxu1 %v16867_v23  ;;  %v3870_v23 = vsel %vm514_vm1, %v16785_v47, %v17161_v18  ;;  %v3041_v47 = vpop.permute.xlu0 %3040 }
 0x1f0   : > { %12014 = vmatmul.mubr.f32.gmra.mrb[12].mxu0 %v17154_v14  ;;  %12410 = vmatmul.mubr.f32.gmra.mrb[12].mxu1 %v5301_v9 }
 0x1f1   : > { %14118 = vmatpush3.bf16.msra.mxu0 %v14115_v52  ;;  %14406 = vmatpush3.bf16.msra.mxu1 %v14115_v52 }
 0x1f2   : > { %14120 = vmatprep.subr.bf16.mxu0 %v14119_v50  ;;  %14408 = vmatprep.subr.bf16.mxu1 %v14119_v50 }
 0x1f3   : > { %12016 = vmatprep.mubr.f32.mxu0 %v3868_v27  ;;  %12412 = vmatprep.mubr.f32.mxu1 %v17189_v39  ;;  %v17227_v28 = vpop.permute.xlu0 %3050 }
 0x1f4   : > { %12017 = vmatmul.mubr.f32.gmra.mrb[14].mxu0 %v3870_v23  ;;  %12413 = vmatmul.mubr.f32.gmra.mrb[14].mxu1 %v17198_v32  ;;  %v9249_v23 = vld [vmem:[%s18664_s1 + $0x380] sm:$0xff] }
 0x1f5   : > { %14122 = vmatpush3.bf16.msra.mxu0 %v14119_v50  ;;  %14410 = vmatpush3.bf16.msra.mxu1 %v14119_v50 }
 0x1f6   : > { %14124 = vmatprep.subr.bf16.mxu0 %v14123_v53  ;;  %14412 = vmatprep.subr.bf16.mxu1 %v14123_v53 }
 0x1f7   : > { %12051 = vmatprep.mubr.f32.mxu0 %v16932_v1  ;;  %12447 = vmatprep.mubr.f32.mxu1 %v5464_v3  ;;  %v9247_v1 = vld [vmem:[%s18664_s1 + $0x370] sm:$0xff] }
 0x1f8   : > { %v14135_v27 = vpack.c.bf16 %v9248_v45, %v9247_v1 }
 0x1f9   : > { %14126 = vmatpush3.bf16.msra.mxu0 %v14123_v53  ;;  %14414 = vmatpush3.bf16.msra.mxu1 %v14123_v53  ;;  %v4030_v53 = vrot.slane %v17236_v4, 7 }
 0x1fa   : > { %14128 = vmatprep.subr.bf16.mxu0 %v14127_v46  ;;  %14416 = vmatprep.subr.bf16.mxu1 %v14127_v46 }
 0x1fb   : > { %v11349_v10 = vpop.f32.mrb[0].mxu0  ;;  %v11745_v43 = vpop.f32.mrb[0].mxu1 }
 0x1fc   : > { %v1580_v52 = vadd.f32 %v11349_v10, %v17223_v44  ;;  %v3015_v13 = vadd.f32 %v11745_v43, %v17223_v44  ;;  %v1526_v56 = vpop.f32.mrb[1].mxu0  ;;  %v2967_v17 = vpop.f32.mrb[1].mxu1 }
 0x1fd   : > { %v1579_v9 = vadd.f32 %v17223_v44, %v1526_v56  ;;  %v3014_v50 = vadd.f32 %v17223_v44, %v2967_v17  ;;  %14130 = vmatpush3.bf16.msra.mxu0 %v14127_v46  ;;  %14418 = vmatpush3.bf16.msra.mxu1 %v14127_v46  ;;  %v9250_v46 = vld [vmem:[%s18664_s1 + $0x388] sm:$0xff] }
 0x1fe   : > { %v1588_v35 = vmax.f32 %v1580_v52, 0.0  ;;  %v3023_v57 = vmax.f32 %v3015_v13, 0.0  ;;  %14132 = vmatprep.subr.bf16.mxu0 %v14131_v40  ;;  %14420 = vmatprep.subr.bf16.mxu1 %v14131_v40  ;;  %v17257_v56 = vld [vmem:[%s15543_s10 + $0x108] sm:$0xff] }
 0x1ff   : > { %v1587_v54 = vmax.f32 %v1579_v9, 0.0  ;;  %v3022_v21 = vmax.f32 %v3014_v50, 0.0  ;;  %v11352_v3 = vpop.f32.mrb[2].mxu0  ;;  %v11748_v2 = vpop.f32.mrb[2].mxu1 }
 0x200   : > { %v1644_v10 = vmul.f32 %v17096_v36, %v1588_v35  ;;  %v3079_v43 = vmul.f32 %v3046_v60, %v3023_v57  ;;  %v1582_v1 = vadd.f32 %v11352_v3, %v17223_v44  ;;  %v3017_v45 = vadd.f32 %v11748_v2, %v17223_v44  ;;  %v1536_v52 = vpop.f32.mrb[3].mxu0  ;;  %v2977_v13 = vpop.f32.mrb[3].mxu1 }
 0x201   : > { %v1643_v17 = vmul.f32 %v17085_v48, %v1587_v54  ;;  %v3078_v9 = vmul.f32 %v3041_v47, %v3022_v21  ;;  %v1581_v50 = vadd.f32 %v17223_v44, %v1536_v52  ;;  %v3016_v29 = vadd.f32 %v17223_v44, %v2977_v13  ;;  %14134 = vmatpush3.bf16.msra.mxu0 %v14131_v40  ;;  %v3066_v35 = vpop.permute.xlu1 %3065  ;;  %v3061_v57 = vpop.permute.xlu0 %3060  ;;  %v9251_v47 = vld [vmem:[%s18664_s1 + $0x390] sm:$0xff] }
 0x202   : > { %1652 = vst [vmem:[%s16760_s13 + $0x28] sm:$0xff] %v1644_v10  ;;  %3087 = vst [vmem:[%s16760_s13 + $0x68] sm:$0xff] %v3079_v43  ;;  %v1590_v36 = vmax.f32 %v1582_v1, 0.0  ;;  %v3025_v60 = vmax.f32 %v3017_v45, 0.0  ;;  %14422 = vmatpush3.bf16.msra.mxu1 %v14131_v40  ;;  %14136 = vmatprep.subr.bf16.mxu0 %v14135_v27  ;;  %v17264_v3 = vpack.c.bf16 %v9250_v46, %v9249_v23  ;;  %v17282_v23 = vrot.slane %v17257_v56, 7 }
 0x203   : > { %v4031_v48 = vsel %vm365_vm0, %v16917_v49, %v4030_v53  ;;  %1651 = vst [vmem:[%s16760_s13 + $0x20] sm:$0xff] %v1643_v17  ;;  %3086 = vst [vmem:[%s16760_s13 + $0x60] sm:$0xff] %v3078_v9  ;;  %v1589_v54 = vmax.f32 %v1581_v50, 0.0  ;;  %v3024_v21 = vmax.f32 %v3016_v29, 0.0  ;;  %v11355_v2 = vpop.f32.mrb[4].mxu0  ;;  %v11751_v10 = vpop.f32.mrb[4].mxu1  ;;  %14424 = vmatprep.subr.bf16.mxu1 %v14135_v27  ;;  %v5466_v40 = vsel %vm365_vm0, %v5463_v61, %v5465_v41 }
 0x204   : > { %v9252_v49 = vld [vmem:[%s18664_s1 + $0x398] sm:$0xff]  ;;  %v1646_v29 = vmul.f32 %v17094_v25, %v1590_v36  ;;  %v3081_v46 = vmul.f32 %v17225_v12, %v3025_v60  ;;  %v1584_v43 = vadd.f32 %v11355_v2, %v17223_v44  ;;  %v3019_v1 = vadd.f32 %v11751_v10, %v17223_v44  ;;  %v1546_v45 = vpop.f32.mrb[5].mxu0  ;;  %v2987_v52 = vpop.f32.mrb[5].mxu1 }
 0x205   : > { %v17289_v61 = vld [vmem:[%s15543_s10 + $0xd8] sm:$0xff]  ;;  %v1645_v13 = vmul.f32 %v17083_v11, %v1589_v54  ;;  %v3080_v17 = vmul.f32 %v17227_v28, %v3024_v21  ;;  %v1583_v9 = vadd.f32 %v17223_v44, %v1546_v45  ;;  %v3018_v25 = vadd.f32 %v17223_v44, %v2987_v52  ;;  %14138 = vmatpush3.bf16.msra.mxu0 %v14135_v27  ;;  %v9253_v11 = vld [vmem:[%s18664_s1 + $0x3a0] sm:$0xff] }
 0x206   : > { %1654 = vst [vmem:[%s16760_s13 + $0x38] sm:$0xff] %v1646_v29  ;;  %3089 = vst [vmem:[%s16760_s13 + $0x78] sm:$0xff] %v3081_v46  ;;  %v1592_v12 = vmax.f32 %v1584_v43, 0.0  ;;  %v3027_v50 = vmax.f32 %v3019_v1, 0.0  ;;  %14426 = vmatpush3.bf16.msra.mxu1 %v14135_v27  ;;  %14140 = vmatprep.subr.bf16.mxu0 %v17264_v3  ;;  %v17298_v36 = vpack.c.bf16 %v9252_v49, %v9251_v47  ;;  %v9254_v27 = vld [vmem:[%s18664_s1 + $0x3a8] sm:$0xff] }
 0x207   : > { %v4033_v28 = vsel %vm365_vm0, %v4030_v53, %v16935_v7  ;;  %1653 = vst [vmem:[%s16760_s13 + $0x30] sm:$0xff] %v1645_v13  ;;  %3088 = vst [vmem:[%s16760_s13 + $0x70] sm:$0xff] %v3080_v17  ;;  %v1591_v60 = vmax.f32 %v1583_v9, 0.0  ;;  %v3026_v54 = vmax.f32 %v3018_v25, 0.0  ;;  %v11358_v21 = vpop.f32.mrb[6].mxu0  ;;  %v11754_v2 = vpop.f32.mrb[6].mxu1  ;;  %14428 = vmatprep.subr.bf16.mxu1 %v17264_v3  ;;  %v17315_v47 = vsel %vm365_vm0, %v5465_v41, %v17282_v23 }
 0x208   : > { %v4036_v7 = vrot.slane %v17289_v61, 7  ;;  %v1648_v53 = vmul.f32 %v17115_v62, %v1592_v12  ;;  %v3083_v10 = vmul.f32 %v3066_v35, %v3027_v50  ;;  %v1586_v49 = vadd.f32 %v11358_v21, %v17223_v44  ;;  %v1556_v46 = vpop.f32.mrb[7].mxu0  ;;  %v2997_v43 = vpop.f32.mrb[7].mxu1  ;;  %12052 = vmatmul.mubr.f32.vlgmr.msra.gmra.mrb[8].mxu0 %v4031_v48  ;;  %v17326_v35 = vld [vmem:[%s15543_s10 + $0xe8] sm:$0xff]  ;;  %v9256_v25 = vld [vmem:[%s18664_s1 + $0x3b8] sm:$0xff] }
 0x209   : > { %v3021_v29 = vadd.f32 %v11754_v2, %v17223_v44  ;;  %v1647_v1 = vmul.f32 %v17117_v26, %v1591_v60  ;;  %v3082_v41 = vmul.f32 %v3061_v57, %v3026_v54  ;;  %v1585_v45 = vadd.f32 %v17223_v44, %v1556_v46  ;;  %14142 = vmatpush3.bf16.msra.mxu0 %v17264_v3  ;;  %v3076_v62 = vpop.permute.xlu1 %3075  ;;  %v3071_v48 = vpop.permute.xlu0 %3070  ;;  %v17342_v12 = vld [vmem:[%s15543_s10 + $0x128] sm:$0xff] }
 0x20a   : > { %v3020_v52 = vadd.f32 %v17223_v44, %v2997_v43  ;;  %1656 = vst [vmem:[%s16760_s13 + $0x48] sm:$0xff] %v1648_v53  ;;  %3091 = vst [vmem:[%s16760_s13 + $0x88] sm:$0xff] %v3083_v10  ;;  %v1594_v13 = vmax.f32 %v1586_v49, 0.0  ;;  %12448 = vmatmul.mubr.f32.vlgmr.msra.gmra.mrb[8].mxu1 %v5466_v40  ;;  %14144 = vmatprep.subr.bf16.mxu0 %v17298_v36  ;;  %v14147_v26 = vpack.c.bf16 %v9254_v27, %v9253_v11  ;;  %v9255_v44 = vld [vmem:[%s18664_s1 + $0x3b0] sm:$0xff] }
 0x20b   : > { %v3029_v17 = vmax.f32 %v3021_v29, 0.0  ;;  %1655 = vst [vmem:[%s16760_s13 + $0x40] sm:$0xff] %v1647_v1  ;;  %3090 = vst [vmem:[%s16760_s13 + $0x80] sm:$0xff] %v3082_v41  ;;  %v1593_v57 = vmax.f32 %v1585_v45, 0.0  ;;  %14430 = vmatpush3.bf16.msra.mxu1 %v17264_v3  ;;  %12054 = vmatprep.mubr.f32.mxu0 %v4033_v28  ;;  %v4038_v40 = vrot.slane %v17134_v19, 7  ;;  %v4037_v3 = vsel %vm365_vm0, %v16960_v38, %v4036_v7  ;;  %v17363_v27 = vld [vmem:[%s15543_s10 + $0x130] sm:$0xff] }
 0x20c   : > { %v3028_v9 = vmax.f32 %v3020_v52, 0.0  ;;  %v1650_v50 = vmul.f32 %v17172_v34, %v1594_v13  ;;  %14432 = vmatprep.subr.bf16.mxu1 %v17298_v36  ;;  %12450 = vmatprep.mubr.f32.mxu1 %v17315_v47  ;;  %v4040_v60 = vrot.slane %v17326_v35, 7  ;;  %v5470_v34 = vsel %vm365_vm0, %v17282_v23, %v16963_v15  ;;  %v9257_v15 = vld [vmem:[%s18664_s1 + $0x3c0] sm:$0xff]  ;;  %v9259_v29 = vld [vmem:[%s18664_s1 + $0x3d0] sm:$0xff]  ;;  %v9262_v45 = vld [vmem:[%s18664_s1 + $0x3e8] sm:$0xff] }
 0x20d   : > { %v3085_v11 = vmul.f32 %v3076_v62, %v3029_v17  ;;  %v1649_v28 = vmul.f32 %v17174_v8, %v1593_v57  ;;  %14146 = vmatpush3.bf16.msra.mxu0 %v17298_v36  ;;  %v17356_v21 = vrot.slane %v17137_v24, 7  ;;  %v14151_v2 = vpack.c.bf16 %v9256_v25, %v9255_v44  ;;  %v9258_v8 = vld [vmem:[%s18664_s1 + $0x3c8] sm:$0xff]  ;;  %v9261_v41 = vld [vmem:[%s18664_s1 + $0x3e0] sm:$0xff]  ;;  %v9264_v17 = vld [vmem:[%s18664_s1 + $0x3f8] sm:$0xff] }
 0x20e   : > { %v3084_v54 = vmul.f32 %v3071_v48, %v3028_v9  ;;  %1658 = vst [vmem:[%s16760_s13 + $0x58] sm:$0xff] %v1650_v50  ;;  %14148 = vmatprep.subr.bf16.mxu0 %v14147_v26  ;;  %12055 = vmatmul.mubr.f32.gmra.mrb[10].mxu0 %v16982_v16  ;;  %v5475_v38 = vrot.slane %v17342_v12, 7  ;;  %v4039_v53 = vsel %vm365_vm0, %v4036_v7, %v4038_v40  ;;  %v5477_v10 = vrot.slane %v17363_v27, 7  ;;  %v4466_v52 = vld [vmem:[%s18666_s3 + $0x88] sm:$0xff]  ;;  %v4465_v62 = vld [vmem:[%s18666_s3 + $0x80] sm:$0xff]  ;;  %v4468_v48 = vld [vmem:[%s18666_s3 + $0x98] sm:$0xff] }
 0x20f   : > { %3093 = vst [vmem:[%s16760_s13 + $0x98] sm:$0xff] %v3085_v11  ;;  %1657 = vst [vmem:[%s16760_s13 + $0x50] sm:$0xff] %v1649_v28  ;;  %14434 = vmatpush3.bf16.msra.mxu1 %v17298_v36  ;;  %12057 = vmatprep.mubr.f32.mxu0 %v4037_v3  ;;  %v4041_v16 = vsel %vm365_vm0, %v4038_v40, %v4040_v60  ;;  %v5474_v36 = vsel %vm365_vm0, %v5020_v20, %v17356_v21  ;;  %v18669_v20 = vrot.slane %v17167_v33, 7  ;;  %v9265_v9 = vld [vmem:[%s18664_s1 + $0x400] sm:$0xff]  ;;  %v9266_v44 = vld [vmem:[%s18664_s1 + $0x408] sm:$0xff] }
 0x210   : > { %3092 = vst [vmem:[%s16760_s13 + $0x90] sm:$0xff] %v3084_v54  ;;  %14436 = vmatprep.subr.bf16.mxu1 %v14147_v26  ;;  %12451 = vmatmul.mubr.f32.gmra.mrb[10].mxu1 %v5470_v34  ;;  %v14155_v49 = vpack.c.bf16 %v9258_v8, %v9257_v15  ;;  %v17384_v7 = vsel %vm365_vm0, %v17356_v21, %v5475_v38  ;;  %v4470_v25 = vld [vmem:[%s18666_s3 + $0xa8] sm:$0xff]  ;;  %v4469_v40 = vld [vmem:[%s18666_s3 + $0xa0] sm:$0xff]  ;;  %v9267_v11 = vld [vmem:[%s18664_s1 + $0x410] sm:$0xff] }
 0x211   : > { %14150 = vmatpush3.bf16.msra.mxu0 %v14147_v26  ;;  %12453 = vmatprep.mubr.f32.mxu1 %v16993_v30  ;;  %v9260_v30 = vld [vmem:[%s18664_s1 + $0x3d8] sm:$0xff]  ;;  %v4043_v46 = vsel %vm365_vm0, %v4040_v60, %v18669_v20  ;;  %v17399_v43 = vsel %vm365_vm0, %v5475_v38, %v5477_v10  ;;  %v14163_v13 = vpack.c.bf16 %v9262_v45, %v9261_v41  ;;  %v4471_v28 = vld [vmem:[%s18666_s3 + $0xb0] sm:$0xff]  ;;  %v9269_v34 = vld [vmem:[%s18664_s1 + $0x420] sm:$0xff] }
 0x212   : > { %14152 = vmatprep.subr.bf16.mxu0 %v14151_v2  ;;  %12058 = vmatmul.mubr.f32.gmra.mrb[12].mxu0 %v4039_v53  ;;  %v14159_v1 = vpack.c.bf16 %v9260_v30, %v9259_v29  ;;  %v14171_v50 = vpack.c.bf16 %v9266_v44, %v9265_v9  ;;  %v9268_v3 = vld [vmem:[%s18664_s1 + $0x418] sm:$0xff]  ;;  %v9271_v15 = vld [vmem:[%s18664_s1 + $0x430] sm:$0xff]  ;;  %v4312_v53 = vrot.slane %v17236_v4, 1  ;;  %v5901_v30 = vld [vmem:[%s18666_s3 + $0xc8] sm:$0xff] }
 0x213   : > { %14438 = vmatpush3.bf16.msra.mxu1 %v14147_v26  ;;  %12060 = vmatprep.mubr.f32.mxu0 %v4041_v16  ;;  %v4467_v26 = vld [vmem:[%s18666_s3 + $0x90] sm:$0xff]  ;;  %v4472_v60 = vld [vmem:[%s18666_s3 + $0xb8] sm:$0xff]  ;;  %v14175_v54 = vpack.c.bf16 %v9268_v3, %v9267_v11  ;;  %v9273_v16 = vld [vmem:[%s18664_s1 + $0x440] sm:$0xff] }
 0x214   : > { %14440 = vmatprep.subr.bf16.mxu1 %v14151_v2  ;;  %12454 = vmatmul.mubr.f32.gmra.mrb[12].mxu1 %v5474_v36  ;;  %v9272_v8 = vld [vmem:[%s18664_s1 + $0x438] sm:$0xff]  ;;  %v9274_v36 = vld [vmem:[%s18664_s1 + $0x448] sm:$0xff]  ;;  %v4313_v29 = vsel %vm514_vm1, %v17105_v59, %v4312_v53  ;;  %v9411_v11 = vld [vmem:[%s18664_s1 + $0x90] sm:$0xff] }
 0x215   : > { %14154 = vmatpush3.bf16.msra.mxu0 %v14151_v2  ;;  %12456 = vmatprep.mubr.f32.mxu1 %v17384_v7  ;;  %v9278_v41 = vld [vmem:[%s18664_s1 + $0x468] sm:$0xff]  ;;  %v5903_v45 = vld [vmem:[%s18666_s3 + $0xd8] sm:$0xff] }
 0x216   : > { %14156 = vmatprep.subr.bf16.mxu0 %v14155_v49  ;;  %12061 = vmatmul.mubr.f32.gmra.mrb[14].mxu0 %v4043_v46  ;;  %v5900_v46 = vld [vmem:[%s18666_s3 + $0xc0] sm:$0xff]  ;;  %v9410_v9 = vld [vmem:[%s18664_s1 + $0x88] sm:$0xff]  ;;  %v5907_v44 = vld [vmem:[%s18666_s3 + $0xf8] sm:$0xff] }
 0x217   : > { %14442 = vmatpush3.bf16.msra.mxu1 %v14151_v2  ;;  %12095 = vmatprep.mubr.f32.mxu0 %v16906_v58  ;;  %v9263_v58 = vld [vmem:[%s18664_s1 + $0x3f0] sm:$0xff]  ;;  %v9270_v2 = vld [vmem:[%s18664_s1 + $0x428] sm:$0xff]  ;;  %v9412_v3 = vld [vmem:[%s18664_s1 + $0x98] sm:$0xff] }
 0x218   : > { %14444 = vmatprep.subr.bf16.mxu1 %v14155_v49  ;;  %12457 = vmatmul.mubr.f32.gmra.mrb[14].mxu1 %v17399_v43  ;;  %v14167_v57 = vpack.c.bf16 %v9264_v17, %v9263_v58  ;;  %v14179_v38 = vpack.c.bf16 %v9270_v2, %v9269_v34  ;;  %v9280_v58 = vld [vmem:[%s18664_s1 + $0x478] sm:$0xff]  ;;  %v5905_v17 = vld [vmem:[%s18666_s3 + $0xe8] sm:$0xff]  ;;  %v9413_v2 = vld [vmem:[%s18664_s1 + $0xa0] sm:$0xff] }
 0x219   : > { %14158 = vmatpush3.bf16.msra.mxu0 %v14155_v49  ;;  %12491 = vmatprep.mubr.f32.mxu1 %v17170_v31 }
 0x21a   : > { %14160 = vmatprep.subr.bf16.mxu0 %v14159_v1  ;;  %4480 = vperm.xlu1 %15463, %v4466_v52  }
 0x21b   : > { %14446 = vmatpush3.bf16.msra.mxu1 %v14155_v49  ;;  %4475 = vperm.xlu0 %15462, %v4465_v62   ;;  %v14187_v49 = vpack.c.bf16 %v9274_v36, %v9273_v16  ;;  %v5902_v62 = vld [vmem:[%s18666_s3 + $0xd0] sm:$0xff] }
 0x21c   : > { %14448 = vmatprep.subr.bf16.mxu1 %v14159_v1 }
 0x21d   : > { %14162 = vmatpush3.bf16.msra.mxu0 %v14159_v1 }
 0x21e   : > { %14164 = vmatprep.subr.bf16.mxu0 %v14163_v13  ;;  %4490 = vperm.xlu1 %15463, %v4468_v48  }
 0x21f   : > { %14450 = vmatpush3.bf16.msra.mxu1 %v14159_v1  ;;  %4485 = vperm.xlu0 %15462, %v4467_v26   ;;  %v9277_v1 = vld [vmem:[%s18664_s1 + $0x460] sm:$0xff] }
 0x220   : > { %14452 = vmatprep.subr.bf16.mxu1 %v14163_v13  ;;  %v14195_v52 = vpack.c.bf16 %v9278_v41, %v9277_v1  ;;  %v5904_v26 = vld [vmem:[%s18666_s3 + $0xe0] sm:$0xff]  ;;  %v9424_v1 = vld [vmem:[%s18664_s1 + $0xf8] sm:$0xff] }
 0x221   : > { %14166 = vmatpush3.bf16.msra.mxu0 %v14163_v13 }
 0x222   : > { %14168 = vmatprep.subr.bf16.mxu0 %v14167_v57  ;;  %4500 = vperm.xlu1 %15463, %v4470_v25  }
 0x223   : > { %14454 = vmatpush3.bf16.msra.mxu1 %v14163_v13  ;;  %4495 = vperm.xlu0 %15462, %v4469_v40   ;;  %v9279_v13 = vld [vmem:[%s18664_s1 + $0x470] sm:$0xff] }
 0x224   : > { %14456 = vmatprep.subr.bf16.mxu1 %v14167_v57  ;;  %v14199_v48 = vpack.c.bf16 %v9280_v58, %v9279_v13  ;;  %v5906_v40 = vld [vmem:[%s18666_s3 + $0xf0] sm:$0xff]  ;;  %v5977_v58 = vld [vmem:[%s18664_s1 + $0x18] sm:$0xff] }
 0x225   : > { %14170 = vmatpush3.bf16.msra.mxu0 %v14167_v57  ;;  %v5976_v13 = vld [vmem:[%s18664_s1 + $0x10] sm:$0xff] }
 0x226   : > { %14172 = vmatprep.subr.bf16.mxu0 %v14171_v50  ;;  %4510 = vperm.xlu1 %15463, %v4472_v60   ;;  %v4315_v60 = vsel %vm514_vm1, %v4312_v53, %v17122_v55 }
 0x227   : > { %14458 = vmatpush3.bf16.msra.mxu1 %v14167_v57  ;;  %4505 = vperm.xlu0 %15462, %v4471_v28   ;;  %v9409_v57 = vld [vmem:[%s18664_s1 + $0x80] sm:$0xff]  ;;  %v4318_v28 = vrot.slane %v17289_v61, 1 }
 0x228   : > { %14460 = vmatprep.subr.bf16.mxu1 %v14171_v50  ;;  %12096 = vmatmul.mubr.f32.vlgmr.msra.gmra.mrb[8].mxu0 %v17236_v4  ;;  %v14491_v25 = vpack.c.bf16 %v9410_v9, %v9409_v57  ;;  %v9414_v4 = vld [vmem:[%s18664_s1 + $0xa8] sm:$0xff]  ;;  %v17661_v57 = vld [vmem:[%s15543_s10 + $0x150] sm:$0xff]  ;;  %v5978_v9 = vld [vmem:[%s18664_s1 + $0x20] sm:$0xff] }
 0x229   : > { %14174 = vmatpush3.bf16.msra.mxu0 %v14171_v50  ;;  %12098 = vmatprep.mubr.f32.mxu0 %v16920_v37  ;;  %v14183_v37 = vpack.c.bf16 %v9272_v8, %v9271_v15  ;;  %v14499_v15 = vpack.c.bf16 %v9414_v4, %v9413_v2  ;;  %v4324_v8 = vrot.slane %v17167_v33, 1  ;;  %v5982_v2 = vld [vmem:[%s18664_s1 + $0x40] sm:$0xff]  ;;  %v17702_v4 = vld [vmem:[%s15543_s10 + $0x170] sm:$0xff] }
 0x22a   : > { %12492 = vmatmul.mubr.f32.vlgmr.msra.gmra.mrb[8].mxu1 %v17241_v0  ;;  %14176 = vmatprep.subr.bf16.mxu0 %v14175_v54 }
 0x22b   : > { %14462 = vmatpush3.bf16.msra.mxu1 %v14171_v50  ;;  %12494 = vmatprep.mubr.f32.mxu1 %v17257_v56  ;;  %v17545_v50 = vrot.slane %v17257_v56, 1 }
 0x22c   : > { %14464 = vmatprep.subr.bf16.mxu1 %v14175_v54  ;;  %12099 = vmatmul.mubr.f32.gmra.mrb[10].mxu0 %v16939_v22  ;;  %v5746_v22 = vrot.slane %v17170_v31, 1  ;;  %v9420_v31 = vld [vmem:[%s18664_s1 + $0xd8] sm:$0xff] }
 0x22d   : > { %14178 = vmatpush3.bf16.msra.mxu0 %v14175_v54  ;;  %12101 = vmatprep.mubr.f32.mxu0 %v17289_v61  ;;  %v5752_v55 = vsel %vm514_vm1, %v17545_v50, %v17131_v6  ;;  %v4322_v61 = vrot.slane %v17326_v35, 1  ;;  %v5757_v6 = vrot.slane %v17342_v12, 1 }
 0x22e   : > { %14180 = vmatprep.subr.bf16.mxu0 %v14179_v38  ;;  %12495 = vmatmul.mubr.f32.gmra.mrb[10].mxu1 %v16942_v42  ;;  %v5747_v42 = vrot.slane %v17241_v0, 1  ;;  %v4319_v0 = vsel %vm514_vm1, %v17128_v5, %v4318_v28  ;;  %v9416_v5 = vld [vmem:[%s18664_s1 + $0xb8] sm:$0xff] }
 0x22f   : > { %14466 = vmatpush3.bf16.msra.mxu1 %v14175_v54  ;;  %12497 = vmatprep.mubr.f32.mxu1 %v16945_v51  ;;  %v9275_v51 = vld [vmem:[%s18664_s1 + $0x450] sm:$0xff]  ;;  %v14495_v54 = vpack.c.bf16 %v9412_v3, %v9411_v11  ;;  %v4325_v53 = vsel %vm514_vm1, %v4322_v61, %v4324_v8  ;;  %v17596_v36 = vsel %vm514_vm1, %v17164_v63, %v5757_v6  ;;  %v5981_v3 = vld [vmem:[%s18664_s1 + $0x38] sm:$0xff] }
 0x230   : > { %14468 = vmatprep.subr.bf16.mxu1 %v14179_v38  ;;  %12102 = vmatmul.mubr.f32.gmra.mrb[12].mxu0 %v17134_v19  ;;  %v9276_v19 = vld [vmem:[%s18664_s1 + $0x458] sm:$0xff]  ;;  %v5748_v59 = vsel %vm514_vm1, %v5746_v22, %v5747_v42  ;;  %v5750_v34 = vsel %vm514_vm1, %v5747_v42, %v17545_v50  ;;  %v5980_v11 = vld [vmem:[%s18664_s1 + $0x30] sm:$0xff] }
 0x231   : > { %14182 = vmatpush3.bf16.msra.mxu0 %v14179_v38  ;;  %12104 = vmatprep.mubr.f32.mxu0 %v17326_v35  ;;  %v14191_v20 = vpack.c.bf16 %v9276_v19, %v9275_v51  ;;  %v5759_v35 = vrot.slane %v17363_v27, 1  ;;  %v9419_v19 = vld [vmem:[%s18664_s1 + $0xd0] sm:$0xff] }
 0x232   : > { %14184 = vmatprep.subr.bf16.mxu0 %v14183_v37  ;;  %12498 = vmatmul.mubr.f32.gmra.mrb[12].mxu1 %v17137_v24 }
 0x233   : > { %14470 = vmatpush3.bf16.msra.mxu1 %v14179_v38  ;;  %12500 = vmatprep.mubr.f32.mxu1 %v17342_v12  ;;  %v4321_v38 = vsel %vm514_vm1, %v4318_v28, %v17161_v18  ;;  %v17687_v28 = vld [vmem:[%s15543_s10 + $0x168] sm:$0xff] }
 0x234   : > { %14472 = vmatprep.subr.bf16.mxu1 %v14183_v37  ;;  %12105 = vmatmul.mubr.f32.gmra.mrb[14].mxu0 %v17167_v33  ;;  %v4323_v33 = vsel %vm514_vm1, %v17161_v18, %v4322_v61  ;;  %v9418_v18 = vld [vmem:[%s18664_s1 + $0xc8] sm:$0xff] }
 0x235   : > { %14186 = vmatpush3.bf16.msra.mxu0 %v14183_v37  ;;  %12139 = vmatprep.mubr.f32.mxu0 %v4313_v29 }
 0x236   : > { %14188 = vmatprep.subr.bf16.mxu0 %v14187_v49  ;;  %12501 = vmatmul.mubr.f32.gmra.mrb[14].mxu1 %v17363_v27 }
 0x237   : > { %14474 = vmatpush3.bf16.msra.mxu1 %v14183_v37  ;;  %12535 = vmatprep.mubr.f32.mxu1 %v5748_v59  ;;  %v17587_v37 = vld [vmem:[%s15543_s10 + $0x138] sm:$0xff]  ;;  %v14511_v59 = vpack.c.bf16 %v9420_v31, %v9419_v19  ;;  %v7558_v31 = vrot.slane %v17661_v57, 7 }
 0x238   : > { %14476 = vmatprep.subr.bf16.mxu1 %v14187_v49  ;;  %5915 = vperm.xlu1 %15463, %v5901_v30   ;;  %v5761_v42 = vrot.slane %v17587_v37, 1  ;;  %v9421_v30 = vld [vmem:[%s18664_s1 + $0xe0] sm:$0xff] }
 0x239   : > { %14190 = vmatpush3.bf16.msra.mxu0 %v14187_v49  ;;  %5910 = vperm.xlu0 %15462, %v5900_v46  }
 0x23a   : > { %14192 = vmatprep.subr.bf16.mxu0 %v14191_v20  ;;  %v17616_v51 = vsel %vm514_vm1, %v5759_v35, %v5761_v42 }
 0x23b   : > { %14478 = vmatpush3.bf16.msra.mxu1 %v14187_v49  ;;  %v9417_v49 = vld [vmem:[%s18664_s1 + $0xc0] sm:$0xff] }
 0x23c   : > { %14480 = vmatprep.subr.bf16.mxu1 %v14191_v20  ;;  %5925 = vperm.xlu1 %15463, %v5903_v45   ;;  %v14507_v29 = vpack.c.bf16 %v9418_v18, %v9417_v49  ;;  %v5974_v45 = vld [vmem:[%s18664_s1] sm:$0xff]  ;;  %v9426_v18 = vld [vmem:[%s18664_s1 + $0x108] sm:$0xff] }
 0x23d   : > { %14194 = vmatpush3.bf16.msra.mxu0 %v14191_v20  ;;  %5920 = vperm.xlu0 %15462, %v5902_v62   ;;  %v9425_v49 = vld [vmem:[%s18664_s1 + $0x100] sm:$0xff] }
 0x23e   : > { %14196 = vmatprep.subr.bf16.mxu0 %v14195_v52  ;;  %v14555_v19 = vpack.c.bf16 %v9426_v18, %v9425_v49  ;;  %v9437_v49 = vld [vmem:[%s18664_s1 + $0x160] sm:$0xff]  ;;  %v9438_v18 = vld [vmem:[%s18664_s1 + $0x168] sm:$0xff] }
 0x23f   : > { %14482 = vmatpush3.bf16.msra.mxu1 %v14191_v20  ;;  %v9422_v20 = vld [vmem:[%s18664_s1 + $0xe8] sm:$0xff] }
 0x240   : > { %14484 = vmatprep.subr.bf16.mxu1 %v14195_v52  ;;  %5935 = vperm.xlu1 %15463, %v5905_v17   ;;  %v14515_v46 = vpack.c.bf16 %v9422_v20, %v9421_v30  ;;  %v17655_v17 = vld [vmem:[%s15543_s10 + $0x110] sm:$0xff]  ;;  %v9428_v30 = vld [vmem:[%s18664_s1 + $0x118] sm:$0xff] }
 0x241   : > { %14198 = vmatpush3.bf16.msra.mxu0 %v14195_v52  ;;  %5930 = vperm.xlu0 %15462, %v5904_v26   ;;  %v17658_v26 = vld [vmem:[%s15543_s10 + $0x118] sm:$0xff] }
 0x242   : > { %14200 = vmatprep.subr.bf16.mxu0 %v14199_v48 }
 0x243   : > { %14486 = vmatpush3.bf16.msra.mxu1 %v14195_v52  ;;  %v5975_v52 = vld [vmem:[%s18664_s1 + $0x8] sm:$0xff] }
 0x244   : > { %14488 = vmatprep.subr.bf16.mxu1 %v14199_v48  ;;  %5945 = vperm.xlu1 %15463, %v5907_v44   ;;  %v14523_v62 = vpack.c.bf16 %v5975_v52, %v5974_v45  ;;  %v5979_v44 = vld [vmem:[%s18664_s1 + $0x28] sm:$0xff]  ;;  %v9429_v52 = vld [vmem:[%s18664_s1 + $0x120] sm:$0xff] }
 0x245   : > { %14202 = vmatpush3.bf16.msra.mxu0 %v14199_v48  ;;  %5940 = vperm.xlu0 %15462, %v5906_v40   ;;  %v14531_v40 = vpack.c.bf16 %v5979_v44, %v5978_v9  ;;  %v7566_v44 = vrot.slane %v17702_v4, 7 }
 0x246   : > { %14492 = vmatprep.subr.bf16.mxu0 %v14491_v25 }
 0x247   : > { %14490 = vmatpush3.bf16.msra.mxu1 %v14199_v48  ;;  %v14527_v48 = vpack.c.bf16 %v5977_v58, %v5976_v13 }
 0x248   : > { %12140 = vmatmul.mubr.f32.vlgmr.msra.gmra.mrb[8].mxu0 %v4315_v60  ;;  %14780 = vmatprep.subr.bf16.mxu1 %v14491_v25  ;;  %v17683_v60 = vld [vmem:[%s15543_s10 + $0x160] sm:$0xff] }
 0x249   : > { %14494 = vmatpush3.bf16.msra.mxu0 %v14491_v25  ;;  %12142 = vmatprep.mubr.f32.mxu0 %v17154_v14  ;;  %v9415_v14 = vld [vmem:[%s18664_s1 + $0xb0] sm:$0xff] }
 0x24a   : > { %12536 = vmatmul.mubr.f32.vlgmr.msra.gmra.mrb[8].mxu1 %v5750_v34  ;;  %14496 = vmatprep.subr.bf16.mxu0 %v14495_v54  ;;  %v14503_v16 = vpack.c.bf16 %v9416_v5, %v9415_v14  ;;  %v14535_v34 = vpack.c.bf16 %v5981_v3, %v5980_v11  ;;  %v5986_v5 = vld [vmem:[%s18664_s1 + $0x60] sm:$0xff]  ;;  %v9432_v11 = vld [vmem:[%s18664_s1 + $0x138] sm:$0xff] }
 0x24b   : > { %14782 = vmatpush3.bf16.msra.mxu1 %v14491_v25  ;;  %12538 = vmatprep.mubr.f32.mxu1 %v5752_v55  ;;  %v17671_v25 = vld [vmem:[%s15543_s10 + $0x158] sm:$0xff] }
 0x24c   : > { %12143 = vmatmul.mubr.f32.gmra.mrb[10].mxu0 %v4319_v0  ;;  %14784 = vmatprep.subr.bf16.mxu1 %v14495_v54  ;;  %v17707_v55 = vld [vmem:[%s15543_s10 + $0x178] sm:$0xff]  ;;  %v7560_v20 = vrot.slane %v17671_v25, 7 }
 0x24d   : > { %14498 = vmatpush3.bf16.msra.mxu0 %v14495_v54  ;;  %12145 = vmatprep.mubr.f32.mxu0 %v4321_v38  ;;  %v5984_v38 = vld [vmem:[%s18664_s1 + $0x50] sm:$0xff]  ;;  %v7568_v3 = vrot.slane %v17707_v55, 7 }
 0x24e   : > { %12539 = vmatmul.mubr.f32.gmra.mrb[10].mxu1 %v17189_v39  ;;  %14500 = vmatprep.subr.bf16.mxu0 %v14499_v15  ;;  %v17606_v39 = vsel %vm514_vm1, %v5757_v6, %v5759_v35  ;;  %v5987_v35 = vld [vmem:[%s18664_s1 + $0x68] sm:$0xff]  ;;  %v17778_v13 = vsel %vm365_vm0, %v7558_v31, %v7560_v20 }
 0x24f   : > { %14786 = vmatpush3.bf16.msra.mxu1 %v14495_v54  ;;  %12541 = vmatprep.mubr.f32.mxu1 %v17198_v32  ;;  %v4327_v32 = vsel %vm514_vm1, %v4324_v8, %v5746_v22  ;;  %v17625_v22 = vld [vmem:[%s15543_s10 + $0x148] sm:$0xff]  ;;  %v17691_v54 = vld [vmem:[%s15543_s10 + $0x140] sm:$0xff] }
 0x250   : > { %12146 = vmatmul.mubr.f32.gmra.mrb[12].mxu0 %v4323_v33  ;;  %14788 = vmatprep.subr.bf16.mxu1 %v14499_v15  ;;  %v17710_v0 = vrot.slane %v17691_v54, 7  ;;  %v17722_v8 = vld [vmem:[%s15543_s10 + $0x180] sm:$0xff]  ;;  %v14547_v33 = vpack.c.bf16 %v5987_v35, %v5986_v5 }
 0x251   : > { %14502 = vmatpush3.bf16.msra.mxu0 %v14499_v15  ;;  %12148 = vmatprep.mubr.f32.mxu0 %v4325_v53  ;;  %v5989_v53 = vld [vmem:[%s18664_s1 + $0x78] sm:$0xff] }
 0x252   : > { %12542 = vmatmul.mubr.f32.gmra.mrb[12].mxu1 %v17596_v36  ;;  %14504 = vmatprep.subr.bf16.mxu0 %v14503_v16 }
 0x253   : > { %14790 = vmatpush3.bf16.msra.mxu1 %v14499_v15  ;;  %12544 = vmatprep.mubr.f32.mxu1 %v17606_v39  ;;  %v5985_v15 = vld [vmem:[%s18664_s1 + $0x58] sm:$0xff] }
 0x254   : > { %12149 = vmatmul.mubr.f32.gmra.mrb[14].mxu0 %v4327_v32  ;;  %14792 = vmatprep.subr.bf16.mxu1 %v14503_v16  ;;  %v14543_v14 = vpack.c.bf16 %v5985_v15, %v5984_v38  ;;  %v6123_v32 = vrot.slane %v17655_v17, 7  ;;  %v9433_v38 = vld [vmem:[%s18664_s1 + $0x140] sm:$0xff] }
 0x255   : > { %14506 = vmatpush3.bf16.msra.mxu0 %v14503_v16  ;;  %12579 = vmatprep.mubr.f32.mxu0 %v17257_v56  ;;  %v9423_v56 = vld [vmem:[%s18664_s1 + $0xf0] sm:$0xff] }
 0x256   : > { %12545 = vmatmul.mubr.f32.gmra.mrb[14].mxu1 %v17616_v51  ;;  %14508 = vmatprep.subr.bf16.mxu0 %v14507_v29  ;;  %v14519_v41 = vpack.c.bf16 %v9424_v1, %v9423_v56 }
 0x257   : > { %14794 = vmatpush3.bf16.msra.mxu1 %v14503_v16  ;;  %12975 = vmatprep.mubr.f32.mxu1 %v17625_v22 }
 0x258   : > { %14796 = vmatprep.subr.bf16.mxu1 %v14507_v29 }
 0x259   : > { %14510 = vmatpush3.bf16.msra.mxu0 %v14507_v29 }
 0x25a   : > { %14512 = vmatprep.subr.bf16.mxu0 %v14511_v59 }
 0x25b   : > { %14798 = vmatpush3.bf16.msra.mxu1 %v14507_v29  ;;  %v17752_v29 = vrot.slane %v17658_v26, 7 }
 0x25c   : > { %14800 = vmatprep.subr.bf16.mxu1 %v14511_v59 }
 0x25d   : > { %14514 = vmatpush3.bf16.msra.mxu0 %v14511_v59  ;;  %v6126_v1 = vsel %vm365_vm0, %v6123_v32, %v17752_v29  ;;  %v6128_v58 = vsel %vm365_vm0, %v17752_v29, %v17356_v21 }
 0x25e   : > { %14516 = vmatprep.subr.bf16.mxu0 %v14515_v46 }
 0x25f   : > { %14802 = vmatpush3.bf16.msra.mxu1 %v14511_v59  ;;  %v9427_v59 = vld [vmem:[%s18664_s1 + $0x110] sm:$0xff] }
 0x260   : > { %14804 = vmatprep.subr.bf16.mxu1 %v14515_v46  ;;  %v14559_v56 = vpack.c.bf16 %v9428_v30, %v9427_v59  ;;  %v9441_v30 = vld [vmem:[%s18664_s1 + $0x180] sm:$0xff] }
 0x261   : > { %14518 = vmatpush3.bf16.msra.mxu0 %v14515_v46 }
 0x262   : > { %14520 = vmatprep.subr.bf16.mxu0 %v14519_v41 }
 0x263   : > { %14806 = vmatpush3.bf16.msra.mxu1 %v14515_v46  ;;  %v6124_v46 = vsel %vm365_vm0, %v17282_v23, %v6123_v32  ;;  %v7564_v23 = vrot.slane %v17687_v28, 7  ;;  %v14579_v32 = vpack.c.bf16 %v9438_v18, %v9437_v49 }
 0x264   : > { %14808 = vmatprep.subr.bf16.mxu1 %v14519_v41 }
 0x265   : > { %14522 = vmatpush3.bf16.msra.mxu0 %v14519_v41  ;;  %v17815_v15 = vsel %vm365_vm0, %v7564_v23, %v7566_v44 }
 0x266   : > { %14524 = vmatprep.subr.bf16.mxu0 %v14523_v62 }
 0x267   : > { %14810 = vmatpush3.bf16.msra.mxu1 %v14519_v41  ;;  %v7562_v41 = vrot.slane %v17683_v60, 7 }
 0x268   : > { %14812 = vmatprep.subr.bf16.mxu1 %v14523_v62  ;;  %12580 = vmatmul.mubr.f32.vlgmr.msra.gmra.mrb[16].mxu0 %v17655_v17 }
 0x269   : > { %14526 = vmatpush3.bf16.msra.mxu0 %v14523_v62  ;;  %12582 = vmatprep.mubr.f32.mxu0 %v17658_v26  ;;  %v17794_v21 = vsel %vm365_vm0, %v7560_v20, %v7562_v41  ;;  %v9442_v20 = vld [vmem:[%s18664_s1 + $0x188] sm:$0xff] }
 0x26a   : > { %12976 = vmatmul.mubr.f32.vlgmr.msra.gmra.mrb[16].mxu1 %v17661_v57  ;;  %14528 = vmatprep.subr.bf16.mxu0 %v14527_v48 }
 0x26b   : > { %14814 = vmatpush3.bf16.msra.mxu1 %v14523_v62  ;;  %12978 = vmatprep.mubr.f32.mxu1 %v17671_v25  ;;  %v9430_v62 = vld [vmem:[%s18664_s1 + $0x128] sm:$0xff] }
 0x26c   : > { %14816 = vmatprep.subr.bf16.mxu1 %v14527_v48  ;;  %12583 = vmatmul.mubr.f32.gmra.mrb[18].mxu0 %v17137_v24  ;;  %v5983_v24 = vld [vmem:[%s18664_s1 + $0x48] sm:$0xff]  ;;  %v14563_v9 = vpack.c.bf16 %v9430_v62, %v9429_v52  ;;  %v9444_v52 = vld [vmem:[%s18664_s1 + $0x198] sm:$0xff]  ;;  %v7707_v62 = vrot.slane %v17683_v60, 1 }
 0x26d   : > { %14530 = vmatpush3.bf16.msra.mxu0 %v14527_v48  ;;  %12585 = vmatprep.mubr.f32.mxu0 %v17342_v12  ;;  %v7556_v12 = vrot.slane %v17625_v22, 7  ;;  %v14539_v61 = vpack.c.bf16 %v5983_v24, %v5982_v2 }
 0x26e   : > { %14532 = vmatprep.subr.bf16.mxu0 %v14531_v40  ;;  %12979 = vmatmul.mubr.f32.gmra.mrb[18].mxu1 %v17683_v60 }
 0x26f   : > { %14818 = vmatpush3.bf16.msra.mxu1 %v14527_v48  ;;  %12981 = vmatprep.mubr.f32.mxu1 %v17687_v28  ;;  %v17727_v6 = vsel %vm365_vm0, %v17710_v0, %v7556_v12  ;;  %v17768_v45 = vsel %vm365_vm0, %v7556_v12, %v7558_v31  ;;  %v6133_v48 = vrot.slane %v17587_v37, 7  ;;  %v6268_v12 = vrot.slane %v17655_v17, 1  ;;  %v9440_v31 = vld [vmem:[%s18664_s1 + $0x178] sm:$0xff]  ;;  %v9446_v17 = vld [vmem:[%s18664_s1 + $0x1a8] sm:$0xff] }
 0x270   : > { %14820 = vmatprep.subr.bf16.mxu1 %v14531_v40  ;;  %12586 = vmatmul.mubr.f32.gmra.mrb[20].mxu0 %v17363_v27  ;;  %v7702_v27 = vrot.slane %v17625_v22, 1 }
 0x271   : > { %14534 = vmatpush3.bf16.msra.mxu0 %v14531_v40  ;;  %12588 = vmatprep.mubr.f32.mxu0 %v17587_v37  ;;  %v6134_v24 = vsel %vm365_vm0, %v5477_v10, %v6133_v48  ;;  %v17820_v10 = vsel %vm365_vm0, %v7566_v44, %v7568_v3  ;;  %v6136_v5 = vsel %vm365_vm0, %v6133_v48, %v17710_v0  ;;  %v7709_v48 = vrot.slane %v17687_v28, 1  ;;  %v9445_v44 = vld [vmem:[%s18664_s1 + $0x1a0] sm:$0xff] }
 0x272   : > { %14536 = vmatprep.subr.bf16.mxu0 %v14535_v34  ;;  %12982 = vmatmul.mubr.f32.gmra.mrb[20].mxu1 %v17702_v4 }
 0x273   : > { %14822 = vmatpush3.bf16.msra.mxu1 %v14531_v40  ;;  %12984 = vmatprep.mubr.f32.mxu1 %v17707_v55  ;;  %v9431_v40 = vld [vmem:[%s18664_s1 + $0x130] sm:$0xff] }
 0x274   : > { %14824 = vmatprep.subr.bf16.mxu1 %v14535_v34  ;;  %12589 = vmatmul.mubr.f32.gmra.mrb[22].mxu0 %v17691_v54  ;;  %v14567_v2 = vpack.c.bf16 %v9432_v11, %v9431_v40  ;;  %v7711_v40 = vrot.slane %v17702_v4, 1  ;;  %v17899_v11 = vrot.slane %v17691_v54, 1 }
 0x275   : > { %14538 = vmatpush3.bf16.msra.mxu0 %v14535_v34  ;;  %12623 = vmatprep.mubr.f32.mxu0 %v17315_v47  ;;  %v5988_v47 = vld [vmem:[%s18664_s1 + $0x70] sm:$0xff] }
 0x276   : > { %14540 = vmatprep.subr.bf16.mxu0 %v14539_v61  ;;  %12985 = vmatmul.mubr.f32.gmra.mrb[22].mxu1 %v17722_v8  ;;  %v14551_v16 = vpack.c.bf16 %v5989_v53, %v5988_v47  ;;  %v9436_v47 = vld [vmem:[%s18664_s1 + $0x158] sm:$0xff]  ;;  %v6283_v49 = vsel %vm514_vm1, %v17899_v11, %v7702_v27 }
 0x277   : > { %14826 = vmatpush3.bf16.msra.mxu1 %v14535_v34  ;;  %13019 = vmatprep.mubr.f32.mxu1 %v17727_v6  ;;  %v17798_v34 = vsel %vm365_vm0, %v7562_v41, %v7564_v23  ;;  %v9443_v41 = vld [vmem:[%s18664_s1 + $0x190] sm:$0xff] }
 0x278   : > { %14828 = vmatprep.subr.bf16.mxu1 %v14539_v61  ;;  %v14591_v23 = vpack.c.bf16 %v9444_v52, %v9443_v41  ;;  %v9457_v41 = vld [vmem:[%s18664_s1 + $0x200] sm:$0xff]  ;;  %v9458_v52 = vld [vmem:[%s18664_s1 + $0x208] sm:$0xff] }
 0x279   : > { %14542 = vmatpush3.bf16.msra.mxu0 %v14539_v61 }
 0x27a   : > { %14544 = vmatprep.subr.bf16.mxu0 %v14543_v14 }
 0x27b   : > { %14830 = vmatpush3.bf16.msra.mxu1 %v14539_v61  ;;  %v7570_v61 = vrot.slane %v17722_v8, 7 }
 0x27c   : > { %14832 = vmatprep.subr.bf16.mxu1 %v14543_v14 }
 0x27d   : > { %14546 = vmatpush3.bf16.msra.mxu0 %v14543_v14  ;;  %v17842_v53 = vsel %vm365_vm0, %v7568_v3, %v7570_v61  ;;  %v14595_v3 = vpack.c.bf16 %v9446_v17, %v9445_v44  ;;  %v9459_v44 = vld [vmem:[%s18664_s1 + $0x210] sm:$0xff]  ;;  %v9460_v17 = vld [vmem:[%s18664_s1 + $0x218] sm:$0xff] }
 0x27e   : > { %14548 = vmatprep.subr.bf16.mxu0 %v14547_v33 }
 0x27f   : > { %14834 = vmatpush3.bf16.msra.mxu1 %v14543_v14  ;;  %v17823_v14 = vrot.slane %v17661_v57, 1 }
 0x280   : > { %14836 = vmatprep.subr.bf16.mxu1 %v14547_v33 }
 0x281   : > { %14550 = vmatpush3.bf16.msra.mxu0 %v14547_v33 }
 0x282   : > { %14552 = vmatprep.subr.bf16.mxu0 %v14551_v16 }
 0x283   : > { %14838 = vmatpush3.bf16.msra.mxu1 %v14547_v33  ;;  %v9435_v33 = vld [vmem:[%s18664_s1 + $0x150] sm:$0xff] }
 0x284   : > { %14840 = vmatprep.subr.bf16.mxu1 %v14551_v16 }
 0x285   : > { %14554 = vmatpush3.bf16.msra.mxu0 %v14551_v16 }
 0x286   : > { %14556 = vmatprep.subr.bf16.mxu0 %v14555_v19 }
 0x287   : > { %14842 = vmatpush3.bf16.msra.mxu1 %v14551_v16  ;;  %v14575_v16 = vpack.c.bf16 %v9436_v47, %v9435_v33  ;;  %v6281_v47 = vsel %vm514_vm1, %v5761_v42, %v17899_v11 }
 0x288   : > { %14844 = vmatprep.subr.bf16.mxu1 %v14555_v19  ;;  %12624 = vmatmul.mubr.f32.vlgmr.msra.gmra.mrb[16].mxu0 %v6124_v46  ;;  %v6270_v46 = vrot.slane %v17658_v26, 1 }
 0x289   : > { %14558 = vmatpush3.bf16.msra.mxu0 %v14555_v19  ;;  %12626 = vmatprep.mubr.f32.mxu0 %v6126_v1  ;;  %v17869_v1 = vrot.slane %v17671_v25, 1 }
 0x28a   : > { %13020 = vmatmul.mubr.f32.vlgmr.msra.gmra.mrb[16].mxu1 %v17768_v45  ;;  %14560 = vmatprep.subr.bf16.mxu0 %v14559_v56  ;;  %v6271_v26 = vsel %vm514_vm1, %v6268_v12, %v6270_v46 }
 0x28b   : > { %14846 = vmatpush3.bf16.msra.mxu1 %v14555_v19  ;;  %13022 = vmatprep.mubr.f32.mxu1 %v17778_v13  ;;  %v9439_v19 = vld [vmem:[%s18664_s1 + $0x170] sm:$0xff] }
 0x28c   : > { %14848 = vmatprep.subr.bf16.mxu1 %v14559_v56  ;;  %12627 = vmatmul.mubr.f32.gmra.mrb[18].mxu0 %v6128_v58  ;;  %v14583_v59 = vpack.c.bf16 %v9440_v31, %v9439_v19  ;;  %v6273_v58 = vsel %vm514_vm1, %v6270_v46, %v17164_v63  ;;  %v7708_v63 = vsel %vm514_vm1, %v17869_v1, %v7707_v62  ;;  %v9452_v19 = vld [vmem:[%s18664_s1 + $0x1d8] sm:$0xff]  ;;  %v9453_v31 = vld [vmem:[%s18664_s1 + $0x1e0] sm:$0xff] }
 0x28d   : > { %14562 = vmatpush3.bf16.msra.mxu0 %v14559_v56  ;;  %12629 = vmatprep.mubr.f32.mxu0 %v17384_v7  ;;  %v9434_v7 = vld [vmem:[%s18664_s1 + $0x148] sm:$0xff]  ;;  %v9456_v46 = vld [vmem:[%s18664_s1 + $0x1f8] sm:$0xff] }
 0x28e   : > { %14564 = vmatprep.subr.bf16.mxu0 %v14563_v9  ;;  %13023 = vmatmul.mubr.f32.gmra.mrb[18].mxu1 %v17794_v21  ;;  %v14571_v35 = vpack.c.bf16 %v9434_v7, %v9433_v38  ;;  %v17910_v38 = vsel %vm514_vm1, %v7707_v62, %v7709_v48  ;;  %v17913_v7 = vld [vmem:[%s15543_s10 + $0x120] sm:$0xff]  ;;  %v17988_v62 = vld [vmem:[%s15543_s10 + $0x130] sm:$0xff] }
 0x28f   : > { %14850 = vmatpush3.bf16.msra.mxu1 %v14559_v56  ;;  %13025 = vmatprep.mubr.f32.mxu1 %v17798_v34  ;;  %v14587_v56 = vpack.c.bf16 %v9442_v20, %v9441_v30  ;;  %v9455_v20 = vld [vmem:[%s18664_s1 + $0x1f0] sm:$0xff] }
 0x290   : > { %14852 = vmatprep.subr.bf16.mxu1 %v14563_v9  ;;  %12630 = vmatmul.mubr.f32.gmra.mrb[20].mxu0 %v17399_v43  ;;  %v6269_v43 = vsel %vm514_vm1, %v17545_v50, %v6268_v12  ;;  %v7704_v50 = vsel %vm514_vm1, %v7702_v27, %v17823_v14  ;;  %v9448_v12 = vld [vmem:[%s18664_s1 + $0x1b8] sm:$0xff] }
 0x291   : > { %14566 = vmatpush3.bf16.msra.mxu0 %v14563_v9  ;;  %12632 = vmatprep.mubr.f32.mxu0 %v6134_v24  ;;  %v9447_v24 = vld [vmem:[%s18664_s1 + $0x1b0] sm:$0xff] }
 0x292   : > { %14568 = vmatprep.subr.bf16.mxu0 %v14567_v2  ;;  %13026 = vmatmul.mubr.f32.gmra.mrb[20].mxu1 %v17815_v15  ;;  %v14599_v33 = vpack.c.bf16 %v9448_v12, %v9447_v24  ;;  %v9461_v24 = vld [vmem:[%s18664_s1 + $0x220] sm:$0xff]  ;;  %v9462_v12 = vld [vmem:[%s18664_s1 + $0x228] sm:$0xff] }
 0x293   : > { %14854 = vmatpush3.bf16.msra.mxu1 %v14563_v9  ;;  %13028 = vmatprep.mubr.f32.mxu1 %v17820_v10  ;;  %v17887_v9 = vsel %vm514_vm1, %v17823_v14, %v17869_v1 }
 0x294   : > { %14856 = vmatprep.subr.bf16.mxu1 %v14567_v2  ;;  %12633 = vmatmul.mubr.f32.gmra.mrb[22].mxu0 %v6136_v5  ;;  %v7715_v5 = vrot.slane %v17722_v8, 1 }
 0x295   : > { %14570 = vmatpush3.bf16.msra.mxu0 %v14567_v2  ;;  %12667 = vmatprep.mubr.f32.mxu0 %v6269_v43  ;;  %v17921_v43 = vld [vmem:[%s15543_s10 + $0x188] sm:$0xff] }
 0x296   : > { %14572 = vmatprep.subr.bf16.mxu0 %v14571_v35  ;;  %13029 = vmatmul.mubr.f32.gmra.mrb[22].mxu1 %v17842_v53  ;;  %v7717_v37 = vrot.slane %v17921_v43, 1 }
 0x297   : > { %14858 = vmatpush3.bf16.msra.mxu1 %v14567_v2  ;;  %13063 = vmatprep.mubr.f32.mxu1 %v7704_v50  ;;  %v7713_v2 = vrot.slane %v17707_v55, 1  ;;  %v6441_v50 = vrot.slane %v17913_v7, 7 }
 0x298   : > { %14860 = vmatprep.subr.bf16.mxu1 %v14571_v35  ;;  %v17962_v27 = vsel %vm514_vm1, %v7715_v5, %v7717_v37 }
 0x299   : > { %14574 = vmatpush3.bf16.msra.mxu0 %v14571_v35  ;;  %v17943_v42 = vsel %vm514_vm1, %v7713_v2, %v7715_v5 }
 0x29a   : > { %14576 = vmatprep.subr.bf16.mxu0 %v14575_v16 }
 0x29b   : > { %14862 = vmatpush3.bf16.msra.mxu1 %v14571_v35  ;;  %v17918_v35 = vsel %vm514_vm1, %v7709_v48, %v7711_v40  ;;  %v17993_v48 = vld [vmem:[%s15543_s10 + $0x138] sm:$0xff] }
 0x29c   : > { %14864 = vmatprep.subr.bf16.mxu1 %v14575_v16 }
 0x29d   : > { %14578 = vmatpush3.bf16.msra.mxu0 %v14575_v16 }
 0x29e   : > { %14580 = vmatprep.subr.bf16.mxu0 %v14579_v32 }
 0x29f   : > { %14866 = vmatpush3.bf16.msra.mxu1 %v14575_v16  ;;  %v17938_v16 = vsel %vm514_vm1, %v7711_v40, %v7713_v2 }
 0x2a0   : > { %14868 = vmatprep.subr.bf16.mxu1 %v14579_v32 }
 0x2a1   : > { %14582 = vmatpush3.bf16.msra.mxu0 %v14579_v32 }
 0x2a2   : > { %14584 = vmatprep.subr.bf16.mxu0 %v14583_v59 }
 0x2a3   : > { %14870 = vmatpush3.bf16.msra.mxu1 %v14579_v32  ;;  %v6442_v32 = vsel %vm365_vm0, %v17752_v29, %v6441_v50 }
 0x2a4   : > { %14872 = vmatprep.subr.bf16.mxu1 %v14583_v59 }
 0x2a5   : > { %14586 = vmatpush3.bf16.msra.mxu0 %v14583_v59 }
 0x2a6   : > { %14588 = vmatprep.subr.bf16.mxu0 %v14587_v56 }
 0x2a7   : > { %14874 = vmatpush3.bf16.msra.mxu1 %v14583_v59  ;;  %v9454_v59 = vld [vmem:[%s18664_s1 + $0x1e8] sm:$0xff] }
 0x2a8   : > { %14876 = vmatprep.subr.bf16.mxu1 %v14587_v56  ;;  %12668 = vmatmul.mubr.f32.vlgmr.msra.gmra.mrb[16].mxu0 %v6271_v26  ;;  %v14611_v30 = vpack.c.bf16 %v9454_v59, %v9453_v31  ;;  %v7335_v59 = vld [vmem:[%s18666_s3 + $0x100] sm:$0xff] }
 0x2a9   : > { %14590 = vmatpush3.bf16.msra.mxu0 %v14587_v56  ;;  %12670 = vmatprep.mubr.f32.mxu0 %v6273_v58  ;;  %v6445_v58 = vrot.slane %v17988_v62, 7 }
 0x2aa   : > { %13064 = vmatmul.mubr.f32.vlgmr.msra.gmra.mrb[16].mxu1 %v17887_v9  ;;  %14592 = vmatprep.subr.bf16.mxu0 %v14591_v23 }
 0x2ab   : > { %14878 = vmatpush3.bf16.msra.mxu1 %v14587_v56  ;;  %13066 = vmatprep.mubr.f32.mxu1 %v7708_v63  ;;  %v14615_v56 = vpack.c.bf16 %v9456_v46, %v9455_v20  ;;  %v18003_v63 = vrot.slane %v17993_v48, 7  ;;  %v7338_v20 = vld [vmem:[%s18666_s3 + $0x118] sm:$0xff] }
 0x2ac   : > { %14880 = vmatprep.subr.bf16.mxu1 %v14591_v23  ;;  %12671 = vmatmul.mubr.f32.gmra.mrb[18].mxu0 %v17596_v36  ;;  %v9449_v36 = vld [vmem:[%s18664_s1 + $0x1c0] sm:$0xff] }
 0x2ad   : > { %14594 = vmatpush3.bf16.msra.mxu0 %v14591_v23  ;;  %12673 = vmatprep.mubr.f32.mxu0 %v17606_v39  ;;  %v9450_v39 = vld [vmem:[%s18664_s1 + $0x1c8] sm:$0xff]  ;;  %v18014_v5 = vsel %vm365_vm0, %v6445_v58, %v18003_v63 }
 0x2ae   : > { %14596 = vmatprep.subr.bf16.mxu0 %v14595_v3  ;;  %13067 = vmatmul.mubr.f32.gmra.mrb[18].mxu1 %v17910_v38  ;;  %v14603_v18 = vpack.c.bf16 %v9450_v39, %v9449_v36  ;;  %v9463_v36 = vld [vmem:[%s18664_s1 + $0x230] sm:$0xff]  ;;  %v9464_v39 = vld [vmem:[%s18664_s1 + $0x238] sm:$0xff] }
 0x2af   : > { %14882 = vmatpush3.bf16.msra.mxu1 %v14591_v23  ;;  %13069 = vmatprep.mubr.f32.mxu1 %v17918_v35  ;;  %v14619_v23 = vpack.c.bf16 %v9458_v52, %v9457_v41  ;;  %v9471_v41 = vld [vmem:[%s18664_s1 + $0x270] sm:$0xff]  ;;  %v7340_v52 = vld [vmem:[%s18666_s3 + $0x128] sm:$0xff] }
 0x2b0   : > { %14884 = vmatprep.subr.bf16.mxu1 %v14595_v3  ;;  %12674 = vmatmul.mubr.f32.gmra.mrb[20].mxu0 %v17616_v51  ;;  %v9451_v51 = vld [vmem:[%s18664_s1 + $0x1d0] sm:$0xff] }
 0x2b1   : > { %14598 = vmatpush3.bf16.msra.mxu0 %v14595_v3  ;;  %12676 = vmatprep.mubr.f32.mxu0 %v6281_v47  ;;  %v14607_v29 = vpack.c.bf16 %v9452_v19, %v9451_v51  ;;  %v14627_v47 = vpack.c.bf16 %v9462_v12, %v9461_v24  ;;  %v9476_v24 = vld [vmem:[%s18664_s1 + $0x298] sm:$0xff] }
 0x2b2   : > { %14600 = vmatprep.subr.bf16.mxu0 %v14599_v33  ;;  %13070 = vmatmul.mubr.f32.gmra.mrb[20].mxu1 %v17938_v16 }
 0x2b3   : > { %14886 = vmatpush3.bf16.msra.mxu1 %v14595_v3  ;;  %13072 = vmatprep.mubr.f32.mxu1 %v17943_v42  ;;  %v14623_v3 = vpack.c.bf16 %v9460_v17, %v9459_v44  ;;  %v9474_v44 = vld [vmem:[%s18664_s1 + $0x288] sm:$0xff]  ;;  %v7342_v17 = vld [vmem:[%s18666_s3 + $0x138] sm:$0xff] }
 0x2b4   : > { %14888 = vmatprep.subr.bf16.mxu1 %v14599_v33  ;;  %12677 = vmatmul.mubr.f32.gmra.mrb[22].mxu0 %v6283_v49  ;;  %v7886_v49 = vrot.slane %v17921_v43, 7 }
 0x2b5   : > { %14602 = vmatpush3.bf16.msra.mxu0 %v14599_v33  ;;  %12711 = vmatprep.mubr.f32.mxu0 %v6442_v32  ;;  %v9466_v32 = vld [vmem:[%s18664_s1 + $0x248] sm:$0xff] }
 0x2b6   : > { %14604 = vmatprep.subr.bf16.mxu0 %v14603_v18  ;;  %13073 = vmatmul.mubr.f32.gmra.mrb[22].mxu1 %v17962_v27  ;;  %v7887_v51 = vsel %vm365_vm0, %v7570_v61, %v7886_v49  ;;  %v9468_v61 = vld [vmem:[%s18664_s1 + $0x258] sm:$0xff] }
 0x2b7   : > { %14890 = vmatpush3.bf16.msra.mxu1 %v14599_v33  ;;  %13107 = vmatprep.mubr.f32.mxu1 %v17794_v21  ;;  %v17979_v21 = vld [vmem:[%s15543_s10 + $0x128] sm:$0xff]  ;;  %v18017_v33 = vld [vmem:[%s15543_s10 + $0x190] sm:$0xff] }
 0x2b8   : > { %14892 = vmatprep.subr.bf16.mxu1 %v14603_v18  ;;  %v6443_v26 = vrot.slane %v17979_v21, 7  ;;  %7345 = vperm.xlu0 %15462, %v7335_v59  }
 0x2b9   : > { %14606 = vmatpush3.bf16.msra.mxu0 %v14603_v18 }
 0x2ba   : > { %14608 = vmatprep.subr.bf16.mxu0 %v14607_v29  ;;  %v6444_v40 = vsel %vm365_vm0, %v6441_v50, %v6443_v26  ;;  %v6446_v2 = vsel %vm365_vm0, %v6443_v26, %v6445_v58  ;;  %v6450_v50 = vsel %vm365_vm0, %v18003_v63, %v17710_v0  ;;  %v18036_v0 = vld [vmem:[%s15543_s10 + $0x198] sm:$0xff]  ;;  %v9473_v58 = vld [vmem:[%s18664_s1 + $0x280] sm:$0xff] }
 0x2bb   : > { %14894 = vmatpush3.bf16.msra.mxu1 %v14603_v18  ;;  %v14631_v18 = vpack.c.bf16 %v9464_v39, %v9463_v36  ;;  %v7890_v19 = vrot.slane %v18036_v0, 7  ;;  %v9479_v39 = vld [vmem:[%s18664_s1 + $0x2b0] sm:$0xff] }
 0x2bc   : > { %14896 = vmatprep.subr.bf16.mxu1 %v14607_v29 }
 0x2bd   : > { %14610 = vmatpush3.bf16.msra.mxu0 %v14607_v29 }
 0x2be   : > { %14612 = vmatprep.subr.bf16.mxu0 %v14611_v30 }
 0x2bf   : > { %14898 = vmatpush3.bf16.msra.mxu1 %v14607_v29 }
 0x2c0   : > { %14900 = vmatprep.subr.bf16.mxu1 %v14611_v30 }
 0x2c1   : > { %14614 = vmatpush3.bf16.msra.mxu0 %v14611_v30 }
 0x2c2   : > { %14616 = vmatprep.subr.bf16.mxu0 %v14615_v56 }
 0x2c3   : > { %14902 = vmatpush3.bf16.msra.mxu1 %v14611_v30  ;;  %v9470_v30 = vld [vmem:[%s18664_s1 + $0x268] sm:$0xff] }
 0x2c4   : > { %14904 = vmatprep.subr.bf16.mxu1 %v14615_v56 }
 0x2c5   : > { %14618 = vmatpush3.bf16.msra.mxu0 %v14615_v56 }
 0x2c6   : > { %14620 = vmatprep.subr.bf16.mxu0 %v14619_v23 }
 0x2c7   : > { %14906 = vmatpush3.bf16.msra.mxu1 %v14615_v56  ;;  %v7337_v56 = vld [vmem:[%s18666_s3 + $0x110] sm:$0xff] }
 0x2c8   : > { %14908 = vmatprep.subr.bf16.mxu1 %v14619_v23  ;;  %12712 = vmatmul.mubr.f32.vlgmr.msra.gmra.mrb[16].mxu0 %v6444_v40  ;;  %v14651_v40 = vpack.c.bf16 %v9474_v44, %v9473_v58  ;;  %v9492_v58 = vld [vmem:[%s18664_s1 + $0x318] sm:$0xff] }
 0x2c9   : > { %14622 = vmatpush3.bf16.msra.mxu0 %v14619_v23  ;;  %12714 = vmatprep.mubr.f32.mxu0 %v6446_v2  ;;  %v9475_v2 = vld [vmem:[%s18664_s1 + $0x290] sm:$0xff] }
 0x2ca   : > { %13108 = vmatmul.mubr.f32.vlgmr.msra.gmra.mrb[16].mxu1 %v17798_v34  ;;  %14624 = vmatprep.subr.bf16.mxu0 %v14623_v3  ;;  %v18033_v34 = vrot.slane %v18017_v33, 7  ;;  %v14655_v12 = vpack.c.bf16 %v9476_v24, %v9475_v2  ;;  %v9493_v24 = vld [vmem:[%s18664_s1 + $0x320] sm:$0xff] }
 0x2cb   : > { %14910 = vmatpush3.bf16.msra.mxu1 %v14619_v23  ;;  %13110 = vmatprep.mubr.f32.mxu1 %v17815_v15  ;;  %v9465_v15 = vld [vmem:[%s18664_s1 + $0x240] sm:$0xff] }
 0x2cc   : > { %14912 = vmatprep.subr.bf16.mxu1 %v14623_v3  ;;  %12715 = vmatmul.mubr.f32.gmra.mrb[18].mxu0 %v18014_v5  ;;  %v14635_v29 = vpack.c.bf16 %v9466_v32, %v9465_v15  ;;  %v7339_v23 = vld [vmem:[%s18666_s3 + $0x120] sm:$0xff]  ;;  %v6725_v15 = vrot.slane %v17979_v21, 1 }
 0x2cd   : > { %14626 = vmatpush3.bf16.msra.mxu0 %v14623_v3  ;;  %12717 = vmatprep.mubr.f32.mxu0 %v6450_v50  ;;  %v9478_v50 = vld [vmem:[%s18664_s1 + $0x2a8] sm:$0xff]  ;;  %v9481_v32 = vld [vmem:[%s18664_s1 + $0x2c0] sm:$0xff] }
 0x2ce   : > { %14628 = vmatprep.subr.bf16.mxu0 %v14627_v47  ;;  %13111 = vmatmul.mubr.f32.gmra.mrb[18].mxu1 %v17820_v10  ;;  %v7889_v10 = vsel %vm365_vm0, %v7886_v49, %v18033_v34  ;;  %v9480_v49 = vld [vmem:[%s18664_s1 + $0x2b8] sm:$0xff] }
 0x2cf   : > { %14914 = vmatpush3.bf16.msra.mxu1 %v14623_v3  ;;  %13113 = vmatprep.mubr.f32.mxu1 %v17842_v53  ;;  %v9467_v53 = vld [vmem:[%s18664_s1 + $0x250] sm:$0xff] }
 0x2d0   : > { %14916 = vmatprep.subr.bf16.mxu1 %v14627_v47  ;;  %12718 = vmatmul.mubr.f32.gmra.mrb[20].mxu0 %v17727_v6  ;;  %v18064_v6 = vsel %vm365_vm0, %v18033_v34, %v7890_v19  ;;  %v14639_v31 = vpack.c.bf16 %v9468_v61, %v9467_v53  ;;  %v7341_v3 = vld [vmem:[%s18666_s3 + $0x130] sm:$0xff] }
 0x2d1   : > { %14630 = vmatpush3.bf16.msra.mxu0 %v14627_v47  ;;  %12720 = vmatprep.mubr.f32.mxu0 %v17768_v45  ;;  %v7336_v45 = vld [vmem:[%s18666_s3 + $0x108] sm:$0xff]  ;;  %v8772_v61 = vld [vmem:[%s18666_s3 + $0x150] sm:$0xff] }
 0x2d2   : > { %14632 = vmatprep.subr.bf16.mxu0 %v14631_v18  ;;  %13114 = vmatmul.mubr.f32.gmra.mrb[20].mxu1 %v7887_v51  ;;  %v8770_v51 = vld [vmem:[%s18666_s3 + $0x140] sm:$0xff] }
 0x2d3   : > { %14918 = vmatpush3.bf16.msra.mxu1 %v14627_v47  ;;  %13116 = vmatprep.mubr.f32.mxu1 %v7889_v10  ;;  %v9477_v47 = vld [vmem:[%s18664_s1 + $0x2a0] sm:$0xff] }
 0x2d4   : > { %14920 = vmatprep.subr.bf16.mxu1 %v14631_v18  ;;  %12721 = vmatmul.mubr.f32.gmra.mrb[22].mxu0 %v17778_v13  ;;  %v9469_v13 = vld [vmem:[%s18664_s1 + $0x260] sm:$0xff]  ;;  %v14659_v36 = vpack.c.bf16 %v9478_v50, %v9477_v47 }
 0x2d5   : > { %14634 = vmatpush3.bf16.msra.mxu0 %v14631_v18  ;;  %12755 = vmatprep.mubr.f32.mxu0 %v17913_v7  ;;  %v14643_v46 = vpack.c.bf16 %v9470_v30, %v9469_v13  ;;  %v9485_v10 = vld [vmem:[%s18664_s1 + $0x2e0] sm:$0xff] }
 0x2d6   : > { %14636 = vmatprep.subr.bf16.mxu0 %v14635_v29  ;;  %13117 = vmatmul.mubr.f32.gmra.mrb[22].mxu1 %v18064_v6  ;;  %v8774_v13 = vld [vmem:[%s18666_s3 + $0x160] sm:$0xff] }
 0x2d7   : > { %14922 = vmatpush3.bf16.msra.mxu1 %v14631_v18  ;;  %13151 = vmatprep.mubr.f32.mxu1 %v17683_v60  ;;  %v9472_v60 = vld [vmem:[%s18664_s1 + $0x278] sm:$0xff]  ;;  %v6724_v18 = vrot.slane %v17913_v7, 1  ;;  %v9483_v7 = vld [vmem:[%s18664_s1 + $0x2d0] sm:$0xff]  ;;  %v9489_v30 = vld [vmem:[%s18664_s1 + $0x300] sm:$0xff] }
 0x2d8   : > { %14924 = vmatprep.subr.bf16.mxu1 %v14635_v29  ;;  %7350 = vperm.xlu1 %15463, %v7336_v45   ;;  %v14647_v26 = vpack.c.bf16 %v9472_v60, %v9471_v41  ;;  %v9487_v45 = vld [vmem:[%s18664_s1 + $0x2f0] sm:$0xff]  ;;  %v8777_v41 = vld [vmem:[%s18666_s3 + $0x178] sm:$0xff] }
 0x2d9   : > { %14638 = vmatpush3.bf16.msra.mxu0 %v14635_v29  ;;  %7355 = vperm.xlu0 %15462, %v7337_v56   ;;  %v18199_v56 = vpop.permute.xlu1 %4480 }
 0x2da   : > { %14640 = vmatprep.subr.bf16.mxu0 %v14639_v31 }
 0x2db   : > { %14926 = vmatpush3.bf16.msra.mxu1 %v14635_v29  ;;  %v8773_v29 = vld [vmem:[%s18666_s3 + $0x158] sm:$0xff] }
 0x2dc   : > { %14928 = vmatprep.subr.bf16.mxu1 %v14639_v31  ;;  %7360 = vperm.xlu1 %15463, %v7338_v20   ;;  %v9490_v20 = vld [vmem:[%s18664_s1 + $0x308] sm:$0xff] }
 0x2dd   : > { %14642 = vmatpush3.bf16.msra.mxu0 %v14639_v31  ;;  %7365 = vperm.xlu0 %15462, %v7339_v23   ;;  %v14683_v60 = vpack.c.bf16 %v9490_v20, %v9489_v30  ;;  %v8776_v23 = vld [vmem:[%s18666_s3 + $0x170] sm:$0xff] }
 0x2de   : > { %14644 = vmatprep.subr.bf16.mxu0 %v14643_v46  ;;  %v9503_v30 = vld [vmem:[%s18664_s1 + $0x370] sm:$0xff] }
 0x2df   : > { %14930 = vmatpush3.bf16.msra.mxu1 %v14639_v31  ;;  %v8775_v31 = vld [vmem:[%s18666_s3 + $0x168] sm:$0xff] }
 0x2e0   : > { %14932 = vmatprep.subr.bf16.mxu1 %v14643_v46  ;;  %7370 = vperm.xlu1 %15463, %v7340_v52   ;;  %v18204_v52 = vpop.permute.xlu0 %4475 }
 0x2e1   : > { %14646 = vmatpush3.bf16.msra.mxu0 %v14643_v46  ;;  %7375 = vperm.xlu0 %15462, %v7341_v3   ;;  %v15466_v3 = vld [vmem:[%s15543_s10 + $0x148] sm:$0xff] }
 0x2e2   : > { %14648 = vmatprep.subr.bf16.mxu0 %v14647_v26  ;;  %v6733_v2 = vrot.slane %v15466_v3, 1 }
 0x2e3   : > { %14934 = vmatpush3.bf16.msra.mxu1 %v14643_v46  ;;  %v6727_v46 = vrot.slane %v17988_v62, 1 }
 0x2e4   : > { %14936 = vmatprep.subr.bf16.mxu1 %v14647_v26  ;;  %7380 = vperm.xlu1 %15463, %v7342_v17   ;;  %v18232_v47 = vpop.permute.xlu0 %4485 }
 0x2e5   : > { %14650 = vmatpush3.bf16.msra.mxu0 %v14647_v26  ;;  %8780 = vperm.xlu0 %15462, %v8770_v51   ;;  %v6728_v44 = vsel %vm514_vm1, %v6725_v15, %v6727_v46 }
 0x2e6   : > { %14652 = vmatprep.subr.bf16.mxu0 %v14651_v40 }
 0x2e7   : > { %14938 = vmatpush3.bf16.msra.mxu1 %v14647_v26  ;;  %v18207_v26 = vrot.slane %v17993_v48, 1 }
 0x2e8   : > { %14940 = vmatprep.subr.bf16.mxu1 %v14651_v40  ;;  %12756 = vmatmul.mubr.f32.vlgmr.msra.gmra.mrb[16].mxu0 %v17979_v21  ;;  %v9494_v21 = vld [vmem:[%s18664_s1 + $0x328] sm:$0xff] }
 0x2e9   : > { %14654 = vmatpush3.bf16.msra.mxu0 %v14651_v40  ;;  %12758 = vmatprep.mubr.f32.mxu0 %v17988_v62  ;;  %v9491_v62 = vld [vmem:[%s18664_s1 + $0x310] sm:$0xff]  ;;  %v6732_v50 = vsel %vm514_vm1, %v18207_v26, %v17899_v11 }
 0x2ea   : > { %13152 = vmatmul.mubr.f32.vlgmr.msra.gmra.mrb[16].mxu1 %v17687_v28  ;;  %14656 = vmatprep.subr.bf16.mxu0 %v14655_v12  ;;  %v14663_v28 = vpack.c.bf16 %v9480_v49, %v9479_v39  ;;  %v14687_v17 = vpack.c.bf16 %v9492_v58, %v9491_v62  ;;  %v6734_v39 = vsel %vm514_vm1, %v17899_v11, %v6733_v2  ;;  %v18241_v49 = vld [vmem:[%s15543_s10 + $0x160] sm:$0xff]  ;;  %v8172_v11 = vrot.slane %v18036_v0, 1 }
 0x2eb   : > { %14942 = vmatpush3.bf16.msra.mxu1 %v14651_v40  ;;  %13154 = vmatprep.mubr.f32.mxu1 %v17702_v4  ;;  %v9482_v4 = vld [vmem:[%s18664_s1 + $0x2c8] sm:$0xff]  ;;  %v6730_v40 = vsel %vm514_vm1, %v6727_v46, %v18207_v26 }
 0x2ec   : > { %14944 = vmatprep.subr.bf16.mxu1 %v14655_v12  ;;  %12759 = vmatmul.mubr.f32.gmra.mrb[18].mxu0 %v17993_v48 }
 0x2ed   : > { %14658 = vmatpush3.bf16.msra.mxu0 %v14655_v12  ;;  %12761 = vmatprep.mubr.f32.mxu0 %v17691_v54  ;;  %v14667_v54 = vpack.c.bf16 %v9482_v4, %v9481_v32  ;;  %v6736_v4 = vsel %vm514_vm1, %v6733_v2, %v17823_v14  ;;  %v9498_v14 = vld [vmem:[%s18664_s1 + $0x348] sm:$0xff]  ;;  %v9507_v2 = vld [vmem:[%s18664_s1 + $0x390] sm:$0xff] }
 0x2ee   : > { %14660 = vmatprep.subr.bf16.mxu0 %v14659_v36  ;;  %13155 = vmatmul.mubr.f32.gmra.mrb[18].mxu1 %v17707_v55  ;;  %v6726_v55 = vsel %vm514_vm1, %v6724_v18, %v6725_v15  ;;  %v9496_v18 = vld [vmem:[%s18664_s1 + $0x338] sm:$0xff]  ;;  %v18255_v15 = vld [vmem:[%s15543_s10 + $0x1a0] sm:$0xff] }
 0x2ef   : > { %14946 = vmatpush3.bf16.msra.mxu1 %v14655_v12  ;;  %13157 = vmatprep.mubr.f32.mxu1 %v17722_v8  ;;  %v18230_v12 = vpop.permute.xlu1 %4490  ;;  %v8174_v51 = vrot.slane %v18255_v15, 1 }
 0x2f0   : > { %14948 = vmatprep.subr.bf16.mxu1 %v14659_v36  ;;  %12762 = vmatmul.mubr.f32.gmra.mrb[20].mxu0 %v17625_v22  ;;  %v9484_v22 = vld [vmem:[%s18664_s1 + $0x2d8] sm:$0xff] }
 0x2f1   : > { %14662 = vmatpush3.bf16.msra.mxu0 %v14659_v36  ;;  %12764 = vmatprep.mubr.f32.mxu0 %v17661_v57  ;;  %v8771_v57 = vld [vmem:[%s18666_s3 + $0x148] sm:$0xff]  ;;  %v14671_v8 = vpack.c.bf16 %v9484_v22, %v9483_v7  ;;  %v18270_v22 = vpop.permute.xlu0 %4495 }
 0x2f2   : > { %14664 = vmatprep.subr.bf16.mxu0 %v14663_v28  ;;  %13158 = vmatmul.mubr.f32.gmra.mrb[20].mxu1 %v17921_v43 }
 0x2f3   : > { %14950 = vmatpush3.bf16.msra.mxu1 %v14659_v36  ;;  %13160 = vmatprep.mubr.f32.mxu1 %v18017_v33  ;;  %v14691_v36 = vpack.c.bf16 %v9494_v21, %v9493_v24  ;;  %v18257_v32 = vpop.permute.xlu1 %4500  ;;  %v9508_v24 = vld [vmem:[%s18664_s1 + $0x398] sm:$0xff]  ;;  %v18355_v21 = vld [vmem:[%s15543_s10 + $0x148] sm:$0xff] }
 0x2f4   : > { %14952 = vmatprep.subr.bf16.mxu1 %v14663_v28  ;;  %12765 = vmatmul.mubr.f32.gmra.mrb[22].mxu0 %v17671_v25  ;;  %v9486_v25 = vld [vmem:[%s18664_s1 + $0x2e8] sm:$0xff] }
 0x2f5   : > { %14666 = vmatpush3.bf16.msra.mxu0 %v14663_v28  ;;  %12799 = vmatprep.mubr.f32.mxu0 %v6726_v55  ;;  %v14675_v53 = vpack.c.bf16 %v9486_v25, %v9485_v10  ;;  %v18268_v55 = vld [vmem:[%s15543_s10 + $0x178] sm:$0xff] }
 0x2f6   : > { %14668 = vmatprep.subr.bf16.mxu0 %v14667_v54  ;;  %13161 = vmatmul.mubr.f32.gmra.mrb[22].mxu1 %v18036_v0  ;;  %v8333_v25 = vrot.slane %v18268_v55, 7 }
 0x2f7   : > { %14954 = vmatpush3.bf16.msra.mxu1 %v14663_v28  ;;  %13195 = vmatprep.mubr.f32.mxu1 %v17910_v38  ;;  %v9488_v38 = vld [vmem:[%s18664_s1 + $0x2f8] sm:$0xff]  ;;  %v9495_v28 = vld [vmem:[%s18664_s1 + $0x330] sm:$0xff] }
 0x2f8   : > { %14956 = vmatprep.subr.bf16.mxu1 %v14667_v54  ;;  %8785 = vperm.xlu1 %15463, %v8771_v57   ;;  %v14679_v59 = vpack.c.bf16 %v9488_v38, %v9487_v45  ;;  %v14695_v7 = vpack.c.bf16 %v9496_v18, %v9495_v28  ;;  %v9497_v57 = vld [vmem:[%s18664_s1 + $0x340] sm:$0xff]  ;;  %v18363_v18 = vld [vmem:[%s15543_s10 + $0x188] sm:$0xff] }
 0x2f9   : > { %14670 = vmatpush3.bf16.msra.mxu0 %v14667_v54  ;;  %8790 = vperm.xlu0 %15462, %v8772_v61   ;;  %v9501_v38 = vld [vmem:[%s18664_s1 + $0x360] sm:$0xff] }
 0x2fa   : > { %14672 = vmatprep.subr.bf16.mxu0 %v14671_v8 }
 0x2fb   : > { %14958 = vmatpush3.bf16.msra.mxu1 %v14667_v54  ;;  %v18262_v54 = vrot.slane %v18241_v49, 1 }
 0x2fc   : > { %14960 = vmatprep.subr.bf16.mxu1 %v14671_v8  ;;  %8795 = vperm.xlu1 %15463, %v8773_v29   ;;  %v9499_v29 = vld [vmem:[%s18664_s1 + $0x350] sm:$0xff] }
 0x2fd   : > { %14674 = vmatpush3.bf16.msra.mxu0 %v14671_v8  ;;  %8800 = vperm.xlu0 %15462, %v8774_v13   ;;  %v6740_v43 = vsel %vm514_vm1, %v17869_v1, %v18262_v54  ;;  %v18307_v1 = vsel %vm514_vm1, %v8172_v11, %v8174_v51  ;;  %v18326_v13 = vld [vmem:[%s15543_s10 + $0x180] sm:$0xff] }
 0x2fe   : > { %14676 = vmatprep.subr.bf16.mxu0 %v14675_v53  ;;  %v8335_v58 = vrot.slane %v18326_v13, 7 }
 0x2ff   : > { %14962 = vmatpush3.bf16.msra.mxu1 %v14671_v8 }
 0x300   : > { %14964 = vmatprep.subr.bf16.mxu1 %v14675_v53  ;;  %8805 = vperm.xlu1 %15463, %v8775_v31   ;;  %v9502_v31 = vld [vmem:[%s18664_s1 + $0x368] sm:$0xff] }
 0x301   : > { %14678 = vmatpush3.bf16.msra.mxu0 %v14675_v53  ;;  %8810 = vperm.xlu0 %15462, %v8776_v23   ;;  %v14707_v46 = vpack.c.bf16 %v9502_v31, %v9501_v38  ;;  %v9506_v23 = vld [vmem:[%s18664_s1 + $0x388] sm:$0xff]  ;;  %v18386_v38 = vld [vmem:[%s15543_s10 + $0x150] sm:$0xff] }
 0x302   : > { %14680 = vmatprep.subr.bf16.mxu0 %v14679_v59 }
 0x303   : > { %14966 = vmatpush3.bf16.msra.mxu1 %v14675_v53  ;;  %v9500_v53 = vld [vmem:[%s18664_s1 + $0x358] sm:$0xff] }
 0x304   : > { %14968 = vmatprep.subr.bf16.mxu1 %v14679_v59  ;;  %8815 = vperm.xlu1 %15463, %v8777_v41   ;;  %v14703_v45 = vpack.c.bf16 %v9500_v53, %v9499_v29  ;;  %v9504_v41 = vld [vmem:[%s18664_s1 + $0x378] sm:$0xff] }
 0x305   : > { %14682 = vmatpush3.bf16.msra.mxu0 %v14679_v59 }
 0x306   : > { %14684 = vmatprep.subr.bf16.mxu0 %v14683_v60 }
 0x307   : > { %14970 = vmatpush3.bf16.msra.mxu1 %v14679_v59  ;;  %v18323_v59 = vld [vmem:[%s15543_s10 + $0x140] sm:$0xff] }
 0x308   : > { %14972 = vmatprep.subr.bf16.mxu1 %v14683_v60  ;;  %12800 = vmatmul.mubr.f32.vlgmr.msra.gmra.mrb[16].mxu0 %v6728_v44  ;;  %v6900_v62 = vrot.slane %v18323_v59, 7 }
 0x309   : > { %14686 = vmatpush3.bf16.msra.mxu0 %v14683_v60  ;;  %12802 = vmatprep.mubr.f32.mxu0 %v6730_v40 }
 0x30a   : > { %13196 = vmatmul.mubr.f32.vlgmr.msra.gmra.mrb[16].mxu1 %v17918_v35  ;;  %14688 = vmatprep.subr.bf16.mxu0 %v14687_v17  ;;  %v18251_v35 = vrot.slane %v18017_v33, 1 }
 0x30b   : > { %14974 = vmatpush3.bf16.msra.mxu1 %v14683_v60  ;;  %13198 = vmatprep.mubr.f32.mxu1 %v17938_v16  ;;  %v18265_v16 = vld [vmem:[%s15543_s10 + $0x170] sm:$0xff]  ;;  %v9505_v60 = vld [vmem:[%s18664_s1 + $0x380] sm:$0xff] }
 0x30c   : > { %14976 = vmatprep.subr.bf16.mxu1 %v14687_v17  ;;  %12803 = vmatmul.mubr.f32.gmra.mrb[18].mxu0 %v6732_v50  ;;  %v8171_v8 = vsel %vm514_vm1, %v7717_v37, %v18251_v35  ;;  %v8332_v10 = vrot.slane %v18265_v16, 7  ;;  %v14699_v37 = vpack.c.bf16 %v9498_v14, %v9497_v57  ;;  %v18360_v28 = vpack.c.bf16 %v9506_v23, %v9505_v60 }
 0x30d   : > { %14690 = vmatpush3.bf16.msra.mxu0 %v14687_v17  ;;  %12805 = vmatprep.mubr.f32.mxu0 %v6734_v39  ;;  %v18358_v39 = vpack.c.bf16 %v9504_v41, %v9503_v30  ;;  %v18368_v57 = vsel %vm365_vm0, %v18003_v63, %v6900_v62  ;;  %v18373_v14 = vsel %vm365_vm0, %v8333_v25, %v8335_v58 }
 0x30e   : > { %14692 = vmatprep.subr.bf16.mxu0 %v14691_v36  ;;  %13199 = vmatmul.mubr.f32.gmra.mrb[18].mxu1 %v17943_v42  ;;  %v18287_v42 = vsel %vm514_vm1, %v18251_v35, %v8172_v11  ;;  %v8334_v61 = vsel %vm365_vm0, %v8332_v10, %v8333_v25  ;;  %v6902_v25 = vrot.slane %v18355_v21, 7 }
 0x30f   : > { %14978 = vmatpush3.bf16.msra.mxu1 %v14687_v17  ;;  %13201 = vmatprep.mubr.f32.mxu1 %v17962_v27  ;;  %v18295_v27 = vpop.permute.xlu1 %4510  ;;  %v18345_v17 = vld [vmem:[%s18665_s2] ss:$0 sm:$0xff] }
 0x310   : > { %14980 = vmatprep.subr.bf16.mxu1 %v14691_v36  ;;  %12806 = vmatmul.mubr.f32.gmra.mrb[20].mxu0 %v6736_v4 }
 0x311   : > { %14694 = vmatpush3.bf16.msra.mxu0 %v14691_v36  ;;  %12808 = vmatprep.mubr.f32.mxu0 %v17887_v9  ;;  %v18309_v9 = vpop.permute.xlu0 %4505 }
 0x312   : > { %14696 = vmatprep.subr.bf16.mxu0 %v14695_v7  ;;  %13202 = vmatmul.mubr.f32.gmra.mrb[20].mxu1 %v8171_v8  ;;  %v9509_v8 = vld [vmem:[%s18664_s1 + $0x3a0] sm:$0xff] }
 0x313   : > { %14982 = vmatpush3.bf16.msra.mxu1 %v14691_v36  ;;  %13204 = vmatprep.mubr.f32.mxu1 %v18287_v42 }
 0x314   : > { %14984 = vmatprep.subr.bf16.mxu1 %v14695_v7  ;;  %12809 = vmatmul.mubr.f32.gmra.mrb[22].mxu0 %v6740_v43  ;;  %v9510_v43 = vld [vmem:[%s18664_s1 + $0x3a8] sm:$0xff] }
 0x315   : > { %14698 = vmatpush3.bf16.msra.mxu0 %v14695_v7  ;;  %12843 = vmatprep.mubr.f32.mxu0 %v18014_v5  ;;  %v5916_v5 = vpop.permute.xlu1 %5915  ;;  %v5911_v20 = vpop.permute.xlu0 %5910 }
 0x316   : > { %14700 = vmatprep.subr.bf16.mxu0 %v14699_v37  ;;  %13205 = vmatmul.mubr.f32.gmra.mrb[22].mxu1 %v18307_v1 }
 0x317   : > { %14986 = vmatpush3.bf16.msra.mxu1 %v14695_v7  ;;  %13239 = vmatprep.mubr.f32.mxu1 %v8334_v61  ;;  %v18382_v61 = vpack.c.bf16 %v9508_v24, %v9507_v2  ;;  %v18393_v24 = vpack.c.bf16 %v9510_v43, %v9509_v8 }
 0x318   : > { %14988 = vmatprep.subr.bf16.mxu1 %v14699_v37 }
 0x319   : > { %14702 = vmatpush3.bf16.msra.mxu0 %v14699_v37  ;;  %v5926_v63 = vpop.permute.xlu1 %5925  ;;  %v5921_v23 = vpop.permute.xlu0 %5920 }
 0x31a   : > { %14704 = vmatprep.subr.bf16.mxu0 %v14703_v45 }
 0x31b   : > { %14990 = vmatpush3.bf16.msra.mxu1 %v14699_v37  ;;  %v12141_v44 = vpop.f32.mrb[8].mxu0 }
 0x31c   : > { %v4450_v40 = vadd.f32 %v18345_v17, %v12141_v44  ;;  %v4402_v3 = vpop.f32.mrb[9].mxu0  ;;  %14992 = vmatprep.subr.bf16.mxu1 %v14703_v45 }
 0x31d   : > { %v12537_v50 = vpop.f32.mrb[8].mxu1  ;;  %v4449_v36 = vadd.f32 %v18345_v17, %v4402_v3  ;;  %14706 = vmatpush3.bf16.msra.mxu0 %v14703_v45 }
 0x31e   : > { %v4458_v11 = vmax.f32 %v4450_v40, 0.0  ;;  %v5885_v4 = vadd.f32 %v18345_v17, %v12537_v50  ;;  %v5837_v7 = vpop.f32.mrb[9].mxu1  ;;  %14708 = vmatprep.subr.bf16.mxu0 %v14707_v46 }
 0x31f   : > { %v4457_v37 = vmax.f32 %v4449_v36, 0.0  ;;  %v5884_v29 = vadd.f32 %v18345_v17, %v5837_v7  ;;  %14994 = vmatpush3.bf16.msra.mxu1 %v14703_v45  ;;  %v12144_v53 = vpop.f32.mrb[10].mxu0  ;;  %v8337_v45 = vrot.slane %v18363_v18, 7 }
 0x320   : > { %v4514_v31 = vmul.f32 %v18199_v56, %v4458_v11  ;;  %v5893_v30 = vmax.f32 %v5885_v4, 0.0  ;;  %v4452_v41 = vadd.f32 %v18345_v17, %v12144_v53  ;;  %v4412_v60 = vpop.f32.mrb[11].mxu0  ;;  %14996 = vmatprep.subr.bf16.mxu1 %v14707_v46  ;;  %v6904_v4 = vrot.slane %v18386_v38, 7 }
 0x321   : > { %v4513_v44 = vmul.f32 %v18204_v52, %v4457_v37  ;;  %v5892_v40 = vmax.f32 %v5884_v29, 0.0  ;;  %v12540_v3 = vpop.f32.mrb[10].mxu1  ;;  %v4451_v2 = vadd.f32 %v18345_v17, %v4412_v60  ;;  %14710 = vmatpush3.bf16.msra.mxu0 %v14707_v46  ;;  %v18400_v52 = vld [vmem:[%s15543_s10 + $0x158] sm:$0xff] }
 0x322   : > { %4522 = vst [vmem:[%s16760_s13 + $0xa8] sm:$0xff] %v4514_v31  ;;  %v5949_v56 = vmul.f32 %v5916_v5, %v5893_v30  ;;  %v4460_v50 = vmax.f32 %v4452_v41, 0.0  ;;  %v5887_v36 = vadd.f32 %v18345_v17, %v12540_v3  ;;  %v5847_v11 = vpop.f32.mrb[11].mxu1  ;;  %14712 = vmatprep.subr.bf16.mxu0 %v18358_v39  ;;  %v6903_v5 = vsel %vm365_vm0, %v6900_v62, %v6902_v25 }
 0x323   : > { %4521 = vst [vmem:[%s16760_s13 + $0xa0] sm:$0xff] %v4513_v44  ;;  %v5948_v7 = vmul.f32 %v5911_v20, %v5892_v40  ;;  %v4459_v37 = vmax.f32 %v4451_v2, 0.0  ;;  %v5886_v8 = vadd.f32 %v18345_v17, %v5847_v11  ;;  %14998 = vmatpush3.bf16.msra.mxu1 %v14707_v46  ;;  %v12147_v43 = vpop.f32.mrb[12].mxu0  ;;  %v8338_v20 = vsel %vm365_vm0, %v8335_v58, %v8337_v45 }
 0x324   : > { %5957 = vst [vmem:[%s16760_s13 + $0xe8] sm:$0xff] %v5949_v56  ;;  %v4516_v29 = vmul.f32 %v18230_v12, %v4460_v50  ;;  %v5895_v53 = vmax.f32 %v5887_v36, 0.0  ;;  %v4454_v31 = vadd.f32 %v18345_v17, %v12147_v43  ;;  %v4422_v30 = vpop.f32.mrb[13].mxu0  ;;  %15000 = vmatprep.subr.bf16.mxu1 %v18358_v39  ;;  %v5936_v12 = vpop.permute.xlu1 %5935  ;;  %v6906_v44 = vrot.slane %v18400_v52, 7 }
 0x325   : > { %5956 = vst [vmem:[%s16760_s13 + $0xe0] sm:$0xff] %v5948_v7  ;;  %v4515_v46 = vmul.f32 %v18232_v47, %v4459_v37  ;;  %v5894_v41 = vmax.f32 %v5886_v8, 0.0  ;;  %v12543_v62 = vpop.f32.mrb[12].mxu1  ;;  %v4453_v60 = vadd.f32 %v18345_v17, %v4422_v30  ;;  %14714 = vmatpush3.bf16.msra.mxu0 %v18358_v39  ;;  %v5931_v56 = vpop.permute.xlu0 %5930  ;;  %v8340_v47 = vsel %vm365_vm0, %v8337_v45, %v18033_v34  ;;  %v18427_v37 = vld [vmem:[%s15543_s10 + $0x168] sm:$0xff] }
 0x326   : > { %4524 = vst [vmem:[%s16760_s13 + $0xb8] sm:$0xff] %v4516_v29  ;;  %v5951_v40 = vmul.f32 %v5926_v63, %v5895_v53  ;;  %v4462_v3 = vmax.f32 %v4454_v31, 0.0  ;;  %v5889_v58 = vadd.f32 %v18345_v17, %v12543_v62  ;;  %v5857_v2 = vpop.f32.mrb[13].mxu1  ;;  %14716 = vmatprep.subr.bf16.mxu0 %v18360_v28  ;;  %v6905_v63 = vsel %vm365_vm0, %v6902_v25, %v6904_v4  ;;  %v18443_v31 = vld [vmem:[%s15543_s10 + $0x1a8] sm:$0xff] }
 0x327   : > { %4523 = vst [vmem:[%s16760_s13 + $0xb0] sm:$0xff] %v4515_v46  ;;  %v5950_v50 = vmul.f32 %v5921_v23, %v5894_v41  ;;  %v4461_v36 = vmax.f32 %v4453_v60, 0.0  ;;  %v5888_v11 = vadd.f32 %v18345_v17, %v5857_v2  ;;  %15002 = vmatpush3.bf16.msra.mxu1 %v18358_v39  ;;  %v12150_v7 = vpop.f32.mrb[14].mxu0  ;;  %v6908_v39 = vrot.slane %v18241_v49, 7 }
 0x328   : > { %5959 = vst [vmem:[%s16760_s13 + $0xf8] sm:$0xff] %v5951_v40  ;;  %v4518_v8 = vmul.f32 %v18257_v32, %v4462_v3  ;;  %v5897_v43 = vmax.f32 %v5889_v58, 0.0  ;;  %v4456_v34 = vadd.f32 %v18345_v17, %v12150_v7  ;;  %v4432_v45 = vpop.f32.mrb[15].mxu0  ;;  %15004 = vmatprep.subr.bf16.mxu1 %v18360_v28  ;;  %12844 = vmatmul.mubr.f32.vlgmr.msra.gmra.mrb[16].mxu0 %v18368_v57  ;;  %v6910_v41 = vrot.slane %v18427_v37, 7  ;;  %v5946_v60 = vpop.permute.xlu1 %5945 }
 0x329   : > { %5958 = vst [vmem:[%s16760_s13 + $0xf0] sm:$0xff] %v5950_v50  ;;  %v4517_v25 = vmul.f32 %v18270_v22, %v4461_v36  ;;  %v5896_v23 = vmax.f32 %v5888_v11, 0.0  ;;  %v12546_v29 = vpop.f32.mrb[14].mxu1  ;;  %v4455_v53 = vadd.f32 %v18345_v17, %v4432_v45  ;;  %14718 = vmatpush3.bf16.msra.mxu0 %v18360_v28  ;;  %12846 = vmatprep.mubr.f32.mxu0 %v6903_v5  ;;  %v8343_v40 = vrot.slane %v18255_v15, 7  ;;  %v5941_v2 = vpop.permute.xlu0 %5940 }
 0x32a   : > { %v6907_v32 = vsel %vm365_vm0, %v6904_v4, %v6906_v44  ;;  %4526 = vst [vmem:[%s16760_s13 + $0xc8] sm:$0xff] %v4518_v8  ;;  %v5953_v57 = vmul.f32 %v5936_v12, %v5897_v43  ;;  %v4464_v30 = vmax.f32 %v4456_v34, 0.0  ;;  %v5891_v22 = vadd.f32 %v18345_v17, %v12546_v29  ;;  %v5867_v46 = vpop.f32.mrb[15].mxu1  ;;  %13240 = vmatmul.mubr.f32.vlgmr.msra.gmra.mrb[16].mxu1 %v18373_v14  ;;  %v9511_v12 = vld [vmem:[%s18664_s1 + $0x3b0] sm:$0xff]  ;;  %v9512_v14 = vld [vmem:[%s18664_s1 + $0x3b8] sm:$0xff] }
 0x32b   : > { %14720 = vmatprep.subr.bf16.mxu0 %v18382_v61  ;;  %4525 = vst [vmem:[%s16760_s13 + $0xc0] sm:$0xff] %v4517_v25  ;;  %v5952_v5 = vmul.f32 %v5931_v56, %v5896_v23  ;;  %v4463_v62 = vmax.f32 %v4455_v53, 0.0  ;;  %v5890_v4 = vadd.f32 %v18345_v17, %v5867_v46  ;;  %15006 = vmatpush3.bf16.msra.mxu1 %v18360_v28  ;;  %v8345_v28 = vrot.slane %v18443_v31, 7  ;;  %v18465_v56 = vld [vmem:[%s15543_s10 + $0x1b0] sm:$0xff]  ;;  %v9516_v34 = vld [vmem:[%s18664_s1 + $0x3d8] sm:$0xff]  ;;  %v9521_v53 = vld [vmem:[%s18664_s1 + $0x400] sm:$0xff] }
 0x32c   : > { %13242 = vmatprep.mubr.f32.mxu1 %v8338_v20  ;;  %5961 = vst [vmem:[%s16760_s13 + $0x108] sm:$0xff] %v5953_v57  ;;  %v4520_v3 = vmul.f32 %v18295_v27, %v4464_v30  ;;  %v5899_v58 = vmax.f32 %v5891_v22, 0.0  ;;  %15008 = vmatprep.subr.bf16.mxu1 %v18382_v61  ;;  %v6909_v27 = vsel %vm365_vm0, %v6906_v44, %v6908_v39  ;;  %v9514_v44 = vld [vmem:[%s18664_s1 + $0x3c8] sm:$0xff]  ;;  %v8347_v8 = vrot.slane %v18465_v56, 7  ;;  %v9520_v23 = vld [vmem:[%s18664_s1 + $0x3f8] sm:$0xff]  ;;  %v9523_v30 = vld [vmem:[%s18664_s1 + $0x410] sm:$0xff] }
 0x32d   : > { %12847 = vmatmul.mubr.f32.gmra.mrb[18].mxu0 %v6905_v63  ;;  %5960 = vst [vmem:[%s16760_s13 + $0x100] sm:$0xff] %v5952_v5  ;;  %v4519_v50 = vmul.f32 %v18309_v9, %v4463_v62  ;;  %v5898_v20 = vmax.f32 %v5890_v4, 0.0  ;;  %v14727_v11 = vpack.c.bf16 %v9512_v14, %v9511_v12  ;;  %v6911_v7 = vsel %vm365_vm0, %v6908_v39, %v6910_v41  ;;  %v9513_v63 = vld [vmem:[%s18664_s1 + $0x3c0] sm:$0xff]  ;;  %v9518_v39 = vld [vmem:[%s18664_s1 + $0x3e8] sm:$0xff]  ;;  %v9524_v22 = vld [vmem:[%s18664_s1 + $0x418] sm:$0xff] }
 0x32e   : > { %14722 = vmatpush3.bf16.msra.mxu0 %v18382_v61  ;;  %12849 = vmatprep.mubr.f32.mxu0 %v6907_v32  ;;  %4528 = vst [vmem:[%s16760_s13 + $0xd8] sm:$0xff] %v4520_v3  ;;  %v5955_v36 = vmul.f32 %v5946_v60, %v5899_v58  ;;  %v14731_v43 = vpack.c.bf16 %v9514_v44, %v9513_v63  ;;  %v9522_v32 = vld [vmem:[%s18664_s1 + $0x408] sm:$0xff]  ;;  %v9527_v4 = vld [vmem:[%s18664_s1 + $0x430] sm:$0xff]  ;;  %v9528_v60 = vld [vmem:[%s18664_s1 + $0x438] sm:$0xff]  ;;  %v7182_v14 = vrot.slane %v18323_v59, 1  ;;  %v8616_v58 = vrot.slane %v18268_v55, 1 }
 0x32f   : > { %14724 = vmatprep.subr.bf16.mxu0 %v18393_v24  ;;  %13243 = vmatmul.mubr.f32.gmra.mrb[18].mxu1 %v8340_v47  ;;  %4527 = vst [vmem:[%s16760_s13 + $0xd0] sm:$0xff] %v4519_v50  ;;  %v5954_v9 = vmul.f32 %v5941_v2, %v5898_v20  ;;  %v8344_v47 = vsel %vm365_vm0, %v7890_v19, %v8343_v40  ;;  %v9515_v19 = vld [vmem:[%s18664_s1 + $0x3d0] sm:$0xff]  ;;  %v9526_v5 = vld [vmem:[%s18664_s1 + $0x428] sm:$0xff]  ;;  %v8619_v63 = vrot.slane %v18363_v18, 1 }
 0x330   : > { %15010 = vmatpush3.bf16.msra.mxu1 %v18382_v61  ;;  %13245 = vmatprep.mubr.f32.mxu1 %v18064_v6  ;;  %5963 = vst [vmem:[%s16760_s13 + $0x118] sm:$0xff] %v5955_v36  ;;  %v8346_v61 = vsel %vm365_vm0, %v8343_v40, %v8345_v28  ;;  %v6913_v6 = vsel %vm365_vm0, %v6910_v41, %v8332_v10  ;;  %v9525_v41 = vld [vmem:[%s18664_s1 + $0x420] sm:$0xff]  ;;  %v9530_v3 = vld [vmem:[%s18664_s1 + $0x448] sm:$0xff]  ;;  %v9536_v36 = vld [vmem:[%s18664_s1 + $0x478] sm:$0xff] }
 0x331   : > { %15012 = vmatprep.subr.bf16.mxu1 %v18393_v24  ;;  %12850 = vmatmul.mubr.f32.gmra.mrb[20].mxu0 %v6909_v27  ;;  %5962 = vst [vmem:[%s16760_s13 + $0x110] sm:$0xff] %v5954_v9  ;;  %v8348_v45 = vsel %vm365_vm0, %v8345_v28, %v8347_v8  ;;  %v14735_v10 = vpack.c.bf16 %v9516_v34, %v9515_v19  ;;  %v9529_v40 = vld [vmem:[%s18664_s1 + $0x440] sm:$0xff]  ;;  %v9534_v50 = vld [vmem:[%s18664_s1 + $0x468] sm:$0xff]  ;;  %v9535_v27 = vld [vmem:[%s18664_s1 + $0x470] sm:$0xff]  ;;  %v7186_v9 = vrot.slane %v18386_v38, 1  ;;  %v8629_v19 = vrot.slane %v18465_v56, 1 }
 0x332   : > { %14726 = vmatpush3.bf16.msra.mxu0 %v18393_v24  ;;  %12852 = vmatprep.mubr.f32.mxu0 %v6911_v7  ;;  %v14747_v57 = vpack.c.bf16 %v9522_v32, %v9521_v53  ;;  %v14751_v46 = vpack.c.bf16 %v9524_v22, %v9523_v30  ;;  %v14755_v62 = vpack.c.bf16 %v9526_v5, %v9525_v41  ;;  %v9533_v28 = vld [vmem:[%s18664_s1 + $0x460] sm:$0xff]  ;;  %v7184_v7 = vrot.slane %v18355_v21, 1  ;;  %v8306_v34 = vld [vmem:[%s15543_s10 + $0x1b8] sm:$0xff] }
 0x333   : > { %14728 = vmatprep.subr.bf16.mxu0 %v14727_v11  ;;  %13246 = vmatmul.mubr.f32.gmra.mrb[20].mxu1 %v8344_v47  ;;  %v14759_v12 = vpack.c.bf16 %v9528_v60, %v9527_v4  ;;  %v7183_v2 = vsel %vm514_vm1, %v18207_v26, %v7182_v14  ;;  %v14771_v20 = vpack.c.bf16 %v9534_v50, %v9533_v28  ;;  %v7188_v47 = vrot.slane %v18400_v52, 1 }
 0x334   : > { %15014 = vmatpush3.bf16.msra.mxu1 %v18393_v24  ;;  %13248 = vmatprep.mubr.f32.mxu1 %v8346_v61  ;;  %v9517_v24 = vld [vmem:[%s18664_s1 + $0x3e0] sm:$0xff]  ;;  %v7185_v44 = vsel %vm514_vm1, %v7182_v14, %v7184_v7  ;;  %v7187_v8 = vsel %vm514_vm1, %v7184_v7, %v7186_v9 }
 0x335   : > { %15016 = vmatprep.subr.bf16.mxu1 %v14727_v11  ;;  %12853 = vmatmul.mubr.f32.gmra.mrb[22].mxu0 %v6913_v6  ;;  %v14739_v25 = vpack.c.bf16 %v9518_v39, %v9517_v24  ;;  %v7191_v6 = vsel %vm514_vm1, %v7188_v47, %v18262_v54 }
 0x336   : > { %14730 = vmatpush3.bf16.msra.mxu0 %v14727_v11  ;;  %12887 = vmatprep.mubr.f32.mxu0 %v17993_v48  ;;  %v9519_v48 = vld [vmem:[%s18664_s1 + $0x3f0] sm:$0xff] }
 0x337   : > { %14732 = vmatprep.subr.bf16.mxu0 %v14731_v43  ;;  %13249 = vmatmul.mubr.f32.gmra.mrb[22].mxu1 %v8348_v45  ;;  %v14743_v29 = vpack.c.bf16 %v9520_v23, %v9519_v48  ;;  %v8631_v45 = vrot.slane %v8306_v34, 1 }
 0x338   : > { %15018 = vmatpush3.bf16.msra.mxu1 %v14727_v11  ;;  %13283 = vmatprep.mubr.f32.mxu1 %v18268_v55  ;;  %v14775_v11 = vpack.c.bf16 %v9536_v36, %v9535_v27 }
 0x339   : > { %15020 = vmatprep.subr.bf16.mxu1 %v14731_v43 }
 0x33a   : > { %14734 = vmatpush3.bf16.msra.mxu0 %v14731_v43 }
 0x33b   : > { %14736 = vmatprep.subr.bf16.mxu0 %v14735_v10 }
 0x33c   : > { %15022 = vmatpush3.bf16.msra.mxu1 %v14731_v43  ;;  %v8627_v43 = vrot.slane %v18443_v31, 1 }
 0x33d   : > { %15024 = vmatprep.subr.bf16.mxu1 %v14735_v10 }
 0x33e   : > { %14738 = vmatpush3.bf16.msra.mxu0 %v14735_v10 }
 0x33f   : > { %14740 = vmatprep.subr.bf16.mxu0 %v14739_v25 }
 0x340   : > { %15026 = vmatpush3.bf16.msra.mxu1 %v14735_v10 }
 0x341   : > { %15028 = vmatprep.subr.bf16.mxu1 %v14739_v25 }
 0x342   : > { %14742 = vmatpush3.bf16.msra.mxu0 %v14739_v25 }
 0x343   : > { %14744 = vmatprep.subr.bf16.mxu0 %v14743_v29 }
 0x344   : > { %15030 = vmatpush3.bf16.msra.mxu1 %v14739_v25 }
 0x345   : > { %15032 = vmatprep.subr.bf16.mxu1 %v14743_v29 }
 0x346   : > { %14746 = vmatpush3.bf16.msra.mxu0 %v14743_v29 }
 0x347   : > { %14748 = vmatprep.subr.bf16.mxu0 %v14747_v57 }
 0x348   : > { %15034 = vmatpush3.bf16.msra.mxu1 %v14743_v29 }
 0x349   : > { %15036 = vmatprep.subr.bf16.mxu1 %v14747_v57  ;;  %12888 = vmatmul.mubr.f32.vlgmr.msra.gmra.mrb[16].mxu0 %v18323_v59  ;;  %v14763_v59 = vpack.c.bf16 %v9530_v3, %v9529_v40 }
 0x34a   : > { %14750 = vmatpush3.bf16.msra.mxu0 %v14747_v57  ;;  %12890 = vmatprep.mubr.f32.mxu0 %v18355_v21  ;;  %v8622_v21 = vsel %vm514_vm1, %v8619_v63, %v18251_v35 }
 0x34b   : > { %13284 = vmatmul.mubr.f32.vlgmr.msra.gmra.mrb[16].mxu1 %v18326_v13  ;;  %14752 = vmatprep.subr.bf16.mxu0 %v14751_v46 }
 0x34c   : > { %15038 = vmatpush3.bf16.msra.mxu1 %v14747_v57  ;;  %13286 = vmatprep.mubr.f32.mxu1 %v18363_v18  ;;  %v7192_v18 = vrot.slane %v18427_v37, 1 }
 0x34d   : > { %15040 = vmatprep.subr.bf16.mxu1 %v14751_v46  ;;  %12891 = vmatmul.mubr.f32.gmra.mrb[18].mxu0 %v18386_v38  ;;  %v7189_v38 = vsel %vm514_vm1, %v7186_v9, %v7188_v47 }
 0x34e   : > { %14754 = vmatpush3.bf16.msra.mxu0 %v14751_v46  ;;  %12893 = vmatprep.mubr.f32.mxu0 %v18400_v52  ;;  %v7194_v52 = vrot.slane %v18265_v16, 1  ;;  %v7193_v35 = vsel %vm514_vm1, %v18262_v54, %v7192_v18  ;;  %v8632_v54 = vsel %vm514_vm1, %v8629_v19, %v8631_v45 }
 0x34f   : > { %14756 = vmatprep.subr.bf16.mxu0 %v14755_v62  ;;  %13287 = vmatmul.mubr.f32.gmra.mrb[18].mxu1 %v18017_v33  ;;  %v8617_v33 = vrot.slane %v18326_v13, 1 }
 0x350   : > { %15042 = vmatpush3.bf16.msra.mxu1 %v14751_v46  ;;  %13289 = vmatprep.mubr.f32.mxu1 %v18036_v0  ;;  %v9531_v0 = vld [vmem:[%s18664_s1 + $0x450] sm:$0xff] }
 0x351   : > { %15044 = vmatprep.subr.bf16.mxu1 %v14755_v62  ;;  %12894 = vmatmul.mubr.f32.gmra.mrb[20].mxu0 %v18241_v49  ;;  %v9532_v49 = vld [vmem:[%s18664_s1 + $0x458] sm:$0xff]  ;;  %v8618_v13 = vsel %vm514_vm1, %v8616_v58, %v8617_v33  ;;  %v8620_v61 = vsel %vm514_vm1, %v8617_v33, %v8619_v63 }
 0x352   : > { %14758 = vmatpush3.bf16.msra.mxu0 %v14755_v62  ;;  %12896 = vmatprep.mubr.f32.mxu0 %v18427_v37  ;;  %v14767_v26 = vpack.c.bf16 %v9532_v49, %v9531_v0  ;;  %v7195_v37 = vsel %vm514_vm1, %v7192_v18, %v7194_v52 }
 0x353   : > { %14760 = vmatprep.subr.bf16.mxu0 %v14759_v12  ;;  %13290 = vmatmul.mubr.f32.gmra.mrb[20].mxu1 %v18255_v15 }
 0x354   : > { %15046 = vmatpush3.bf16.msra.mxu1 %v14755_v62  ;;  %13292 = vmatprep.mubr.f32.mxu1 %v18443_v31  ;;  %v8630_v31 = vsel %vm514_vm1, %v8627_v43, %v8629_v19 }
 0x355   : > { %15048 = vmatprep.subr.bf16.mxu1 %v14759_v12  ;;  %12897 = vmatmul.mubr.f32.gmra.mrb[22].mxu0 %v18265_v16  ;;  %v8628_v16 = vsel %vm514_vm1, %v8174_v51, %v8627_v43 }
 0x356   : > { %14762 = vmatpush3.bf16.msra.mxu0 %v14759_v12  ;;  %12931 = vmatprep.mubr.f32.mxu0 %v7183_v2 }
 0x357   : > { %14764 = vmatprep.subr.bf16.mxu0 %v14763_v59  ;;  %13293 = vmatmul.mubr.f32.gmra.mrb[22].mxu1 %v18465_v56  ;;  %v7197_v56 = vsel %vm514_vm1, %v7194_v52, %v8616_v58 }
 0x358   : > { %15050 = vmatpush3.bf16.msra.mxu1 %v14759_v12  ;;  %13327 = vmatprep.mubr.f32.mxu1 %v8618_v13 }
 0x359   : > { %15052 = vmatprep.subr.bf16.mxu1 %v14763_v59 }
 0x35a   : > { %14766 = vmatpush3.bf16.msra.mxu0 %v14763_v59 }
 0x35b   : > { %14768 = vmatprep.subr.bf16.mxu0 %v14767_v26 }
 0x35c   : > { %15054 = vmatpush3.bf16.msra.mxu1 %v14763_v59 }
 0x35d   : > { %15056 = vmatprep.subr.bf16.mxu1 %v14767_v26 }
 0x35e   : > { %14770 = vmatpush3.bf16.msra.mxu0 %v14767_v26 }
 0x35f   : > { %14772 = vmatprep.subr.bf16.mxu0 %v14771_v20 }
 0x360   : > { %15058 = vmatpush3.bf16.msra.mxu1 %v14767_v26 }
 0x361   : > { %15060 = vmatprep.subr.bf16.mxu1 %v14771_v20 }
 0x362   : > { %14774 = vmatpush3.bf16.msra.mxu0 %v14771_v20 }
 0x363   : > { %14776 = vmatprep.subr.bf16.mxu0 %v14775_v11 }
 0x364   : > { %15062 = vmatpush3.bf16.msra.mxu1 %v14771_v20 }
 0x365   : > { %15064 = vmatprep.subr.bf16.mxu1 %v14775_v11 }
 0x366   : > { %14778 = vmatpush3.bf16.msra.mxu0 %v14775_v11 }
 0x368   : > { %15066 = vmatpush3.bf16.msra.mxu1 %v14775_v11 }
 0x369   : > { %12932 = vmatmul.mubr.f32.vlgmr.msra.gmra.mrb[16].mxu0 %v7185_v44 }
 0x36a   : > { %12934 = vmatprep.mubr.f32.mxu0 %v7187_v8 }
 0x36b   : > { %13328 = vmatmul.mubr.f32.vlgmr.msra.gmra.mrb[16].mxu1 %v8620_v61 }
 0x36c   : > { %13330 = vmatprep.mubr.f32.mxu1 %v8622_v21 }
 0x36d   : > { %12935 = vmatmul.mubr.f32.gmra.mrb[18].mxu0 %v7189_v38 }
 0x36e   : > { %12937 = vmatprep.mubr.f32.mxu0 %v7191_v6 }
 0x36f   : > { %13331 = vmatmul.mubr.f32.gmra.mrb[18].mxu1 %v18287_v42  ;;  %v7351_v42 = vpop.permute.xlu1 %7350 }
 0x370   : > { %13333 = vmatprep.mubr.f32.mxu1 %v18307_v1  ;;  %v7346_v1 = vpop.permute.xlu0 %7345 }
 0x371   : > { %12938 = vmatmul.mubr.f32.gmra.mrb[20].mxu0 %v7193_v35 }
 0x372   : > { %12940 = vmatprep.mubr.f32.mxu0 %v7195_v37 }
 0x373   : > { %13334 = vmatmul.mubr.f32.gmra.mrb[20].mxu1 %v8628_v16  ;;  %v7361_v15 = vpop.permute.xlu1 %7360 }
 0x374   : > { %13336 = vmatprep.mubr.f32.mxu1 %v8630_v31  ;;  %v7356_v10 = vpop.permute.xlu0 %7355 }
 0x375   : > { %12941 = vmatmul.mubr.f32.gmra.mrb[22].mxu0 %v7197_v56 }
 0x377   : > { %13337 = vmatmul.mubr.f32.gmra.mrb[22].mxu1 %v8632_v54  ;;  %v7371_v51 = vpop.permute.xlu1 %7370 }
 0x378   : > { %v18619_v24 = vpop.permute.xlu0 %7365 }
 0x37b   : > { %v18621_v39 = vpop.permute.xlu1 %7380 }
 0x37c   : > { %v18623_v25 = vpop.permute.xlu0 %7375 }
 0x37f   : > { %v8786_v55 = vpop.permute.xlu1 %8785 }
 0x380   : > { %v8781_v23 = vpop.permute.xlu0 %8780 }
 0x383   : > { %v8796_v40 = vpop.permute.xlu1 %8795 }
 0x384   : > { %v8791_v2 = vpop.permute.xlu0 %8790 }
 0x387   : > { %v8806_v6 = vpop.permute.xlu1 %8805 }
 0x388   : > { %v8801_v35 = vpop.permute.xlu0 %8800 }
 0x43c   : > { %v12933_v48 = vpop.f32.mrb[16].mxu0 }
 0x43d   : > { %v7320_v29 = vadd.f32 %v18345_v17, %v12933_v48  ;;  %v7272_v53 = vpop.f32.mrb[17].mxu0 }
 0x43e   : > { %v13329_v32 = vpop.f32.mrb[16].mxu1  ;;  %v7319_v57 = vadd.f32 %v18345_v17, %v7272_v53 }
 0x43f   : > { %v7328_v30 = vmax.f32 %v7320_v29, 0.0  ;;  %v8755_v22 = vadd.f32 %v18345_v17, %v13329_v32  ;;  %v8707_v46 = vpop.f32.mrb[17].mxu1  ;;  %v8816_v32 = vpop.permute.xlu1 %8815 }
 0x440   : > { %v7327_v41 = vmax.f32 %v7319_v57, 0.0  ;;  %v8754_v5 = vadd.f32 %v18345_v17, %v8707_v46  ;;  %v12936_v62 = vpop.f32.mrb[18].mxu0 }
 0x441   : > { %v7384_v4 = vmul.f32 %v7351_v42, %v7328_v30  ;;  %v8763_v60 = vmax.f32 %v8755_v22, 0.0  ;;  %v7322_v12 = vadd.f32 %v18345_v17, %v12936_v62  ;;  %v7282_v14 = vpop.f32.mrb[19].mxu0  ;;  %v8811_v22 = vpop.permute.xlu0 %8810 }
 0x442   : > { %v7383_v3 = vmul.f32 %v7346_v1, %v7327_v41  ;;  %v8762_v58 = vmax.f32 %v8754_v5, 0.0  ;;  %v13332_v33 = vpop.f32.mrb[18].mxu1  ;;  %v7321_v59 = vadd.f32 %v18345_v17, %v7282_v14 }
 0x443   : > { %7392 = vst [vmem:[%s16760_s13 + $0x128] sm:$0xff] %v7384_v4  ;;  %v8819_v0 = vmul.f32 %v8786_v55, %v8763_v60  ;;  %v7330_v49 = vmax.f32 %v7322_v12, 0.0  ;;  %v8757_v13 = vadd.f32 %v18345_v17, %v13332_v33  ;;  %v8717_v26 = vpop.f32.mrb[19].mxu1 }
 0x444   : > { %7391 = vst [vmem:[%s16760_s13 + $0x120] sm:$0xff] %v7383_v3  ;;  %v8818_v28 = vmul.f32 %v8781_v23, %v8762_v58  ;;  %v7329_v50 = vmax.f32 %v7321_v59, 0.0  ;;  %v8756_v20 = vadd.f32 %v18345_v17, %v8717_v26  ;;  %v12939_v27 = vpop.f32.mrb[20].mxu0 }
 0x445   : > { %8827 = vst [vmem:[%s16760_s13 + $0x168] sm:$0xff] %v8819_v0  ;;  %v7386_v36 = vmul.f32 %v7361_v15, %v7330_v49  ;;  %v8765_v11 = vmax.f32 %v8757_v13, 0.0  ;;  %v7324_v7 = vadd.f32 %v18345_v17, %v12939_v27  ;;  %v7292_v9 = vpop.f32.mrb[21].mxu0 }
 0x446   : > { %8826 = vst [vmem:[%s16760_s13 + $0x160] sm:$0xff] %v8818_v28  ;;  %v7385_v63 = vmul.f32 %v7356_v10, %v7329_v50  ;;  %v8764_v44 = vmax.f32 %v8756_v20, 0.0  ;;  %v13335_v47 = vpop.f32.mrb[20].mxu1  ;;  %v7323_v8 = vadd.f32 %v18345_v17, %v7292_v9 }
 0x447   : > { %7394 = vst [vmem:[%s16760_s13 + $0x138] sm:$0xff] %v7386_v36  ;;  %v8821_v61 = vmul.f32 %v8796_v40, %v8765_v11  ;;  %v7332_v21 = vmax.f32 %v7324_v7, 0.0  ;;  %v8759_v38 = vadd.f32 %v18345_v17, %v13335_v47  ;;  %v8727_v18 = vpop.f32.mrb[21].mxu1 }
 0x448   : > { %7393 = vst [vmem:[%s16760_s13 + $0x130] sm:$0xff] %v7385_v63  ;;  %v8820_v52 = vmul.f32 %v8791_v2, %v8764_v44  ;;  %v7331_v43 = vmax.f32 %v7323_v8, 0.0  ;;  %v8758_v19 = vadd.f32 %v18345_v17, %v8727_v18  ;;  %v12942_v34 = vpop.f32.mrb[22].mxu0 }
 0x449   : > { %8829 = vst [vmem:[%s16760_s13 + $0x178] sm:$0xff] %v8821_v61  ;;  %v7388_v37 = vmul.f32 %v7371_v51, %v7332_v21  ;;  %v8767_v16 = vmax.f32 %v8759_v38, 0.0  ;;  %v7326_v45 = vadd.f32 %v18345_v17, %v12942_v34  ;;  %v7302_v31 = vpop.f32.mrb[23].mxu0 }
 0x44a   : > { %8828 = vst [vmem:[%s16760_s13 + $0x170] sm:$0xff] %v8820_v52  ;;  %v7387_v56 = vmul.f32 %v18619_v24, %v7331_v43  ;;  %v8766_v54 = vmax.f32 %v8758_v19, 0.0  ;;  %v13338_v42 = vpop.f32.mrb[22].mxu1  ;;  %v7325_v1 = vadd.f32 %v18345_v17, %v7302_v31 }
 0x44b   : > { %7396 = vst [vmem:[%s16760_s13 + $0x148] sm:$0xff] %v7388_v37  ;;  %v8823_v15 = vmul.f32 %v8806_v6, %v8767_v16  ;;  %v7334_v10 = vmax.f32 %v7326_v45, 0.0  ;;  %v8761_v55 = vadd.f32 %v18345_v17, %v13338_v42  ;;  %v8737_v51 = vpop.f32.mrb[23].mxu1 }
 0x44c   : > { %7395 = vst [vmem:[%s16760_s13 + $0x140] sm:$0xff] %v7387_v56  ;;  %v8822_v48 = vmul.f32 %v8801_v35, %v8766_v54  ;;  %v7333_v23 = vmax.f32 %v7325_v1, 0.0  ;;  %v8760_v24 = vadd.f32 %v18345_v17, %v8737_v51 }
 0x44d   : > { %8831 = vst [vmem:[%s16760_s13 + $0x188] sm:$0xff] %v8823_v15  ;;  %v7390_v29 = vmul.f32 %v18621_v39, %v7334_v10  ;;  %v8769_v53 = vmax.f32 %v8761_v55, 0.0 }
 0x44e   : > { %8830 = vst [vmem:[%s16760_s13 + $0x180] sm:$0xff] %v8822_v48  ;;  %v7389_v57 = vmul.f32 %v18623_v25, %v7333_v23  ;;  %v8768_v30 = vmax.f32 %v8760_v24, 0.0 }
 0x44f   : > { %7398 = vst [vmem:[%s16760_s13 + $0x158] sm:$0xff] %v7390_v29  ;;  %v8825_v46 = vmul.f32 %v8816_v32, %v8769_v53 }
 0x450   : > { %7397 = vst [vmem:[%s16760_s13 + $0x150] sm:$0xff] %v7389_v57  ;;  %v8824_v41 = vmul.f32 %v8811_v22, %v8768_v30 }
 0x451   : > { %8833 = vst [vmem:[%s16760_s13 + $0x198] sm:$0xff] %v8825_v46 }
 0x452   : > { %8832 = vst [vmem:[%s16760_s13 + $0x190] sm:$0xff] %v8824_v41 }
 0x453 PF: > { %s14_s15 = sadd.s32 1, %s15474_s15  }
 0x454   : > { %p11_p4 = scmp.ge.s32.totalorder %s14_s15, 6  }
 0x456   :  { %13 = sbr.rel (!%p11_p4) target bundleno = 1 (0x1), region = 74 }

</bundles_post_ra>
